<compile_context>
chip_gen: v7x
topology: tpu7x:2x2x1
jax: 0.10.0
libtpu: 0.0.40
codegen_flags: <defaults>
</compile_context>

<pallas_src>
import functools

import jax
import jax.numpy as jnp
import numpy as np
from jax.experimental import pallas as pl
from jax.experimental.pallas import tpu as pltpu


def _window_attn_kernel(x_ref, wqkv_ref, bqkv_ref, bias_ref, wproj_ref,
                        bproj_ref, o_ref, qkv_ref,
                        *, num_heads, head_dim, bw, n, nw, compute_dtype):
    """One grid step = BW windows (BW is a multiple of nW).

    x_ref    : (BW*N, C)      compute_dtype (bf16) activations
    wqkv_ref : (C, 3C)        compute_dtype, attention scale folded into q cols
    bqkv_ref : (1, 3C)        f32, scale folded into the q part
    bias_ref : (H, nW, N, N)  f32, rel-pos bias + pad_mask + shift mask
    wproj_ref: (C, C)         compute_dtype
    bproj_ref: (1, C)         f32
    o_ref    : (BW*N, C)      output dtype
    qkv_ref  : (BW*N, 3C)     compute_dtype VMEM scratch (fused qkv activations)
    """
    C = num_heads * head_dim
    rows = bw * n
    gpw = bw // nw   # window-groups per step; each group spans the nW windows

    # Fused QKV projection for the whole window batch (one MXU GEMM, f32
    # accumulation).  Cast once to bf16 into an explicit VMEM scratch so the
    # large qkv value is not kept live in f32 across the unrolled head loop.
    qkv = jnp.dot(x_ref[...], wqkv_ref[...], preferred_element_type=jnp.float32)
    qkv_ref[...] = (qkv + bqkv_ref[...]).astype(compute_dtype)

    # Per-head attention.  Heads are static lane slices of the qkv scratch;
    # num_heads is small & static so the Python loop unrolls at trace time.
    # TODO(synk): batch ceil(128/head_dim) heads per dot_general (in-group head
    # batch axis) to reduce MXU underfill; per-head K=head_dim stays shallow.
    head_outs = []
    for h in range(num_heads):
        off = h * head_dim
        qh = qkv_ref[:, off:off + head_dim].reshape(bw, n, head_dim)
        kh = qkv_ref[:, C + off:C + off + head_dim].reshape(bw, n, head_dim)
        vh = qkv_ref[:, 2 * C + off:2 * C + off + head_dim].reshape(
            bw, n, head_dim)

        # (BW, N, N) attention logits for this head (f32 accumulation).
        s = jnp.einsum('bnd,bmd->bnm', qh, kh,
                       preferred_element_type=jnp.float32)
        # rel-pos bias + pad/shift mask were pre-combined per (head, window);
        # broadcast over the bw//nW window groups of this step.
        s = s.reshape(gpw, nw, n, n) + bias_ref[h][None]

        # Numerically stable softmax, all f32 (v5e VPU/EUP have no bf16);
        # attn_drop is identity (p = 0) at inference.
        s = s - jnp.max(s, axis=-1, keepdims=True)
        p = jnp.exp(s)
        p = p * pl.reciprocal(jnp.sum(p, axis=-1, keepdims=True), approx=True)
        p = p.reshape(bw, n, n).astype(compute_dtype)

        oh = jnp.einsum('bnm,bmd->bnd', p, vh,
                        preferred_element_type=jnp.float32)
        head_outs.append(oh.astype(compute_dtype))

    # Merge heads along the lane axis (no f32 scratch, no masked partial
    # stores) and run one lane-dense output-projection GEMM.  proj_drop is
    # identity at inference.
    attn = jnp.concatenate(head_outs, axis=-1).reshape(rows, C)
    y = jnp.dot(attn, wproj_ref[...], preferred_element_type=jnp.float32)
    o_ref[...] = (y + bproj_ref[...]).astype(o_ref.dtype)
    # TODO(synk): training-time attn_drop / proj_drop (p > 0) not implemented
    # in-kernel; the module's inference path (p = 0) is the identity.


def _vmem_plan():
    """Generation-aware (target_rows, vmem_limit_bytes).

    v7x has 64 MiB VMEM per TensorCore -> keep blocks moderate and leave
    headroom; v5e / v6e have 128 MiB -> larger blocks amortize the ~0.35 us
    per-grid-step overhead and raise the M dim of the GEMMs.
    """
    try:
        cap = int(pltpu.get_tpu_info().vmem_capacity_bytes)
    except Exception:
        cap = None
    if cap is None:
        return 512, 32 * 1024 * 1024           # portable conservative default
    if cap <= 80 * 1024 * 1024:                 # v7x-class (64 MiB per TC)
        return 512, 48 * 1024 * 1024
    return 1024, 96 * 1024 * 1024               # v5e / v6e (128 MiB)


def _pick_block_windows(B_, nW, N, target_rows):
    """Per-step window count BW: a multiple of nW dividing B_, with
    BW*N <= target_rows.  Prefer an even number of grid steps (v7x: 2
    TensorCores share the single "parallel" axis), then >= 2 steps, then the
    largest fitting block."""
    batch = B_ // nW
    candidates = [g * nW for g in range(1, batch + 1) if batch % g == 0]
    fits = [bw for bw in candidates if bw * N <= target_rows]
    if not fits:
        return nW
    even = [bw for bw in fits if (B_ // bw) >= 2 and (B_ // bw) % 2 == 0]
    if even:
        return max(even)
    multi = [bw for bw in fits if B_ // bw >= 2]
    if multi:
        return max(multi)
    return max(fits)


def window_attention(x, wqkv, bqkv, rel_bias, pad_mask, mask, wproj, bproj,
                     num_heads, *, compute_dtype=jnp.bfloat16,
                     target_rows=None, vmem_limit_bytes=None):
    """x: (B_, N, C); pad_mask/mask: (nW, N, N); rel_bias: (num_heads, N, N).

    Returns (B_, N, C) in x.dtype, matching WindowAttention.forward at
    inference (attn_drop = proj_drop = 0).

    Caller contract: N must be a multiple of 8 (pad real Swin windows, e.g.
    N=49 -> 56/64) and the padded key columns MUST carry -100 (or -inf) in
    pad_mask so the softmax never attends to padded tokens.
    """
    B_, N, C = x.shape
    nW = pad_mask.shape[0]
    assert B_ % nW == 0, "B_ must be a multiple of nW (batch*nW window layout)"
    assert C % num_heads == 0, "dim must be divisible by num_heads"
    assert N % 8 == 0, "pad N to a multiple of 8 (mask padded keys with -100)"
    head_dim = C // num_heads
    scale = head_dim ** (-0.5)
    out_dtype = x.dtype

    if mask is None:
        mask = jnp.zeros_like(pad_mask)

    # ---- one-time constant folds on parameters / masks --------------------
    # Fold the attention scale into the q columns of the qkv projection:
    #   (x @ Wq + bq) * scale == x @ (Wq*scale) + bq*scale
    col_scale = jnp.concatenate(
        [jnp.full((C,), scale, dtype=jnp.float32),
         jnp.ones((2 * C,), dtype=jnp.float32)])
    wqkv_c = (wqkv.astype(jnp.float32) * col_scale[None, :]).astype(compute_dtype)
    bqkv2 = (bqkv.astype(jnp.float32) * col_scale).reshape(1, 3 * C)

    # Fold rel-pos bias + pad_mask + shift mask into ONE additive bias per
    # (head, window): (H, nW, N, N).  No per-step tiling of the mask.
    bias = (rel_bias.astype(jnp.float32)[:, None]
            + (pad_mask.astype(jnp.float32) + mask.astype(jnp.float32))[None])

    if target_rows is None or vmem_limit_bytes is None:
        tr, vl = _vmem_plan()
        target_rows = tr if target_rows is None else target_rows
        vmem_limit_bytes = vl if vmem_limit_bytes is None else vmem_limit_bytes

    bw = _pick_block_windows(B_, nW, N, target_rows)
    assert bw % nW == 0 and B_ % bw == 0
    grid = B_ // bw

    # bf16 activations & weights; f32 accumulation inside the kernel.
    x2 = x.reshape(B_ * N, C).astype(compute_dtype)
    wproj_c = wproj.astype(compute_dtype)
    bproj2 = bproj.astype(jnp.float32).reshape(1, C)

    kernel = functools.partial(
        _window_attn_kernel, num_heads=num_heads, head_dim=head_dim,
        bw=bw, n=N, nw=nW, compute_dtype=compute_dtype)

    def build_and_run(single_buffer_consts):
        def const_spec(shape):
            nd = len(shape)
            index_map = lambda b, _nd=nd: (0,) * _nd
            if single_buffer_consts:
                # Grid-invariant operand: no need to double-buffer it.
                return pl.BlockSpec(shape, index_map,
                                    pipeline_mode=pl.Buffered(1))
            return pl.BlockSpec(shape, index_map)

        call = pl.pallas_call(
            kernel,
            out_shape=jax.ShapeDtypeStruct((B_ * N, C), out_dtype),
            grid_spec=pltpu.PrefetchScalarGridSpec(
                num_scalar_prefetch=0,
                grid=(grid,),
                in_specs=[
                    pl.BlockSpec((bw * N, C), lambda b: (b, 0)),   # x
                    const_spec((C, 3 * C)),                        # Wqkv
                    const_spec((1, 3 * C)),                        # bqkv
                    const_spec((num_heads, nW, N, N)),             # bias+mask
                    const_spec((C, C)),                            # Wproj
                    const_spec((1, C)),                            # bproj
                ],
                out_specs=pl.BlockSpec((bw * N, C), lambda b: (b, 0)),
                scratch_shapes=[pltpu.VMEM((bw * N, 3 * C), compute_dtype)],
            ),
            compiler_params=pltpu.CompilerParams(
                dimension_semantics=("parallel",),
                vmem_limit_bytes=vmem_limit_bytes),
        )
        return call(x2, wqkv_c, bqkv2, bias, wproj_c, bproj2)

    try:
        out2 = build_and_run(True)
    except Exception:
        # JAX builds without BlockSpec.pipeline_mode support: fall back to the
        # default double-buffered pipeline for the grid-invariant operands.
        out2 = build_and_run(False)

    return out2.reshape(B_, N, C)


def make_relative_position_index(window_size):
    """Same construction as the PyTorch module (pure index glue)."""
    Wh, Ww = window_size
    coords_h = np.arange(Wh)
    coords_w = np.arange(Ww)
    coords = np.stack(np.meshgrid(coords_h, coords_w, indexing="ij"))  # (2,Wh,Ww)
    coords_flatten = coords.reshape(2, -1)                             # (2, N)
    rel = coords_flatten[:, :, None] - coords_flatten[:, None, :]      # (2, N, N)
    rel = rel.transpose(1, 2, 0).copy()                                # (N, N, 2)
    rel[:, :, 0] += Wh - 1
    rel[:, :, 1] += Ww - 1
    rel[:, :, 0] *= 2 * Ww - 1
    return rel.sum(-1)                                                 # (N, N)


def reference_window_attention(x, wqkv, bqkv, rel_bias, pad_mask, mask,
                               wproj, bproj, num_heads):
    """Pure-JAX f32 reference mirroring the PyTorch forward."""
    B_, N, C = x.shape
    nW = pad_mask.shape[0]
    head_dim = C // num_heads
    scale = head_dim ** (-0.5)

    qkv = x @ wqkv + bqkv[None, None, :]
    qkv = qkv.reshape(B_, N, 3, num_heads, head_dim).transpose(2, 0, 3, 1, 4)
    q, k, v = qkv[0], qkv[1], qkv[2]
    q = q * scale
    attn = jnp.einsum('bhnd,bhmd->bhnm', q, k)
    attn = attn + rel_bias[None]
    attn = attn.reshape(B_ // nW, nW, num_heads, N, N) + pad_mask[None, :, None]
    attn = attn.reshape(B_ // nW, nW, num_heads, N, N) + mask[None, :, None]
    attn = attn.reshape(B_, num_heads, N, N)
    attn = jax.nn.softmax(attn, axis=-1)
    out = jnp.einsum('bhnm,bhmd->bhnd', attn, v)
    out = out.transpose(0, 2, 1, 3).reshape(B_, N, C)
    return out @ wproj + bproj[None, None, :]


if __name__ == "__main__":
    # Small config: dim=32, window 4x4 (N=16), 4 heads, batch=8, nW=2 -> B_=16.
    dim = 32
    window_size = (4, 4)
    num_heads = 4
    N = window_size[0] * window_size[1]
    nW = 2
    batch = 8
    B_ = batch * nW

    key = jax.random.PRNGKey(0)
    k_x, k_tbl, k_wqkv, k_bqkv, k_wproj, k_bproj, k_pad, k_msk = \
        jax.random.split(key, 8)

    x = jax.random.normal(k_x, (B_, N, dim), dtype=jnp.float32)

    # Parameters (deterministic synthetic init; trunc_normal approximated by a
    # scaled normal for the bias table).
    num_rel = (2 * window_size[0] - 1) * (2 * window_size[1] - 1)
    rel_table = 0.02 * jax.random.normal(k_tbl, (num_rel, num_heads),
                                         dtype=jnp.float32)
    wqkv = 0.1 * jax.random.normal(k_wqkv, (dim, 3 * dim), dtype=jnp.float32)
    bqkv = 0.1 * jax.random.normal(k_bqkv, (3 * dim,), dtype=jnp.float32)
    wproj = 0.1 * jax.random.normal(k_wproj, (dim, dim), dtype=jnp.float32)
    bproj = 0.1 * jax.random.normal(k_bproj, (dim,), dtype=jnp.float32)

    # Attention masks (pad_mask and shift mask), shape (nW, N, N).
    pad_mask = jnp.where(
        jax.random.uniform(k_pad, (nW, N, N)) > 0.9, -100.0, 0.0
    ).astype(jnp.float32)
    mask = jnp.where(
        jax.random.uniform(k_msk, (nW, N, N)) > 0.9, -100.0, 0.0
    ).astype(jnp.float32)

    # Pre-gather relative position bias (index glue) -> (num_heads, N, N).
    rel_index = jnp.asarray(make_relative_position_index(window_size))
    rel_bias = rel_table[rel_index.reshape(-1)].reshape(N, N, num_heads)
    rel_bias = jnp.transpose(rel_bias, (2, 0, 1)).astype(jnp.float32)

    out = window_attention(x, wqkv, bqkv, rel_bias, pad_mask, mask,
                           wproj, bproj, num_heads)
    out = jax.block_until_ready(out)

    ref = reference_window_attention(x, wqkv, bqkv, rel_bias, pad_mask, mask,
                                     wproj, bproj, num_heads)
    ref = jax.block_until_ready(ref)

    # bf16 compute (f32 accumulate) vs f32 reference -> modest tolerance.
    np.testing.assert_allclose(np.asarray(out), np.asarray(ref),
                               rtol=3e-2, atol=3e-2)
    print("KERNEL_OK")
</pallas_src>

<mosaic_0001>
module attributes {stable_mosaic.version = 11 : i64} {
  func.func @_window_attn_kernel(%arg0: i32, %arg1: memref<128x32xbf16, #tpu.memory_space<vmem>>, %arg2: memref<32x96xbf16, #tpu.memory_space<vmem>>, %arg3: memref<1x96xf32, #tpu.memory_space<vmem>>, %arg4: memref<4x2x16x16xf32, #tpu.memory_space<vmem>>, %arg5: memref<32x32xbf16, #tpu.memory_space<vmem>>, %arg6: memref<1x32xf32, #tpu.memory_space<vmem>>, %arg7: memref<128x32xf32, #tpu.memory_space<vmem>>, %arg8: memref<128x96xbf16, #tpu.memory_space<vmem>>) attributes {dimension_semantics = [#tpu.dimension_semantics<parallel>], iteration_bounds = array<i64: 2>, scalar_prefetch = 0 : i64, scratch_operands = 1 : i64, tpu.core_type = #tpu.core_type<tc>, window_params = [{transform_indices = @transform_0, window_bounds = array<i64: 128, 32>}, {pipeline_mode = #tpu.pipeline_mode<synchronous>, transform_indices = @transform_1, window_bounds = array<i64: 32, 96>}, {pipeline_mode = #tpu.pipeline_mode<synchronous>, transform_indices = @transform_2, window_bounds = array<i64: 1, 96>}, {pipeline_mode = #tpu.pipeline_mode<synchronous>, transform_indices = @transform_3, window_bounds = array<i64: 4, 2, 16, 16>}, {pipeline_mode = #tpu.pipeline_mode<synchronous>, transform_indices = @transform_4, window_bounds = array<i64: 32, 32>}, {pipeline_mode = #tpu.pipeline_mode<synchronous>, transform_indices = @transform_5, window_bounds = array<i64: 1, 32>}, {transform_indices = @transform_6, window_bounds = array<i64: 128, 32>}]} {
    %c0 = arith.constant 0 : index
    %c0_0 = arith.constant 0 : index
    %0 = vector.load %arg1[%c0, %c0_0] : memref<128x32xbf16, #tpu.memory_space<vmem>>, vector<128x32xbf16>
    %c0_1 = arith.constant 0 : index
    %c0_2 = arith.constant 0 : index
    %1 = vector.load %arg2[%c0_1, %c0_2] : memref<32x96xbf16, #tpu.memory_space<vmem>>, vector<32x96xbf16>
    %cst = arith.constant dense<0.000000e+00> : vector<128x96xf32>
    %2 = tpu.matmul %0, %1, %cst {dimension_numbers = #tpu.dot_dimension_numbers<[1], [0], [0], [1], [0, 0, 1, 1], [], []>} : vector<128x32xbf16>, vector<32x96xbf16>, vector<128x96xf32> -> vector<128x96xf32>
    %c0_3 = arith.constant 0 : index
    %c0_4 = arith.constant 0 : index
    %3 = vector.load %arg3[%c0_3, %c0_4] : memref<1x96xf32, #tpu.memory_space<vmem>>, vector<1x96xf32>
    %4 = vector.broadcast %3 : vector<1x96xf32> to vector<128x96xf32>
    %5 = arith.addf %2, %4 : vector<128x96xf32>
    %6 = arith.truncf %5 : vector<128x96xf32> to vector<128x96xbf16>
    %c0_5 = arith.constant 0 : index
    %c0_6 = arith.constant 0 : index
    %7 = vector.load %arg8[%c0_5, %c0_6] : memref<128x96xbf16, #tpu.memory_space<vmem>>, vector<128x96xbf16>
    tpu.vector_store %arg8[%c0_5, %c0_6], %6 {strides = array<i32>} : memref<128x96xbf16, #tpu.memory_space<vmem>>, vector<128x96xbf16>,
    %c0_7 = arith.constant 0 : index
    %c0_8 = arith.constant 0 : index
    %8 = vector.load %arg8[%c0_7, %c0_8] : memref<128x96xbf16, #tpu.memory_space<vmem>>, vector<128x8xbf16>
    %9 = vector.shape_cast %8 : vector<128x8xbf16> to vector<8x16x8xbf16>
    %c0_9 = arith.constant 0 : index
    %c32 = arith.constant 32 : index
    %10 = vector.load %arg8[%c0_9, %c32] : memref<128x96xbf16, #tpu.memory_space<vmem>>, vector<128x8xbf16>
    %11 = vector.shape_cast %10 : vector<128x8xbf16> to vector<8x16x8xbf16>
    %c0_10 = arith.constant 0 : index
    %c64 = arith.constant 64 : index
    %12 = vector.load %arg8[%c0_10, %c64] : memref<128x96xbf16, #tpu.memory_space<vmem>>, vector<128x8xbf16>
    %13 = vector.shape_cast %12 : vector<128x8xbf16> to vector<8x16x8xbf16>
    "tpu.trace_start"() <{level = 10 : i32, message = "bnd,bmd->bnm"}> : () -> ()
    %cst_11 = arith.constant dense<0.000000e+00> : vector<8x16x16xf32>
    %14 = tpu.matmul %9, %11, %cst_11 {dimension_numbers = #tpu.dot_dimension_numbers<[2], [2], [1], [1], [0, 0, 0, 1, 1, 1], [0], [0]>} : vector<8x16x8xbf16>, vector<8x16x8xbf16>, vector<8x16x16xf32> -> vector<8x16x16xf32>
    "tpu.trace_stop"() : () -> ()
    %15 = vector.shape_cast %14 : vector<8x16x16xf32> to vector<4x2x16x16xf32>
    %c0_12 = arith.constant 0 : index
    %c0_13 = arith.constant 0 : index
    %c0_14 = arith.constant 0 : index
    %c0_15 = arith.constant 0 : index
    %16 = vector.load %arg4[%c0_12, %c0_13, %c0_14, %c0_15] : memref<4x2x16x16xf32, #tpu.memory_space<vmem>>, vector<1x2x16x16xf32>
    %17 = vector.shape_cast %16 : vector<1x2x16x16xf32> to vector<2x16x16xf32>
    %18 = vector.shape_cast %17 : vector<2x16x16xf32> to vector<1x2x16x16xf32>
    %19 = vector.broadcast %18 : vector<1x2x16x16xf32> to vector<4x2x16x16xf32>
    %20 = arith.addf %15, %19 : vector<4x2x16x16xf32>
    %cst_16 = arith.constant dense<0xFF800000> : vector<4x2x16xf32>
    %21 = vector.multi_reduction <maximumf>, %20, %cst_16 [3] : vector<4x2x16x16xf32> to vector<4x2x16xf32>
    %22 = vector.shape_cast %21 : vector<4x2x16xf32> to vector<4x2x16x1xf32>
    %23 = vector.broadcast %22 : vector<4x2x16x1xf32> to vector<4x2x16x16xf32>
    %24 = arith.subf %20, %23 : vector<4x2x16x16xf32>
    %25 = math.exp %24 : vector<4x2x16x16xf32>
    %cst_17 = arith.constant dense<0.000000e+00> : vector<4x2x16xf32>
    %26 = vector.multi_reduction <add>, %25, %cst_17 [3] : vector<4x2x16x16xf32> to vector<4x2x16xf32>
    %27 = vector.shape_cast %26 : vector<4x2x16xf32> to vector<4x2x16x1xf32>
    %28 = tpu.reciprocal %27 {approx = true} : vector<4x2x16x1xf32> -> vector<4x2x16x1xf32>
    %29 = vector.broadcast %28 : vector<4x2x16x1xf32> to vector<4x2x16x16xf32>
    %30 = arith.mulf %25, %29 : vector<4x2x16x16xf32>
    %31 = vector.shape_cast %30 : vector<4x2x16x16xf32> to vector<8x16x16xf32>
    %32 = arith.truncf %31 : vector<8x16x16xf32> to vector<8x16x16xbf16>
    "tpu.trace_start"() <{level = 10 : i32, message = "bnm,bmd->bnd"}> : () -> ()
    %cst_18 = arith.constant dense<0.000000e+00> : vector<8x16x8xf32>
    %33 = tpu.matmul %32, %13, %cst_18 {dimension_numbers = #tpu.dot_dimension_numbers<[2], [1], [1], [2], [0, 0, 0, 1, 1, 2], [0], [0]>} : vector<8x16x16xbf16>, vector<8x16x8xbf16>, vector<8x16x8xf32> -> vector<8x16x8xf32>
    "tpu.trace_stop"() : () -> ()
    %34 = arith.truncf %33 : vector<8x16x8xf32> to vector<8x16x8xbf16>
    %c0_19 = arith.constant 0 : index
    %c8 = arith.constant 8 : index
    %35 = vector.load %arg8[%c0_19, %c8] : memref<128x96xbf16, #tpu.memory_space<vmem>>, vector<128x8xbf16>
    %36 = vector.shape_cast %35 : vector<128x8xbf16> to vector<8x16x8xbf16>
    %c0_20 = arith.constant 0 : index
    %c40 = arith.constant 40 : index
    %37 = vector.load %arg8[%c0_20, %c40] : memref<128x96xbf16, #tpu.memory_space<vmem>>, vector<128x8xbf16>
    %38 = vector.shape_cast %37 : vector<128x8xbf16> to vector<8x16x8xbf16>
    %c0_21 = arith.constant 0 : index
    %c72 = arith.constant 72 : index
    %39 = vector.load %arg8[%c0_21, %c72] : memref<128x96xbf16, #tpu.memory_space<vmem>>, vector<128x8xbf16>
    %40 = vector.shape_cast %39 : vector<128x8xbf16> to vector<8x16x8xbf16>
    "tpu.trace_start"() <{level = 10 : i32, message = "bnd,bmd->bnm"}> : () -> ()
    %cst_22 = arith.constant dense<0.000000e+00> : vector<8x16x16xf32>
    %41 = tpu.matmul %36, %38, %cst_22 {dimension_numbers = #tpu.dot_dimension_numbers<[2], [2], [1], [1], [0, 0, 0, 1, 1, 1], [0], [0]>} : vector<8x16x8xbf16>, vector<8x16x8xbf16>, vector<8x16x16xf32> -> vector<8x16x16xf32>
    "tpu.trace_stop"() : () -> ()
    %42 = vector.shape_cast %41 : vector<8x16x16xf32> to vector<4x2x16x16xf32>
    %c1 = arith.constant 1 : index
    %c0_23 = arith.constant 0 : index
    %c0_24 = arith.constant 0 : index
    %c0_25 = arith.constant 0 : index
    %43 = vector.load %arg4[%c1, %c0_23, %c0_24, %c0_25] : memref<4x2x16x16xf32, #tpu.memory_space<vmem>>, vector<1x2x16x16xf32>
    %44 = vector.shape_cast %43 : vector<1x2x16x16xf32> to vector<2x16x16xf32>
    %45 = vector.shape_cast %44 : vector<2x16x16xf32> to vector<1x2x16x16xf32>
    %46 = vector.broadcast %45 : vector<1x2x16x16xf32> to vector<4x2x16x16xf32>
    %47 = arith.addf %42, %46 : vector<4x2x16x16xf32>
    %cst_26 = arith.constant dense<0xFF800000> : vector<4x2x16xf32>
    %48 = vector.multi_reduction <maximumf>, %47, %cst_26 [3] : vector<4x2x16x16xf32> to vector<4x2x16xf32>
    %49 = vector.shape_cast %48 : vector<4x2x16xf32> to vector<4x2x16x1xf32>
    %50 = vector.broadcast %49 : vector<4x2x16x1xf32> to vector<4x2x16x16xf32>
    %51 = arith.subf %47, %50 : vector<4x2x16x16xf32>
    %52 = math.exp %51 : vector<4x2x16x16xf32>
    %cst_27 = arith.constant dense<0.000000e+00> : vector<4x2x16xf32>
    %53 = vector.multi_reduction <add>, %52, %cst_27 [3] : vector<4x2x16x16xf32> to vector<4x2x16xf32>
    %54 = vector.shape_cast %53 : vector<4x2x16xf32> to vector<4x2x16x1xf32>
    %55 = tpu.reciprocal %54 {approx = true} : vector<4x2x16x1xf32> -> vector<4x2x16x1xf32>
    %56 = vector.broadcast %55 : vector<4x2x16x1xf32> to vector<4x2x16x16xf32>
    %57 = arith.mulf %52, %56 : vector<4x2x16x16xf32>
    %58 = vector.shape_cast %57 : vector<4x2x16x16xf32> to vector<8x16x16xf32>
    %59 = arith.truncf %58 : vector<8x16x16xf32> to vector<8x16x16xbf16>
    "tpu.trace_start"() <{level = 10 : i32, message = "bnm,bmd->bnd"}> : () -> ()
    %cst_28 = arith.constant dense<0.000000e+00> : vector<8x16x8xf32>
    %60 = tpu.matmul %59, %40, %cst_28 {dimension_numbers = #tpu.dot_dimension_numbers<[2], [1], [1], [2], [0, 0, 0, 1, 1, 2], [0], [0]>} : vector<8x16x16xbf16>, vector<8x16x8xbf16>, vector<8x16x8xf32> -> vector<8x16x8xf32>
    "tpu.trace_stop"() : () -> ()
    %61 = arith.truncf %60 : vector<8x16x8xf32> to vector<8x16x8xbf16>
    %c0_29 = arith.constant 0 : index
    %c16 = arith.constant 16 : index
    %62 = vector.load %arg8[%c0_29, %c16] : memref<128x96xbf16, #tpu.memory_space<vmem>>, vector<128x8xbf16>
    %63 = vector.shape_cast %62 : vector<128x8xbf16> to vector<8x16x8xbf16>
    %c0_30 = arith.constant 0 : index
    %c48 = arith.constant 48 : index
    %64 = vector.load %arg8[%c0_30, %c48] : memref<128x96xbf16, #tpu.memory_space<vmem>>, vector<128x8xbf16>
    %65 = vector.shape_cast %64 : vector<128x8xbf16> to vector<8x16x8xbf16>
    %c0_31 = arith.constant 0 : index
    %c80 = arith.constant 80 : index
    %66 = vector.load %arg8[%c0_31, %c80] : memref<128x96xbf16, #tpu.memory_space<vmem>>, vector<128x8xbf16>
    %67 = vector.shape_cast %66 : vector<128x8xbf16> to vector<8x16x8xbf16>
    "tpu.trace_start"() <{level = 10 : i32, message = "bnd,bmd->bnm"}> : () -> ()
    %cst_32 = arith.constant dense<0.000000e+00> : vector<8x16x16xf32>
    %68 = tpu.matmul %63, %65, %cst_32 {dimension_numbers = #tpu.dot_dimension_numbers<[2], [2], [1], [1], [0, 0, 0, 1, 1, 1], [0], [0]>} : vector<8x16x8xbf16>, vector<8x16x8xbf16>, vector<8x16x16xf32> -> vector<8x16x16xf32>
    "tpu.trace_stop"() : () -> ()
    %69 = vector.shape_cast %68 : vector<8x16x16xf32> to vector<4x2x16x16xf32>
    %c2 = arith.constant 2 : index
    %c0_33 = arith.constant 0 : index
    %c0_34 = arith.constant 0 : index
    %c0_35 = arith.constant 0 : index
    %70 = vector.load %arg4[%c2, %c0_33, %c0_34, %c0_35] : memref<4x2x16x16xf32, #tpu.memory_space<vmem>>, vector<1x2x16x16xf32>
    %71 = vector.shape_cast %70 : vector<1x2x16x16xf32> to vector<2x16x16xf32>
    %72 = vector.shape_cast %71 : vector<2x16x16xf32> to vector<1x2x16x16xf32>
    %73 = vector.broadcast %72 : vector<1x2x16x16xf32> to vector<4x2x16x16xf32>
    %74 = arith.addf %69, %73 : vector<4x2x16x16xf32>
    %cst_36 = arith.constant dense<0xFF800000> : vector<4x2x16xf32>
    %75 = vector.multi_reduction <maximumf>, %74, %cst_36 [3] : vector<4x2x16x16xf32> to vector<4x2x16xf32>
    %76 = vector.shape_cast %75 : vector<4x2x16xf32> to vector<4x2x16x1xf32>
    %77 = vector.broadcast %76 : vector<4x2x16x1xf32> to vector<4x2x16x16xf32>
    %78 = arith.subf %74, %77 : vector<4x2x16x16xf32>
    %79 = math.exp %78 : vector<4x2x16x16xf32>
    %cst_37 = arith.constant dense<0.000000e+00> : vector<4x2x16xf32>
    %80 = vector.multi_reduction <add>, %79, %cst_37 [3] : vector<4x2x16x16xf32> to vector<4x2x16xf32>
    %81 = vector.shape_cast %80 : vector<4x2x16xf32> to vector<4x2x16x1xf32>
    %82 = tpu.reciprocal %81 {approx = true} : vector<4x2x16x1xf32> -> vector<4x2x16x1xf32>
    %83 = vector.broadcast %82 : vector<4x2x16x1xf32> to vector<4x2x16x16xf32>
    %84 = arith.mulf %79, %83 : vector<4x2x16x16xf32>
    %85 = vector.shape_cast %84 : vector<4x2x16x16xf32> to vector<8x16x16xf32>
    %86 = arith.truncf %85 : vector<8x16x16xf32> to vector<8x16x16xbf16>
    "tpu.trace_start"() <{level = 10 : i32, message = "bnm,bmd->bnd"}> : () -> ()
    %cst_38 = arith.constant dense<0.000000e+00> : vector<8x16x8xf32>
    %87 = tpu.matmul %86, %67, %cst_38 {dimension_numbers = #tpu.dot_dimension_numbers<[2], [1], [1], [2], [0, 0, 0, 1, 1, 2], [0], [0]>} : vector<8x16x16xbf16>, vector<8x16x8xbf16>, vector<8x16x8xf32> -> vector<8x16x8xf32>
    "tpu.trace_stop"() : () -> ()
    %88 = arith.truncf %87 : vector<8x16x8xf32> to vector<8x16x8xbf16>
    %c0_39 = arith.constant 0 : index
    %c24 = arith.constant 24 : index
    %89 = vector.load %arg8[%c0_39, %c24] : memref<128x96xbf16, #tpu.memory_space<vmem>>, vector<128x8xbf16>
    %90 = vector.shape_cast %89 : vector<128x8xbf16> to vector<8x16x8xbf16>
    %c0_40 = arith.constant 0 : index
    %c56 = arith.constant 56 : index
    %91 = vector.load %arg8[%c0_40, %c56] : memref<128x96xbf16, #tpu.memory_space<vmem>>, vector<128x8xbf16>
    %92 = vector.shape_cast %91 : vector<128x8xbf16> to vector<8x16x8xbf16>
    %c0_41 = arith.constant 0 : index
    %c88 = arith.constant 88 : index
    %93 = vector.load %arg8[%c0_41, %c88] : memref<128x96xbf16, #tpu.memory_space<vmem>>, vector<128x8xbf16>
    %94 = vector.shape_cast %93 : vector<128x8xbf16> to vector<8x16x8xbf16>
    "tpu.trace_start"() <{level = 10 : i32, message = "bnd,bmd->bnm"}> : () -> ()
    %cst_42 = arith.constant dense<0.000000e+00> : vector<8x16x16xf32>
    %95 = tpu.matmul %90, %92, %cst_42 {dimension_numbers = #tpu.dot_dimension_numbers<[2], [2], [1], [1], [0, 0, 0, 1, 1, 1], [0], [0]>} : vector<8x16x8xbf16>, vector<8x16x8xbf16>, vector<8x16x16xf32> -> vector<8x16x16xf32>
    "tpu.trace_stop"() : () -> ()
    %96 = vector.shape_cast %95 : vector<8x16x16xf32> to vector<4x2x16x16xf32>
    %c3 = arith.constant 3 : index
    %c0_43 = arith.constant 0 : index
    %c0_44 = arith.constant 0 : index
    %c0_45 = arith.constant 0 : index
    %97 = vector.load %arg4[%c3, %c0_43, %c0_44, %c0_45] : memref<4x2x16x16xf32, #tpu.memory_space<vmem>>, vector<1x2x16x16xf32>
    %98 = vector.shape_cast %97 : vector<1x2x16x16xf32> to vector<2x16x16xf32>
    %99 = vector.shape_cast %98 : vector<2x16x16xf32> to vector<1x2x16x16xf32>
    %100 = vector.broadcast %99 : vector<1x2x16x16xf32> to vector<4x2x16x16xf32>
    %101 = arith.addf %96, %100 : vector<4x2x16x16xf32>
    %cst_46 = arith.constant dense<0xFF800000> : vector<4x2x16xf32>
    %102 = vector.multi_reduction <maximumf>, %101, %cst_46 [3] : vector<4x2x16x16xf32> to vector<4x2x16xf32>
    %103 = vector.shape_cast %102 : vector<4x2x16xf32> to vector<4x2x16x1xf32>
    %104 = vector.broadcast %103 : vector<4x2x16x1xf32> to vector<4x2x16x16xf32>
    %105 = arith.subf %101, %104 : vector<4x2x16x16xf32>
    %106 = math.exp %105 : vector<4x2x16x16xf32>
    %cst_47 = arith.constant dense<0.000000e+00> : vector<4x2x16xf32>
    %107 = vector.multi_reduction <add>, %106, %cst_47 [3] : vector<4x2x16x16xf32> to vector<4x2x16xf32>
    %108 = vector.shape_cast %107 : vector<4x2x16xf32> to vector<4x2x16x1xf32>
    %109 = tpu.reciprocal %108 {approx = true} : vector<4x2x16x1xf32> -> vector<4x2x16x1xf32>
    %110 = vector.broadcast %109 : vector<4x2x16x1xf32> to vector<4x2x16x16xf32>
    %111 = arith.mulf %106, %110 : vector<4x2x16x16xf32>
    %112 = vector.shape_cast %111 : vector<4x2x16x16xf32> to vector<8x16x16xf32>
    %113 = arith.truncf %112 : vector<8x16x16xf32> to vector<8x16x16xbf16>
    "tpu.trace_start"() <{level = 10 : i32, message = "bnm,bmd->bnd"}> : () -> ()
    %cst_48 = arith.constant dense<0.000000e+00> : vector<8x16x8xf32>
    %114 = tpu.matmul %113, %94, %cst_48 {dimension_numbers = #tpu.dot_dimension_numbers<[2], [1], [1], [2], [0, 0, 0, 1, 1, 2], [0], [0]>} : vector<8x16x16xbf16>, vector<8x16x8xbf16>, vector<8x16x8xf32> -> vector<8x16x8xf32>
    "tpu.trace_stop"() : () -> ()
    %115 = arith.truncf %114 : vector<8x16x8xf32> to vector<8x16x8xbf16>
    %116 = tpu.concatenate %34, %61, %88, %115 in 2 : vector<8x16x8xbf16>, vector<8x16x8xbf16>, vector<8x16x8xbf16>, vector<8x16x8xbf16> -> vector<8x16x32xbf16>
    %117 = vector.shape_cast %116 : vector<8x16x32xbf16> to vector<128x32xbf16>
    %c0_49 = arith.constant 0 : index
    %c0_50 = arith.constant 0 : index
    %118 = vector.load %arg5[%c0_49, %c0_50] : memref<32x32xbf16, #tpu.memory_space<vmem>>, vector<32x32xbf16>
    %cst_51 = arith.constant dense<0.000000e+00> : vector<128x32xf32>
    %119 = tpu.matmul %117, %118, %cst_51 {dimension_numbers = #tpu.dot_dimension_numbers<[1], [0], [0], [1], [0, 0, 1, 1], [], []>} : vector<128x32xbf16>, vector<32x32xbf16>, vector<128x32xf32> -> vector<128x32xf32>
    %c0_52 = arith.constant 0 : index
    %c0_53 = arith.constant 0 : index
    %120 = vector.load %arg6[%c0_52, %c0_53] : memref<1x32xf32, #tpu.memory_space<vmem>>, vector<1x32xf32>
    %121 = vector.broadcast %120 : vector<1x32xf32> to vector<128x32xf32>
    %122 = arith.addf %119, %121 : vector<128x32xf32>
    %c0_54 = arith.constant 0 : index
    %c0_55 = arith.constant 0 : index
    %123 = vector.load %arg7[%c0_54, %c0_55] : memref<128x32xf32, #tpu.memory_space<vmem>>, vector<128x32xf32>
    tpu.vector_store %arg7[%c0_54, %c0_55], %122 {strides = array<i32>} : memref<128x32xf32, #tpu.memory_space<vmem>>, vector<128x32xf32>,
    return
  }
  func.func @transform_0(%arg0: i32) -> (i32, i32) {
    %c0_i32 = arith.constant 0 : i32
    %c0_i32_0 = arith.constant 0 : i32
    return %arg0, %c0_i32 : i32, i32
  }
  func.func @transform_1(%arg0: i32) -> (i32, i32) {
    %c0_i32 = arith.constant 0 : i32
    %c0_i32_0 = arith.constant 0 : i32
    %c0_i32_1 = arith.constant 0 : i32
    return %c0_i32, %c0_i32_0 : i32, i32
  }
  func.func @transform_2(%arg0: i32) -> (i32, i32) {
    %c0_i32 = arith.constant 0 : i32
    %c0_i32_0 = arith.constant 0 : i32
    %c0_i32_1 = arith.constant 0 : i32
    return %c0_i32, %c0_i32_0 : i32, i32
  }
  func.func @transform_3(%arg0: i32) -> (i32, i32, i32, i32) {
    %c0_i32 = arith.constant 0 : i32
    %c0_i32_0 = arith.constant 0 : i32
    %c0_i32_1 = arith.constant 0 : i32
    %c0_i32_2 = arith.constant 0 : i32
    %c0_i32_3 = arith.constant 0 : i32
    return %c0_i32, %c0_i32_0, %c0_i32_1, %c0_i32_2 : i32, i32, i32, i32
  }
  func.func @transform_4(%arg0: i32) -> (i32, i32) {
    %c0_i32 = arith.constant 0 : i32
    %c0_i32_0 = arith.constant 0 : i32
    %c0_i32_1 = arith.constant 0 : i32
    return %c0_i32, %c0_i32_0 : i32, i32
  }
  func.func @transform_5(%arg0: i32) -> (i32, i32) {
    %c0_i32 = arith.constant 0 : i32
    %c0_i32_0 = arith.constant 0 : i32
    %c0_i32_1 = arith.constant 0 : i32
    return %c0_i32, %c0_i32_0 : i32, i32
  }
  func.func @transform_6(%arg0: i32) -> (i32, i32) {
    %c0_i32 = arith.constant 0 : i32
    %c0_i32_0 = arith.constant 0 : i32
    return %arg0, %c0_i32 : i32, i32
  }
}

module attributes {stable_mosaic.version = 11 : i64} {
  func.func @_window_attn_kernel(%arg0: i32, %arg1: memref<128x32xbf16, #tpu.memory_space<vmem>>, %arg2: memref<32x96xbf16, #tpu.memory_space<vmem>>, %arg3: memref<1x96xf32, #tpu.memory_space<vmem>>, %arg4: memref<4x2x16x16xf32, #tpu.memory_space<vmem>>, %arg5: memref<32x32xbf16, #tpu.memory_space<vmem>>, %arg6: memref<1x32xf32, #tpu.memory_space<vmem>>, %arg7: memref<128x32xf32, #tpu.memory_space<vmem>>, %arg8: memref<128x96xbf16, #tpu.memory_space<vmem>>) attributes {dimension_semantics = [#tpu.dimension_semantics<parallel>], iteration_bounds = array<i64: 2>, scalar_prefetch = 0 : i64, scratch_operands = 1 : i64, tpu.core_type = #tpu.core_type<tc>, window_params = [{transform_indices = @transform_0, window_bounds = array<i64: 128, 32>}, {pipeline_mode = #tpu.pipeline_mode<synchronous>, transform_indices = @transform_1, window_bounds = array<i64: 32, 96>}, {pipeline_mode = #tpu.pipeline_mode<synchronous>, transform_indices = @transform_2, window_bounds = array<i64: 1, 96>}, {pipeline_mode = #tpu.pipeline_mode<synchronous>, transform_indices = @transform_3, window_bounds = array<i64: 4, 2, 16, 16>}, {pipeline_mode = #tpu.pipeline_mode<synchronous>, transform_indices = @transform_4, window_bounds = array<i64: 32, 32>}, {pipeline_mode = #tpu.pipeline_mode<synchronous>, transform_indices = @transform_5, window_bounds = array<i64: 1, 32>}, {transform_indices = @transform_6, window_bounds = array<i64: 128, 32>}]} {
    %c0 = arith.constant 0 : index
    %c0_0 = arith.constant 0 : index
    %0 = vector.load %arg1[%c0, %c0_0] : memref<128x32xbf16, #tpu.memory_space<vmem>>, vector<128x32xbf16>
    %c0_1 = arith.constant 0 : index
    %c0_2 = arith.constant 0 : index
    %1 = vector.load %arg2[%c0_1, %c0_2] : memref<32x96xbf16, #tpu.memory_space<vmem>>, vector<32x96xbf16>
    %cst = arith.constant dense<0.000000e+00> : vector<128x96xf32>
    %2 = tpu.matmul %0, %1, %cst {dimension_numbers = #tpu.dot_dimension_numbers<[1], [0], [0], [1], [0, 0, 1, 1], [], []>} : vector<128x32xbf16>, vector<32x96xbf16>, vector<128x96xf32> -> vector<128x96xf32>
    %c0_3 = arith.constant 0 : index
    %c0_4 = arith.constant 0 : index
    %3 = vector.load %arg3[%c0_3, %c0_4] : memref<1x96xf32, #tpu.memory_space<vmem>>, vector<1x96xf32>
    %4 = vector.broadcast %3 : vector<1x96xf32> to vector<128x96xf32>
    %5 = arith.addf %2, %4 : vector<128x96xf32>
    %6 = arith.truncf %5 : vector<128x96xf32> to vector<128x96xbf16>
    %c0_5 = arith.constant 0 : index
    %c0_6 = arith.constant 0 : index
    %7 = vector.load %arg8[%c0_5, %c0_6] : memref<128x96xbf16, #tpu.memory_space<vmem>>, vector<128x96xbf16>
    tpu.vector_store %arg8[%c0_5, %c0_6], %6 {strides = array<i32>} : memref<128x96xbf16, #tpu.memory_space<vmem>>, vector<128x96xbf16>,
    %c0_7 = arith.constant 0 : index
    %c0_8 = arith.constant 0 : index
    %8 = vector.load %arg8[%c0_7, %c0_8] : memref<128x96xbf16, #tpu.memory_space<vmem>>, vector<128x8xbf16>
    %9 = vector.shape_cast %8 : vector<128x8xbf16> to vector<8x16x8xbf16>
    %c0_9 = arith.constant 0 : index
    %c32 = arith.constant 32 : index
    %10 = vector.load %arg8[%c0_9, %c32] : memref<128x96xbf16, #tpu.memory_space<vmem>>, vector<128x8xbf16>
    %11 = vector.shape_cast %10 : vector<128x8xbf16> to vector<8x16x8xbf16>
    %c0_10 = arith.constant 0 : index
    %c64 = arith.constant 64 : index
    %12 = vector.load %arg8[%c0_10, %c64] : memref<128x96xbf16, #tpu.memory_space<vmem>>, vector<128x8xbf16>
    %13 = vector.shape_cast %12 : vector<128x8xbf16> to vector<8x16x8xbf16>
    "tpu.trace_start"() <{level = 10 : i32, message = "bnd,bmd->bnm"}> : () -> ()
    %cst_11 = arith.constant dense<0.000000e+00> : vector<8x16x16xf32>
    %14 = tpu.matmul %9, %11, %cst_11 {dimension_numbers = #tpu.dot_dimension_numbers<[2], [2], [1], [1], [0, 0, 0, 1, 1, 1], [0], [0]>} : vector<8x16x8xbf16>, vector<8x16x8xbf16>, vector<8x16x16xf32> -> vector<8x16x16xf32>
    "tpu.trace_stop"() : () -> ()
    %15 = vector.shape_cast %14 : vector<8x16x16xf32> to vector<4x2x16x16xf32>
    %c0_12 = arith.constant 0 : index
    %c0_13 = arith.constant 0 : index
    %c0_14 = arith.constant 0 : index
    %c0_15 = arith.constant 0 : index
    %16 = vector.load %arg4[%c0_12, %c0_13, %c0_14, %c0_15] : memref<4x2x16x16xf32, #tpu.memory_space<vmem>>, vector<1x2x16x16xf32>
    %17 = vector.shape_cast %16 : vector<1x2x16x16xf32> to vector<2x16x16xf32>
    %18 = vector.shape_cast %17 : vector<2x16x16xf32> to vector<1x2x16x16xf32>
    %19 = vector.broadcast %18 : vector<1x2x16x16xf32> to vector<4x2x16x16xf32>
    %20 = arith.addf %15, %19 : vector<4x2x16x16xf32>
    %cst_16 = arith.constant dense<0xFF800000> : vector<4x2x16xf32>
    %21 = vector.multi_reduction <maximumf>, %20, %cst_16 [3] : vector<4x2x16x16xf32> to vector<4x2x16xf32>
    %22 = vector.shape_cast %21 : vector<4x2x16xf32> to vector<4x2x16x1xf32>
    %23 = vector.broadcast %22 : vector<4x2x16x1xf32> to vector<4x2x16x16xf32>
    %24 = arith.subf %20, %23 : vector<4x2x16x16xf32>
    %25 = math.exp %24 : vector<4x2x16x16xf32>
    %cst_17 = arith.constant dense<0.000000e+00> : vector<4x2x16xf32>
    %26 = vector.multi_reduction <add>, %25, %cst_17 [3] : vector<4x2x16x16xf32> to vector<4x2x16xf32>
    %27 = vector.shape_cast %26 : vector<4x2x16xf32> to vector<4x2x16x1xf32>
    %28 = tpu.reciprocal %27 {approx = true} : vector<4x2x16x1xf32> -> vector<4x2x16x1xf32>
    %29 = vector.broadcast %28 : vector<4x2x16x1xf32> to vector<4x2x16x16xf32>
    %30 = arith.mulf %25, %29 : vector<4x2x16x16xf32>
    %31 = vector.shape_cast %30 : vector<4x2x16x16xf32> to vector<8x16x16xf32>
    %32 = arith.truncf %31 : vector<8x16x16xf32> to vector<8x16x16xbf16>
    "tpu.trace_start"() <{level = 10 : i32, message = "bnm,bmd->bnd"}> : () -> ()
    %cst_18 = arith.constant dense<0.000000e+00> : vector<8x16x8xf32>
    %33 = tpu.matmul %32, %13, %cst_18 {dimension_numbers = #tpu.dot_dimension_numbers<[2], [1], [1], [2], [0, 0, 0, 1, 1, 2], [0], [0]>} : vector<8x16x16xbf16>, vector<8x16x8xbf16>, vector<8x16x8xf32> -> vector<8x16x8xf32>
    "tpu.trace_stop"() : () -> ()
    %34 = arith.truncf %33 : vector<8x16x8xf32> to vector<8x16x8xbf16>
    %c0_19 = arith.constant 0 : index
    %c8 = arith.constant 8 : index
    %35 = vector.load %arg8[%c0_19, %c8] : memref<128x96xbf16, #tpu.memory_space<vmem>>, vector<128x8xbf16>
    %36 = vector.shape_cast %35 : vector<128x8xbf16> to vector<8x16x8xbf16>
    %c0_20 = arith.constant 0 : index
    %c40 = arith.constant 40 : index
    %37 = vector.load %arg8[%c0_20, %c40] : memref<128x96xbf16, #tpu.memory_space<vmem>>, vector<128x8xbf16>
    %38 = vector.shape_cast %37 : vector<128x8xbf16> to vector<8x16x8xbf16>
    %c0_21 = arith.constant 0 : index
    %c72 = arith.constant 72 : index
    %39 = vector.load %arg8[%c0_21, %c72] : memref<128x96xbf16, #tpu.memory_space<vmem>>, vector<128x8xbf16>
    %40 = vector.shape_cast %39 : vector<128x8xbf16> to vector<8x16x8xbf16>
    "tpu.trace_start"() <{level = 10 : i32, message = "bnd,bmd->bnm"}> : () -> ()
    %cst_22 = arith.constant dense<0.000000e+00> : vector<8x16x16xf32>
    %41 = tpu.matmul %36, %38, %cst_22 {dimension_numbers = #tpu.dot_dimension_numbers<[2], [2], [1], [1], [0, 0, 0, 1, 1, 1], [0], [0]>} : vector<8x16x8xbf16>, vector<8x16x8xbf16>, vector<8x16x16xf32> -> vector<8x16x16xf32>
    "tpu.trace_stop"() : () -> ()
    %42 = vector.shape_cast %41 : vector<8x16x16xf32> to vector<4x2x16x16xf32>
    %c1 = arith.constant 1 : index
    %c0_23 = arith.constant 0 : index
    %c0_24 = arith.constant 0 : index
    %c0_25 = arith.constant 0 : index
    %43 = vector.load %arg4[%c1, %c0_23, %c0_24, %c0_25] : memref<4x2x16x16xf32, #tpu.memory_space<vmem>>, vector<1x2x16x16xf32>
    %44 = vector.shape_cast %43 : vector<1x2x16x16xf32> to vector<2x16x16xf32>
    %45 = vector.shape_cast %44 : vector<2x16x16xf32> to vector<1x2x16x16xf32>
    %46 = vector.broadcast %45 : vector<1x2x16x16xf32> to vector<4x2x16x16xf32>
    %47 = arith.addf %42, %46 : vector<4x2x16x16xf32>
    %cst_26 = arith.constant dense<0xFF800000> : vector<4x2x16xf32>
    %48 = vector.multi_reduction <maximumf>, %47, %cst_26 [3] : vector<4x2x16x16xf32> to vector<4x2x16xf32>
    %49 = vector.shape_cast %48 : vector<4x2x16xf32> to vector<4x2x16x1xf32>
    %50 = vector.broadcast %49 : vector<4x2x16x1xf32> to vector<4x2x16x16xf32>
    %51 = arith.subf %47, %50 : vector<4x2x16x16xf32>
    %52 = math.exp %51 : vector<4x2x16x16xf32>
    %cst_27 = arith.constant dense<0.000000e+00> : vector<4x2x16xf32>
    %53 = vector.multi_reduction <add>, %52, %cst_27 [3] : vector<4x2x16x16xf32> to vector<4x2x16xf32>
    %54 = vector.shape_cast %53 : vector<4x2x16xf32> to vector<4x2x16x1xf32>
    %55 = tpu.reciprocal %54 {approx = true} : vector<4x2x16x1xf32> -> vector<4x2x16x1xf32>
    %56 = vector.broadcast %55 : vector<4x2x16x1xf32> to vector<4x2x16x16xf32>
    %57 = arith.mulf %52, %56 : vector<4x2x16x16xf32>
    %58 = vector.shape_cast %57 : vector<4x2x16x16xf32> to vector<8x16x16xf32>
    %59 = arith.truncf %58 : vector<8x16x16xf32> to vector<8x16x16xbf16>
    "tpu.trace_start"() <{level = 10 : i32, message = "bnm,bmd->bnd"}> : () -> ()
    %cst_28 = arith.constant dense<0.000000e+00> : vector<8x16x8xf32>
    %60 = tpu.matmul %59, %40, %cst_28 {dimension_numbers = #tpu.dot_dimension_numbers<[2], [1], [1], [2], [0, 0, 0, 1, 1, 2], [0], [0]>} : vector<8x16x16xbf16>, vector<8x16x8xbf16>, vector<8x16x8xf32> -> vector<8x16x8xf32>
    "tpu.trace_stop"() : () -> ()
    %61 = arith.truncf %60 : vector<8x16x8xf32> to vector<8x16x8xbf16>
    %c0_29 = arith.constant 0 : index
    %c16 = arith.constant 16 : index
    %62 = vector.load %arg8[%c0_29, %c16] : memref<128x96xbf16, #tpu.memory_space<vmem>>, vector<128x8xbf16>
    %63 = vector.shape_cast %62 : vector<128x8xbf16> to vector<8x16x8xbf16>
    %c0_30 = arith.constant 0 : index
    %c48 = arith.constant 48 : index
    %64 = vector.load %arg8[%c0_30, %c48] : memref<128x96xbf16, #tpu.memory_space<vmem>>, vector<128x8xbf16>
    %65 = vector.shape_cast %64 : vector<128x8xbf16> to vector<8x16x8xbf16>
    %c0_31 = arith.constant 0 : index
    %c80 = arith.constant 80 : index
    %66 = vector.load %arg8[%c0_31, %c80] : memref<128x96xbf16, #tpu.memory_space<vmem>>, vector<128x8xbf16>
    %67 = vector.shape_cast %66 : vector<128x8xbf16> to vector<8x16x8xbf16>
    "tpu.trace_start"() <{level = 10 : i32, message = "bnd,bmd->bnm"}> : () -> ()
    %cst_32 = arith.constant dense<0.000000e+00> : vector<8x16x16xf32>
    %68 = tpu.matmul %63, %65, %cst_32 {dimension_numbers = #tpu.dot_dimension_numbers<[2], [2], [1], [1], [0, 0, 0, 1, 1, 1], [0], [0]>} : vector<8x16x8xbf16>, vector<8x16x8xbf16>, vector<8x16x16xf32> -> vector<8x16x16xf32>
    "tpu.trace_stop"() : () -> ()
    %69 = vector.shape_cast %68 : vector<8x16x16xf32> to vector<4x2x16x16xf32>
    %c2 = arith.constant 2 : index
    %c0_33 = arith.constant 0 : index
    %c0_34 = arith.constant 0 : index
    %c0_35 = arith.constant 0 : index
    %70 = vector.load %arg4[%c2, %c0_33, %c0_34, %c0_35] : memref<4x2x16x16xf32, #tpu.memory_space<vmem>>, vector<1x2x16x16xf32>
    %71 = vector.shape_cast %70 : vector<1x2x16x16xf32> to vector<2x16x16xf32>
    %72 = vector.shape_cast %71 : vector<2x16x16xf32> to vector<1x2x16x16xf32>
    %73 = vector.broadcast %72 : vector<1x2x16x16xf32> to vector<4x2x16x16xf32>
    %74 = arith.addf %69, %73 : vector<4x2x16x16xf32>
    %cst_36 = arith.constant dense<0xFF800000> : vector<4x2x16xf32>
    %75 = vector.multi_reduction <maximumf>, %74, %cst_36 [3] : vector<4x2x16x16xf32> to vector<4x2x16xf32>
    %76 = vector.shape_cast %75 : vector<4x2x16xf32> to vector<4x2x16x1xf32>
    %77 = vector.broadcast %76 : vector<4x2x16x1xf32> to vector<4x2x16x16xf32>
    %78 = arith.subf %74, %77 : vector<4x2x16x16xf32>
    %79 = math.exp %78 : vector<4x2x16x16xf32>
    %cst_37 = arith.constant dense<0.000000e+00> : vector<4x2x16xf32>
    %80 = vector.multi_reduction <add>, %79, %cst_37 [3] : vector<4x2x16x16xf32> to vector<4x2x16xf32>
    %81 = vector.shape_cast %80 : vector<4x2x16xf32> to vector<4x2x16x1xf32>
    %82 = tpu.reciprocal %81 {approx = true} : vector<4x2x16x1xf32> -> vector<4x2x16x1xf32>
    %83 = vector.broadcast %82 : vector<4x2x16x1xf32> to vector<4x2x16x16xf32>
    %84 = arith.mulf %79, %83 : vector<4x2x16x16xf32>
    %85 = vector.shape_cast %84 : vector<4x2x16x16xf32> to vector<8x16x16xf32>
    %86 = arith.truncf %85 : vector<8x16x16xf32> to vector<8x16x16xbf16>
    "tpu.trace_start"() <{level = 10 : i32, message = "bnm,bmd->bnd"}> : () -> ()
    %cst_38 = arith.constant dense<0.000000e+00> : vector<8x16x8xf32>
    %87 = tpu.matmul %86, %67, %cst_38 {dimension_numbers = #tpu.dot_dimension_numbers<[2], [1], [1], [2], [0, 0, 0, 1, 1, 2], [0], [0]>} : vector<8x16x16xbf16>, vector<8x16x8xbf16>, vector<8x16x8xf32> -> vector<8x16x8xf32>
    "tpu.trace_stop"() : () -> ()
    %88 = arith.truncf %87 : vector<8x16x8xf32> to vector<8x16x8xbf16>
    %c0_39 = arith.constant 0 : index
    %c24 = arith.constant 24 : index
    %89 = vector.load %arg8[%c0_39, %c24] : memref<128x96xbf16, #tpu.memory_space<vmem>>, vector<128x8xbf16>
    %90 = vector.shape_cast %89 : vector<128x8xbf16> to vector<8x16x8xbf16>
    %c0_40 = arith.constant 0 : index
    %c56 = arith.constant 56 : index
    %91 = vector.load %arg8[%c0_40, %c56] : memref<128x96xbf16, #tpu.memory_space<vmem>>, vector<128x8xbf16>
    %92 = vector.shape_cast %91 : vector<128x8xbf16> to vector<8x16x8xbf16>
    %c0_41 = arith.constant 0 : index
    %c88 = arith.constant 88 : index
    %93 = vector.load %arg8[%c0_41, %c88] : memref<128x96xbf16, #tpu.memory_space<vmem>>, vector<128x8xbf16>
    %94 = vector.shape_cast %93 : vector<128x8xbf16> to vector<8x16x8xbf16>
    "tpu.trace_start"() <{level = 10 : i32, message = "bnd,bmd->bnm"}> : () -> ()
    %cst_42 = arith.constant dense<0.000000e+00> : vector<8x16x16xf32>
    %95 = tpu.matmul %90, %92, %cst_42 {dimension_numbers = #tpu.dot_dimension_numbers<[2], [2], [1], [1], [0, 0, 0, 1, 1, 1], [0], [0]>} : vector<8x16x8xbf16>, vector<8x16x8xbf16>, vector<8x16x16xf32> -> vector<8x16x16xf32>
    "tpu.trace_stop"() : () -> ()
    %96 = vector.shape_cast %95 : vector<8x16x16xf32> to vector<4x2x16x16xf32>
    %c3 = arith.constant 3 : index
    %c0_43 = arith.constant 0 : index
    %c0_44 = arith.constant 0 : index
    %c0_45 = arith.constant 0 : index
    %97 = vector.load %arg4[%c3, %c0_43, %c0_44, %c0_45] : memref<4x2x16x16xf32, #tpu.memory_space<vmem>>, vector<1x2x16x16xf32>
    %98 = vector.shape_cast %97 : vector<1x2x16x16xf32> to vector<2x16x16xf32>
    %99 = vector.shape_cast %98 : vector<2x16x16xf32> to vector<1x2x16x16xf32>
    %100 = vector.broadcast %99 : vector<1x2x16x16xf32> to vector<4x2x16x16xf32>
    %101 = arith.addf %96, %100 : vector<4x2x16x16xf32>
    %cst_46 = arith.constant dense<0xFF800000> : vector<4x2x16xf32>
    %102 = vector.multi_reduction <maximumf>, %101, %cst_46 [3] : vector<4x2x16x16xf32> to vector<4x2x16xf32>
    %103 = vector.shape_cast %102 : vector<4x2x16xf32> to vector<4x2x16x1xf32>
    %104 = vector.broadcast %103 : vector<4x2x16x1xf32> to vector<4x2x16x16xf32>
    %105 = arith.subf %101, %104 : vector<4x2x16x16xf32>
    %106 = math.exp %105 : vector<4x2x16x16xf32>
    %cst_47 = arith.constant dense<0.000000e+00> : vector<4x2x16xf32>
    %107 = vector.multi_reduction <add>, %106, %cst_47 [3] : vector<4x2x16x16xf32> to vector<4x2x16xf32>
    %108 = vector.shape_cast %107 : vector<4x2x16xf32> to vector<4x2x16x1xf32>
    %109 = tpu.reciprocal %108 {approx = true} : vector<4x2x16x1xf32> -> vector<4x2x16x1xf32>
    %110 = vector.broadcast %109 : vector<4x2x16x1xf32> to vector<4x2x16x16xf32>
    %111 = arith.mulf %106, %110 : vector<4x2x16x16xf32>
    %112 = vector.shape_cast %111 : vector<4x2x16x16xf32> to vector<8x16x16xf32>
    %113 = arith.truncf %112 : vector<8x16x16xf32> to vector<8x16x16xbf16>
    "tpu.trace_start"() <{level = 10 : i32, message = "bnm,bmd->bnd"}> : () -> ()
    %cst_48 = arith.constant dense<0.000000e+00> : vector<8x16x8xf32>
    %114 = tpu.matmul %113, %94, %cst_48 {dimension_numbers = #tpu.dot_dimension_numbers<[2], [1], [1], [2], [0, 0, 0, 1, 1, 2], [0], [0]>} : vector<8x16x16xbf16>, vector<8x16x8xbf16>, vector<8x16x8xf32> -> vector<8x16x8xf32>
    "tpu.trace_stop"() : () -> ()
    %115 = arith.truncf %114 : vector<8x16x8xf32> to vector<8x16x8xbf16>
    %116 = tpu.concatenate %34, %61, %88, %115 in 2 : vector<8x16x8xbf16>, vector<8x16x8xbf16>, vector<8x16x8xbf16>, vector<8x16x8xbf16> -> vector<8x16x32xbf16>
    %117 = vector.shape_cast %116 : vector<8x16x32xbf16> to vector<128x32xbf16>
    %c0_49 = arith.constant 0 : index
    %c0_50 = arith.constant 0 : index
    %118 = vector.load %arg5[%c0_49, %c0_50] : memref<32x32xbf16, #tpu.memory_space<vmem>>, vector<32x32xbf16>
    %cst_51 = arith.constant dense<0.000000e+00> : vector<128x32xf32>
    %119 = tpu.matmul %117, %118, %cst_51 {dimension_numbers = #tpu.dot_dimension_numbers<[1], [0], [0], [1], [0, 0, 1, 1], [], []>} : vector<128x32xbf16>, vector<32x32xbf16>, vector<128x32xf32> -> vector<128x32xf32>
    %c0_52 = arith.constant 0 : index
    %c0_53 = arith.constant 0 : index
    %120 = vector.load %arg6[%c0_52, %c0_53] : memref<1x32xf32, #tpu.memory_space<vmem>>, vector<1x32xf32>
    %121 = vector.broadcast %120 : vector<1x32xf32> to vector<128x32xf32>
    %122 = arith.addf %119, %121 : vector<128x32xf32>
    %c0_54 = arith.constant 0 : index
    %c0_55 = arith.constant 0 : index
    %123 = vector.load %arg7[%c0_54, %c0_55] : memref<128x32xf32, #tpu.memory_space<vmem>>, vector<128x32xf32>
    tpu.vector_store %arg7[%c0_54, %c0_55], %122 {strides = array<i32>} : memref<128x32xf32, #tpu.memory_space<vmem>>, vector<128x32xf32>,
    return
  }
  func.func @transform_0(%arg0: i32) -> (i32, i32) {
    %c0_i32 = arith.constant 0 : i32
    %c0_i32_0 = arith.constant 0 : i32
    return %arg0, %c0_i32 : i32, i32
  }
  func.func @transform_1(%arg0: i32) -> (i32, i32) {
    %c0_i32 = arith.constant 0 : i32
    %c0_i32_0 = arith.constant 0 : i32
    %c0_i32_1 = arith.constant 0 : i32
    return %c0_i32, %c0_i32_0 : i32, i32
  }
  func.func @transform_2(%arg0: i32) -> (i32, i32) {
    %c0_i32 = arith.constant 0 : i32
    %c0_i32_0 = arith.constant 0 : i32
    %c0_i32_1 = arith.constant 0 : i32
    return %c0_i32, %c0_i32_0 : i32, i32
  }
  func.func @transform_3(%arg0: i32) -> (i32, i32, i32, i32) {
    %c0_i32 = arith.constant 0 : i32
    %c0_i32_0 = arith.constant 0 : i32
    %c0_i32_1 = arith.constant 0 : i32
    %c0_i32_2 = arith.constant 0 : i32
    %c0_i32_3 = arith.constant 0 : i32
    return %c0_i32, %c0_i32_0, %c0_i32_1, %c0_i32_2 : i32, i32, i32, i32
  }
  func.func @transform_4(%arg0: i32) -> (i32, i32) {
    %c0_i32 = arith.constant 0 : i32
    %c0_i32_0 = arith.constant 0 : i32
    %c0_i32_1 = arith.constant 0 : i32
    return %c0_i32, %c0_i32_0 : i32, i32
  }
  func.func @transform_5(%arg0: i32) -> (i32, i32) {
    %c0_i32 = arith.constant 0 : i32
    %c0_i32_0 = arith.constant 0 : i32
    %c0_i32_1 = arith.constant 0 : i32
    return %c0_i32, %c0_i32_0 : i32, i32
  }
  func.func @transform_6(%arg0: i32) -> (i32, i32) {
    %c0_i32 = arith.constant 0 : i32
    %c0_i32_0 = arith.constant 0 : i32
    return %arg0, %c0_i32 : i32, i32
  }
}

</mosaic_0001>

<bundles_post_ra>
// kernel: tpu_custom_call.1
= control target key start
LH: loop header
LB: loop body
LE: loop exit
PB: predicated region body
PF: predicated region fallthrough
CT: control target
= control target key end

     0   :  { %s5903_s21 = smov 0   ;;  %s7491_s0 = inlined_call_operand.vmem [shape: bf16[256,32], index: 0, kind: input, shape index: {}]   ;;  %s7492_s1 = inlined_call_operand.vmem [shape: bf16[32,96], index: 1, kind: input, shape index: {}]   ;;  %s7493_s2 = inlined_call_operand.vmem [shape: f32[1,96], index: 2, kind: input, shape index: {}]   ;;  %s7494_s3 = inlined_call_operand.vmem [shape: f32[4,2,16,16], index: 3, kind: input, shape index: {}]   ;;  %s7495_s4 = inlined_call_operand.vmem [shape: bf16[32,32], index: 4, kind: input, shape index: {}]   ;;  %s7496_s5 = inlined_call_operand.vmem [shape: f32[1,32], index: 5, kind: input, shape index: {}]   ;;  %s7497_s6 = inlined_call_operand.vmem [shape: f32[256,32], index: 6, kind: output, shape index: {}]  }
   0x1 LB: > { %s4848_s22 = sadd.s32 4294967295, %s5850_s21   ;;  %p4852_p0 = scmp.ge.s32.totalorder %s5850_s21, 1  ;;  %s5850_s21 = sphi %s5903_s21, %s16_s21  }
   0x2   : > { %p213_p1 = scmp.lt.s32.totalorder %s5850_s21, 3 }
   0x4   : > { %p214_p2 = pnand %p4852_p0, %p213_p1 }
   0x6   : > { %217 = sbr.rel (%p214_p2) target bundleno = 3244 (0xcac), region = 44 }
   0xd   : > { %v5565_v0 = vld [vmem:[%s7492_s1] sm:$0xff]   ;;  %s4853_s25 = sshll.u32 %s4848_s22, 4  ;;  %v5566_v1 = vld [vmem:[%s7492_s1 + $0x8] sm:$0xff]   ;;  %vm335_vm0 = vcmask 261120   ;;  %v7498_v20 = vmov 0.0   ;;  %vm465_vm1 = vcmask 785408  }
   0xe   : > { %p244_p3 = scmp.lt.s32.totalorder %s4853_s25, 31  ;;  %5113 = vmatprep.subr.bf16.mxu0 %v5565_v0  ;;  %5537 = vmatprep.subr.bf16.mxu1 %v5565_v0  ;;  %v4857_v11 = vld [vmem:[%s7493_s2] ss:$0 sm:$0xff]  ;;  %vm5853_vm2 = vmmov 0   ;;  %s5854_s10 = smov 96   ;;  %vm485_vm3 = vcmask 64512  }
   0xf   : > { %5114 = vmatpush3.bf16.msra.mxu0 %v5565_v0  ;;  %5539 = vmatpush3.bf16.msra.mxu1 %v5565_v0  ;;  %s5855_s11 = smov 64   ;;  %vm903_vm4 = vcmask 130048   ;;  %s5856_s20 = smov 88   ;;  %vm4623_vm5 = vcmask 195584  }
  0x10   : > { %s7571_s25 = smov (!%p244_p3, %s4853_s25), 31  ;;  %5115 = vmatprep.subr.bf16.mxu0 %v5566_v1  ;;  %5538 = vmatprep.subr.bf16.mxu1 %v5566_v1  ;;  %s5857_s22 = smov 120  }
  0x11   : > { %s4854_s28 = sshll.u32 %s7571_s25, 2  ;;  %s5858_s23 = smov 56  }
  0x12   : > { %s247_s7 = scalar_lea.vmem %s7491_s0, %s4854_s28  ;;  %s5859_s9 = smov 80  }
  0x13   : > { %5116 = vmatpush3.bf16.msra.mxu0 %v5566_v1  ;;  %v5567_v2 = vld [vmem:[%s247_s7] sm:$0xff]   ;;  %5540 = vmatpush3.bf16.msra.mxu1 %v5566_v1  ;;  %v5568_v3 = vld [vmem:[%s247_s7 + $0x8] sm:$0xff]   ;;  %v5571_v6 = vld [vmem:[%s247_s7 + $0x10] sm:$0xff]   ;;  %s5867_s15 = smov 24   ;;  %s4856_s16 = sshll.u32 %s7571_s25, 3 }
  0x14   : > { %5117 = vmatprep.mubr.msk.bf16.mxu0 %vm335_vm0, %v5567_v2  ;;  %v5569_v4 = vld [vmem:[%s247_s7 + $0x20] sm:$0xff]   ;;  %v5570_v5 = vld [vmem:[%s247_s7 + $0x28] sm:$0xff]   ;;  %v5573_v7 = vld [vmem:[%s247_s7 + $0x30] sm:$0xff]   ;;  %5133 = vmatprep.subr.bf16.mxu1 %v7498_v20 }
  0x15   : > { %5125 = vmatprep.mubr.msk.bf16.mxu1 %vm335_vm0, %v5569_v4  ;;  %v5572_v8 = vld [vmem:[%s247_s7 + $0x18] sm:$0xff]   ;;  %5157 = vmatprep.subr.bf16.mxu0 %v7498_v20 }
  0x16   : > { %5118 = vmatmul.mubr.msk.bf16.vlgmr.msra.gmra.mrb[0].mxu0 %vm335_vm0, %v5568_v3  ;;  %5126 = vmatmul.mubr.msk.bf16.vlgmr.msra.gmra.mrb[0].mxu1 %vm335_vm0, %v5570_v5  ;;  %v5574_v9 = vld [vmem:[%s247_s7 + $0x38] sm:$0xff]  }
  0x17   : > { %5121 = vmatprep.mubr.msk.bf16.mxu0 %vm335_vm0, %v5571_v6  ;;  %5129 = vmatprep.mubr.msk.bf16.mxu1 %vm335_vm0, %v5573_v7 }
  0x1e   : > { %5122 = vmatmul.mubr.msk.bf16.gmra.mrb[4].mxu0 %vm335_vm0, %v5572_v8  ;;  %5130 = vmatmul.mubr.msk.bf16.gmra.mrb[4].mxu1 %vm335_vm0, %v5574_v9 }
  0x1f   : > { %5135 = vmatprep.mubr.msk.bf16.mxu1 %vm5853_vm2, %v7498_v20  ;;  %5159 = vmatprep.mubr.msk.bf16.mxu0 %vm5853_vm2, %v7498_v20 }
  0xe9   : > { %v5119_v10 = vpop.f32.mrb[0].mxu0  ;;  %v5127_v14 = vpop.f32.mrb[0].mxu1 }
  0xea   : > { %v394_v12 = vpop.f32.mrb[1].mxu0  ;;  %v403_v15 = vadd.f32 %v5119_v10, %v4857_v11  ;;  %v435_v18 = vadd.f32 %v5127_v14, %v4857_v11  ;;  %v426_v19 = vpop.f32.mrb[1].mxu1  ;;  %v883_v14 = vld [vmem:[%s7494_s3] sm:$0xff] }
  0xeb   : > { %v5120_v13 = vpop.f32.mrb[2].mxu0  ;;  %v395_v21 = vadd.f32 %v4857_v11, %v394_v12  ;;  %v427_v23 = vadd.f32 %v4857_v11, %v426_v19  ;;  %v5128_v24 = vpop.f32.mrb[2].mxu1 }
  0xec   : > { %v406_v16 = vadd.f32 %v5120_v13, %v4857_v11  ;;  %v397_v17 = vpop.f32.mrb[3].mxu0  ;;  %v438_v26 = vadd.f32 %v5128_v24, %v4857_v11  ;;  %v429_v27 = vpop.f32.mrb[3].mxu1 }
  0xed   : > { %v398_v22 = vadd.f32 %v4857_v11, %v397_v17  ;;  %v430_v29 = vadd.f32 %v4857_v11, %v429_v27 }
  0xee   : > { %v458_v25 = vpack.c.bf16 %v406_v16, %v403_v15  ;;  %v462_v30 = vpack.c.bf16 %v438_v26, %v435_v18 }
  0xef   : > { %v457_v28 = vpack.c.bf16 %v398_v22, %v395_v21  ;;  %v461_v32 = vpack.c.bf16 %v430_v29, %v427_v23  ;;  %v884_v22 = vld [vmem:[%s7494_s3 + $0x8] sm:$0xff] }
  0xf0   : > { %467 = vst.msk [vmem:[#allocation2 + $0x8] sm:$0xff] %vm465_vm1, %v458_v25  ;;  %471 = vst.msk [vmem:[#allocation2 + $0x28] sm:$0xff] %vm465_vm1, %v462_v30 }
  0xf1   : > { %466 = vst.msk [vmem:[#allocation2] sm:$0xff] %vm465_vm1, %v457_v28  ;;  %v5123_v31 = vpop.f32.mrb[4].mxu0  ;;  %470 = vst.msk [vmem:[#allocation2 + $0x20] sm:$0xff] %vm465_vm1, %v461_v32  ;;  %v5131_v37 = vpop.f32.mrb[4].mxu1  ;;  %v885_v28 = vld [vmem:[%s7494_s3 + $0x10] sm:$0xff] }
  0xf2   : > { %v419_v33 = vadd.f32 %v5123_v31, %v4857_v11  ;;  %v410_v34 = vpop.f32.mrb[5].mxu0  ;;  %v451_v40 = vadd.f32 %v5131_v37, %v4857_v11  ;;  %v442_v41 = vpop.f32.mrb[5].mxu1 }
  0xf3   : > { %v411_v35 = vadd.f32 %v4857_v11, %v410_v34  ;;  %v5124_v36 = vpop.f32.mrb[6].mxu0  ;;  %v443_v43 = vadd.f32 %v4857_v11, %v442_v41  ;;  %v5132_v44 = vpop.f32.mrb[6].mxu1 }
  0xf4   : > { %v422_v38 = vadd.f32 %v5124_v36, %v4857_v11  ;;  %v413_v39 = vpop.f32.mrb[7].mxu0  ;;  %v454_v46 = vadd.f32 %v5132_v44, %v4857_v11  ;;  %v445_v47 = vpop.f32.mrb[7].mxu1 }
  0xf5   : > { %v414_v42 = vadd.f32 %v4857_v11, %v413_v39  ;;  %v446_v49 = vadd.f32 %v4857_v11, %v445_v47 }
  0xf6   : > { %v460_v45 = vpack.c.bf16 %v422_v38, %v419_v33  ;;  %v464_v50 = vpack.c.bf16 %v454_v46, %v451_v40  ;;  %v886_v38 = vld [vmem:[%s7494_s3 + $0x18] sm:$0xff] }
  0xf7   : > { %v459_v48 = vpack.c.bf16 %v414_v42, %v411_v35  ;;  %v463_v52 = vpack.c.bf16 %v446_v49, %v443_v43  ;;  %v5951_v53 = vld [vmem:[#allocation2 + $0x8] sm:$0xff] }
  0xf8   : > { %469 = vst.msk [vmem:[#allocation2 + $0x18] sm:$0xff] %vm465_vm1, %v460_v45  ;;  %v5945_v51 = vld [vmem:[#allocation2] sm:$0xff]  ;;  %473 = vst.msk [vmem:[#allocation2 + $0x38] sm:$0xff] %vm465_vm1, %v464_v50  ;;  %v5966_v58 = vld [vmem:[#allocation2 + $0x28] sm:$0xff] }
  0xf9   : > { %468 = vst.msk [vmem:[#allocation2 + $0x10] sm:$0xff] %vm465_vm1, %v459_v48  ;;  %483 = vrot.lane.b32.xlu0 %v5945_v51, %s5854_s10  ;;  %472 = vst.msk [vmem:[#allocation2 + $0x30] sm:$0xff] %vm465_vm1, %v463_v52  ;;  %v5956_v55 = vld [vmem:[#allocation2 + $0x20] sm:$0xff] }
  0xfd   : > { %534 = vrot.lane.b32.xlu0 %v5951_v53, %s5854_s10 }
  0xff   : > { %v5960_v56 = vld [vmem:[#allocation2 + $0x18] sm:$0xff] }
 0x100   : > { %v5954_v54 = vld [vmem:[#allocation2 + $0x10] sm:$0xff]  ;;  %v5971_v59 = vld [vmem:[#allocation2 + $0x38] sm:$0xff] }
 0x101   : > { %584 = vrot.lane.b32.xlu1 %v5954_v54, %s5854_s10  ;;  %684 = vrot.lane.b32.xlu0 %v5956_v55, %s5854_s10  ;;  %v5962_v57 = vld [vmem:[#allocation2 + $0x30] sm:$0xff] }
 0x105   : > { %634 = vrot.lane.b32.xlu1 %v5960_v56, %s5854_s10  ;;  %784 = vrot.lane.b32.xlu0 %v5962_v57, %s5854_s10 }
 0x109   : > { %734 = vrot.lane.b32.xlu1 %v5966_v58, %s5854_s10  ;;  %1135 = vrot.lane.b32.xlu0 %v5951_v53, %s5855_s11 }
 0x10d   : > { %834 = vrot.lane.b32.xlu1 %v5971_v59, %s5854_s10  ;;  %s5860_s10 = smov 112  }
 0x111   : > { %1088 = vrot.lane.b32.xlu1 %v5945_v51, %s5855_s11 }
 0x115   : > { %1229 = vrot.lane.b32.xlu1 %v5960_v56, %s5855_s11 }
 0x119   : > { %1182 = vrot.lane.b32.xlu1 %v5954_v54, %s5855_s11 }
 0x16b   : > { %v484_v60 = vpop.permute.xlu0 %483 }
 0x16c   : > { %v490_v61 = vsel %vm485_vm3, %v484_v60, 0 }
 0x16d   : > { %5134 = vmatpush3.bf16.xpose.msra.mxu1 %v490_v61 }
 0x16e   : > { %5139 = vmatprep.subr.bf16.mxu1 %v7498_v20 }
 0x16f   : > { %v535_v62 = vpop.permute.xlu0 %534 }
 0x170   : > { %v540_v1 = vsel %vm485_vm3, %v535_v62, 0 }
 0x173   : > { %v585_v63 = vpop.permute.xlu1 %584  ;;  %v685_v0 = vpop.permute.xlu0 %684 }
 0x174   : > { %v690_v2 = vsel %vm485_vm3, %v685_v0, 0  ;;  %5136 = vmatmul.mubr.msk.bf16.vlgmr.msra.gmra.mrb[8].mxu1 %vm485_vm3, %v5945_v51  ;;  %v590_v5 = vsel %vm485_vm3, %v585_v63, 0 }
 0x175   : > { %5140 = vmatpush3.bf16.xpose.msra.mxu1 %v540_v1  ;;  %5158 = vmatpush3.bf16.xpose.msra.mxu0 %v690_v2 }
 0x176   : > { %5141 = vmatprep.mubr.msk.bf16.mxu1 %vm5853_vm2, %v7498_v20  ;;  %5145 = vmatprep.subr.bf16.mxu1 %v7498_v20 }
 0x177   : > { %v635_v3 = vpop.permute.xlu1 %634  ;;  %5169 = vmatprep.subr.bf16.mxu0 %v7498_v20  ;;  %v785_v4 = vpop.permute.xlu0 %784 }
 0x178   : > { %v790_v6 = vsel %vm485_vm3, %v785_v4, 0  ;;  %v640_v10 = vsel %vm485_vm3, %v635_v3, 0 }
 0x17b   : > { %v735_v7 = vpop.permute.xlu1 %734  ;;  %v1136_v13 = vpop.permute.xlu0 %1135 }
 0x17c   : > { %5142 = vmatmul.mubr.msk.bf16.vlgmr.msra.gmra.mrb[12].mxu1 %vm485_vm3, %v5951_v53  ;;  %5160 = vmatmul.mubr.msk.bf16.vlgmr.msra.gmra.mrb[8].mxu0 %vm485_vm3, %v5956_v55  ;;  %v740_v11 = vsel %vm485_vm3, %v735_v7, 0 }
 0x17d   : > { %5146 = vmatpush3.bf16.xpose.msra.mxu1 %v590_v5  ;;  %5170 = vmatpush3.bf16.xpose.msra.mxu0 %v790_v6 }
 0x17e   : > { %5147 = vmatprep.mubr.msk.bf16.mxu1 %vm5853_vm2, %v7498_v20  ;;  %5171 = vmatprep.mubr.msk.bf16.mxu0 %vm5853_vm2, %v7498_v20 }
 0x17f   : > { %v835_v8 = vpop.permute.xlu1 %834  ;;  %5151 = vmatprep.subr.bf16.mxu1 %v7498_v20  ;;  %5181 = vmatprep.subr.bf16.mxu0 %v7498_v20 }
 0x180   : > { %v840_v12 = vsel %vm485_vm3, %v835_v8, 0 }
 0x183   : > { %v1089_v9 = vpop.permute.xlu1 %1088 }
 0x184   : > { %5148 = vmatmul.mubr.msk.bf16.vlgmr.msra.gmra.mrb[16].mxu1 %vm485_vm3, %v5954_v54  ;;  %5172 = vmatmul.mubr.msk.bf16.vlgmr.msra.gmra.mrb[12].mxu0 %vm485_vm3, %v5962_v57 }
 0x185   : > { %5152 = vmatpush3.bf16.xpose.msra.mxu1 %v640_v10  ;;  %5182 = vmatpush3.bf16.msra.mxu0 %v1089_v9 }
 0x186   : > { %5153 = vmatprep.mubr.msk.bf16.mxu1 %vm5853_vm2, %v7498_v20  ;;  %5163 = vmatprep.subr.bf16.mxu1 %v7498_v20 }
 0x187   : > { %5183 = vmatprep.mubr.msk.bf16.mxu0 %vm5853_vm2, %v7498_v20  ;;  %5193 = vmatprep.subr.bf16.mxu0 %v7498_v20 }
 0x18c   : > { %5154 = vmatmul.mubr.msk.bf16.vlgmr.msra.gmra.mrb[20].mxu1 %vm485_vm3, %v5960_v56 }
 0x18d   : > { %5164 = vmatpush3.bf16.xpose.msra.mxu1 %v740_v11  ;;  %5165 = vmatprep.mubr.msk.bf16.mxu1 %vm5853_vm2, %v7498_v20 }
 0x18e   : > { %5175 = vmatprep.subr.bf16.mxu1 %v7498_v20 }
 0x194   : > { %5166 = vmatmul.mubr.msk.bf16.vlgmr.msra.gmra.mrb[24].mxu1 %vm485_vm3, %v5966_v58 }
 0x195   : > { %5176 = vmatpush3.bf16.xpose.msra.mxu1 %v840_v12  ;;  %5177 = vmatprep.mubr.msk.bf16.mxu1 %vm5853_vm2, %v7498_v20 }
 0x196   : > { %5187 = vmatprep.subr.bf16.mxu1 %v7498_v20 }
 0x19c   : > { %5178 = vmatmul.mubr.msk.bf16.vlgmr.msra.gmra.mrb[28].mxu1 %vm485_vm3, %v5971_v59 }
 0x19d   : > { %5188 = vmatpush3.bf16.msra.mxu1 %v1136_v13  ;;  %5189 = vmatprep.mubr.msk.bf16.mxu1 %vm5853_vm2, %v7498_v20 }
 0x19e   : > { %5199 = vmatprep.subr.bf16.mxu1 %v7498_v20 }
 0x247   : > { %v526_v15 = vpop.f32.mrb[8].mxu1 }
 0x248   : > { %v6033_v16 = vadd.f32 %v883_v14, %v526_v15  ;;  %v5137_v17 = vpop.f32.mrb[9].mxu1 }
 0x249   : > { %v529_v18 = vpop.f32.mrb[10].mxu1 }
 0x24a   : > { %v5138_v19 = vpop.f32.mrb[11].mxu1  ;;  %v904_v21 = vsel %vm903_vm4, %v6033_v16, -inf  ;;  %v6045_v31 = vadd.f32 %v884_v22, %v529_v18 }
 0x24b   : > { %905 = vmax.xlane.f32.xlu0 %v904_v21 }
 0x24c   : > { %v907_v39 = vsel %vm903_vm4, %v6045_v31, -inf }
 0x24f   : > { %v576_v23 = vpop.f32.mrb[12].mxu1  ;;  %v726_v24 = vpop.f32.mrb[8].mxu0 }
 0x250   : > { %v6040_v25 = vadd.f32 %v883_v14, %v726_v24  ;;  %v5143_v26 = vpop.f32.mrb[13].mxu1  ;;  %v5161_v27 = vpop.f32.mrb[9].mxu0  ;;  %v6051_v36 = vadd.f32 %v885_v28, %v576_v23 }
 0x251   : > { %v579_v29 = vpop.f32.mrb[14].mxu1  ;;  %v729_v30 = vpop.f32.mrb[10].mxu0 }
 0x252   : > { %v6047_v32 = vadd.f32 %v884_v22, %v729_v30  ;;  %v5144_v33 = vpop.f32.mrb[15].mxu1  ;;  %v5162_v34 = vpop.f32.mrb[11].mxu0  ;;  %v928_v35 = vsel %vm903_vm4, %v6040_v25, -inf  ;;  %v6060_v42 = vadd.f32 %v886_v38, %v579_v29  ;;  %v910_v46 = vsel %vm903_vm4, %v6051_v36, -inf }
 0x253   : > { %929 = vmax.xlane.f32.xlu1 %v928_v35 }
 0x254   : > { %v931_v37 = vsel %vm903_vm4, %v6047_v32, -inf  ;;  %v913_v62 = vsel %vm903_vm4, %v6060_v42, -inf }
 0x255   : > { %932 = vmax.xlane.f32.xlu0 %v931_v37 }
 0x257   : > { %v626_v40 = vpop.f32.mrb[16].mxu1  ;;  %908 = vmax.xlane.f32.xlu1 %v907_v39  ;;  %v826_v41 = vpop.f32.mrb[12].mxu0 }
 0x258   : > { %v6062_v43 = vadd.f32 %v883_v14, %v826_v41  ;;  %v5149_v44 = vpop.f32.mrb[17].mxu1  ;;  %v5173_v45 = vpop.f32.mrb[13].mxu0  ;;  %v6066_v49 = vadd.f32 %v883_v14, %v626_v40 }
 0x259   : > { %v629_v47 = vpop.f32.mrb[18].mxu1  ;;  %911 = vmax.xlane.f32.xlu0 %v910_v46  ;;  %v829_v48 = vpop.f32.mrb[14].mxu0 }
 0x25a   : > { %v5150_v50 = vpop.f32.mrb[19].mxu1  ;;  %v5174_v52 = vpop.f32.mrb[15].mxu0  ;;  %v940_v60 = vsel %vm903_vm4, %v6062_v43, -inf  ;;  %v6070_v61 = vadd.f32 %v884_v22, %v829_v48  ;;  %v916_v63 = vsel %vm903_vm4, %v6066_v49, -inf  ;;  %v6076_v1 = vadd.f32 %v884_v22, %v629_v47 }
 0x25b   : > { %941 = vmax.xlane.f32.xlu1 %v940_v60 }
 0x25c   : > { %v943_v4 = vsel %vm903_vm4, %v6070_v61, -inf  ;;  %v919_v9 = vsel %vm903_vm4, %v6076_v1, -inf }
 0x25d   : > { %914 = vmax.xlane.f32.xlu0 %v913_v62 }
 0x25f   : > { %v676_v0 = vpop.f32.mrb[20].mxu1  ;;  %917 = vmax.xlane.f32.xlu1 %v916_v63 }
 0x260   : > { %v6078_v2 = vadd.f32 %v885_v28, %v676_v0  ;;  %v5155_v3 = vpop.f32.mrb[21].mxu1 }
 0x261   : > { %v679_v5 = vpop.f32.mrb[22].mxu1  ;;  %944 = vmax.xlane.f32.xlu0 %v943_v4 }
 0x262   : > { %v5156_v6 = vpop.f32.mrb[23].mxu1  ;;  %v922_v7 = vsel %vm903_vm4, %v6078_v2, -inf  ;;  %v6084_v8 = vadd.f32 %v886_v38, %v679_v5 }
 0x263   : > { %923 = vmax.xlane.f32.xlu1 %v922_v7 }
 0x264   : > { %v925_v13 = vsel %vm903_vm4, %v6084_v8, -inf }
 0x265   : > { %920 = vmax.xlane.f32.xlu0 %v919_v9 }
 0x267   : > { %v776_v10 = vpop.f32.mrb[24].mxu1 }
 0x268   : > { %v6088_v11 = vadd.f32 %v885_v28, %v776_v10  ;;  %v5167_v12 = vpop.f32.mrb[25].mxu1 }
 0x269   : > { %v779_v14 = vpop.f32.mrb[26].mxu1  ;;  %926 = vmax.xlane.f32.xlu0 %v925_v13 }
 0x26a   : > { %v6092_v15 = vadd.f32 %v886_v38, %v779_v14  ;;  %v5168_v17 = vpop.f32.mrb[27].mxu1  ;;  %v934_v18 = vsel %vm903_vm4, %v6088_v11, -inf }
 0x26b   : > { %935 = vmax.xlane.f32.xlu1 %v934_v18 }
 0x26c   : > { %v937_v19 = vsel %vm903_vm4, %v6092_v15, -inf }
 0x26d   : > { %938 = vmax.xlane.f32.xlu0 %v937_v19 }
 0x26f   : > { %v876_v21 = vpop.f32.mrb[28].mxu1 }
 0x270   : > { %v6098_v22 = vadd.f32 %v885_v28, %v876_v21  ;;  %v5179_v23 = vpop.f32.mrb[29].mxu1  ;;  %v6110_v28 = vpop.permute.xlu1 %1229 }
 0x271   : > { %v879_v24 = vpop.f32.mrb[30].mxu1 }
 0x272   : > { %v6100_v26 = vadd.f32 %v886_v38, %v879_v24  ;;  %v5180_v27 = vpop.f32.mrb[31].mxu1  ;;  %v946_v29 = vsel %vm903_vm4, %v6098_v22, -inf }
 0x273   : > { %947 = vmax.xlane.f32.xlu1 %v946_v29 }
 0x274   : > { %v949_v30 = vsel %vm903_vm4, %v6100_v26, -inf  ;;  %v6113_v37 = vpop.permute.xlu1 %1182 }
 0x275   : > { %950 = vmax.xlane.f32.xlu0 %v949_v30 }
 0x284   : > { %1323 = vrot.lane.b32.xlu1 %v5966_v58, %s5855_s11 }
 0x28b   : > { %1276 = vrot.lane.b32.xlu0 %v5956_v55, %s5855_s11 }
 0x2d8   : > { %v906_v33 = vpop.xlane.xlu0 %905 }
 0x2d9   : > { %v952_v34 = vsub.f32 %v6033_v16, %v906_v33 }
 0x2db   : > { %v968_v35 = vmul.f32 1.442695, %v952_v34 }
 0x2dd   : > { %5577 = vpow2.f32 %v968_v35 }
 0x2e0   : > { %v930_v38 = vpop.xlane.xlu1 %929 }
 0x2e1   : > { %v960_v39 = vsub.f32 %v6040_v25, %v930_v38 }
 0x2e2   : > { %v933_v40 = vpop.xlane.xlu0 %932 }
 0x2e3   : > { %v984_v41 = vmul.f32 1.442695, %v960_v39  ;;  %v961_v44 = vsub.f32 %v6047_v32, %v933_v40 }
 0x2e4   : > { %v909_v45 = vpop.xlane.xlu1 %908 }
 0x2e5   : > { %5579 = vpow2.f32 %v984_v41  ;;  %v953_v46 = vsub.f32 %v6045_v31, %v909_v45  ;;  %v986_v47 = vmul.f32 1.442695, %v961_v44 }
 0x2e6   : > { %v912_v48 = vpop.xlane.xlu0 %911 }
 0x2e7   : > { %v6118_v50 = vpop.eup %5577  ;;  %v970_v16 = vmul.f32 1.442695, %v953_v46  ;;  %v954_v52 = vsub.f32 %v6051_v36, %v912_v48 }
 0x2e8   : > { %v942_v60 = vpop.xlane.xlu1 %941  ;;  %v1000_v62 = vsel %vm903_vm4, %v6118_v50, 0.0 }
 0x2e9   : > { %5581 = vpow2.f32 %v970_v16  ;;  %v972_v25 = vmul.f32 1.442695, %v954_v52  ;;  %v964_v63 = vsub.f32 %v6062_v43, %v942_v60  ;;  %1001 = vadd.xlane.f32.xlu1 %v1000_v62 }
 0x2ea   : > { %5583 = vpow2.f32 %v986_v47  ;;  %v915_v32 = vpop.xlane.xlu0 %914 }
 0x2eb   : > { %5585 = vpow2.f32 %v972_v25  ;;  %v992_v31 = vmul.f32 1.442695, %v964_v63  ;;  %v955_v0 = vsub.f32 %v6060_v42, %v915_v32 }
 0x2ec   : > { %v918_v3 = vpop.xlane.xlu1 %917 }
 0x2ed   : > { %5587 = vpow2.f32 %v992_v31  ;;  %v974_v4 = vmul.f32 1.442695, %v955_v0  ;;  %v956_v36 = vsub.f32 %v6066_v49, %v918_v3 }
 0x2ee   : > { %v945_v5 = vpop.xlane.xlu0 %944 }
 0x2ef   : > { %v6126_v6 = vpop.eup %5579  ;;  %5589 = vpow2.f32 %v974_v4  ;;  %v976_v7 = vmul.f32 1.442695, %v956_v36  ;;  %v965_v9 = vsub.f32 %v6070_v61, %v945_v5 }
 0x2f0   : > { %v924_v43 = vpop.xlane.xlu1 %923  ;;  %v1024_v10 = vsel %vm903_vm4, %v6126_v6, 0.0 }
 0x2f1   : > { %5591 = vpow2.f32 %v976_v7  ;;  %v994_v12 = vmul.f32 1.442695, %v965_v9  ;;  %v958_v42 = vsub.f32 %v6078_v2, %v924_v43  ;;  %1025 = vadd.xlane.f32.xlu1 %v1024_v10 }
 0x2f2   : > { %v921_v13 = vpop.xlane.xlu0 %920 }
 0x2f3   : > { %v6132_v14 = vpop.eup %5581  ;;  %5593 = vpow2.f32 %v994_v12  ;;  %v980_v49 = vmul.f32 1.442695, %v958_v42  ;;  %v957_v17 = vsub.f32 %v6076_v1, %v921_v13 }
 0x2f4   : > { %v6135_v18 = vpop.eup %5583  ;;  %v1003_v61 = vsel %vm903_vm4, %v6132_v14, 0.0 }
 0x2f5   : > { %v6139_v19 = vpop.eup %5585  ;;  %5595 = vpow2.f32 %v980_v49  ;;  %v978_v21 = vmul.f32 1.442695, %v957_v17  ;;  %1004 = vadd.xlane.f32.xlu0 %v1003_v61  ;;  %v1027_v29 = vsel %vm903_vm4, %v6135_v18, 0.0 }
 0x2f6   : > { %v927_v23 = vpop.xlane.xlu0 %926  ;;  %v1006_v2 = vsel %vm903_vm4, %v6139_v19, 0.0 }
 0x2f7   : > { %v6143_v24 = vpop.eup %5587  ;;  %5597 = vpow2.f32 %v978_v21  ;;  %v959_v27 = vsub.f32 %v6084_v8, %v927_v23  ;;  %1007 = vadd.xlane.f32.xlu1 %v1006_v2 }
 0x2f8   : > { %v936_v1 = vpop.xlane.xlu1 %935  ;;  %v1036_v38 = vsel %vm903_vm4, %v6143_v24, 0.0 }
 0x2f9   : > { %v6148_v30 = vpop.eup %5589  ;;  %v982_v33 = vmul.f32 1.442695, %v959_v27  ;;  %v962_v34 = vsub.f32 %v6088_v11, %v936_v1  ;;  %1028 = vadd.xlane.f32.xlu0 %v1027_v29 }
 0x2fa   : > { %v939_v35 = vpop.xlane.xlu0 %938  ;;  %v1009_v41 = vsel %vm903_vm4, %v6148_v30, 0.0 }
 0x2fb   : > { %v6153_v39 = vpop.eup %5591  ;;  %5599 = vpow2.f32 %v982_v33  ;;  %v988_v40 = vmul.f32 1.442695, %v962_v34  ;;  %v963_v8 = vsub.f32 %v6092_v15, %v939_v35  ;;  %1037 = vadd.xlane.f32.xlu1 %v1036_v38 }
 0x2fc   : > { %v1012_v11 = vsel %vm903_vm4, %v6153_v39, 0.0 }
 0x2fd   : > { %v6158_v44 = vpop.eup %5593  ;;  %5601 = vpow2.f32 %v988_v40  ;;  %v990_v45 = vmul.f32 1.442695, %v963_v8  ;;  %1010 = vadd.xlane.f32.xlu0 %v1009_v41 }
 0x2fe   : > { %v1039_v47 = vsel %vm903_vm4, %v6158_v44, 0.0 }
 0x2ff   : > { %v6162_v46 = vpop.eup %5595  ;;  %5603 = vpow2.f32 %v990_v45  ;;  %1013 = vadd.xlane.f32.xlu1 %v1012_v11 }
 0x300   : > { %v1018_v48 = vsel %vm903_vm4, %v6162_v46, 0.0  ;;  %v948_v31 = vpop.xlane.xlu1 %947 }
 0x301   : > { %v6166_v15 = vpop.eup %5597  ;;  %1040 = vadd.xlane.f32.xlu0 %v1039_v47  ;;  %v966_v0 = vsub.f32 %v6098_v22, %v948_v31 }
 0x302   : > { %v1015_v16 = vsel %vm903_vm4, %v6166_v15, 0.0  ;;  %v951_v3 = vpop.xlane.xlu0 %950 }
 0x303   : > { %1019 = vadd.xlane.f32.xlu1 %v1018_v48  ;;  %v996_v4 = vmul.f32 1.442695, %v966_v0  ;;  %v967_v36 = vsub.f32 %v6100_v26, %v951_v3 }
 0x304   : > { %v6220_v22 = vpop.permute.xlu1 %1323 }
 0x305   : > { %v6172_v52 = vpop.eup %5599  ;;  %1016 = vadd.xlane.f32.xlu0 %v1015_v16  ;;  %5605 = vpow2.f32 %v996_v4  ;;  %v998_v5 = vmul.f32 1.442695, %v967_v36 }
 0x306   : > { %v1021_v25 = vsel %vm903_vm4, %v6172_v52, 0.0 }
 0x307   : > { %v6174_v60 = vpop.eup %5601  ;;  %5607 = vpow2.f32 %v998_v5 }
 0x308   : > { %v1030_v62 = vsel %vm903_vm4, %v6174_v60, 0.0 }
 0x309   : > { %v6180_v63 = vpop.eup %5603  ;;  %1031 = vadd.xlane.f32.xlu1 %v1030_v62  ;;  %1022 = vadd.xlane.f32.xlu0 %v1021_v25 }
 0x30a   : > { %v1033_v32 = vsel %vm903_vm4, %v6180_v63, 0.0 }
 0x30d   : > { %1034 = vadd.xlane.f32.xlu0 %v1033_v32 }
 0x30f   : > { %v6190_v7 = vpop.eup %5605 }
 0x310   : > { %v1042_v9 = vsel %vm903_vm4, %v6190_v7, 0.0 }
 0x311   : > { %v6194_v43 = vpop.eup %5607 }
 0x312   : > { %v1045_v10 = vsel %vm903_vm4, %v6194_v43, 0.0 }
 0x31a   : > { %1417 = vrot.lane.b32.xlu1 %v5971_v59, %s5855_s11 }
 0x323   : > { %1370 = vrot.lane.b32.xlu0 %v5962_v57, %s5855_s11  ;;  %s5861_s11 = smov 48  }
 0x33e   : > { %1043 = vadd.xlane.f32.xlu1 %v1042_v9 }
 0x342   : > { %1046 = vadd.xlane.f32.xlu0 %v1045_v10 }
 0x34f   : > { %1535 = vrot.lane.b32.xlu1 %v5951_v53, %s5856_s20 }
 0x353   : > { %1587 = vrot.lane.b32.xlu1 %v5954_v54, %s5856_s20 }
 0x357   : > { %1639 = vrot.lane.b32.xlu1 %v5960_v56, %s5856_s20 }
 0x358   : > { %1483 = vrot.lane.b32.xlu0 %v5945_v51, %s5856_s20 }
 0x35b   : > { %1691 = vrot.lane.b32.xlu1 %v5956_v55, %s5856_s20 }
 0x35c   : > { %1481 = vrot.lane.b32.xlu0 %v5945_v51, %s5857_s22 }
 0x35f   : > { %1743 = vrot.lane.b32.xlu1 %v5966_v58, %s5856_s20 }
 0x360   : > { %1533 = vrot.lane.b32.xlu0 %v5951_v53, %s5857_s22 }
 0x363   : > { %1795 = vrot.lane.b32.xlu1 %v5962_v57, %s5856_s20 }
 0x364   : > { %1585 = vrot.lane.b32.xlu0 %v5954_v54, %s5857_s22 }
 0x367   : > { %1847 = vrot.lane.b32.xlu1 %v5971_v59, %s5856_s20  ;;  %s5862_s20 = smov 72  }
 0x368   : > { %1637 = vrot.lane.b32.xlu0 %v5960_v56, %s5857_s22 }
 0x36b   : > { %1845 = vrot.lane.b32.xlu1 %v5971_v59, %s5857_s22  ;;  %v1277_v59 = vpop.permute.xlu0 %1276 }
 0x36c   : > { %1689 = vrot.lane.b32.xlu0 %v5956_v55, %s5857_s22 }
 0x36f   : > { %2101 = vrot.lane.b32.xlu1 %v5945_v51, %s5858_s23 }
 0x370   : > { %1741 = vrot.lane.b32.xlu0 %v5966_v58, %s5857_s22 }
 0x373   : > { %2195 = vrot.lane.b32.xlu1 %v5954_v54, %s5858_s23 }
 0x374   : > { %1793 = vrot.lane.b32.xlu0 %v5962_v57, %s5857_s22  ;;  %s5863_s22 = smov 104  }
 0x376   : > { %v1002_v55 = vpop.xlane.xlu1 %1001 }
 0x377   : > { %2242 = vrot.lane.b32.xlu1 %v5960_v56, %s5858_s23  ;;  %5609 = vrcp.f32 %v1002_v55 }
 0x378   : > { %2148 = vrot.lane.b32.xlu0 %v5951_v53, %s5858_s23 }
 0x37e   : > { %v1026_v26 = vpop.xlane.xlu1 %1025 }
 0x381   : > { %v5610_v57 = vpop.eup %5609 }
 0x382   : > { %v1005_v51 = vpop.xlane.xlu0 %1004  ;;  %v1064_v49 = vmul.f32 %v5610_v57, %v6118_v50 }
 0x383   : > { %5611 = vrcp.f32 %v1005_v51 }
 0x384   : > { %v1008_v58 = vpop.xlane.xlu1 %1007 }
 0x385   : > { %5613 = vrcp.f32 %v1008_v58 }
 0x386   : > { %v1029_v12 = vpop.xlane.xlu0 %1028 }
 0x388   : > { %v1038_v42 = vpop.xlane.xlu1 %1037 }
 0x38a   : > { %v1011_v54 = vpop.xlane.xlu0 %1010 }
 0x38b   : > { %5615 = vrcp.f32 %v1011_v54 }
 0x38c   : > { %v1014_v56 = vpop.xlane.xlu1 %1013 }
 0x38d   : > { %v5612_v13 = vpop.eup %5611  ;;  %5617 = vrcp.f32 %v1014_v56 }
 0x38e   : > { %v1065_v17 = vmul.f32 %v5612_v13, %v6132_v14  ;;  %v1041_v53 = vpop.xlane.xlu0 %1040 }
 0x38f   : > { %v5614_v23 = vpop.eup %5613 }
 0x390   : > { %v1080_v61 = vpack.c.bf16 %v1065_v17, %v1064_v49  ;;  %v1020_v2 = vpop.xlane.xlu1 %1019  ;;  %v1066_v50 = vmul.f32 %v5614_v23, %v6139_v19 }
 0x392   : > { %5184 = vmatmul.mubr.msk.bf16.vlgmr.msra.gmra.mrb[16].mxu0 %vm903_vm4, %v1080_v61  ;;  %v1017_v21 = vpop.xlane.xlu0 %1016 }
 0x393   : > { %5194 = vmatpush3.bf16.msra.mxu0 %v6113_v37  ;;  %5619 = vrcp.f32 %v1017_v21  ;;  %5195 = vmatprep.mubr.msk.bf16.mxu0 %vm5853_vm2, %v7498_v20 }
 0x394   : > { %5205 = vmatprep.subr.bf16.mxu0 %v7498_v20  ;;  %5621 = vrcp.f32 %v1020_v2 }
 0x395   : > { %v5616_v27 = vpop.eup %5615  ;;  %5623 = vrcp.f32 %v1029_v12 }
 0x396   : > { %v1067_v14 = vmul.f32 %v5616_v27, %v6148_v30  ;;  %v1023_v1 = vpop.xlane.xlu0 %1022  ;;  %v1032_v34 = vpop.xlane.xlu1 %1031 }
 0x397   : > { %5625 = vrcp.f32 %v1023_v1  ;;  %v5618_v33 = vpop.eup %5617 }
 0x398   : > { %v1081_v29 = vpack.c.bf16 %v1067_v14, %v1066_v50  ;;  %5627 = vrcp.f32 %v1026_v26  ;;  %v1068_v30 = vmul.f32 %v5618_v33, %v6153_v39 }
 0x39a   : > { %5190 = vmatmul.mubr.msk.bf16.vlgmr.msra.gmra.mrb[32].mxu1 %vm903_vm4, %v1081_v29  ;;  %v1035_v37 = vpop.xlane.xlu0 %1034 }
 0x39b   : > { %5200 = vmatpush3.bf16.msra.mxu1 %v6110_v28  ;;  %5201 = vmatprep.mubr.msk.bf16.mxu1 %vm5853_vm2, %v7498_v20  ;;  %5629 = vrcp.f32 %v1035_v37 }
 0x39c   : > { %5211 = vmatprep.subr.bf16.mxu1 %v7498_v20  ;;  %5631 = vrcp.f32 %v1032_v34 }
 0x39d   : > { %v5620_v19 = vpop.eup %5619  ;;  %5633 = vrcp.f32 %v1041_v53 }
 0x39e   : > { %v1069_v35 = vmul.f32 %v5620_v19, %v6166_v15  ;;  %v5622_v38 = vpop.eup %5621  ;;  %5635 = vrcp.f32 %v1038_v42 }
 0x39f   : > { %v5624_v8 = vpop.eup %5623  ;;  %v1070_v45 = vmul.f32 %v5622_v38, %v6162_v46 }
 0x3a0   : > { %v1082_v40 = vpack.c.bf16 %v1069_v35, %v1068_v30  ;;  %v1073_v39 = vmul.f32 %v5624_v8, %v6135_v18  ;;  %v1371_v18 = vpop.permute.xlu0 %1370 }
 0x3a1   : > { %v5626_v41 = vpop.eup %5625 }
 0x3a2   : > { %5196 = vmatmul.mubr.msk.bf16.vlgmr.msra.gmra.mrb[20].mxu0 %vm903_vm4, %v1082_v40  ;;  %v5628_v28 = vpop.eup %5627  ;;  %v1071_v11 = vmul.f32 %v5626_v41, %v6172_v52 }
 0x3a3   : > { %5206 = vmatpush3.bf16.msra.mxu0 %v1277_v59  ;;  %5207 = vmatprep.mubr.msk.bf16.mxu0 %vm5853_vm2, %v7498_v20  ;;  %v1072_v48 = vmul.f32 %v5628_v28, %v6126_v6 }
 0x3a4   : > { %5217 = vmatprep.subr.bf16.mxu0 %v7498_v20  ;;  %v1083_v47 = vpack.c.bf16 %v1071_v11, %v1070_v45 }
 0x3a5   : > { %v5630_v15 = vpop.eup %5629  ;;  %v1084_v46 = vpack.c.bf16 %v1073_v39, %v1072_v48 }
 0x3a6   : > { %5202 = vmatmul.mubr.msk.bf16.vlgmr.msra.gmra.mrb[36].mxu1 %vm903_vm4, %v1083_v47  ;;  %v5632_v16 = vpop.eup %5631  ;;  %v1075_v62 = vmul.f32 %v5630_v15, %v6180_v63  ;;  %v1418_v63 = vpop.permute.xlu1 %1417 }
 0x3a7   : > { %5212 = vmatpush3.bf16.msra.mxu1 %v6220_v22  ;;  %5213 = vmatprep.mubr.msk.bf16.mxu1 %vm5853_vm2, %v7498_v20  ;;  %v5634_v52 = vpop.eup %5633  ;;  %v1074_v6 = vmul.f32 %v5632_v16, %v6174_v60 }
 0x3a8   : > { %5223 = vmatprep.subr.bf16.mxu1 %v7498_v20  ;;  %v5636_v25 = vpop.eup %5635  ;;  %v1077_v32 = vmul.f32 %v5634_v52, %v6158_v44 }
 0x3a9   : > { %v1085_v31 = vpack.c.bf16 %v1075_v62, %v1074_v6  ;;  %v1076_v0 = vmul.f32 %v5636_v25, %v6143_v24 }
 0x3aa   : > { %5208 = vmatmul.mubr.msk.bf16.vlgmr.msra.gmra.mrb[24].mxu0 %vm903_vm4, %v1084_v46 }
 0x3ab   : > { %5218 = vmatpush3.bf16.msra.mxu0 %v1371_v18  ;;  %5219 = vmatprep.mubr.msk.bf16.mxu0 %vm5853_vm2, %v7498_v20  ;;  %v1086_v3 = vpack.c.bf16 %v1077_v32, %v1076_v0 }
 0x3ac   : > { %5229 = vmatprep.subr.bf16.mxu0 %v7498_v20 }
 0x3ae   : > { %5214 = vmatmul.mubr.msk.bf16.vlgmr.msra.gmra.mrb[40].mxu1 %vm903_vm4, %v1085_v31 }
 0x3af   : > { %5224 = vmatpush3.bf16.msra.mxu1 %v1418_v63  ;;  %5225 = vmatprep.mubr.msk.bf16.mxu1 %vm5853_vm2, %v7498_v20 }
 0x3b0   : > { %5235 = vmatprep.subr.bf16.mxu1 %v7498_v20 }
 0x3b2   : > { %5220 = vmatmul.mubr.msk.bf16.vlgmr.msra.gmra.mrb[28].mxu0 %vm903_vm4, %v1086_v3 }
 0x3b3   : > { %5231 = vmatprep.mubr.msk.bf16.mxu0 %vm5853_vm2, %v7498_v20 }
 0x3cb   : > { %v1044_v44 = vpop.xlane.xlu1 %1043 }
 0x3cc   : > { %5637 = vrcp.f32 %v1044_v44 }
 0x3cf   : > { %v1536_v60 = vpop.permute.xlu1 %1535  ;;  %v1047_v4 = vpop.xlane.xlu0 %1046 }
 0x3d0   : > { %5639 = vrcp.f32 %v1047_v4  ;;  %v1541_v54 = vsel %vm485_vm3, %v1536_v60, 0 }
 0x3d3   : > { %v1588_v24 = vpop.permute.xlu1 %1587  ;;  %v1484_v36 = vpop.permute.xlu0 %1483 }
 0x3d4   : > { %v1489_v5 = vsel %vm485_vm3, %v1484_v36, 0  ;;  %v1593_v12 = vsel %vm485_vm3, %v1588_v24, 0 }
 0x3d5   : > { %5230 = vmatpush3.bf16.xpose.msra.mxu0 %v1489_v5  ;;  %v6360_v5 = vld [vmem:[%s7494_s3 + $0x20] sm:$0xff] }
 0x3d6   : > { %5241 = vmatprep.subr.bf16.mxu0 %v7498_v20  ;;  %v5638_v22 = vpop.eup %5637 }
 0x3d7   : > { %v1640_v9 = vpop.permute.xlu1 %1639  ;;  %v1482_v10 = vpop.permute.xlu0 %1481  ;;  %v1078_v59 = vmul.f32 %v5638_v22, %v6190_v7 }
 0x3d8   : > { %v1645_v49 = vsel %vm485_vm3, %v1640_v9, 0 }
 0x3da   : > { %v5640_v55 = vpop.eup %5639 }
 0x3db   : > { %v1079_v26 = vmul.f32 %v5640_v55, %v6194_v43  ;;  %v1692_v51 = vpop.permute.xlu1 %1691  ;;  %v1534_v58 = vpop.permute.xlu0 %1533 }
 0x3dc   : > { %5232 = vmatmul.mubr.msk.bf16.vlgmr.msra.gmra.mrb[32].mxu0 %vm485_vm3, %v1482_v10  ;;  %v1697_v56 = vsel %vm485_vm3, %v1692_v51, 0  ;;  %v6365_v10 = vld [vmem:[%s7494_s3 + $0x28] sm:$0xff] }
 0x3dd   : > { %5242 = vmatpush3.bf16.xpose.msra.mxu0 %v1593_v12  ;;  %v1087_v42 = vpack.c.bf16 %v1079_v26, %v1078_v59  ;;  %5243 = vmatprep.mubr.msk.bf16.mxu0 %vm5853_vm2, %v7498_v20 }
 0x3de   : > { %5253 = vmatprep.subr.bf16.mxu0 %v7498_v20 }
 0x3df   : > { %v1744_v57 = vpop.permute.xlu1 %1743  ;;  %5226 = vmatmul.mubr.msk.bf16.vlgmr.msra.gmra.mrb[44].mxu1 %vm903_vm4, %v1087_v42  ;;  %v1586_v7 = vpop.permute.xlu0 %1585 }
 0x3e0   : > { %5236 = vmatpush3.bf16.xpose.msra.mxu1 %v1541_v54  ;;  %5237 = vmatprep.mubr.msk.bf16.mxu1 %vm5853_vm2, %v7498_v20  ;;  %v1749_v2 = vsel %vm485_vm3, %v1744_v57, 0 }
 0x3e1   : > { %5247 = vmatprep.subr.bf16.mxu1 %v7498_v20 }
 0x3e3   : > { %v1796_v43 = vpop.permute.xlu1 %1795  ;;  %v1638_v13 = vpop.permute.xlu0 %1637 }
 0x3e4   : > { %5244 = vmatmul.mubr.msk.bf16.vlgmr.msra.gmra.mrb[36].mxu0 %vm485_vm3, %v1586_v7  ;;  %v1801_v61 = vsel %vm485_vm3, %v1796_v43, 0 }
 0x3e5   : > { %5254 = vmatpush3.bf16.xpose.msra.mxu0 %v1697_v56  ;;  %5255 = vmatprep.mubr.msk.bf16.mxu0 %vm5853_vm2, %v7498_v20 }
 0x3e6   : > { %5265 = vmatprep.subr.bf16.mxu0 %v7498_v20 }
 0x3e7   : > { %5238 = vmatmul.mubr.msk.bf16.vlgmr.msra.gmra.mrb[48].mxu1 %vm485_vm3, %v1534_v58  ;;  %v1690_v17 = vpop.permute.xlu0 %1689  ;;  %v1848_v53 = vpop.permute.xlu1 %1847 }
 0x3e8   : > { %5248 = vmatpush3.bf16.xpose.msra.mxu1 %v1645_v49  ;;  %5249 = vmatprep.mubr.msk.bf16.mxu1 %vm5853_vm2, %v7498_v20  ;;  %v1853_v14 = vsel %vm485_vm3, %v1848_v53, 0 }
 0x3e9   : > { %5259 = vmatprep.subr.bf16.mxu1 %v7498_v20 }
 0x3eb   : > { %v1742_v21 = vpop.permute.xlu0 %1741  ;;  %v1846_v23 = vpop.permute.xlu1 %1845 }
 0x3ec   : > { %5256 = vmatmul.mubr.msk.bf16.vlgmr.msra.gmra.mrb[40].mxu0 %vm485_vm3, %v1690_v17  ;;  %v4902_v17 = vld [vmem:[%s7494_s3 + $0x30] sm:$0xff] }
 0x3ed   : > { %5266 = vmatpush3.bf16.xpose.msra.mxu0 %v1801_v61  ;;  %5267 = vmatprep.mubr.msk.bf16.mxu0 %vm5853_vm2, %v7498_v20 }
 0x3ee   : > { %5277 = vmatprep.subr.bf16.mxu0 %v7498_v20 }
 0x3ef   : > { %5250 = vmatmul.mubr.msk.bf16.vlgmr.msra.gmra.mrb[52].mxu1 %vm485_vm3, %v1638_v13  ;;  %v1794_v27 = vpop.permute.xlu0 %1793  ;;  %v2102_v50 = vpop.permute.xlu1 %2101 }
 0x3f0   : > { %5260 = vmatpush3.bf16.xpose.msra.mxu1 %v1749_v2  ;;  %5261 = vmatprep.mubr.msk.bf16.mxu1 %vm5853_vm2, %v7498_v20  ;;  %v4903_v2 = vld [vmem:[%s7494_s3 + $0x38] sm:$0xff] }
 0x3f1   : > { %5271 = vmatprep.subr.bf16.mxu1 %v7498_v20 }
 0x3f3   : > { %v2149_v1 = vpop.permute.xlu0 %2148 }
 0x3f4   : > { %5268 = vmatmul.mubr.msk.bf16.vlgmr.msra.gmra.mrb[44].mxu0 %vm485_vm3, %v1794_v27 }
 0x3f5   : > { %5278 = vmatpush3.bf16.msra.mxu0 %v2102_v50  ;;  %5279 = vmatprep.mubr.msk.bf16.mxu0 %vm5853_vm2, %v7498_v20 }
 0x3f6   : > { %5289 = vmatprep.subr.bf16.mxu0 %v7498_v20 }
 0x3f7   : > { %5262 = vmatmul.mubr.msk.bf16.vlgmr.msra.gmra.mrb[56].mxu1 %vm485_vm3, %v1742_v21 }
 0x3f8   : > { %5272 = vmatpush3.bf16.xpose.msra.mxu1 %v1853_v14  ;;  %5273 = vmatprep.mubr.msk.bf16.mxu1 %vm5853_vm2, %v7498_v20 }
 0x3f9   : > { %5283 = vmatprep.subr.bf16.mxu1 %v7498_v20 }
 0x3ff   : > { %5274 = vmatmul.mubr.msk.bf16.vlgmr.msra.gmra.mrb[60].mxu1 %vm485_vm3, %v1846_v23 }
 0x400   : > { %5284 = vmatpush3.bf16.msra.mxu1 %v2149_v1  ;;  %5285 = vmatprep.mubr.msk.bf16.mxu1 %vm5853_vm2, %v7498_v20 }
 0x401   : > { %5295 = vmatprep.subr.bf16.mxu1 %v7498_v20 }
 0x465   : > { %v6315_v29 = vpop.f32.mrb[16].mxu0 }
 0x466   : > { %7515 = vst [vmem:[#allocation3_spill] sm:$0xff] %v6315_v29  ;;  %v5185_v37 = vpop.f32.mrb[17].mxu0 }
 0x467   : > { %v6317_v33 = vpop.f32.mrb[18].mxu0 }
 0x468   : > { %v5186_v19 = vpop.f32.mrb[19].mxu0 }
 0x46d   : > { %v6321_v30 = vpop.f32.mrb[32].mxu1 }
 0x46e   : > { %7516 = vst [vmem:[#allocation4_spill] sm:$0xff] %v6321_v30  ;;  %v5191_v35 = vpop.f32.mrb[33].mxu1 }
 0x46f   : > { %v6323_v38 = vpop.f32.mrb[34].mxu1 }
 0x470   : > { %7517 = vst [vmem:[#allocation5_spill] sm:$0xff] %v6323_v38  ;;  %v5192_v8 = vpop.f32.mrb[35].mxu1 }
 0x475   : > { %v6327_v41 = vpop.f32.mrb[20].mxu0 }
 0x476   : > { %7518 = vst [vmem:[#allocation6_spill] sm:$0xff] %v6327_v41  ;;  %v5197_v28 = vpop.f32.mrb[21].mxu0 }
 0x477   : > { %v6329_v45 = vpop.f32.mrb[22].mxu0 }
 0x478   : > { %7519 = vst [vmem:[#allocation7_spill] sm:$0xff] %v6329_v45  ;;  %v5198_v39 = vpop.f32.mrb[23].mxu0 }
 0x479   : > { %v6333_v47 = vpop.f32.mrb[36].mxu1 }
 0x47a   : > { %7520 = vst [vmem:[#allocation8_spill] sm:$0xff] %v6333_v47  ;;  %v5203_v15 = vpop.f32.mrb[37].mxu1 }
 0x47b   : > { %v6335_v48 = vpop.f32.mrb[38].mxu1 }
 0x47c   : > { %7521 = vst [vmem:[#allocation9_spill] sm:$0xff] %v6335_v48  ;;  %v5204_v46 = vpop.f32.mrb[39].mxu1 }
 0x47d   : > { %v6339_v52 = vpop.f32.mrb[24].mxu0 }
 0x47e   : > { %7522 = vst [vmem:[#allocation10_spill] sm:$0xff] %v6339_v52  ;;  %v5209_v62 = vpop.f32.mrb[25].mxu0 }
 0x47f   : > { %v6341_v18 = vpop.f32.mrb[26].mxu0 }
 0x480   : > { %7523 = vst [vmem:[#allocation11_spill] sm:$0xff] %v6341_v18  ;;  %v5210_v6 = vpop.f32.mrb[27].mxu0 }
 0x481   : > { %v6345_v32 = vpop.f32.mrb[40].mxu1 }
 0x482   : > { %7524 = vst [vmem:[#allocation12_spill] sm:$0xff] %v6345_v32  ;;  %v5215_v31 = vpop.f32.mrb[41].mxu1 }
 0x483   : > { %v6347_v0 = vpop.f32.mrb[42].mxu1 }
 0x484   : > { %7525 = vst [vmem:[#allocation13_spill] sm:$0xff] %v6347_v0  ;;  %v5216_v3 = vpop.f32.mrb[43].mxu1 }
 0x485   : > { %v6351_v44 = vpop.f32.mrb[28].mxu0 }
 0x486   : > { %7526 = vst [vmem:[#allocation14_spill] sm:$0xff] %v6351_v44  ;;  %v5221_v60 = vpop.f32.mrb[29].mxu0 }
 0x487   : > { %v6353_v4 = vpop.f32.mrb[30].mxu0 }
 0x488   : > { %7527 = vst [vmem:[#allocation15_spill] sm:$0xff] %v6353_v4  ;;  %v5222_v36 = vpop.f32.mrb[31].mxu0 }
 0x4af   : > { %v1525_v9 = vpop.f32.mrb[32].mxu0 }
 0x4b0   : > { %v6368_v22 = vadd.f32 %v6360_v5, %v1525_v9  ;;  %v5233_v55 = vpop.f32.mrb[33].mxu0 }
 0x4b1   : > { %v1528_v59 = vpop.f32.mrb[34].mxu0 }
 0x4b2   : > { %v6371_v26 = vadd.f32 %v6365_v10, %v1528_v59  ;;  %v6373_v51 = vpop.f32.mrb[44].mxu1  ;;  %v5234_v58 = vpop.f32.mrb[35].mxu0  ;;  %v1917_v12 = vsel %vm903_vm4, %v6368_v22, -inf }
 0x4b3   : > { %7528 = vst [vmem:[#allocation16_spill] sm:$0xff] %v6373_v51  ;;  %v5227_v42 = vpop.f32.mrb[45].mxu1  ;;  %1918 = vmax.xlane.f32.xlu0 %v1917_v12 }
 0x4b4   : > { %v6377_v54 = vpop.f32.mrb[46].mxu1  ;;  %v1920_v57 = vsel %vm903_vm4, %v6371_v26, -inf }
 0x4b5   : > { %7529 = vst [vmem:[#allocation17_spill] sm:$0xff] %v6377_v54  ;;  %v5228_v43 = vpop.f32.mrb[47].mxu1  ;;  %1921 = vmax.xlane.f32.xlu1 %v1920_v57 }
 0x4b7   : > { %v1629_v13 = vpop.f32.mrb[36].mxu0 }
 0x4b8   : > { %v6384_v56 = vadd.f32 %v6360_v5, %v1629_v13  ;;  %v5245_v49 = vpop.f32.mrb[37].mxu0 }
 0x4b9   : > { %v1632_v53 = vpop.f32.mrb[38].mxu0 }
 0x4ba   : > { %v1577_v61 = vpop.f32.mrb[48].mxu1  ;;  %v5246_v21 = vpop.f32.mrb[39].mxu0  ;;  %v1929_v23 = vsel %vm903_vm4, %v6384_v56, -inf  ;;  %v6401_v28 = vadd.f32 %v6365_v10, %v1632_v53 }
 0x4bb   : > { %v6394_v27 = vadd.f32 %v4902_v17, %v1577_v61  ;;  %v5239_v50 = vpop.f32.mrb[49].mxu1  ;;  %1930 = vmax.xlane.f32.xlu1 %v1929_v23 }
 0x4bc   : > { %v1580_v14 = vpop.f32.mrb[50].mxu1  ;;  %v1932_v55 = vsel %vm903_vm4, %v6401_v28, -inf }
 0x4bd   : > { %v6396_v1 = vadd.f32 %v4903_v2, %v1580_v14  ;;  %v5240_v37 = vpop.f32.mrb[51].mxu1  ;;  %v1923_v19 = vsel %vm903_vm4, %v6394_v27, -inf }
 0x4be   : > { %1924 = vmax.xlane.f32.xlu0 %v1923_v19 }
 0x4bf   : > { %v1733_v35 = vpop.f32.mrb[40].mxu0  ;;  %v1926_v15 = vsel %vm903_vm4, %v6396_v1, -inf }
 0x4c0   : > { %v5257_v8 = vpop.f32.mrb[41].mxu0  ;;  %v6408_v60 = vadd.f32 %v6360_v5, %v1733_v35 }
 0x4c1   : > { %v1736_v39 = vpop.f32.mrb[42].mxu0 }
 0x4c2   : > { %1927 = vmax.xlane.f32.xlu0 %v1926_v15  ;;  %v1681_v46 = vpop.f32.mrb[52].mxu1  ;;  %v5258_v62 = vpop.f32.mrb[43].mxu0  ;;  %v6417_v42 = vadd.f32 %v6365_v10, %v1736_v39  ;;  %v1941_v13 = vsel %vm903_vm4, %v6408_v60, -inf }
 0x4c3   : > { %v6405_v6 = vadd.f32 %v4902_v17, %v1681_v46  ;;  %v5251_v31 = vpop.f32.mrb[53].mxu1 }
 0x4c4   : > { %v1684_v3 = vpop.f32.mrb[54].mxu1  ;;  %v1944_v19 = vsel %vm903_vm4, %v6417_v42, -inf }
 0x4c5   : > { %v6410_v36 = vadd.f32 %v4903_v2, %v1684_v3  ;;  %v5252_v9 = vpop.f32.mrb[55].mxu1  ;;  %v1935_v59 = vsel %vm903_vm4, %v6405_v6, -inf }
 0x4c6   : > { %1933 = vmax.xlane.f32.xlu0 %v1932_v55  ;;  %1936 = vmax.xlane.f32.xlu1 %v1935_v59 }
 0x4c7   : > { %v1837_v58 = vpop.f32.mrb[44].mxu0  ;;  %v1938_v43 = vsel %vm903_vm4, %v6410_v36, -inf }
 0x4c8   : > { %v5269_v12 = vpop.f32.mrb[45].mxu0  ;;  %v6426_v50 = vadd.f32 %v6360_v5, %v1837_v58  ;;  %v5833_v58 = vld [vmem:[#allocation2 + $0x28] sm:$0xff] }
 0x4c9   : > { %v1840_v57 = vpop.f32.mrb[46].mxu0  ;;  %v5836_v12 = vld [vmem:[#allocation2 + $0x30] sm:$0xff] }
 0x4ca   : > { %1939 = vmax.xlane.f32.xlu0 %v1938_v43  ;;  %1942 = vmax.xlane.f32.xlu1 %v1941_v13  ;;  %v1785_v49 = vpop.f32.mrb[56].mxu1  ;;  %v5270_v53 = vpop.f32.mrb[47].mxu0  ;;  %v6435_v8 = vadd.f32 %v6365_v10, %v1840_v57  ;;  %v1953_v5 = vsel %vm903_vm4, %v6426_v50, -inf }
 0x4cb   : > { %v6423_v61 = vadd.f32 %v4902_v17, %v1785_v49  ;;  %v5263_v21 = vpop.f32.mrb[57].mxu1  ;;  %v6455_v57 = vpop.permute.xlu1 %2195 }
 0x4cc   : > { %v1788_v23 = vpop.f32.mrb[58].mxu1  ;;  %v1956_v55 = vsel %vm903_vm4, %v6435_v8, -inf }
 0x4cd   : > { %v6428_v14 = vadd.f32 %v4903_v2, %v1788_v23  ;;  %v5264_v37 = vpop.f32.mrb[59].mxu1  ;;  %v1947_v35 = vsel %vm903_vm4, %v6423_v61, -inf }
 0x4ce   : > { %1945 = vmax.xlane.f32.xlu0 %v1944_v19  ;;  %1948 = vmax.xlane.f32.xlu1 %v1947_v35 }
 0x4cf   : > { %v1950_v39 = vsel %vm903_vm4, %v6428_v14, -inf  ;;  %v6457_v43 = vpop.permute.xlu1 %2242 }
 0x4d2   : > { %1951 = vmax.xlane.f32.xlu0 %v1950_v39  ;;  %v1889_v15 = vpop.f32.mrb[60].mxu1  ;;  %1954 = vmax.xlane.f32.xlu1 %v1953_v5 }
 0x4d3   : > { %v6441_v46 = vadd.f32 %v4902_v17, %v1889_v15  ;;  %v5275_v62 = vpop.f32.mrb[61].mxu1  ;;  %v5834_v17 = vld [vmem:[#allocation2 + $0x38] sm:$0xff] }
 0x4d4   : > { %v1892_v31 = vpop.f32.mrb[62].mxu1 }
 0x4d5   : > { %v6443_v3 = vadd.f32 %v4903_v2, %v1892_v31  ;;  %v5276_v9 = vpop.f32.mrb[63].mxu1  ;;  %v1959_v10 = vsel %vm903_vm4, %v6441_v46, -inf  ;;  %v5835_v2 = vld [vmem:[#allocation2 + $0x20] sm:$0xff] }
 0x4d6   : > { %1960 = vmax.xlane.f32.xlu1 %v1959_v10  ;;  %1957 = vmax.xlane.f32.xlu0 %v1956_v55 }
 0x4d7   : > { %v1962_v59 = vsel %vm903_vm4, %v6443_v3, -inf }
 0x4da   : > { %1963 = vmax.xlane.f32.xlu0 %v1962_v59 }
 0x4e7   : > { %2336 = vrot.lane.b32.xlu1 %v5833_v58, %s5858_s23 }
 0x4eb   : > { %2430 = vrot.lane.b32.xlu1 %v5834_v17, %s5858_s23 }
 0x4f0   : > { %2289 = vrot.lane.b32.xlu0 %v5835_v2, %s5858_s23 }
 0x4f4   : > { %2383 = vrot.lane.b32.xlu0 %v5836_v12, %s5858_s23  ;;  %s5864_s23 = smov 40  }
 0x540   : > { %v1919_v13 = vpop.xlane.xlu0 %1918 }
 0x541   : > { %v1965_v49 = vsub.f32 %v6368_v22, %v1919_v13 }
 0x542   : > { %v1922_v53 = vpop.xlane.xlu1 %1921 }
 0x543   : > { %v1981_v21 = vmul.f32 1.442695, %v1965_v49  ;;  %v1966_v23 = vsub.f32 %v6371_v26, %v1922_v53 }
 0x545   : > { %5641 = vpow2.f32 %v1981_v21  ;;  %v1983_v37 = vmul.f32 1.442695, %v1966_v23 }
 0x547   : > { %5643 = vpow2.f32 %v1983_v37 }
 0x548   : > { %v1931_v19 = vpop.xlane.xlu1 %1930 }
 0x549   : > { %v1969_v35 = vsub.f32 %v6384_v56, %v1931_v19 }
 0x54b   : > { %v1925_v39 = vpop.xlane.xlu0 %1924  ;;  %v1989_v15 = vmul.f32 1.442695, %v1969_v35 }
 0x54c   : > { %v1967_v5 = vsub.f32 %v6394_v27, %v1925_v39 }
 0x54e   : > { %v1985_v62 = vmul.f32 1.442695, %v1967_v5 }
 0x54f   : > { %v6463_v31 = vpop.eup %5641  ;;  %v1928_v9 = vpop.xlane.xlu0 %1927 }
 0x550   : > { %5645 = vpow2.f32 %v1985_v62  ;;  %v1968_v22 = vsub.f32 %v6396_v1, %v1928_v9  ;;  %v2013_v26 = vsel %vm903_vm4, %v6463_v31, 0.0 }
 0x551   : > { %v6468_v10 = vpop.eup %5643  ;;  %2014 = vadd.xlane.f32.xlu1 %v2013_v26  ;;  %5647 = vpow2.f32 %v1989_v15 }
 0x552   : > { %v1987_v55 = vmul.f32 1.442695, %v1968_v22  ;;  %v2016_v56 = vsel %vm903_vm4, %v6468_v10, 0.0 }
 0x553   : > { %v1937_v27 = vpop.xlane.xlu1 %1936  ;;  %2017 = vadd.xlane.f32.xlu0 %v2016_v56  ;;  %v1934_v59 = vpop.xlane.xlu0 %1933 }
 0x554   : > { %5649 = vpow2.f32 %v1987_v55  ;;  %v1971_v58 = vsub.f32 %v6405_v6, %v1937_v27  ;;  %v1970_v17 = vsub.f32 %v6401_v28, %v1934_v59 }
 0x556   : > { %v1993_v1 = vmul.f32 1.442695, %v1971_v58  ;;  %v1991_v2 = vmul.f32 1.442695, %v1970_v17 }
 0x557   : > { %v1943_v12 = vpop.xlane.xlu1 %1942  ;;  %v1940_v13 = vpop.xlane.xlu0 %1939 }
 0x558   : > { %5651 = vpow2.f32 %v1993_v1  ;;  %v1973_v49 = vsub.f32 %v6408_v60, %v1943_v12  ;;  %v1972_v53 = vsub.f32 %v6410_v36, %v1940_v13 }
 0x559   : > { %5653 = vpow2.f32 %v1991_v2 }
 0x55a   : > { %v6476_v21 = vpop.eup %5645  ;;  %v1997_v23 = vmul.f32 1.442695, %v1973_v49  ;;  %v1995_v37 = vmul.f32 1.442695, %v1972_v53 }
 0x55b   : > { %v1949_v19 = vpop.xlane.xlu1 %1948  ;;  %v1946_v35 = vpop.xlane.xlu0 %1945  ;;  %v2019_v6 = vsel %vm903_vm4, %v6476_v21, 0.0 }
 0x55c   : > { %v6480_v28 = vpop.eup %5647  ;;  %5655 = vpow2.f32 %v1997_v23  ;;  %v1975_v39 = vsub.f32 %v6423_v61, %v1949_v19  ;;  %v1974_v5 = vsub.f32 %v6417_v42, %v1946_v35  ;;  %2020 = vadd.xlane.f32.xlu1 %v2019_v6 }
 0x55d   : > { %5657 = vpow2.f32 %v1995_v37  ;;  %v2025_v22 = vsel %vm903_vm4, %v6480_v28, 0.0 }
 0x55e   : > { %v6484_v60 = vpop.eup %5649  ;;  %v2001_v36 = vmul.f32 1.442695, %v1975_v39  ;;  %v1999_v15 = vmul.f32 1.442695, %v1974_v5 }
 0x55f   : > { %v1955_v62 = vpop.xlane.xlu1 %1954  ;;  %v1952_v9 = vpop.xlane.xlu0 %1951  ;;  %v2022_v26 = vsel %vm903_vm4, %v6484_v60, 0.0 }
 0x560   : > { %5659 = vpow2.f32 %v2001_v36  ;;  %v1977_v55 = vsub.f32 %v6426_v50, %v1955_v62  ;;  %v1976_v61 = vsub.f32 %v6428_v14, %v1952_v9  ;;  %2026 = vadd.xlane.f32.xlu1 %v2025_v22  ;;  %2023 = vadd.xlane.f32.xlu0 %v2022_v26 }
 0x561   : > { %5661 = vpow2.f32 %v1999_v15 }
 0x562   : > { %v6492_v42 = vpop.eup %5651  ;;  %v2005_v56 = vmul.f32 1.442695, %v1977_v55  ;;  %v2003_v27 = vmul.f32 1.442695, %v1976_v61 }
 0x563   : > { %v6494_v59 = vpop.eup %5653  ;;  %v1961_v58 = vpop.xlane.xlu1 %1960  ;;  %v2031_v1 = vsel %vm903_vm4, %v6492_v42, 0.0 }
 0x564   : > { %v1958_v17 = vpop.xlane.xlu0 %1957  ;;  %5663 = vpow2.f32 %v2005_v56  ;;  %v1979_v2 = vsub.f32 %v6441_v46, %v1961_v58  ;;  %2032 = vadd.xlane.f32.xlu1 %v2031_v1  ;;  %v2028_v14 = vsel %vm903_vm4, %v6494_v59, 0.0  ;;  %v6542_v58 = vld [vmem:[#allocation2 + $0x10] sm:$0xff]  ;;  %v6548_v1 = vld [vmem:[#allocation2] sm:$0xff] }
 0x565   : > { %v1978_v50 = vsub.f32 %v6435_v8, %v1958_v17  ;;  %5665 = vpow2.f32 %v2003_v27  ;;  %2029 = vadd.xlane.f32.xlu0 %v2028_v14  ;;  %v6539_v27 = vld [vmem:[#allocation2 + $0x8] sm:$0xff]  ;;  %v6545_v17 = vld [vmem:[#allocation2 + $0x18] sm:$0xff]  ;;  %v6559_v14 = vld [vmem:[#allocation2 + $0x30] sm:$0xff] }
 0x566   : > { %v6502_v12 = vpop.eup %5655  ;;  %v2009_v13 = vmul.f32 1.442695, %v1979_v2  ;;  %v6551_v2 = vld [vmem:[#allocation2 + $0x20] sm:$0xff] }
 0x567   : > { %v2007_v49 = vmul.f32 1.442695, %v1978_v50  ;;  %v6504_v53 = vpop.eup %5657  ;;  %v2037_v37 = vsel %vm903_vm4, %v6502_v12, 0.0  ;;  %v6555_v50 = vld [vmem:[#allocation2 + $0x28] sm:$0xff] }
 0x568   : > { %v1964_v23 = vpop.xlane.xlu0 %1963  ;;  %5667 = vpow2.f32 %v2009_v13  ;;  %2038 = vadd.xlane.f32.xlu1 %v2037_v37  ;;  %v2034_v8 = vsel %vm903_vm4, %v6504_v53, 0.0  ;;  %v6563_v13 = vld [vmem:[#allocation2 + $0x38] sm:$0xff] }
 0x569   : > { %v1980_v46 = vsub.f32 %v6443_v3, %v1964_v23  ;;  %5669 = vpow2.f32 %v2007_v49  ;;  %2035 = vadd.xlane.f32.xlu0 %v2034_v8  ;;  %v6579_v49 = vpop.permute.xlu1 %2336 }
 0x56a   : > { %v6511_v19 = vpop.eup %5659 }
 0x56b   : > { %v2011_v35 = vmul.f32 1.442695, %v1980_v46  ;;  %v6513_v6 = vpop.eup %5661  ;;  %v2043_v39 = vsel %vm903_vm4, %v6511_v19, 0.0 }
 0x56c   : > { %2044 = vadd.xlane.f32.xlu1 %v2043_v39  ;;  %v2040_v5 = vsel %vm903_vm4, %v6513_v6, 0.0  ;;  %v2290_v23 = vpop.permute.xlu0 %2289 }
 0x56d   : > { %5671 = vpow2.f32 %v2011_v35  ;;  %2041 = vadd.xlane.f32.xlu0 %v2040_v5  ;;  %v6581_v37 = vpop.permute.xlu1 %2430 }
 0x56e   : > { %v6519_v3 = vpop.eup %5663 }
 0x56f   : > { %v6521_v36 = vpop.eup %5665  ;;  %v2049_v15 = vsel %vm903_vm4, %v6519_v3, 0.0 }
 0x570   : > { %2050 = vadd.xlane.f32.xlu1 %v2049_v15  ;;  %v2046_v62 = vsel %vm903_vm4, %v6521_v36, 0.0  ;;  %v6583_v46 = vpop.permute.xlu0 %2383 }
 0x571   : > { %2047 = vadd.xlane.f32.xlu0 %v2046_v62 }
 0x572   : > { %v6527_v9 = vpop.eup %5667 }
 0x573   : > { %v6529_v22 = vpop.eup %5669  ;;  %v2055_v26 = vsel %vm903_vm4, %v6527_v9, 0.0 }
 0x574   : > { %2056 = vadd.xlane.f32.xlu1 %v2055_v26  ;;  %v2052_v55 = vsel %vm903_vm4, %v6529_v22, 0.0 }
 0x575   : > { %2053 = vadd.xlane.f32.xlu0 %v2052_v55 }
 0x577   : > { %v6535_v61 = vpop.eup %5671 }
 0x578   : > { %v2058_v56 = vsel %vm903_vm4, %v6535_v61, 0.0 }
 0x579   : > { %2059 = vadd.xlane.f32.xlu0 %v2058_v56 }
 0x585   : > { %2548 = vrot.lane.b32.xlu1 %v6539_v27, %s5859_s9 }
 0x589   : > { %2600 = vrot.lane.b32.xlu1 %v6542_v58, %s5859_s9 }
 0x58d   : > { %2652 = vrot.lane.b32.xlu1 %v6545_v17, %s5859_s9 }
 0x58f   : > { %2496 = vrot.lane.b32.xlu0 %v6548_v1, %s5859_s9 }
 0x591   : > { %2704 = vrot.lane.b32.xlu1 %v6551_v2, %s5859_s9 }
 0x593   : > { %2494 = vrot.lane.b32.xlu0 %v6548_v1, %s5860_s10 }
 0x595   : > { %2756 = vrot.lane.b32.xlu1 %v6555_v50, %s5859_s9 }
 0x597   : > { %2546 = vrot.lane.b32.xlu0 %v6539_v27, %s5860_s10 }
 0x599   : > { %2808 = vrot.lane.b32.xlu1 %v6559_v14, %s5859_s9 }
 0x59b   : > { %2598 = vrot.lane.b32.xlu0 %v6542_v58, %s5860_s10 }
 0x59d   : > { %2860 = vrot.lane.b32.xlu1 %v6563_v13, %s5859_s9  ;;  %s5865_s9 = smov 8  }
 0x59f   : > { %2650 = vrot.lane.b32.xlu0 %v6545_v17, %s5860_s10 }
 0x5a1   : > { %2858 = vrot.lane.b32.xlu1 %v6563_v13, %s5860_s10 }
 0x5a3   : > { %2702 = vrot.lane.b32.xlu0 %v6551_v2, %s5860_s10 }
 0x5a5   : > { %3114 = vrot.lane.b32.xlu1 %v6548_v1, %s5861_s11 }
 0x5a7   : > { %2754 = vrot.lane.b32.xlu0 %v6555_v50, %s5860_s10 }
 0x5a9   : > { %3208 = vrot.lane.b32.xlu1 %v6542_v58, %s5861_s11 }
 0x5ab   : > { %2806 = vrot.lane.b32.xlu0 %v6559_v14, %s5860_s10  ;;  %s5866_s10 = smov 16  }
 0x5ad   : > { %3255 = vrot.lane.b32.xlu1 %v6545_v17, %s5861_s11 }
 0x5af   : > { %3161 = vrot.lane.b32.xlu0 %v6539_v27, %s5861_s11 }
 0x5de   : > { %v2015_v8 = vpop.xlane.xlu1 %2014 }
 0x5df   : > { %5673 = vrcp.f32 %v2015_v8 }
 0x5e0   : > { %v2018_v35 = vpop.xlane.xlu0 %2017 }
 0x5e1   : > { %5675 = vrcp.f32 %v2018_v35 }
 0x5e9   : > { %v5674_v39 = vpop.eup %5673  ;;  %v2021_v5 = vpop.xlane.xlu1 %2020 }
 0x5ea   : > { %v2077_v62 = vmul.f32 %v5674_v39, %v6463_v31  ;;  %5677 = vrcp.f32 %v2021_v5 }
 0x5eb   : > { %v5676_v15 = vpop.eup %5675 }
 0x5ec   : > { %v2078_v26 = vmul.f32 %v5676_v15, %v6468_v10 }
 0x5ed   : > { %v2027_v55 = vpop.xlane.xlu1 %2026  ;;  %v2024_v56 = vpop.xlane.xlu0 %2023 }
 0x5ee   : > { %v2093_v7 = vpack.c.bf16 %v2078_v26, %v2077_v62  ;;  %5679 = vrcp.f32 %v2024_v56 }
 0x5ef   : > { %5681 = vrcp.f32 %v2027_v55 }
 0x5f0   : > { %5280 = vmatmul.mubr.msk.bf16.vlgmr.msra.gmra.mrb[48].mxu0 %vm903_vm4, %v2093_v7 }
 0x5f1   : > { %5290 = vmatpush3.bf16.msra.mxu0 %v6455_v57  ;;  %v2033_v8 = vpop.xlane.xlu1 %2032  ;;  %5291 = vmatprep.mubr.msk.bf16.mxu0 %vm5853_vm2, %v7498_v20 }
 0x5f2   : > { %v2030_v35 = vpop.xlane.xlu0 %2029  ;;  %5301 = vmatprep.subr.bf16.mxu0 %v7498_v20 }
 0x5f3   : > { %5683 = vrcp.f32 %v2030_v35 }
 0x5f4   : > { %5685 = vrcp.f32 %v2033_v8  ;;  %v5678_v39 = vpop.eup %5677 }
 0x5f5   : > { %v2039_v31 = vpop.xlane.xlu1 %2038  ;;  %v2079_v7 = vmul.f32 %v5678_v39, %v6476_v21 }
 0x5f6   : > { %v2036_v10 = vpop.xlane.xlu0 %2035 }
 0x5f7   : > { %5687 = vrcp.f32 %v2036_v10 }
 0x5f8   : > { %v5680_v5 = vpop.eup %5679  ;;  %5689 = vrcp.f32 %v2039_v31 }
 0x5f9   : > { %v2045_v15 = vpop.xlane.xlu1 %2044  ;;  %v2080_v57 = vmul.f32 %v5680_v5, %v6484_v60  ;;  %v5682_v26 = vpop.eup %5681 }
 0x5fa   : > { %v2042_v62 = vpop.xlane.xlu0 %2041  ;;  %v2081_v8 = vmul.f32 %v5682_v26, %v6480_v28 }
 0x5fb   : > { %5691 = vrcp.f32 %v2042_v62  ;;  %v2094_v55 = vpack.c.bf16 %v2080_v57, %v2079_v7 }
 0x5fc   : > { %5693 = vrcp.f32 %v2045_v15 }
 0x5fd   : > { %v5684_v56 = vpop.eup %5683  ;;  %v2051_v24 = vpop.xlane.xlu1 %2050  ;;  %5286 = vmatmul.mubr.msk.bf16.vlgmr.msra.gmra.mrb[64].mxu1 %vm903_vm4, %v2094_v55 }
 0x5fe   : > { %v2082_v35 = vmul.f32 %v5684_v56, %v6494_v59  ;;  %v2048_v10 = vpop.xlane.xlu0 %2047  ;;  %v5686_v31 = vpop.eup %5685  ;;  %5296 = vmatpush3.bf16.msra.mxu1 %v6457_v43  ;;  %5297 = vmatprep.mubr.msk.bf16.mxu1 %vm5853_vm2, %v7498_v20 }
 0x5ff   : > { %5695 = vrcp.f32 %v2048_v10  ;;  %5307 = vmatprep.subr.bf16.mxu1 %v7498_v20  ;;  %v2083_v28 = vmul.f32 %v5686_v31, %v6492_v42 }
 0x600   : > { %v2095_v21 = vpack.c.bf16 %v2082_v35, %v2081_v8  ;;  %5697 = vrcp.f32 %v2051_v24 }
 0x601   : > { %v5688_v60 = vpop.eup %5687  ;;  %v2057_v39 = vpop.xlane.xlu1 %2056 }
 0x602   : > { %v2084_v59 = vmul.f32 %v5688_v60, %v6504_v53  ;;  %5292 = vmatmul.mubr.msk.bf16.vlgmr.msra.gmra.mrb[52].mxu0 %vm903_vm4, %v2095_v21  ;;  %v2054_v5 = vpop.xlane.xlu0 %2053  ;;  %v5690_v15 = vpop.eup %5689 }
 0x603   : > { %5302 = vmatpush3.bf16.msra.mxu0 %v2290_v23  ;;  %5699 = vrcp.f32 %v2054_v5  ;;  %5303 = vmatprep.mubr.msk.bf16.mxu0 %vm5853_vm2, %v7498_v20  ;;  %v2085_v57 = vmul.f32 %v5690_v15, %v6502_v12 }
 0x604   : > { %v2096_v43 = vpack.c.bf16 %v2084_v59, %v2083_v28  ;;  %5313 = vmatprep.subr.bf16.mxu0 %v7498_v20  ;;  %5701 = vrcp.f32 %v2057_v39 }
 0x605   : > { %v5692_v7 = vpop.eup %5691  ;;  %v2549_v24 = vpop.permute.xlu1 %2548 }
 0x606   : > { %v2086_v42 = vmul.f32 %v5692_v7, %v6513_v6  ;;  %5298 = vmatmul.mubr.msk.bf16.vlgmr.msra.gmra.mrb[68].mxu1 %vm903_vm4, %v2096_v43  ;;  %v2060_v53 = vpop.xlane.xlu0 %2059  ;;  %v5694_v62 = vpop.eup %5693  ;;  %v2554_v5 = vsel %vm485_vm3, %v2549_v24, 0 }
 0x607   : > { %5308 = vmatpush3.bf16.msra.mxu1 %v6579_v49  ;;  %5703 = vrcp.f32 %v2060_v53  ;;  %5309 = vmatprep.mubr.msk.bf16.mxu1 %vm5853_vm2, %v7498_v20  ;;  %v2087_v56 = vmul.f32 %v5694_v62, %v6511_v19 }
 0x608   : > { %v2097_v23 = vpack.c.bf16 %v2086_v42, %v2085_v57  ;;  %5319 = vmatprep.subr.bf16.mxu1 %v7498_v20 }
 0x609   : > { %v5696_v26 = vpop.eup %5695  ;;  %v2601_v55 = vpop.permute.xlu1 %2600 }
 0x60a   : > { %v2088_v12 = vmul.f32 %v5696_v26, %v6521_v36  ;;  %5304 = vmatmul.mubr.msk.bf16.vlgmr.msra.gmra.mrb[56].mxu0 %vm903_vm4, %v2097_v23  ;;  %v2497_v6 = vpop.permute.xlu0 %2496  ;;  %v5698_v8 = vpop.eup %5697 }
 0x60b   : > { %5314 = vmatpush3.bf16.msra.mxu0 %v6583_v46  ;;  %5315 = vmatprep.mubr.msk.bf16.mxu0 %vm5853_vm2, %v7498_v20  ;;  %v2089_v10 = vmul.f32 %v5698_v8, %v6519_v3 }
 0x60c   : > { %v2098_v49 = vpack.c.bf16 %v2088_v12, %v2087_v56  ;;  %5325 = vmatprep.subr.bf16.mxu0 %v7498_v20 }
 0x60d   : > { %v5700_v35 = vpop.eup %5699  ;;  %v2653_v21 = vpop.permute.xlu1 %2652 }
 0x60e   : > { %v2090_v31 = vmul.f32 %v5700_v35, %v6529_v22  ;;  %5310 = vmatmul.mubr.msk.bf16.vlgmr.msra.gmra.mrb[72].mxu1 %vm903_vm4, %v2098_v49  ;;  %v2495_v19 = vpop.permute.xlu0 %2494  ;;  %v5702_v36 = vpop.eup %5701  ;;  %v2502_v22 = vsel %vm485_vm3, %v2497_v6, 0  ;;  %v2658_v43 = vsel %vm485_vm3, %v2653_v21, 0 }
 0x60f   : > { %5320 = vmatpush3.bf16.msra.mxu1 %v6581_v37  ;;  %5321 = vmatprep.mubr.msk.bf16.mxu1 %vm5853_vm2, %v7498_v20  ;;  %v2091_v39 = vmul.f32 %v5702_v36, %v6527_v9 }
 0x610   : > { %v2099_v46 = vpack.c.bf16 %v2090_v31, %v2089_v10  ;;  %5331 = vmatprep.subr.bf16.mxu1 %v7498_v20 }
 0x611   : > { %v5704_v60 = vpop.eup %5703  ;;  %v2705_v59 = vpop.permute.xlu1 %2704 }
 0x612   : > { %v2092_v3 = vmul.f32 %v5704_v60, %v6535_v61  ;;  %5316 = vmatmul.mubr.msk.bf16.vlgmr.msra.gmra.mrb[60].mxu0 %vm903_vm4, %v2099_v46  ;;  %v2547_v28 = vpop.permute.xlu0 %2546  ;;  %v2606_v61 = vsel %vm485_vm3, %v2601_v55, 0  ;;  %v2710_v57 = vsel %vm485_vm3, %v2705_v59, 0 }
 0x613   : > { %5327 = vmatprep.mubr.msk.bf16.mxu0 %vm5853_vm2, %v7498_v20 }
 0x614   : > { %5326 = vmatpush3.bf16.xpose.msra.mxu0 %v2502_v22  ;;  %v2100_v37 = vpack.c.bf16 %v2092_v3, %v2091_v39 }
 0x615   : > { %5337 = vmatprep.subr.bf16.mxu0 %v7498_v20  ;;  %v2757_v15 = vpop.permute.xlu1 %2756 }
 0x616   : > { %5322 = vmatmul.mubr.msk.bf16.vlgmr.msra.gmra.mrb[76].mxu1 %vm903_vm4, %v2100_v37  ;;  %v2599_v9 = vpop.permute.xlu0 %2598  ;;  %v2762_v53 = vsel %vm485_vm3, %v2757_v15, 0 }
 0x617   : > { %5333 = vmatprep.mubr.msk.bf16.mxu1 %vm5853_vm2, %v7498_v20 }
 0x618   : > { %5332 = vmatpush3.bf16.xpose.msra.mxu1 %v2554_v5 }
 0x619   : > { %5343 = vmatprep.subr.bf16.mxu1 %v7498_v20  ;;  %v2809_v24 = vpop.permute.xlu1 %2808 }
 0x61a   : > { %v2651_v7 = vpop.permute.xlu0 %2650  ;;  %v2814_v23 = vsel %vm485_vm3, %v2809_v24, 0 }
 0x61b   : > { %5328 = vmatmul.mubr.msk.bf16.vlgmr.msra.gmra.mrb[64].mxu0 %vm485_vm3, %v2495_v19 }
 0x61c   : > { %5338 = vmatpush3.bf16.xpose.msra.mxu0 %v2606_v61  ;;  %5339 = vmatprep.mubr.msk.bf16.mxu0 %vm5853_vm2, %v7498_v20 }
 0x61d   : > { %5349 = vmatprep.subr.bf16.mxu0 %v7498_v20  ;;  %v2861_v62 = vpop.permute.xlu1 %2860 }
 0x61e   : > { %v2703_v42 = vpop.permute.xlu0 %2702  ;;  %v2866_v56 = vsel %vm485_vm3, %v2861_v62, 0 }
 0x61f   : > { %5334 = vmatmul.mubr.msk.bf16.vlgmr.msra.gmra.mrb[80].mxu1 %vm485_vm3, %v2547_v28 }
 0x620   : > { %5344 = vmatpush3.bf16.xpose.msra.mxu1 %v2658_v43  ;;  %5345 = vmatprep.mubr.msk.bf16.mxu1 %vm5853_vm2, %v7498_v20 }
 0x621   : > { %5355 = vmatprep.subr.bf16.mxu1 %v7498_v20  ;;  %v2859_v55 = vpop.permute.xlu1 %2858 }
 0x622   : > { %v2755_v26 = vpop.permute.xlu0 %2754 }
 0x623   : > { %5340 = vmatmul.mubr.msk.bf16.vlgmr.msra.gmra.mrb[68].mxu0 %vm485_vm3, %v2599_v9 }
 0x624   : > { %5350 = vmatpush3.bf16.xpose.msra.mxu0 %v2710_v57  ;;  %5351 = vmatprep.mubr.msk.bf16.mxu0 %vm5853_vm2, %v7498_v20 }
 0x625   : > { %5361 = vmatprep.subr.bf16.mxu0 %v7498_v20  ;;  %v3115_v6 = vpop.permute.xlu1 %3114 }
 0x626   : > { %v2807_v12 = vpop.permute.xlu0 %2806 }
 0x627   : > { %5346 = vmatmul.mubr.msk.bf16.vlgmr.msra.gmra.mrb[84].mxu1 %vm485_vm3, %v2651_v7 }
 0x628   : > { %5356 = vmatpush3.bf16.xpose.msra.mxu1 %v2762_v53  ;;  %5357 = vmatprep.mubr.msk.bf16.mxu1 %vm5853_vm2, %v7498_v20 }
 0x629   : > { %5367 = vmatprep.subr.bf16.mxu1 %v7498_v20 }
 0x62a   : > { %v3162_v8 = vpop.permute.xlu0 %3161 }
 0x62b   : > { %5352 = vmatmul.mubr.msk.bf16.vlgmr.msra.gmra.mrb[72].mxu0 %vm485_vm3, %v2703_v42 }
 0x62c   : > { %5362 = vmatpush3.bf16.xpose.msra.mxu0 %v2814_v23  ;;  %5363 = vmatprep.mubr.msk.bf16.mxu0 %vm5853_vm2, %v7498_v20 }
 0x62d   : > { %5373 = vmatprep.subr.bf16.mxu0 %v7498_v20 }
 0x62f   : > { %5358 = vmatmul.mubr.msk.bf16.vlgmr.msra.gmra.mrb[88].mxu1 %vm485_vm3, %v2755_v26 }
 0x630   : > { %5368 = vmatpush3.bf16.xpose.msra.mxu1 %v2866_v56  ;;  %5369 = vmatprep.mubr.msk.bf16.mxu1 %vm5853_vm2, %v7498_v20 }
 0x631   : > { %5379 = vmatprep.subr.bf16.mxu1 %v7498_v20 }
 0x633   : > { %5364 = vmatmul.mubr.msk.bf16.vlgmr.msra.gmra.mrb[76].mxu0 %vm485_vm3, %v2807_v12 }
 0x634   : > { %5374 = vmatpush3.bf16.msra.mxu0 %v3115_v6  ;;  %5375 = vmatprep.mubr.msk.bf16.mxu0 %vm5853_vm2, %v7498_v20 }
 0x635   : > { %5385 = vmatprep.subr.bf16.mxu0 %v7498_v20 }
 0x637   : > { %5370 = vmatmul.mubr.msk.bf16.vlgmr.msra.gmra.mrb[92].mxu1 %vm485_vm3, %v2859_v55 }
 0x638   : > { %5380 = vmatpush3.bf16.msra.mxu1 %v3162_v8  ;;  %5381 = vmatprep.mubr.msk.bf16.mxu1 %vm5853_vm2, %v7498_v20 }
 0x639   : > { %5391 = vmatprep.subr.bf16.mxu1 %v7498_v20 }
 0x6c3   : > { %v6678_v49 = vpop.f32.mrb[48].mxu0 }
 0x6c4   : > { %v5281_v35 = vpop.f32.mrb[49].mxu0 }
 0x6c5   : > { %v6680_v10 = vpop.f32.mrb[50].mxu0 }
 0x6c6   : > { %v5282_v19 = vpop.f32.mrb[51].mxu0 }
 0x6d0   : > { %v6684_v36 = vpop.f32.mrb[64].mxu1 }
 0x6d1   : > { %v5287_v21 = vpop.f32.mrb[65].mxu1 }
 0x6d2   : > { %v6686_v46 = vpop.f32.mrb[66].mxu1 }
 0x6d3   : > { %v5288_v39 = vpop.f32.mrb[67].mxu1 }
 0x6d5   : > { %v6690_v3 = vpop.f32.mrb[52].mxu0 }
 0x6d6   : > { %v5293_v22 = vpop.f32.mrb[53].mxu0 }
 0x6d7   : > { %v6692_v28 = vpop.f32.mrb[54].mxu0 }
 0x6d8   : > { %v5294_v59 = vpop.f32.mrb[55].mxu0 }
 0x6d9   : > { %v6696_v5 = vpop.f32.mrb[68].mxu1 }
 0x6da   : > { %v5299_v9 = vpop.f32.mrb[69].mxu1 }
 0x6db   : > { %v6698_v61 = vpop.f32.mrb[70].mxu1 }
 0x6dc   : > { %v5300_v43 = vpop.f32.mrb[71].mxu1 }
 0x6dd   : > { %v6702_v7 = vpop.f32.mrb[56].mxu0  ;;  %v6729_v43 = vld [vmem:[%s7494_s3 + $0x40] sm:$0xff] }
 0x6de   : > { %v5305_v24 = vpop.f32.mrb[57].mxu0 }
 0x6df   : > { %v6704_v57 = vpop.f32.mrb[58].mxu0 }
 0x6e0   : > { %v5306_v53 = vpop.f32.mrb[59].mxu0 }
 0x6e1   : > { %v6708_v62 = vpop.f32.mrb[72].mxu1  ;;  %v6734_v53 = vld [vmem:[%s7494_s3 + $0x48] sm:$0xff] }
 0x6e2   : > { %v5311_v23 = vpop.f32.mrb[73].mxu1 }
 0x6e3   : > { %v6710_v26 = vpop.f32.mrb[74].mxu1 }
 0x6e4   : > { %v5312_v56 = vpop.f32.mrb[75].mxu1 }
 0x6e5   : > { %v6714_v12 = vpop.f32.mrb[60].mxu0 }
 0x6e6   : > { %v5317_v6 = vpop.f32.mrb[61].mxu0 }
 0x6e7   : > { %v6716_v8 = vpop.f32.mrb[62].mxu0 }
 0x6e8   : > { %v5318_v19 = vpop.f32.mrb[63].mxu0 }
 0x6e9   : > { %v6720_v21 = vpop.f32.mrb[76].mxu1  ;;  %v6742_v19 = vld [vmem:[%s7494_s3 + $0x50] sm:$0xff] }
 0x6ea   : > { %v5323_v39 = vpop.f32.mrb[77].mxu1 }
 0x6eb   : > { %v6722_v22 = vpop.f32.mrb[78].mxu1 }
 0x6ec   : > { %v5324_v9 = vpop.f32.mrb[79].mxu1 }
 0x6ee   : > { %v2538_v24 = vpop.f32.mrb[64].mxu0 }
 0x6ef   : > { %v6737_v23 = vadd.f32 %v6729_v43, %v2538_v24  ;;  %v5329_v56 = vpop.f32.mrb[65].mxu0  ;;  %v6752_v24 = vld [vmem:[%s7494_s3 + $0x58] sm:$0xff] }
 0x6f0   : > { %v2541_v6 = vpop.f32.mrb[66].mxu0 }
 0x6f1   : > { %v6745_v39 = vadd.f32 %v6734_v53, %v2541_v6  ;;  %v5330_v9 = vpop.f32.mrb[67].mxu0  ;;  %v2930_v63 = vsel %vm903_vm4, %v6737_v23, -inf }
 0x6f2   : > { %2931 = vmax.xlane.f32.xlu0 %v2930_v63  ;;  %v2590_v25 = vpop.f32.mrb[80].mxu1 }
 0x6f3   : > { %v6755_v56 = vadd.f32 %v6742_v19, %v2590_v25  ;;  %v5335_v16 = vpop.f32.mrb[81].mxu1  ;;  %v2933_v11 = vsel %vm903_vm4, %v6745_v39, -inf }
 0x6f4   : > { %2934 = vmax.xlane.f32.xlu1 %v2933_v11  ;;  %v2593_v6 = vpop.f32.mrb[82].mxu1 }
 0x6f5   : > { %v6760_v9 = vadd.f32 %v6752_v24, %v2593_v6  ;;  %v5336_v40 = vpop.f32.mrb[83].mxu1  ;;  %v2936_v63 = vsel %vm903_vm4, %v6755_v56, -inf }
 0x6f6   : > { %2937 = vmax.xlane.f32.xlu0 %v2936_v63  ;;  %v2642_v34 = vpop.f32.mrb[68].mxu0 }
 0x6f7   : > { %v6765_v59 = vadd.f32 %v6729_v43, %v2642_v34  ;;  %v5341_v25 = vpop.f32.mrb[69].mxu0  ;;  %v2939_v11 = vsel %vm903_vm4, %v6760_v9, -inf }
 0x6f8   : > { %v2645_v35 = vpop.f32.mrb[70].mxu0 }
 0x6f9   : > { %v6768_v16 = vadd.f32 %v6734_v53, %v2645_v35  ;;  %v5342_v42 = vpop.f32.mrb[71].mxu0  ;;  %v2942_v40 = vsel %vm903_vm4, %v6765_v59, -inf }
 0x6fa   : > { %2940 = vmax.xlane.f32.xlu0 %v2939_v11  ;;  %2943 = vmax.xlane.f32.xlu1 %v2942_v40  ;;  %v2694_v6 = vpop.f32.mrb[84].mxu1 }
 0x6fb   : > { %v6775_v63 = vadd.f32 %v6742_v19, %v2694_v6  ;;  %v5347_v34 = vpop.f32.mrb[85].mxu1  ;;  %v2945_v42 = vsel %vm903_vm4, %v6768_v16, -inf }
 0x6fc   : > { %v2697_v37 = vpop.f32.mrb[86].mxu1 }
 0x6fd   : > { %v6778_v25 = vadd.f32 %v6752_v24, %v2697_v37  ;;  %v5348_v35 = vpop.f32.mrb[87].mxu1  ;;  %v2948_v55 = vsel %vm903_vm4, %v6775_v63, -inf }
 0x6fe   : > { %2946 = vmax.xlane.f32.xlu0 %v2945_v42  ;;  %2949 = vmax.xlane.f32.xlu1 %v2948_v55  ;;  %v2746_v11 = vpop.f32.mrb[72].mxu0 }
 0x6ff   : > { %v6785_v40 = vadd.f32 %v6729_v43, %v2746_v11  ;;  %v5353_v6 = vpop.f32.mrb[73].mxu0  ;;  %v2951_v35 = vsel %vm903_vm4, %v6778_v25, -inf }
 0x700   : > { %v2749_v31 = vpop.f32.mrb[74].mxu0 }
 0x701   : > { %v6788_v34 = vadd.f32 %v6734_v53, %v2749_v31  ;;  %v5354_v37 = vpop.f32.mrb[75].mxu0  ;;  %v2954_v15 = vsel %vm903_vm4, %v6785_v40, -inf }
 0x702   : > { %2952 = vmax.xlane.f32.xlu0 %v2951_v35  ;;  %2955 = vmax.xlane.f32.xlu1 %v2954_v15  ;;  %v2798_v42 = vpop.f32.mrb[88].mxu1 }
 0x703   : > { %v6795_v55 = vadd.f32 %v6742_v19, %v2798_v42  ;;  %v5359_v11 = vpop.f32.mrb[89].mxu1  ;;  %v2957_v37 = vsel %vm903_vm4, %v6788_v34, -inf }
 0x704   : > { %v2801_v60 = vpop.f32.mrb[90].mxu1 }
 0x705   : > { %v6798_v6 = vadd.f32 %v6752_v24, %v2801_v60  ;;  %v5360_v31 = vpop.f32.mrb[91].mxu1  ;;  %v2960_v20 = vsel %vm903_vm4, %v6795_v55, -inf }
 0x706   : > { %2958 = vmax.xlane.f32.xlu0 %v2957_v37  ;;  %2961 = vmax.xlane.f32.xlu1 %v2960_v20  ;;  %v2850_v35 = vpop.f32.mrb[76].mxu0 }
 0x707   : > { %v6805_v15 = vadd.f32 %v6729_v43, %v2850_v35  ;;  %v5365_v42 = vpop.f32.mrb[77].mxu0  ;;  %v2963_v31 = vsel %vm903_vm4, %v6798_v6, -inf }
 0x708   : > { %v2853_v51 = vpop.f32.mrb[78].mxu0 }
 0x709   : > { %v6808_v11 = vadd.f32 %v6734_v53, %v2853_v51  ;;  %v5366_v60 = vpop.f32.mrb[79].mxu0  ;;  %v2966_v54 = vsel %vm903_vm4, %v6805_v15, -inf }
 0x70a   : > { %2964 = vmax.xlane.f32.xlu0 %v2963_v31  ;;  %v2902_v44 = vpop.f32.mrb[92].mxu1  ;;  %2967 = vmax.xlane.f32.xlu1 %v2966_v54 }
 0x70b   : > { %v6815_v20 = vadd.f32 %v6742_v19, %v2902_v44  ;;  %v5371_v43 = vpop.f32.mrb[93].mxu1  ;;  %v2969_v42 = vsel %vm903_vm4, %v6808_v11, -inf  ;;  %v6834_v44 = vpop.permute.xlu1 %3208 }
 0x70c   : > { %v2905_v37 = vpop.f32.mrb[94].mxu1 }
 0x70d   : > { %v6818_v35 = vadd.f32 %v6752_v24, %v2905_v37  ;;  %v5372_v51 = vpop.f32.mrb[95].mxu1  ;;  %v2972_v53 = vsel %vm903_vm4, %v6815_v20, -inf }
 0x70e   : > { %2973 = vmax.xlane.f32.xlu1 %v2972_v53  ;;  %2970 = vmax.xlane.f32.xlu0 %v2969_v42 }
 0x70f   : > { %v2975_v54 = vsel %vm903_vm4, %v6818_v35, -inf  ;;  %v6836_v19 = vpop.permute.xlu1 %3255 }
 0x712   : > { %2976 = vmax.xlane.f32.xlu0 %v2975_v54 }
 0x71f   : > { %3349 = vrot.lane.b32.xlu1 %v6555_v50, %s5861_s11 }
 0x723   : > { %3443 = vrot.lane.b32.xlu1 %v6563_v13, %s5861_s11 }
 0x728   : > { %3302 = vrot.lane.b32.xlu0 %v6551_v2, %s5861_s11 }
 0x72c   : > { %3396 = vrot.lane.b32.xlu0 %v6559_v14, %s5861_s11 }
 0x77f   : > { %v2932_v24 = vpop.xlane.xlu0 %2931 }
 0x780   : > { %v2978_v60 = vsub.f32 %v6737_v23, %v2932_v24 }
 0x781   : > { %v2935_v31 = vpop.xlane.xlu1 %2934 }
 0x782   : > { %v2994_v43 = vmul.f32 1.442695, %v2978_v60  ;;  %v2979_v37 = vsub.f32 %v6745_v39, %v2935_v31 }
 0x783   : > { %v2938_v51 = vpop.xlane.xlu0 %2937 }
 0x784   : > { %5705 = vpow2.f32 %v2994_v43  ;;  %v2996_v53 = vmul.f32 1.442695, %v2979_v37  ;;  %v2980_v42 = vsub.f32 %v6755_v56, %v2938_v51 }
 0x786   : > { %5707 = vpow2.f32 %v2996_v53  ;;  %v2998_v54 = vmul.f32 1.442695, %v2980_v42 }
 0x787   : > { %v2944_v4 = vpop.xlane.xlu1 %2943  ;;  %v2941_v32 = vpop.xlane.xlu0 %2940 }
 0x788   : > { %5709 = vpow2.f32 %v2998_v54  ;;  %v2982_v0 = vsub.f32 %v6765_v59, %v2944_v4  ;;  %v2981_v52 = vsub.f32 %v6760_v9, %v2941_v32 }
 0x78a   : > { %v3002_v18 = vmul.f32 1.442695, %v2982_v0  ;;  %v3000_v23 = vmul.f32 1.442695, %v2981_v52 }
 0x78b   : > { %v2950_v24 = vpop.xlane.xlu1 %2949  ;;  %v2947_v60 = vpop.xlane.xlu0 %2946 }
 0x78c   : > { %5711 = vpow2.f32 %v3002_v18  ;;  %v2984_v39 = vsub.f32 %v6775_v63, %v2950_v24  ;;  %v2983_v31 = vsub.f32 %v6768_v16, %v2947_v60 }
 0x78d   : > { %5713 = vpow2.f32 %v3000_v23 }
 0x78e   : > { %v6845_v56 = vpop.eup %5705  ;;  %v3006_v43 = vmul.f32 1.442695, %v2984_v39  ;;  %v3004_v37 = vmul.f32 1.442695, %v2983_v31 }
 0x78f   : > { %v2956_v51 = vpop.xlane.xlu1 %2955  ;;  %v2953_v53 = vpop.xlane.xlu0 %2952  ;;  %v3026_v4 = vsel %vm903_vm4, %v6845_v56, 0.0 }
 0x790   : > { %v6849_v32 = vpop.eup %5707  ;;  %5715 = vpow2.f32 %v3006_v43  ;;  %v2986_v52 = vsub.f32 %v6785_v40, %v2956_v51  ;;  %v2985_v18 = vsub.f32 %v6778_v25, %v2953_v53  ;;  %3027 = vadd.xlane.f32.xlu1 %v3026_v4 }
 0x791   : > { %5717 = vpow2.f32 %v3004_v37  ;;  %v3029_v0 = vsel %vm903_vm4, %v6849_v32, 0.0 }
 0x792   : > { %v6855_v59 = vpop.eup %5709  ;;  %v3010_v9 = vmul.f32 1.442695, %v2986_v52  ;;  %v3008_v16 = vmul.f32 1.442695, %v2985_v18  ;;  %3030 = vadd.xlane.f32.xlu0 %v3029_v0 }
 0x793   : > { %v2962_v63 = vpop.xlane.xlu1 %2961  ;;  %v2959_v42 = vpop.xlane.xlu0 %2958  ;;  %v3032_v54 = vsel %vm903_vm4, %v6855_v59, 0.0 }
 0x794   : > { %5719 = vpow2.f32 %v3010_v9  ;;  %v2988_v40 = vsub.f32 %v6795_v55, %v2962_v63  ;;  %v2987_v25 = vsub.f32 %v6788_v34, %v2959_v42  ;;  %3033 = vadd.xlane.f32.xlu1 %v3032_v54 }
 0x795   : > { %5721 = vpow2.f32 %v3008_v16 }
 0x796   : > { %v6861_v23 = vpop.eup %5711  ;;  %v3014_v24 = vmul.f32 1.442695, %v2988_v40  ;;  %v3012_v60 = vmul.f32 1.442695, %v2987_v25 }
 0x797   : > { %v6863_v39 = vpop.eup %5713  ;;  %v2968_v31 = vpop.xlane.xlu1 %2967  ;;  %v3038_v37 = vsel %vm903_vm4, %v6861_v23, 0.0 }
 0x798   : > { %v2965_v43 = vpop.xlane.xlu0 %2964  ;;  %5723 = vpow2.f32 %v3014_v24  ;;  %v2990_v51 = vsub.f32 %v6805_v15, %v2968_v31  ;;  %3039 = vadd.xlane.f32.xlu1 %v3038_v37  ;;  %v3035_v34 = vsel %vm903_vm4, %v6863_v39, 0.0 }
 0x799   : > { %v2989_v55 = vsub.f32 %v6798_v6, %v2965_v43  ;;  %5725 = vpow2.f32 %v3012_v60  ;;  %3036 = vadd.xlane.f32.xlu0 %v3035_v34 }
 0x79a   : > { %v6871_v53 = vpop.eup %5715  ;;  %v3018_v4 = vmul.f32 1.442695, %v2990_v51 }
 0x79b   : > { %v3016_v52 = vmul.f32 1.442695, %v2989_v55  ;;  %v6873_v18 = vpop.eup %5717  ;;  %v2974_v0 = vpop.xlane.xlu1 %2973  ;;  %v3044_v16 = vsel %vm903_vm4, %v6871_v53, 0.0 }
 0x79c   : > { %v2971_v9 = vpop.xlane.xlu0 %2970  ;;  %5727 = vpow2.f32 %v3018_v4  ;;  %v2992_v6 = vsub.f32 %v6815_v20, %v2974_v0  ;;  %3045 = vadd.xlane.f32.xlu1 %v3044_v16  ;;  %v3041_v63 = vsel %vm903_vm4, %v6873_v18, 0.0 }
 0x79d   : > { %v2991_v15 = vsub.f32 %v6808_v11, %v2971_v9  ;;  %5729 = vpow2.f32 %v3016_v52  ;;  %3042 = vadd.xlane.f32.xlu0 %v3041_v63 }
 0x79e   : > { %v6881_v42 = vpop.eup %5719  ;;  %v3022_v54 = vmul.f32 1.442695, %v2992_v6 }
 0x79f   : > { %v3020_v40 = vmul.f32 1.442695, %v2991_v15  ;;  %v6883_v25 = vpop.eup %5721  ;;  %v3050_v60 = vsel %vm903_vm4, %v6881_v42, 0.0 }
 0x7a0   : > { %v2977_v24 = vpop.xlane.xlu0 %2976  ;;  %5731 = vpow2.f32 %v3022_v54  ;;  %3051 = vadd.xlane.f32.xlu1 %v3050_v60  ;;  %v3047_v11 = vsel %vm903_vm4, %v6883_v25, 0.0 }
 0x7a1   : > { %v2993_v20 = vsub.f32 %v6818_v35, %v2977_v24  ;;  %5733 = vpow2.f32 %v3020_v40  ;;  %3048 = vadd.xlane.f32.xlu0 %v3047_v11 }
 0x7a2   : > { %v6890_v31 = vpop.eup %5723 }
 0x7a3   : > { %v3024_v43 = vmul.f32 1.442695, %v2993_v20  ;;  %v6892_v37 = vpop.eup %5725  ;;  %v3056_v51 = vsel %vm903_vm4, %v6890_v31, 0.0 }
 0x7a4   : > { %3057 = vadd.xlane.f32.xlu1 %v3056_v51  ;;  %v3053_v55 = vsel %vm903_vm4, %v6892_v37, 0.0  ;;  %v3303_v54 = vpop.permute.xlu0 %3302 }
 0x7a5   : > { %5735 = vpow2.f32 %v3024_v43  ;;  %3054 = vadd.xlane.f32.xlu0 %v3053_v55 }
 0x7a6   : > { %v6898_v35 = vpop.eup %5727 }
 0x7a7   : > { %v6900_v34 = vpop.eup %5729  ;;  %v3062_v4 = vsel %vm903_vm4, %v6898_v35, 0.0 }
 0x7a8   : > { %3063 = vadd.xlane.f32.xlu1 %v3062_v4  ;;  %v3059_v52 = vsel %vm903_vm4, %v6900_v34, 0.0  ;;  %v6940_v40 = vpop.permute.xlu0 %3396 }
 0x7a9   : > { %3060 = vadd.xlane.f32.xlu0 %v3059_v52 }
 0x7aa   : > { %v6906_v0 = vpop.eup %5731 }
 0x7ab   : > { %v6908_v9 = vpop.eup %5733  ;;  %v3068_v16 = vsel %vm903_vm4, %v6906_v0, 0.0 }
 0x7ac   : > { %3069 = vadd.xlane.f32.xlu1 %v3068_v16  ;;  %v3065_v6 = vsel %vm903_vm4, %v6908_v9, 0.0  ;;  %v7530_v16 = vmov 0.0  }
 0x7ad   : > { %3066 = vadd.xlane.f32.xlu0 %v3065_v6 }
 0x7af   : > { %v6914_v15 = vpop.eup %5735 }
 0x7b0   : > { %v3071_v63 = vsel %vm903_vm4, %v6914_v15, 0.0 }
 0x7b1   : > { %3072 = vadd.xlane.f32.xlu0 %v3071_v63 }
 0x7bd   : > { %3561 = vrot.lane.b32.xlu1 %v6539_v27, %s5862_s20 }
 0x7c1   : > { %3613 = vrot.lane.b32.xlu1 %v6542_v58, %s5862_s20 }
 0x7c5   : > { %3665 = vrot.lane.b32.xlu1 %v6545_v17, %s5862_s20 }
 0x7c7   : > { %3509 = vrot.lane.b32.xlu0 %v6548_v1, %s5862_s20 }
 0x7c9   : > { %3717 = vrot.lane.b32.xlu1 %v6551_v2, %s5862_s20 }
 0x7cb   : > { %3507 = vrot.lane.b32.xlu0 %v6548_v1, %s5863_s22 }
 0x7cd   : > { %3769 = vrot.lane.b32.xlu1 %v6555_v50, %s5862_s20 }
 0x7cf   : > { %3559 = vrot.lane.b32.xlu0 %v6539_v27, %s5863_s22  ;;  %v6936_v27 = vpop.permute.xlu1 %3349 }
 0x7d1   : > { %3821 = vrot.lane.b32.xlu1 %v6559_v14, %s5862_s20 }
 0x7d3   : > { %3611 = vrot.lane.b32.xlu0 %v6542_v58, %s5863_s22  ;;  %v6938_v58 = vpop.permute.xlu1 %3443 }
 0x7d5   : > { %3873 = vrot.lane.b32.xlu1 %v6563_v13, %s5862_s20 }
 0x7d7   : > { %3663 = vrot.lane.b32.xlu0 %v6545_v17, %s5863_s22 }
 0x7d9   : > { %3871 = vrot.lane.b32.xlu1 %v6563_v13, %s5863_s22 }
 0x7db   : > { %3715 = vrot.lane.b32.xlu0 %v6551_v2, %s5863_s22 }
 0x7dd   : > { %4127 = vrot.lane.b32.xlu1 %v6548_v1, %s5864_s23 }
 0x7df   : > { %3767 = vrot.lane.b32.xlu0 %v6555_v50, %s5863_s22 }
 0x7e3   : > { %3819 = vrot.lane.b32.xlu0 %v6559_v14, %s5863_s22  ;;  %s7454_s22 = scalar_lea.vmem %s7497_s6, %s4856_s16 }
 0x81d   : > { %v3028_v17 = vpop.xlane.xlu1 %3027 }
 0x81e   : > { %5737 = vrcp.f32 %v3028_v17 }
 0x81f   : > { %v3031_v13 = vpop.xlane.xlu0 %3030 }
 0x820   : > { %5739 = vrcp.f32 %v3031_v13 }
 0x821   : > { %v3034_v2 = vpop.xlane.xlu1 %3033 }
 0x822   : > { %5741 = vrcp.f32 %v3034_v2 }
 0x825   : > { %v3040_v24 = vpop.xlane.xlu1 %3039 }
 0x826   : > { %v3037_v60 = vpop.xlane.xlu0 %3036 }
 0x827   : > { %5743 = vrcp.f32 %v3037_v60 }
 0x828   : > { %v5738_v1 = vpop.eup %5737  ;;  %5745 = vrcp.f32 %v3040_v24 }
 0x829   : > { %v3046_v50 = vpop.xlane.xlu1 %3045  ;;  %v3090_v11 = vmul.f32 %v5738_v1, %v6845_v56 }
 0x82a   : > { %v5740_v14 = vpop.eup %5739  ;;  %v3043_v20 = vpop.xlane.xlu0 %3042 }
 0x82b   : > { %v3091_v43 = vmul.f32 %v5740_v14, %v6849_v32  ;;  %5747 = vrcp.f32 %v3043_v20 }
 0x82c   : > { %5749 = vrcp.f32 %v3046_v50  ;;  %v5742_v52 = vpop.eup %5741 }
 0x82d   : > { %v3052_v51 = vpop.xlane.xlu1 %3051  ;;  %v3106_v55 = vpack.c.bf16 %v3091_v43, %v3090_v11  ;;  %v3092_v56 = vmul.f32 %v5742_v52, %v6855_v59 }
 0x82e   : > { %v3049_v4 = vpop.xlane.xlu0 %3048 }
 0x82f   : > { %5751 = vrcp.f32 %v3049_v4  ;;  %5376 = vmatmul.mubr.msk.bf16.vlgmr.msra.gmra.mrb[80].mxu0 %vm903_vm4, %v3106_v55 }
 0x830   : > { %5386 = vmatpush3.bf16.msra.mxu0 %v6834_v44  ;;  %5387 = vmatprep.mubr.msk.bf16.mxu0 %vm5853_vm2, %v7530_v16  ;;  %5753 = vrcp.f32 %v3052_v51 }
 0x831   : > { %v5744_v6 = vpop.eup %5743  ;;  %v3058_v63 = vpop.xlane.xlu1 %3057  ;;  %5397 = vmatprep.subr.bf16.mxu0 %v7530_v16 }
 0x832   : > { %v3093_v32 = vmul.f32 %v5744_v6, %v6863_v39  ;;  %v3055_v17 = vpop.xlane.xlu0 %3054  ;;  %v5746_v13 = vpop.eup %5745 }
 0x833   : > { %5755 = vrcp.f32 %v3055_v17  ;;  %v3094_v44 = vmul.f32 %v5746_v13, %v6861_v23 }
 0x834   : > { %v3107_v2 = vpack.c.bf16 %v3093_v32, %v3092_v56  ;;  %5757 = vrcp.f32 %v3058_v63 }
 0x835   : > { %v5748_v24 = vpop.eup %5747  ;;  %v3064_v60 = vpop.xlane.xlu1 %3063 }
 0x836   : > { %v3095_v1 = vmul.f32 %v5748_v24, %v6873_v18  ;;  %5382 = vmatmul.mubr.msk.bf16.vlgmr.msra.gmra.mrb[96].mxu1 %vm903_vm4, %v3107_v2  ;;  %v3061_v50 = vpop.xlane.xlu0 %3060  ;;  %v5750_v14 = vpop.eup %5749 }
 0x837   : > { %5392 = vmatpush3.bf16.msra.mxu1 %v6836_v19  ;;  %5759 = vrcp.f32 %v3061_v50  ;;  %5393 = vmatprep.mubr.msk.bf16.mxu1 %vm5853_vm2, %v7530_v16  ;;  %v3096_v23 = vmul.f32 %v5750_v14, %v6871_v53 }
 0x838   : > { %v3108_v59 = vpack.c.bf16 %v3095_v1, %v3094_v44  ;;  %5403 = vmatprep.subr.bf16.mxu1 %v7530_v16  ;;  %5761 = vrcp.f32 %v3064_v60 }
 0x839   : > { %v5752_v39 = vpop.eup %5751  ;;  %v3070_v20 = vpop.xlane.xlu1 %3069 }
 0x83a   : > { %v3097_v18 = vmul.f32 %v5752_v39, %v6883_v25  ;;  %5388 = vmatmul.mubr.msk.bf16.vlgmr.msra.gmra.mrb[84].mxu0 %vm903_vm4, %v3108_v59  ;;  %v3067_v11 = vpop.xlane.xlu0 %3066  ;;  %v5754_v43 = vpop.eup %5753 }
 0x83b   : > { %5398 = vmatpush3.bf16.msra.mxu0 %v3303_v54  ;;  %5763 = vrcp.f32 %v3067_v11  ;;  %5399 = vmatprep.mubr.msk.bf16.mxu0 %vm5853_vm2, %v7530_v16  ;;  %v3098_v4 = vmul.f32 %v5754_v43, %v6881_v42 }
 0x83c   : > { %v3109_v19 = vpack.c.bf16 %v3097_v18, %v3096_v23  ;;  %5409 = vmatprep.subr.bf16.mxu0 %v7530_v16  ;;  %5765 = vrcp.f32 %v3070_v20 }
 0x83d   : > { %v5756_v51 = vpop.eup %5755  ;;  %v3562_v55 = vpop.permute.xlu1 %3561 }
 0x83e   : > { %v3099_v53 = vmul.f32 %v5756_v51, %v6892_v37  ;;  %5394 = vmatmul.mubr.msk.bf16.vlgmr.msra.gmra.mrb[100].mxu1 %vm903_vm4, %v3109_v19  ;;  %v3073_v25 = vpop.xlane.xlu0 %3072  ;;  %v5758_v52 = vpop.eup %5757  ;;  %v3567_v14 = vsel %vm485_vm3, %v3562_v55, 0 }
 0x83f   : > { %5404 = vmatpush3.bf16.msra.mxu1 %v6936_v27  ;;  %5767 = vrcp.f32 %v3073_v25  ;;  %5405 = vmatprep.mubr.msk.bf16.mxu1 %vm5853_vm2, %v7530_v16  ;;  %v3100_v56 = vmul.f32 %v5758_v52, %v6890_v31 }
 0x840   : > { %v3110_v54 = vpack.c.bf16 %v3099_v53, %v3098_v4  ;;  %5415 = vmatprep.subr.bf16.mxu1 %v7530_v16 }
 0x841   : > { %v5760_v6 = vpop.eup %5759  ;;  %v3614_v63 = vpop.permute.xlu1 %3613 }
 0x842   : > { %v3101_v42 = vmul.f32 %v5760_v6, %v6900_v34  ;;  %5400 = vmatmul.mubr.msk.bf16.vlgmr.msra.gmra.mrb[88].mxu0 %vm903_vm4, %v3110_v54  ;;  %v3510_v37 = vpop.permute.xlu0 %3509  ;;  %v5762_v32 = vpop.eup %5761 }
 0x843   : > { %5410 = vmatpush3.bf16.msra.mxu0 %v6940_v40  ;;  %5411 = vmatprep.mubr.msk.bf16.mxu0 %vm5853_vm2, %v7530_v16  ;;  %v3102_v13 = vmul.f32 %v5762_v32, %v6898_v35 }
 0x844   : > { %v3111_v27 = vpack.c.bf16 %v3101_v42, %v3100_v56  ;;  %5421 = vmatprep.subr.bf16.mxu0 %v7530_v16 }
 0x845   : > { %v5764_v17 = vpop.eup %5763  ;;  %v3666_v24 = vpop.permute.xlu1 %3665 }
 0x846   : > { %v3103_v2 = vmul.f32 %v5764_v17, %v6908_v9  ;;  %5406 = vmatmul.mubr.msk.bf16.vlgmr.msra.gmra.mrb[104].mxu1 %vm903_vm4, %v3111_v27  ;;  %v3508_v31 = vpop.permute.xlu0 %3507  ;;  %v5766_v34 = vpop.eup %5765  ;;  %v3515_v9 = vsel %vm485_vm3, %v3510_v37, 0  ;;  %v3671_v39 = vsel %vm485_vm3, %v3666_v24, 0 }
 0x847   : > { %5416 = vmatpush3.bf16.msra.mxu1 %v6938_v58  ;;  %5417 = vmatprep.mubr.msk.bf16.mxu1 %vm5853_vm2, %v7530_v16  ;;  %v3104_v44 = vmul.f32 %v5766_v34, %v6906_v0 }
 0x848   : > { %v3112_v40 = vpack.c.bf16 %v3103_v2, %v3102_v13  ;;  %5427 = vmatprep.subr.bf16.mxu1 %v7530_v16 }
 0x849   : > { %v5768_v60 = vpop.eup %5767  ;;  %v3718_v50 = vpop.permute.xlu1 %3717 }
 0x84a   : > { %v3105_v35 = vmul.f32 %v5768_v60, %v6914_v15  ;;  %5412 = vmatmul.mubr.msk.bf16.vlgmr.msra.gmra.mrb[92].mxu0 %vm903_vm4, %v3112_v40  ;;  %v3560_v1 = vpop.permute.xlu0 %3559  ;;  %v3619_v15 = vsel %vm485_vm3, %v3614_v63, 0  ;;  %v3723_v18 = vsel %vm485_vm3, %v3718_v50, 0 }
 0x84b   : > { %5423 = vmatprep.mubr.msk.bf16.mxu0 %vm5853_vm2, %v7530_v16 }
 0x84c   : > { %5422 = vmatpush3.bf16.xpose.msra.mxu0 %v3515_v9  ;;  %v3113_v58 = vpack.c.bf16 %v3105_v35, %v3104_v44 }
 0x84d   : > { %5433 = vmatprep.subr.bf16.mxu0 %v7530_v16  ;;  %v3770_v59 = vpop.permute.xlu1 %3769 }
 0x84e   : > { %5418 = vmatmul.mubr.msk.bf16.vlgmr.msra.gmra.mrb[108].mxu1 %vm903_vm4, %v3113_v58  ;;  %v3612_v0 = vpop.permute.xlu0 %3611  ;;  %v3775_v43 = vsel %vm485_vm3, %v3770_v59, 0 }
 0x84f   : > { %5429 = vmatprep.mubr.msk.bf16.mxu1 %vm5853_vm2, %v7530_v16 }
 0x850   : > { %5428 = vmatpush3.bf16.xpose.msra.mxu1 %v3567_v14 }
 0x851   : > { %5439 = vmatprep.subr.bf16.mxu1 %v7530_v16  ;;  %v3822_v23 = vpop.permute.xlu1 %3821 }
 0x852   : > { %v3664_v20 = vpop.permute.xlu0 %3663  ;;  %v3827_v51 = vsel %vm485_vm3, %v3822_v23, 0 }
 0x853   : > { %5424 = vmatmul.mubr.msk.bf16.vlgmr.msra.gmra.mrb[96].mxu0 %vm485_vm3, %v3508_v31 }
 0x854   : > { %5434 = vmatpush3.bf16.xpose.msra.mxu0 %v3619_v15  ;;  %5435 = vmatprep.mubr.msk.bf16.mxu0 %vm5853_vm2, %v7530_v16 }
 0x855   : > { %5445 = vmatprep.subr.bf16.mxu0 %v7530_v16  ;;  %v3874_v19 = vpop.permute.xlu1 %3873 }
 0x856   : > { %v3716_v11 = vpop.permute.xlu0 %3715  ;;  %v3879_v53 = vsel %vm485_vm3, %v3874_v19, 0 }
 0x857   : > { %5430 = vmatmul.mubr.msk.bf16.vlgmr.msra.gmra.mrb[112].mxu1 %vm485_vm3, %v3560_v1 }
 0x858   : > { %5440 = vmatpush3.bf16.xpose.msra.mxu1 %v3671_v39  ;;  %5441 = vmatprep.mubr.msk.bf16.mxu1 %vm5853_vm2, %v7530_v16 }
 0x859   : > { %5451 = vmatprep.subr.bf16.mxu1 %v7530_v16  ;;  %v3872_v4 = vpop.permute.xlu1 %3871 }
 0x85a   : > { %v3768_v55 = vpop.permute.xlu0 %3767 }
 0x85b   : > { %5436 = vmatmul.mubr.msk.bf16.vlgmr.msra.gmra.mrb[100].mxu0 %vm485_vm3, %v3612_v0 }
 0x85c   : > { %5446 = vmatpush3.bf16.xpose.msra.mxu0 %v3723_v18  ;;  %5447 = vmatprep.mubr.msk.bf16.mxu0 %vm5853_vm2, %v7530_v16 }
 0x85d   : > { %5457 = vmatprep.subr.bf16.mxu0 %v7530_v16  ;;  %v4128_v52 = vpop.permute.xlu1 %4127 }
 0x85e   : > { %v3820_v25 = vpop.permute.xlu0 %3819 }
 0x85f   : > { %5442 = vmatmul.mubr.msk.bf16.vlgmr.msra.gmra.mrb[116].mxu1 %vm485_vm3, %v3664_v20 }
 0x860   : > { %5452 = vmatpush3.bf16.xpose.msra.mxu1 %v3775_v43  ;;  %5453 = vmatprep.mubr.msk.bf16.mxu1 %vm5853_vm2, %v7530_v16 }
 0x861   : > { %5463 = vmatprep.subr.bf16.mxu1 %v7530_v16 }
 0x863   : > { %5448 = vmatmul.mubr.msk.bf16.vlgmr.msra.gmra.mrb[104].mxu0 %vm485_vm3, %v3716_v11 }
 0x864   : > { %5458 = vmatpush3.bf16.xpose.msra.mxu0 %v3827_v51  ;;  %5459 = vmatprep.mubr.msk.bf16.mxu0 %vm5853_vm2, %v7530_v16 }
 0x865   : > { %5469 = vmatprep.subr.bf16.mxu0 %v7530_v16 }
 0x867   : > { %5454 = vmatmul.mubr.msk.bf16.vlgmr.msra.gmra.mrb[120].mxu1 %vm485_vm3, %v3768_v55 }
 0x868   : > { %5464 = vmatpush3.bf16.xpose.msra.mxu1 %v3879_v53  ;;  %5465 = vmatprep.mubr.msk.bf16.mxu1 %vm5853_vm2, %v7530_v16 }
 0x869   : > { %5475 = vmatprep.subr.bf16.mxu1 %v7530_v16 }
 0x86b   : > { %5460 = vmatmul.mubr.msk.bf16.vlgmr.msra.gmra.mrb[108].mxu0 %vm485_vm3, %v3820_v25 }
 0x86c   : > { %5470 = vmatpush3.bf16.msra.mxu0 %v4128_v52  ;;  %5471 = vmatprep.mubr.msk.bf16.mxu0 %vm5853_vm2, %v7530_v16 }
 0x86d   : > { %5481 = vmatprep.subr.bf16.mxu0 %v7530_v16 }
 0x86f   : > { %5466 = vmatmul.mubr.msk.bf16.vlgmr.msra.gmra.mrb[124].mxu1 %vm485_vm3, %v3872_v4 }
 0x870   : > { %5477 = vmatprep.mubr.msk.bf16.mxu1 %vm5853_vm2, %v7530_v16 }
 0x902   : > { %v7034_v54 = vpop.f32.mrb[80].mxu0 }
 0x903   : > { %v5377_v6 = vpop.f32.mrb[81].mxu0 }
 0x904   : > { %v7036_v63 = vpop.f32.mrb[82].mxu0 }
 0x905   : > { %v5378_v42 = vpop.f32.mrb[83].mxu0 }
 0x906   : > { %v7085_v42 = vld [vmem:[%s7494_s3 + $0x60] sm:$0xff] }
 0x909   : > { %v7040_v37 = vpop.f32.mrb[96].mxu1 }
 0x90a   : > { %v5383_v32 = vpop.f32.mrb[97].mxu1 }
 0x90b   : > { %v7042_v27 = vpop.f32.mrb[98].mxu1 }
 0x90c   : > { %v5384_v13 = vpop.f32.mrb[99].mxu1 }
 0x90d   : > { %v7046_v2 = vpop.f32.mrb[84].mxu0  ;;  %v7090_v13 = vld [vmem:[%s7494_s3 + $0x68] sm:$0xff] }
 0x90e   : > { %v5389_v31 = vpop.f32.mrb[85].mxu0 }
 0x90f   : > { %v7048_v34 = vpop.f32.mrb[86].mxu0 }
 0x910   : > { %v5390_v40 = vpop.f32.mrb[87].mxu0 }
 0x911   : > { %v7052_v60 = vpop.f32.mrb[100].mxu1 }
 0x912   : > { %v5395_v44 = vpop.f32.mrb[101].mxu1 }
 0x913   : > { %v7054_v35 = vpop.f32.mrb[102].mxu1 }
 0x914   : > { %v5396_v1 = vpop.f32.mrb[103].mxu1 }
 0x915   : > { %v7058_v58 = vpop.f32.mrb[88].mxu0  ;;  %v7098_v1 = vld [vmem:[%s7494_s3 + $0x70] sm:$0xff] }
 0x916   : > { %v5401_v50 = vpop.f32.mrb[89].mxu0 }
 0x917   : > { %v7060_v14 = vpop.f32.mrb[90].mxu0 }
 0x918   : > { %v5402_v15 = vpop.f32.mrb[91].mxu0 }
 0x919   : > { %v7064_v59 = vpop.f32.mrb[104].mxu1 }
 0x91a   : > { %v5407_v39 = vpop.f32.mrb[105].mxu1 }
 0x91b   : > { %v7066_v20 = vpop.f32.mrb[106].mxu1 }
 0x91c   : > { %v5408_v18 = vpop.f32.mrb[107].mxu1 }
 0x91d   : > { %v7070_v11 = vpop.f32.mrb[92].mxu0 }
 0x91e   : > { %v5413_v43 = vpop.f32.mrb[93].mxu0 }
 0x91f   : > { %v7072_v19 = vpop.f32.mrb[94].mxu0  ;;  %v7108_v43 = vld [vmem:[%s7494_s3 + $0x78] sm:$0xff] }
 0x920   : > { %v5414_v55 = vpop.f32.mrb[95].mxu0 }
 0x921   : > { %v7076_v4 = vpop.f32.mrb[108].mxu1 }
 0x922   : > { %v5419_v53 = vpop.f32.mrb[109].mxu1 }
 0x923   : > { %v7078_v25 = vpop.f32.mrb[110].mxu1 }
 0x924   : > { %v5420_v6 = vpop.f32.mrb[111].mxu1 }
 0x926   : > { %v3551_v32 = vpop.f32.mrb[96].mxu0 }
 0x927   : > { %v7093_v31 = vadd.f32 %v7085_v42, %v3551_v32  ;;  %v5425_v40 = vpop.f32.mrb[97].mxu0 }
 0x928   : > { %v3554_v44 = vpop.f32.mrb[98].mxu0 }
 0x929   : > { %v7101_v50 = vadd.f32 %v7090_v13, %v3554_v44  ;;  %v5426_v15 = vpop.f32.mrb[99].mxu0  ;;  %v3943_v39 = vsel %vm903_vm4, %v7093_v31, -inf }
 0x92a   : > { %3944 = vmax.xlane.f32.xlu0 %v3943_v39  ;;  %v3603_v18 = vpop.f32.mrb[112].mxu1 }
 0x92b   : > { %v7111_v55 = vadd.f32 %v7098_v1, %v3603_v18  ;;  %v5431_v53 = vpop.f32.mrb[113].mxu1  ;;  %v3946_v6 = vsel %vm903_vm4, %v7101_v50, -inf }
 0x92c   : > { %3947 = vmax.xlane.f32.xlu1 %v3946_v6  ;;  %v3606_v32 = vpop.f32.mrb[114].mxu1 }
 0x92d   : > { %v7116_v40 = vadd.f32 %v7108_v43, %v3606_v32  ;;  %v5432_v44 = vpop.f32.mrb[115].mxu1  ;;  %v3949_v15 = vsel %vm903_vm4, %v7111_v55, -inf }
 0x92e   : > { %3950 = vmax.xlane.f32.xlu0 %v3949_v15  ;;  %v3655_v39 = vpop.f32.mrb[100].mxu0 }
 0x92f   : > { %v7121_v52 = vadd.f32 %v7085_v42, %v3655_v39  ;;  %v5437_v18 = vpop.f32.mrb[101].mxu0  ;;  %v3952_v6 = vsel %vm903_vm4, %v7116_v40, -inf }
 0x930   : > { %v3658_v51 = vpop.f32.mrb[102].mxu0 }
 0x931   : > { %v7124_v53 = vadd.f32 %v7090_v13, %v3658_v51  ;;  %v5438_v23 = vpop.f32.mrb[103].mxu0  ;;  %v3955_v32 = vsel %vm903_vm4, %v7121_v52, -inf }
 0x932   : > { %3953 = vmax.xlane.f32.xlu0 %v3952_v6  ;;  %3956 = vmax.xlane.f32.xlu1 %v3955_v32  ;;  %v3707_v44 = vpop.f32.mrb[116].mxu1 }
 0x933   : > { %v7131_v15 = vadd.f32 %v7098_v1, %v3707_v44  ;;  %v5443_v39 = vpop.f32.mrb[117].mxu1  ;;  %v3958_v23 = vsel %vm903_vm4, %v7124_v53, -inf }
 0x934   : > { %v3710_v0 = vpop.f32.mrb[118].mxu1 }
 0x935   : > { %v7134_v18 = vadd.f32 %v7108_v43, %v3710_v0  ;;  %v5444_v51 = vpop.f32.mrb[119].mxu1  ;;  %v3961_v24 = vsel %vm903_vm4, %v7131_v15, -inf }
 0x936   : > { %3959 = vmax.xlane.f32.xlu0 %v3958_v23  ;;  %3962 = vmax.xlane.f32.xlu1 %v3961_v24  ;;  %v3759_v6 = vpop.f32.mrb[104].mxu0 }
 0x937   : > { %v7141_v32 = vadd.f32 %v7085_v42, %v3759_v6  ;;  %v5449_v44 = vpop.f32.mrb[105].mxu0  ;;  %v3964_v51 = vsel %vm903_vm4, %v7134_v18, -inf }
 0x938   : > { %v3762_v56 = vpop.f32.mrb[106].mxu0 }
 0x939   : > { %v7144_v39 = vadd.f32 %v7090_v13, %v3762_v56  ;;  %v5450_v0 = vpop.f32.mrb[107].mxu0  ;;  %v3967_v9 = vsel %vm903_vm4, %v7141_v32, -inf }
 0x93a   : > { %3965 = vmax.xlane.f32.xlu0 %v3964_v51  ;;  %3968 = vmax.xlane.f32.xlu1 %v3967_v9  ;;  %v3811_v23 = vpop.f32.mrb[120].mxu1 }
 0x93b   : > { %v7151_v24 = vadd.f32 %v7098_v1, %v3811_v23  ;;  %v5455_v6 = vpop.f32.mrb[121].mxu1  ;;  %v3970_v0 = vsel %vm903_vm4, %v7144_v39, -inf }
 0x93c   : > { %v3814_v17 = vpop.f32.mrb[122].mxu1 }
 0x93d   : > { %v7154_v44 = vadd.f32 %v7108_v43, %v3814_v17  ;;  %v5456_v56 = vpop.f32.mrb[123].mxu1  ;;  %v3973_v47 = vsel %vm903_vm4, %v7151_v24, -inf }
 0x93e   : > { %3971 = vmax.xlane.f32.xlu0 %v3970_v0  ;;  %3974 = vmax.xlane.f32.xlu1 %v3973_v47  ;;  %v3863_v51 = vpop.f32.mrb[108].mxu0 }
 0x93f   : > { %v7161_v9 = vadd.f32 %v7085_v42, %v3863_v51  ;;  %v5461_v23 = vpop.f32.mrb[109].mxu0  ;;  %v3976_v56 = vsel %vm903_vm4, %v7154_v44, -inf }
 0x940   : > { %v3866_v48 = vpop.f32.mrb[110].mxu0 }
 0x941   : > { %v7164_v6 = vadd.f32 %v7090_v13, %v3866_v48  ;;  %v5462_v17 = vpop.f32.mrb[111].mxu0  ;;  %v3979_v41 = vsel %vm903_vm4, %v7161_v9, -inf }
 0x942   : > { %3977 = vmax.xlane.f32.xlu0 %v3976_v56  ;;  %v3915_v45 = vpop.f32.mrb[124].mxu1  ;;  %3980 = vmax.xlane.f32.xlu1 %v3979_v41  ;;  %v5840_v17 = vld [vmem:[#allocation2 + $0x8] sm:$0xff]  ;;  %v5841_v56 = vld [vmem:[#allocation2 + $0x20] sm:$0xff] }
 0x943   : > { %v7171_v47 = vadd.f32 %v7098_v1, %v3915_v45  ;;  %v5467_v42 = vpop.f32.mrb[125].mxu1  ;;  %v3982_v23 = vsel %vm903_vm4, %v7164_v6, -inf  ;;  %v5837_v45 = vld [vmem:[#allocation2 + $0x10] sm:$0xff]  ;;  %v5838_v1 = vld [vmem:[#allocation2 + $0x18] sm:$0xff] }
 0x944   : > { %v3918_v0 = vpop.f32.mrb[126].mxu1 }
 0x945   : > { %v7174_v51 = vadd.f32 %v7108_v43, %v3918_v0  ;;  %v5468_v48 = vpop.f32.mrb[127].mxu1  ;;  %v3985_v13 = vsel %vm903_vm4, %v7171_v47, -inf  ;;  %v5839_v43 = vld [vmem:[#allocation2 + $0x28] sm:$0xff] }
 0x946   : > { %3986 = vmax.xlane.f32.xlu1 %v3985_v13  ;;  %3983 = vmax.xlane.f32.xlu0 %v3982_v23 }
 0x947   : > { %v3988_v41 = vsel %vm903_vm4, %v7174_v51, -inf }
 0x94a   : > { %3989 = vmax.xlane.f32.xlu0 %v3988_v41 }
 0x957   : > { %4221 = vrot.lane.b32.xlu1 %v5837_v45, %s5864_s23 }
 0x95b   : > { %4268 = vrot.lane.b32.xlu1 %v5838_v1, %s5864_s23 }
 0x95f   : > { %4362 = vrot.lane.b32.xlu1 %v5839_v43, %s5864_s23 }
 0x960   : > { %4174 = vrot.lane.b32.xlu0 %v5840_v17, %s5864_s23 }
 0x964   : > { %4315 = vrot.lane.b32.xlu0 %v5841_v56, %s5864_s23 }
 0x9b7   : > { %v3945_v42 = vpop.xlane.xlu0 %3944 }
 0x9b8   : > { %v3991_v0 = vsub.f32 %v7093_v31, %v3945_v42 }
 0x9b9   : > { %v3948_v48 = vpop.xlane.xlu1 %3947 }
 0x9ba   : > { %v4007_v13 = vmul.f32 1.442695, %v3991_v0  ;;  %v3992_v23 = vsub.f32 %v7101_v50, %v3948_v48 }
 0x9bb   : > { %v3951_v41 = vpop.xlane.xlu0 %3950 }
 0x9bc   : > { %5769 = vpow2.f32 %v4007_v13  ;;  %v4009_v45 = vmul.f32 1.442695, %v3992_v23  ;;  %v3993_v1 = vsub.f32 %v7111_v55, %v3951_v41 }
 0x9be   : > { %5771 = vpow2.f32 %v4009_v45  ;;  %v4011_v43 = vmul.f32 1.442695, %v3993_v1 }
 0x9bf   : > { %v3957_v30 = vpop.xlane.xlu1 %3956  ;;  %v3954_v38 = vpop.xlane.xlu0 %3953 }
 0x9c0   : > { %5773 = vpow2.f32 %v4011_v43  ;;  %v3995_v17 = vsub.f32 %v7121_v52, %v3957_v30  ;;  %v3994_v56 = vsub.f32 %v7116_v40, %v3954_v38 }
 0x9c2   : > { %v4015_v29 = vmul.f32 1.442695, %v3995_v17  ;;  %v4013_v31 = vmul.f32 1.442695, %v3994_v56 }
 0x9c3   : > { %v3963_v42 = vpop.xlane.xlu1 %3962  ;;  %v3960_v0 = vpop.xlane.xlu0 %3959 }
 0x9c4   : > { %5775 = vpow2.f32 %v4015_v29  ;;  %v3997_v50 = vsub.f32 %v7131_v15, %v3963_v42  ;;  %v3996_v48 = vsub.f32 %v7124_v53, %v3960_v0 }
 0x9c5   : > { %5777 = vpow2.f32 %v4013_v31 }
 0x9c6   : > { %v7194_v55 = vpop.eup %5769  ;;  %v4019_v13 = vmul.f32 1.442695, %v3997_v50  ;;  %v4017_v23 = vmul.f32 1.442695, %v3996_v48 }
 0x9c7   : > { %v3969_v41 = vpop.xlane.xlu1 %3968  ;;  %v3966_v45 = vpop.xlane.xlu0 %3965  ;;  %v4039_v30 = vsel %vm903_vm4, %v7194_v55, 0.0 }
 0x9c8   : > { %v7198_v38 = vpop.eup %5771  ;;  %5779 = vpow2.f32 %v4019_v13  ;;  %v3999_v52 = vsub.f32 %v7141_v32, %v3969_v41  ;;  %v3998_v29 = vsub.f32 %v7134_v18, %v3966_v45  ;;  %4040 = vadd.xlane.f32.xlu1 %v4039_v30 }
 0x9c9   : > { %5781 = vpow2.f32 %v4017_v23  ;;  %v4042_v40 = vsel %vm903_vm4, %v7198_v38, 0.0 }
 0x9ca   : > { %v7204_v53 = vpop.eup %5773  ;;  %v4023_v15 = vmul.f32 1.442695, %v3999_v52  ;;  %v4021_v1 = vmul.f32 1.442695, %v3998_v29  ;;  %4043 = vadd.xlane.f32.xlu0 %v4042_v40 }
 0x9cb   : > { %v3975_v43 = vpop.xlane.xlu1 %3974  ;;  %v3972_v17 = vpop.xlane.xlu0 %3971  ;;  %v4045_v56 = vsel %vm903_vm4, %v7204_v53, 0.0 }
 0x9cc   : > { %5783 = vpow2.f32 %v4023_v15  ;;  %v4001_v32 = vsub.f32 %v7151_v24, %v3975_v43  ;;  %v4000_v18 = vsub.f32 %v7144_v39, %v3972_v17  ;;  %4046 = vadd.xlane.f32.xlu1 %v4045_v56 }
 0x9cd   : > { %5785 = vpow2.f32 %v4021_v1 }
 0x9ce   : > { %v7210_v31 = vpop.eup %5775  ;;  %v4027_v42 = vmul.f32 1.442695, %v4001_v32  ;;  %v4025_v0 = vmul.f32 1.442695, %v4000_v18 }
 0x9cf   : > { %v7212_v50 = vpop.eup %5777  ;;  %v3981_v48 = vpop.xlane.xlu1 %3980  ;;  %v4051_v23 = vsel %vm903_vm4, %v7210_v31, 0.0 }
 0x9d0   : > { %v3978_v13 = vpop.xlane.xlu0 %3977  ;;  %5787 = vpow2.f32 %v4027_v42  ;;  %v4003_v41 = vsub.f32 %v7161_v9, %v3981_v48  ;;  %4052 = vadd.xlane.f32.xlu1 %v4051_v23  ;;  %v4048_v39 = vsel %vm903_vm4, %v7212_v50, 0.0 }
 0x9d1   : > { %v4002_v24 = vsub.f32 %v7154_v44, %v3978_v13  ;;  %5789 = vpow2.f32 %v4025_v0  ;;  %4049 = vadd.xlane.f32.xlu0 %v4048_v39 }
 0x9d2   : > { %v7220_v45 = vpop.eup %5779  ;;  %v4031_v30 = vmul.f32 1.442695, %v4003_v41 }
 0x9d3   : > { %v4029_v52 = vmul.f32 1.442695, %v4002_v24  ;;  %v7222_v29 = vpop.eup %5781  ;;  %v3987_v40 = vpop.xlane.xlu1 %3986  ;;  %v4057_v1 = vsel %vm903_vm4, %v7220_v45, 0.0 }
 0x9d4   : > { %v3984_v15 = vpop.xlane.xlu0 %3983  ;;  %5791 = vpow2.f32 %v4031_v30  ;;  %v4005_v44 = vsub.f32 %v7171_v47, %v3987_v40  ;;  %4058 = vadd.xlane.f32.xlu1 %v4057_v1  ;;  %v4054_v43 = vsel %vm903_vm4, %v7222_v29, 0.0 }
 0x9d5   : > { %v4004_v9 = vsub.f32 %v7164_v6, %v3984_v15  ;;  %5793 = vpow2.f32 %v4029_v52  ;;  %4055 = vadd.xlane.f32.xlu0 %v4054_v43 }
 0x9d6   : > { %v7230_v17 = vpop.eup %5783  ;;  %v4035_v56 = vmul.f32 1.442695, %v4005_v44 }
 0x9d7   : > { %v4033_v32 = vmul.f32 1.442695, %v4004_v9  ;;  %v7232_v18 = vpop.eup %5785  ;;  %v4063_v0 = vsel %vm903_vm4, %v7230_v17, 0.0 }
 0x9d8   : > { %v3990_v42 = vpop.xlane.xlu0 %3989  ;;  %5795 = vpow2.f32 %v4035_v56  ;;  %4064 = vadd.xlane.f32.xlu1 %v4063_v0  ;;  %v4060_v6 = vsel %vm903_vm4, %v7232_v18, 0.0  ;;  %v7532_v0 = vpack.c.bf16 %v7042_v27, %v7040_v37 }
 0x9d9   : > { %v4006_v47 = vsub.f32 %v7174_v51, %v3990_v42  ;;  %5797 = vpow2.f32 %v4033_v32  ;;  %4061 = vadd.xlane.f32.xlu0 %v4060_v6  ;;  %v5842_v32 = vld [vmem:[#allocation2 + $0x38] sm:$0xff]  ;;  %v7531_v42 = vpack.c.bf16 %v6686_v46, %v6684_v36  ;;  %v7533_v6 = vpack.c.bf16 %v6698_v61, %v6696_v5 }
 0x9da   : > { %v7239_v48 = vpop.eup %5787  ;;  %v7535_v36 = vpack.c.bf16 %v7054_v35, %v7052_v60  ;;  %v7536_v46 = vpack.c.bf16 %v7036_v63, %v7034_v54  ;;  %v7537_v5 = vpack.c.bf16 %v6710_v26, %v6708_v62  ;;  %v7540_v61 = vpack.c.bf16 %v6704_v57, %v6702_v7  ;;  %v4222_v54 = vpop.permute.xlu1 %4221 }
 0x9db   : > { %v4037_v13 = vmul.f32 1.442695, %v4006_v47  ;;  %v7241_v23 = vpop.eup %5789  ;;  %v4069_v24 = vsel %vm903_vm4, %v7239_v48, 0.0  ;;  %v5843_v47 = vld [vmem:[#allocation2 + $0x30] sm:$0xff] }
 0x9dc   : > { %v4175_v41 = vpop.permute.xlu0 %4174  ;;  %4070 = vadd.xlane.f32.xlu1 %v4069_v24  ;;  %v4066_v51 = vsel %vm903_vm4, %v7241_v23, 0.0 }
 0x9dd   : > { %5799 = vpow2.f32 %v4037_v13  ;;  %5476 = vmatpush3.bf16.msra.mxu1 %v4175_v41  ;;  %4067 = vadd.xlane.f32.xlu0 %v4066_v51  ;;  %v7534_v13 = vpack.c.bf16 %v6680_v10, %v6678_v49  ;;  %v7538_v49 = vpack.c.bf16 %v6692_v28, %v6690_v3  ;;  %v7539_v10 = vpack.c.bf16 %v7048_v34, %v7046_v2 }
 0x9de   : > { %5487 = vmatprep.subr.bf16.mxu1 %v7530_v16  ;;  %v7248_v39 = vpop.eup %5791  ;;  %v4269_v63 = vpop.permute.xlu1 %4268 }
 0x9df   : > { %v7250_v30 = vpop.eup %5793  ;;  %v4075_v52 = vsel %vm903_vm4, %v7248_v39, 0.0 }
 0x9e0   : > { %4076 = vadd.xlane.f32.xlu1 %v4075_v52  ;;  %v4072_v40 = vsel %vm903_vm4, %v7250_v30, 0.0  ;;  %v4316_v62 = vpop.permute.xlu0 %4315 }
 0x9e1   : > { %4073 = vadd.xlane.f32.xlu0 %v4072_v40 }
 0x9e2   : > { %v7256_v15 = vpop.eup %5795  ;;  %v7310_v37 = vpop.permute.xlu1 %4362 }
 0x9e3   : > { %v7258_v1 = vpop.eup %5797  ;;  %v4081_v44 = vsel %vm903_vm4, %v7256_v15, 0.0 }
 0x9e4   : > { %4082 = vadd.xlane.f32.xlu1 %v4081_v44  ;;  %v4078_v9 = vsel %vm903_vm4, %v7258_v1, 0.0 }
 0x9e5   : > { %4079 = vadd.xlane.f32.xlu0 %v4078_v9 }
 0x9e7   : > { %v7264_v43 = vpop.eup %5799 }
 0x9e8   : > { %v4084_v56 = vsel %vm903_vm4, %v7264_v43, 0.0 }
 0x9e9   : > { %4085 = vadd.xlane.f32.xlu0 %v4084_v56 }
 0x9f5   : > { %4456 = vrot.lane.b32.xlu1 %v5842_v32, %s5864_s23 }
 0x9f9   : > { %4521 = vrot.lane.b32.xlu1 %v7531_v42, %s5865_s9 }
 0x9fd   : > { %4545 = vrot.lane.b32.xlu1 %v7532_v0, %s5866_s10 }
 0x9ff   : > { %4409 = vrot.lane.b32.xlu0 %v5843_v47, %s5864_s23 }
 0xa01   : > { %4525 = vrot.lane.b32.xlu1 %v7533_v6, %s5865_s9 }
 0xa03   : > { %4519 = vrot.lane.b32.xlu0 %v7534_v13, %s5865_s9 }
 0xa05   : > { %4549 = vrot.lane.b32.xlu1 %v7535_v36, %s5866_s10 }
 0xa07   : > { %4543 = vrot.lane.b32.xlu0 %v7536_v46, %s5866_s10 }
 0xa09   : > { %4529 = vrot.lane.b32.xlu1 %v7537_v5, %s5865_s9 }
 0xa0b   : > { %4523 = vrot.lane.b32.xlu0 %v7538_v49, %s5865_s9 }
 0xa0f   : > { %4547 = vrot.lane.b32.xlu0 %v7539_v10, %s5866_s10 }
 0xa13   : > { %4527 = vrot.lane.b32.xlu0 %v7540_v61, %s5865_s9 }
 0xa55   : > { %v4041_v26 = vpop.xlane.xlu1 %4040 }
 0xa56   : > { %5801 = vrcp.f32 %v4041_v26 }
 0xa57   : > { %v4044_v27 = vpop.xlane.xlu0 %4043 }
 0xa58   : > { %5803 = vrcp.f32 %v4044_v27 }
 0xa59   : > { %v4047_v3 = vpop.xlane.xlu1 %4046 }
 0xa5a   : > { %5805 = vrcp.f32 %v4047_v3 }
 0xa5d   : > { %v4053_v28 = vpop.xlane.xlu1 %4052 }
 0xa5e   : > { %v4050_v60 = vpop.xlane.xlu0 %4049 }
 0xa5f   : > { %5807 = vrcp.f32 %v4050_v60 }
 0xa60   : > { %v5802_v2 = vpop.eup %5801  ;;  %5809 = vrcp.f32 %v4053_v28 }
 0xa61   : > { %v4059_v34 = vpop.xlane.xlu1 %4058  ;;  %v4103_v57 = vmul.f32 %v5802_v2, %v7194_v55 }
 0xa62   : > { %v5804_v35 = vpop.eup %5803  ;;  %v4056_v7 = vpop.xlane.xlu0 %4055 }
 0xa63   : > { %v4104_v41 = vmul.f32 %v5804_v35, %v7198_v38  ;;  %5811 = vrcp.f32 %v4056_v7 }
 0xa64   : > { %5813 = vrcp.f32 %v4059_v34  ;;  %v5806_v40 = vpop.eup %5805 }
 0xa65   : > { %v4065_v24 = vpop.xlane.xlu1 %4064  ;;  %v4119_v51 = vpack.c.bf16 %v4104_v41, %v4103_v57  ;;  %v4105_v55 = vmul.f32 %v5806_v40, %v7204_v53 }
 0xa66   : > { %v4062_v52 = vpop.xlane.xlu0 %4061 }
 0xa67   : > { %5815 = vrcp.f32 %v4062_v52  ;;  %5472 = vmatmul.mubr.msk.bf16.vlgmr.msra.gmra.mrb[112].mxu0 %vm903_vm4, %v4119_v51 }
 0xa68   : > { %5482 = vmatpush3.bf16.msra.mxu0 %v4222_v54  ;;  %5483 = vmatprep.mubr.msk.bf16.mxu0 %vm5853_vm2, %v7530_v16  ;;  %5817 = vrcp.f32 %v4065_v24 }
 0xa69   : > { %v5808_v44 = vpop.eup %5807  ;;  %v4071_v9 = vpop.xlane.xlu1 %4070  ;;  %5493 = vmatprep.subr.bf16.mxu0 %v7530_v16 }
 0xa6a   : > { %v4106_v38 = vmul.f32 %v5808_v44, %v7212_v50  ;;  %v4068_v56 = vpop.xlane.xlu0 %4067  ;;  %v5810_v32 = vpop.eup %5809 }
 0xa6b   : > { %5819 = vrcp.f32 %v4068_v56  ;;  %v4107_v6 = vmul.f32 %v5810_v32, %v7210_v31 }
 0xa6c   : > { %v4120_v42 = vpack.c.bf16 %v4106_v38, %v4105_v55  ;;  %5821 = vrcp.f32 %v4071_v9  ;;  %v7541_v55 = vpack.c.bf16 %v7060_v14, %v7058_v58 }
 0xa6d   : > { %v5812_v0 = vpop.eup %5811  ;;  %v4077_v47 = vpop.xlane.xlu1 %4076 }
 0xa6e   : > { %v4108_v13 = vmul.f32 %v5812_v0, %v7222_v29  ;;  %5478 = vmatmul.mubr.msk.bf16.vlgmr.msra.gmra.mrb[128].mxu1 %vm903_vm4, %v4120_v42  ;;  %v4074_v36 = vpop.xlane.xlu0 %4073  ;;  %v5814_v46 = vpop.eup %5813 }
 0xa6f   : > { %5488 = vmatpush3.bf16.msra.mxu1 %v4269_v63  ;;  %5823 = vrcp.f32 %v4074_v36  ;;  %5489 = vmatprep.mubr.msk.bf16.mxu1 %vm5853_vm2, %v7530_v16  ;;  %v4109_v5 = vmul.f32 %v5814_v46, %v7220_v45  ;;  %v7542_v36 = vpack.c.bf16 %v7066_v20, %v7064_v59  ;;  %v7544_v20 = vpack.c.bf16 %v6722_v22, %v6720_v21 }
 0xa70   : > { %v4121_v53 = vpack.c.bf16 %v4108_v13, %v4107_v6  ;;  %5499 = vmatprep.subr.bf16.mxu1 %v7530_v16  ;;  %5825 = vrcp.f32 %v4077_v47  ;;  %v7546_v22 = vpack.c.bf16 %v7078_v25, %v7076_v4  ;;  %v7547_v4 = vld [vmem:[#allocation3_spill] sm:$0xff] }
 0xa71   : > { %v5816_v50 = vpop.eup %5815  ;;  %v4083_v49 = vpop.xlane.xlu1 %4082  ;;  %v7548_v25 = vpack.c.bf16 %v6317_v33, %v7547_v4 }
 0xa72   : > { %v4110_v31 = vmul.f32 %v5816_v50, %v7232_v18  ;;  %5484 = vmatmul.mubr.msk.bf16.vlgmr.msra.gmra.mrb[116].mxu0 %vm903_vm4, %v4121_v53  ;;  %v4080_v29 = vpop.xlane.xlu0 %4079  ;;  %v5818_v10 = vpop.eup %5817 }
 0xa73   : > { %5494 = vmatpush3.bf16.msra.mxu0 %v4316_v62  ;;  %5827 = vrcp.f32 %v4080_v29  ;;  %5495 = vmatprep.mubr.msk.bf16.mxu0 %vm5853_vm2, %v7530_v16  ;;  %v4111_v63 = vmul.f32 %v5818_v10, %v7230_v17 }
 0xa74   : > { %v4122_v61 = vpack.c.bf16 %v4110_v31, %v4109_v5  ;;  %5505 = vmatprep.subr.bf16.mxu0 %v7530_v16  ;;  %5829 = vrcp.f32 %v4083_v49  ;;  %v7543_v5 = vpack.c.bf16 %v6716_v8, %v6714_v12  ;;  %v7545_v8 = vpack.c.bf16 %v7072_v19, %v7070_v11 }
 0xa75   : > { %v5820_v54 = vpop.eup %5819  ;;  %v4457_v35 = vpop.permute.xlu1 %4456 }
 0xa76   : > { %v4112_v45 = vmul.f32 %v5820_v54, %v7241_v23  ;;  %5490 = vmatmul.mubr.msk.bf16.vlgmr.msra.gmra.mrb[132].mxu1 %vm903_vm4, %v4122_v61  ;;  %v4086_v18 = vpop.xlane.xlu0 %4085  ;;  %v5822_v26 = vpop.eup %5821 }
 0xa77   : > { %5500 = vmatpush3.bf16.msra.mxu1 %v7310_v37  ;;  %5831 = vrcp.f32 %v4086_v18  ;;  %5501 = vmatprep.mubr.msk.bf16.mxu1 %vm5853_vm2, %v7530_v16  ;;  %v4113_v3 = vmul.f32 %v5822_v26, %v7239_v48 }
 0xa78   : > { %v4123_v62 = vpack.c.bf16 %v4112_v45, %v4111_v63  ;;  %5511 = vmatprep.subr.bf16.mxu1 %v7530_v16 }
 0xa79   : > { %v5824_v27 = vpop.eup %5823 }
 0xa7a   : > { %v4114_v17 = vmul.f32 %v5824_v27, %v7250_v30  ;;  %5496 = vmatmul.mubr.msk.bf16.vlgmr.msra.gmra.mrb[120].mxu0 %vm903_vm4, %v4123_v62  ;;  %v4410_v23 = vpop.permute.xlu0 %4409  ;;  %v5826_v28 = vpop.eup %5825 }
 0xa7b   : > { %5506 = vmatpush3.bf16.msra.mxu0 %v4410_v23  ;;  %5507 = vmatprep.mubr.msk.bf16.mxu0 %vm5853_vm2, %v7530_v16  ;;  %v4115_v2 = vmul.f32 %v5826_v28, %v7248_v39  ;;  %v5575_v39 = vld [vmem:[%s7495_s4] sm:$0xff]  }
 0xa7c   : > { %v4124_v37 = vpack.c.bf16 %v4114_v17, %v4113_v3  ;;  %5517 = vmatprep.subr.bf16.mxu0 %v5575_v39 }
 0xa7d   : > { %v5828_v60 = vpop.eup %5827 }
 0xa7e   : > { %v4116_v34 = vmul.f32 %v5828_v60, %v7258_v1  ;;  %5502 = vmatmul.mubr.msk.bf16.vlgmr.msra.gmra.mrb[136].mxu1 %vm903_vm4, %v4124_v37  ;;  %v5830_v48 = vpop.eup %5829  ;;  %v4520_v11 = vpop.permute.xlu0 %4519 }
 0xa7f   : > { %5512 = vmatpush3.bf16.msra.mxu1 %v4457_v35  ;;  %5513 = vmatprep.mubr.msk.bf16.mxu1 %vm5853_vm2, %v7530_v16  ;;  %v4117_v57 = vmul.f32 %v5830_v48, %v7256_v15  ;;  %v5576_v16 = vld [vmem:[%s7495_s4 + $0x8] sm:$0xff]   ;;  %v4522_v37 = vpop.permute.xlu1 %4521 }
 0xa80   : > { %v4125_v30 = vpack.c.bf16 %v4116_v34, %v4115_v2 }
 0xa81   : > { %v5832_v7 = vpop.eup %5831 }
 0xa82   : > { %v4118_v41 = vmul.f32 %v5832_v7, %v7264_v43  ;;  %5508 = vmatmul.mubr.msk.bf16.vlgmr.msra.gmra.mrb[124].mxu0 %vm903_vm4, %v4125_v30  ;;  %v4544_v19 = vpop.permute.xlu0 %4543  ;;  %v4585_v7 = vsel %vm485_vm3, %v7548_v25, %v4520_v11  ;;  %v7567_v11 = vld [vmem:[#allocation17_spill] sm:$0xff] }
 0xa83   : > { %5518 = vmatpush3.bf16.msra.mxu0 %v5575_v39  ;;  %v4546_v2 = vpop.permute.xlu1 %4545 }
 0xa84   : > { %v4126_v24 = vpack.c.bf16 %v4118_v41, %v4117_v57  ;;  %5519 = vmatprep.subr.bf16.mxu0 %v5576_v16  ;;  %v4608_v57 = vsel %vm903_vm4, %v4585_v7, %v4544_v19  ;;  %v7568_v19 = vld [vmem:[#allocation16_spill] sm:$0xff] }
 0xa86   : > { %5514 = vmatmul.mubr.msk.bf16.vlgmr.msra.gmra.mrb[140].mxu1 %vm903_vm4, %v4126_v24  ;;  %v4524_v60 = vpop.permute.xlu0 %4523 }
 0xa87   : > { %5520 = vmatpush3.bf16.msra.mxu0 %v5576_v16  ;;  %v4526_v35 = vpop.permute.xlu1 %4525  ;;  %v7549_v16 = vld [vmem:[#allocation5_spill] sm:$0xff] }
 0xa8a   : > { %v4548_v34 = vpop.permute.xlu0 %4547 }
 0xa8b   : > { %v4550_v30 = vpop.permute.xlu1 %4549 }
 0xa8e   : > { %v4528_v48 = vpop.permute.xlu0 %4527 }
 0xa8f   : > { %v4530_v39 = vpop.permute.xlu1 %4529 }
 0xb3a   : > { %v4167_v15 = vpop.f32.mrb[112].mxu0 }
 0xb3b   : > { %v5473_v1 = vpop.f32.mrb[113].mxu0 }
 0xb3c   : > { %v4170_v43 = vpop.f32.mrb[114].mxu0 }
 0xb3d   : > { %v4503_v51 = vpack.c.bf16 %v4170_v43, %v4167_v15  ;;  %v5474_v52 = vpop.f32.mrb[115].mxu0  ;;  %v7550_v15 = vld [vmem:[#allocation4_spill] sm:$0xff] }
 0xb3e   : > { %v7551_v1 = vpack.c.bf16 %v7549_v16, %v7550_v15 }
 0xb3f   : > { %4567 = vrot.lane.b32.xlu0 %v4503_v51, %s5867_s15 }
 0xb40   : > { %v4588_v43 = vsel %vm485_vm3, %v7551_v1, %v4522_v37  ;;  %v7569_v37 = vpack.c.bf16 %v7567_v11, %v7568_v19 }
 0xb41   : > { %v4214_v40 = vpop.f32.mrb[128].mxu1  ;;  %v4610_v51 = vsel %vm903_vm4, %v4588_v43, %v4546_v2 }
 0xb42   : > { %v5479_v44 = vpop.f32.mrb[129].mxu1 }
 0xb43   : > { %v4217_v9 = vpop.f32.mrb[130].mxu1  ;;  %4551 = vrot.lane.b32.xlu0 %v7541_v55, %s5866_s10  ;;  %v7552_v44 = vld [vmem:[#allocation7_spill] sm:$0xff] }
 0xb44   : > { %v4504_v38 = vpack.c.bf16 %v4217_v9, %v4214_v40  ;;  %v5480_v56 = vpop.f32.mrb[131].mxu1  ;;  %v7553_v9 = vld [vmem:[#allocation6_spill] sm:$0xff] }
 0xb45   : > { %v4261_v32 = vpop.f32.mrb[116].mxu0  ;;  %v7554_v55 = vpack.c.bf16 %v7552_v44, %v7553_v9 }
 0xb46   : > { %4569 = vrot.lane.b32.xlu1 %v4504_v38, %s5867_s15  ;;  %v5485_v42 = vpop.f32.mrb[117].mxu0 }
 0xb47   : > { %v4264_v0 = vpop.f32.mrb[118].mxu0  ;;  %v4591_v38 = vsel %vm485_vm3, %v7554_v55, %v4524_v60 }
 0xb48   : > { %v4505_v47 = vpack.c.bf16 %v4264_v0, %v4261_v32  ;;  %v5486_v6 = vpop.f32.mrb[119].mxu0  ;;  %v4612_v56 = vsel %vm903_vm4, %v4591_v38, %v4548_v34 }
 0xb49   : > { %v4308_v13 = vpop.f32.mrb[132].mxu1  ;;  %v7556_v6 = vld [vmem:[#allocation8_spill] sm:$0xff] }
 0xb4a   : > { %4553 = vrot.lane.b32.xlu1 %v7542_v36, %s5866_s10  ;;  %4571 = vrot.lane.b32.xlu0 %v4505_v47, %s5867_s15  ;;  %v5491_v46 = vpop.f32.mrb[133].mxu1  ;;  %v7555_v47 = vld [vmem:[#allocation9_spill] sm:$0xff] }
 0xb4b   : > { %v4311_v58 = vpop.f32.mrb[134].mxu1 }
 0xb4c   : > { %v4506_v14 = vpack.c.bf16 %v4311_v58, %v4308_v13  ;;  %v5492_v53 = vpop.f32.mrb[135].mxu1  ;;  %v7557_v13 = vpack.c.bf16 %v7555_v47, %v7556_v6 }
 0xb4d   : > { %v4355_v50 = vpop.f32.mrb[120].mxu0 }
 0xb4e   : > { %4531 = vrot.lane.b32.xlu0 %v7543_v5, %s5865_s9  ;;  %4573 = vrot.lane.b32.xlu1 %v4506_v14, %s5867_s15  ;;  %v5497_v31 = vpop.f32.mrb[121].mxu0  ;;  %v4594_v36 = vsel %vm485_vm3, %v7557_v13, %v4526_v35  ;;  %v7559_v5 = vld [vmem:[#allocation10_spill] sm:$0xff] }
 0xb4f   : > { %v4358_v49 = vpop.f32.mrb[122].mxu0  ;;  %v4614_v46 = vsel %vm903_vm4, %v4594_v36, %v4550_v30 }
 0xb50   : > { %v4507_v29 = vpack.c.bf16 %v4358_v49, %v4355_v50  ;;  %v5498_v10 = vpop.f32.mrb[123].mxu0  ;;  %v7558_v50 = vld [vmem:[#allocation11_spill] sm:$0xff] }
 0xb51   : > { %v4402_v59 = vpop.f32.mrb[136].mxu1  ;;  %v7560_v31 = vpack.c.bf16 %v7558_v50, %v7559_v5 }
 0xb52   : > { %4533 = vrot.lane.b32.xlu1 %v7544_v20, %s5865_s9  ;;  %4575 = vrot.lane.b32.xlu0 %v4507_v29, %s5867_s15  ;;  %v5503_v61 = vpop.f32.mrb[137].mxu1 }
 0xb53   : > { %v4405_v54 = vpop.f32.mrb[138].mxu1  ;;  %v4597_v49 = vsel %vm485_vm3, %v7560_v31, %v4528_v48  ;;  %v7561_v61 = vld [vmem:[#allocation13_spill] sm:$0xff]  ;;  %v4952_v48 = vld [vmem:[%s7496_s5] ss:$0 sm:$0xff] }
 0xb54   : > { %v4508_v63 = vpack.c.bf16 %v4405_v54, %v4402_v59  ;;  %v5504_v45 = vpop.f32.mrb[139].mxu1  ;;  %v7562_v54 = vld [vmem:[#allocation12_spill] sm:$0xff] }
 0xb55   : > { %v4449_v12 = vpop.f32.mrb[124].mxu0 }
 0xb56   : > { %4555 = vrot.lane.b32.xlu0 %v7545_v8, %s5866_s10  ;;  %4577 = vrot.lane.b32.xlu1 %v4508_v63, %s5867_s15  ;;  %v5509_v18 = vpop.f32.mrb[125].mxu0  ;;  %v7563_v63 = vpack.c.bf16 %v7561_v61, %v7562_v54 }
 0xb57   : > { %v4452_v26 = vpop.f32.mrb[126].mxu0 }
 0xb58   : > { %v4509_v62 = vpack.c.bf16 %v4452_v26, %v4449_v12  ;;  %v5510_v27 = vpop.f32.mrb[127].mxu0  ;;  %v4600_v45 = vsel %vm485_vm3, %v7563_v63, %v4530_v39 }
 0xb59   : > { %v4496_v21 = vpop.f32.mrb[140].mxu1  ;;  %v7565_v27 = vld [vmem:[#allocation14_spill] sm:$0xff] }
 0xb5a   : > { %4557 = vrot.lane.b32.xlu1 %v7546_v22, %s5866_s10  ;;  %v5515_v3 = vpop.f32.mrb[141].mxu1  ;;  %4579 = vrot.lane.b32.xlu0 %v4509_v62, %s5867_s15  ;;  %v7564_v62 = vld [vmem:[#allocation15_spill] sm:$0xff] }
 0xb5b   : > { %v4499_v17 = vpop.f32.mrb[142].mxu1 }
 0xb5c   : > { %v4510_v23 = vpack.c.bf16 %v4499_v17, %v4496_v21  ;;  %v5516_v28 = vpop.f32.mrb[143].mxu1  ;;  %v7566_v21 = vpack.c.bf16 %v7564_v62, %v7565_v27 }
 0xb5e   : > { %4581 = vrot.lane.b32.xlu1 %v4510_v23, %s5867_s15 }
 0xbb1   : > { %v4568_v41 = vpop.permute.xlu0 %4567 }
 0xbb2   : > { %v4625_v24 = vsel %vm4623_vm5, %v4608_v57, %v4568_v41 }
 0xbb3   : > { %5521 = vmatprep.mubr.msk.bf16.mxu0 %vm335_vm0, %v4625_v24 }
 0xbb5   : > { %v4552_v52 = vpop.permute.xlu0 %4551 }
 0xbb6   : > { %v4616_v29 = vsel %vm903_vm4, %v4597_v49, %v4552_v52 }
 0xbb8   : > { %v4570_v40 = vpop.permute.xlu1 %4569 }
 0xbb9   : > { %v4627_v33 = vsel %vm4623_vm5, %v4610_v51, %v4570_v40 }
 0xbba   : > { %5522 = vmatmul.mubr.msk.bf16.vlgmr.msra.gmra.mrb[128].mxu0 %vm335_vm0, %v4627_v33 }
 0xbbc   : > { %v4554_v32 = vpop.permute.xlu1 %4553  ;;  %v4572_v42 = vpop.permute.xlu0 %4571 }
 0xbbd   : > { %v4629_v0 = vsel %vm4623_vm5, %v4612_v56, %v4572_v42  ;;  %v4618_v12 = vsel %vm903_vm4, %v4600_v45, %v4554_v32 }
 0xbbe   : > { %5525 = vmatprep.mubr.msk.bf16.mxu0 %vm335_vm0, %v4629_v0 }
 0xbc0   : > { %v4574_v58 = vpop.permute.xlu1 %4573  ;;  %v4532_v14 = vpop.permute.xlu0 %4531 }
 0xbc1   : > { %v4631_v53 = vsel %vm4623_vm5, %v4614_v46, %v4574_v58  ;;  %v4603_v22 = vsel %vm485_vm3, %v7566_v21, %v4532_v14 }
 0xbc2   : > { %5526 = vmatmul.mubr.msk.bf16.gmra.mrb[132].mxu0 %vm335_vm0, %v4631_v53 }
 0xbc4   : > { %v4534_v10 = vpop.permute.xlu1 %4533  ;;  %v4576_v59 = vpop.permute.xlu0 %4575 }
 0xbc5   : > { %v4633_v20 = vsel %vm4623_vm5, %v4616_v29, %v4576_v59  ;;  %v4606_v60 = vsel %vm485_vm3, %v7569_v37, %v4534_v10 }
 0xbc6   : > { %5529 = vmatprep.mubr.msk.bf16.mxu0 %vm335_vm0, %v4633_v20 }
 0xbc8   : > { %v4578_v8 = vpop.permute.xlu1 %4577  ;;  %v4556_v18 = vpop.permute.xlu0 %4555 }
 0xbc9   : > { %v4635_v26 = vsel %vm4623_vm5, %v4618_v12, %v4578_v8  ;;  %v4620_v3 = vsel %vm903_vm4, %v4603_v22, %v4556_v18 }
 0xbca   : > { %5530 = vmatmul.mubr.msk.bf16.gmra.mrb[136].mxu0 %vm335_vm0, %v4635_v26 }
 0xbcc   : > { %v4558_v17 = vpop.permute.xlu1 %4557  ;;  %v4580_v23 = vpop.permute.xlu0 %4579 }
 0xbcd   : > { %v4637_v28 = vsel %vm4623_vm5, %v4620_v3, %v4580_v23  ;;  %v4622_v2 = vsel %vm903_vm4, %v4606_v60, %v4558_v17 }
 0xbce   : > { %5533 = vmatprep.mubr.msk.bf16.mxu0 %vm335_vm0, %v4637_v28 }
 0xbd0   : > { %v4582_v34 = vpop.permute.xlu1 %4581 }
 0xbd1   : > { %v4639_v35 = vsel %vm4623_vm5, %v4622_v2, %v4582_v34 }
 0xbd2   : > { %5534 = vmatmul.mubr.msk.bf16.gmra.mrb[140].mxu0 %vm335_vm0, %v4639_v35 }
 0xc8d   : > { %v5523_v30 = vpop.f32.mrb[128].mxu0 }
 0xc8e   : > { %v4722_v4 = vadd.f32 %v5523_v30, %v4952_v48  ;;  %v4713_v25 = vpop.f32.mrb[129].mxu0 }
 0xc8f   : > { %v4714_v7 = vadd.f32 %v4952_v48, %v4713_v25  ;;  %v5524_v57 = vpop.f32.mrb[130].mxu0 }
 0xc90   : > { %4778 = vst.msk [vmem:[%s7454_s22 + $0x10] sm:$0xff] %vm335_vm0, %v4722_v4  ;;  %v4725_v41 = vadd.f32 %v5524_v57, %v4952_v48  ;;  %v4716_v24 = vpop.f32.mrb[131].mxu0 }
 0xc91   : > { %4776 = vst.msk [vmem:[%s7454_s22] sm:$0xff] %vm335_vm0, %v4714_v7  ;;  %v4717_v39 = vadd.f32 %v4952_v48, %v4716_v24 }
 0xc92   : > { %4779 = vst.msk [vmem:[%s7454_s22 + $0x18] sm:$0xff] %vm335_vm0, %v4725_v41 }
 0xc93   : > { %4777 = vst.msk [vmem:[%s7454_s22 + $0x8] sm:$0xff] %vm335_vm0, %v4717_v39 }
 0xc95   : > { %v5527_v16 = vpop.f32.mrb[132].mxu0 }
 0xc96   : > { %v4738_v15 = vadd.f32 %v5527_v16, %v4952_v48  ;;  %v4729_v1 = vpop.f32.mrb[133].mxu0 }
 0xc97   : > { %v4730_v43 = vadd.f32 %v4952_v48, %v4729_v1  ;;  %v5528_v51 = vpop.f32.mrb[134].mxu0 }
 0xc98   : > { %4782 = vst.msk [vmem:[%s7454_s22 + $0x30] sm:$0xff] %vm335_vm0, %v4738_v15  ;;  %v4741_v52 = vadd.f32 %v5528_v51, %v4952_v48  ;;  %v4732_v40 = vpop.f32.mrb[135].mxu0 }
 0xc99   : > { %4780 = vst.msk [vmem:[%s7454_s22 + $0x20] sm:$0xff] %vm335_vm0, %v4730_v43  ;;  %v4733_v33 = vadd.f32 %v4952_v48, %v4732_v40 }
 0xc9a   : > { %4783 = vst.msk [vmem:[%s7454_s22 + $0x38] sm:$0xff] %vm335_vm0, %v4741_v52 }
 0xc9b   : > { %4781 = vst.msk [vmem:[%s7454_s22 + $0x28] sm:$0xff] %vm335_vm0, %v4733_v33 }
 0xc9d   : > { %v5531_v44 = vpop.f32.mrb[136].mxu0 }
 0xc9e   : > { %v4754_v9 = vadd.f32 %v5531_v44, %v4952_v48  ;;  %v4745_v55 = vpop.f32.mrb[137].mxu0 }
 0xc9f   : > { %v4746_v38 = vadd.f32 %v4952_v48, %v4745_v55  ;;  %v5532_v56 = vpop.f32.mrb[138].mxu0 }
 0xca0   : > { %4786 = vst.msk [vmem:[%s7454_s22 + $0x50] sm:$0xff] %vm335_vm0, %v4754_v9  ;;  %v4757_v32 = vadd.f32 %v5532_v56, %v4952_v48  ;;  %v4748_v42 = vpop.f32.mrb[139].mxu0 }
 0xca1   : > { %4784 = vst.msk [vmem:[%s7454_s22 + $0x40] sm:$0xff] %vm335_vm0, %v4746_v38  ;;  %v4749_v0 = vadd.f32 %v4952_v48, %v4748_v42 }
 0xca2   : > { %4787 = vst.msk [vmem:[%s7454_s22 + $0x58] sm:$0xff] %vm335_vm0, %v4757_v32 }
 0xca3   : > { %4785 = vst.msk [vmem:[%s7454_s22 + $0x48] sm:$0xff] %vm335_vm0, %v4749_v0 }
 0xca5   : > { %v5535_v47 = vpop.f32.mrb[140].mxu0 }
 0xca6   : > { %v4770_v6 = vadd.f32 %v5535_v47, %v4952_v48  ;;  %v4761_v13 = vpop.f32.mrb[141].mxu0 }
 0xca7   : > { %v4762_v36 = vadd.f32 %v4952_v48, %v4761_v13  ;;  %v5536_v46 = vpop.f32.mrb[142].mxu0 }
 0xca8   : > { %4790 = vst.msk [vmem:[%s7454_s22 + $0x70] sm:$0xff] %vm335_vm0, %v4770_v6  ;;  %v4773_v58 = vadd.f32 %v5536_v46, %v4952_v48  ;;  %v4764_v14 = vpop.f32.mrb[143].mxu0 }
 0xca9   : > { %4788 = vst.msk [vmem:[%s7454_s22 + $0x60] sm:$0xff] %vm335_vm0, %v4762_v36  ;;  %v4765_v53 = vadd.f32 %v4952_v48, %v4764_v14 }
 0xcaa   : > { %4791 = vst.msk [vmem:[%s7454_s22 + $0x78] sm:$0xff] %vm335_vm0, %v4773_v58 }
 0xcab   : > { %4789 = vst.msk [vmem:[%s7454_s22 + $0x68] sm:$0xff] %vm335_vm0, %v4765_v53 }
 0xcac PF: > { %s16_s21 = sadd.s32 1, %s5850_s21  }
 0xcad   : > { %p13_p4 = scmp.ge.s32.totalorder %s16_s21, 4  }
 0xcaf   :  { %15 = sbr.rel (!%p13_p4) target bundleno = 1 (0x1), region = 77 }

// kernel: tpu_custom_call.1
= control target key start
LH: loop header
LB: loop body
LE: loop exit
PB: predicated region body
PF: predicated region fallthrough
CT: control target
= control target key end

     0   :  { %s5903_s21 = smov 0   ;;  %s7491_s0 = inlined_call_operand.vmem [shape: bf16[256,32], index: 0, kind: input, shape index: {}]   ;;  %s7492_s1 = inlined_call_operand.vmem [shape: bf16[32,96], index: 1, kind: input, shape index: {}]   ;;  %s7493_s2 = inlined_call_operand.vmem [shape: f32[1,96], index: 2, kind: input, shape index: {}]   ;;  %s7494_s3 = inlined_call_operand.vmem [shape: f32[4,2,16,16], index: 3, kind: input, shape index: {}]   ;;  %s7495_s4 = inlined_call_operand.vmem [shape: bf16[32,32], index: 4, kind: input, shape index: {}]   ;;  %s7496_s5 = inlined_call_operand.vmem [shape: f32[1,32], index: 5, kind: input, shape index: {}]   ;;  %s7497_s6 = inlined_call_operand.vmem [shape: f32[256,32], index: 6, kind: output, shape index: {}]  }
   0x1 LB: > { %s4848_s22 = sadd.s32 4294967295, %s5850_s21   ;;  %p4852_p0 = scmp.ge.s32.totalorder %s5850_s21, 1  ;;  %s5850_s21 = sphi %s5903_s21, %s16_s21  }
   0x2   : > { %p213_p1 = scmp.lt.s32.totalorder %s5850_s21, 3 }
   0x4   : > { %p214_p2 = pnand %p4852_p0, %p213_p1 }
   0x6   : > { %217 = sbr.rel (%p214_p2) target bundleno = 3244 (0xcac), region = 44 }
   0xd   : > { %v5565_v0 = vld [vmem:[%s7492_s1] sm:$0xff]   ;;  %s4853_s25 = sshll.u32 %s4848_s22, 4  ;;  %v5566_v1 = vld [vmem:[%s7492_s1 + $0x8] sm:$0xff]   ;;  %vm335_vm0 = vcmask 261120   ;;  %v7498_v20 = vmov 0.0   ;;  %vm465_vm1 = vcmask 785408  }
   0xe   : > { %p244_p3 = scmp.lt.s32.totalorder %s4853_s25, 31  ;;  %5113 = vmatprep.subr.bf16.mxu0 %v5565_v0  ;;  %5537 = vmatprep.subr.bf16.mxu1 %v5565_v0  ;;  %v4857_v11 = vld [vmem:[%s7493_s2] ss:$0 sm:$0xff]  ;;  %vm5853_vm2 = vmmov 0   ;;  %s5854_s10 = smov 96   ;;  %vm485_vm3 = vcmask 64512  }
   0xf   : > { %5114 = vmatpush3.bf16.msra.mxu0 %v5565_v0  ;;  %5539 = vmatpush3.bf16.msra.mxu1 %v5565_v0  ;;  %s5855_s11 = smov 64   ;;  %vm903_vm4 = vcmask 130048   ;;  %s5856_s20 = smov 88   ;;  %vm4623_vm5 = vcmask 195584  }
  0x10   : > { %s7571_s25 = smov (!%p244_p3, %s4853_s25), 31  ;;  %5115 = vmatprep.subr.bf16.mxu0 %v5566_v1  ;;  %5538 = vmatprep.subr.bf16.mxu1 %v5566_v1  ;;  %s5857_s22 = smov 120  }
  0x11   : > { %s4854_s28 = sshll.u32 %s7571_s25, 2  ;;  %s5858_s23 = smov 56  }
  0x12   : > { %s247_s7 = scalar_lea.vmem %s7491_s0, %s4854_s28  ;;  %s5859_s9 = smov 80  }
  0x13   : > { %5116 = vmatpush3.bf16.msra.mxu0 %v5566_v1  ;;  %v5567_v2 = vld [vmem:[%s247_s7] sm:$0xff]   ;;  %5540 = vmatpush3.bf16.msra.mxu1 %v5566_v1  ;;  %v5568_v3 = vld [vmem:[%s247_s7 + $0x8] sm:$0xff]   ;;  %v5571_v6 = vld [vmem:[%s247_s7 + $0x10] sm:$0xff]   ;;  %s5867_s15 = smov 24   ;;  %s4856_s16 = sshll.u32 %s7571_s25, 3 }
  0x14   : > { %5117 = vmatprep.mubr.msk.bf16.mxu0 %vm335_vm0, %v5567_v2  ;;  %v5569_v4 = vld [vmem:[%s247_s7 + $0x20] sm:$0xff]   ;;  %v5570_v5 = vld [vmem:[%s247_s7 + $0x28] sm:$0xff]   ;;  %v5573_v7 = vld [vmem:[%s247_s7 + $0x30] sm:$0xff]   ;;  %5133 = vmatprep.subr.bf16.mxu1 %v7498_v20 }
  0x15   : > { %5125 = vmatprep.mubr.msk.bf16.mxu1 %vm335_vm0, %v5569_v4  ;;  %v5572_v8 = vld [vmem:[%s247_s7 + $0x18] sm:$0xff]   ;;  %5157 = vmatprep.subr.bf16.mxu0 %v7498_v20 }
  0x16   : > { %5118 = vmatmul.mubr.msk.bf16.vlgmr.msra.gmra.mrb[0].mxu0 %vm335_vm0, %v5568_v3  ;;  %5126 = vmatmul.mubr.msk.bf16.vlgmr.msra.gmra.mrb[0].mxu1 %vm335_vm0, %v5570_v5  ;;  %v5574_v9 = vld [vmem:[%s247_s7 + $0x38] sm:$0xff]  }
  0x17   : > { %5121 = vmatprep.mubr.msk.bf16.mxu0 %vm335_vm0, %v5571_v6  ;;  %5129 = vmatprep.mubr.msk.bf16.mxu1 %vm335_vm0, %v5573_v7 }
  0x1e   : > { %5122 = vmatmul.mubr.msk.bf16.gmra.mrb[4].mxu0 %vm335_vm0, %v5572_v8  ;;  %5130 = vmatmul.mubr.msk.bf16.gmra.mrb[4].mxu1 %vm335_vm0, %v5574_v9 }
  0x1f   : > { %5135 = vmatprep.mubr.msk.bf16.mxu1 %vm5853_vm2, %v7498_v20  ;;  %5159 = vmatprep.mubr.msk.bf16.mxu0 %vm5853_vm2, %v7498_v20 }
  0xe9   : > { %v5119_v10 = vpop.f32.mrb[0].mxu0  ;;  %v5127_v14 = vpop.f32.mrb[0].mxu1 }
  0xea   : > { %v394_v12 = vpop.f32.mrb[1].mxu0  ;;  %v403_v15 = vadd.f32 %v5119_v10, %v4857_v11  ;;  %v435_v18 = vadd.f32 %v5127_v14, %v4857_v11  ;;  %v426_v19 = vpop.f32.mrb[1].mxu1  ;;  %v883_v14 = vld [vmem:[%s7494_s3] sm:$0xff] }
  0xeb   : > { %v5120_v13 = vpop.f32.mrb[2].mxu0  ;;  %v395_v21 = vadd.f32 %v4857_v11, %v394_v12  ;;  %v427_v23 = vadd.f32 %v4857_v11, %v426_v19  ;;  %v5128_v24 = vpop.f32.mrb[2].mxu1 }
  0xec   : > { %v406_v16 = vadd.f32 %v5120_v13, %v4857_v11  ;;  %v397_v17 = vpop.f32.mrb[3].mxu0  ;;  %v438_v26 = vadd.f32 %v5128_v24, %v4857_v11  ;;  %v429_v27 = vpop.f32.mrb[3].mxu1 }
  0xed   : > { %v398_v22 = vadd.f32 %v4857_v11, %v397_v17  ;;  %v430_v29 = vadd.f32 %v4857_v11, %v429_v27 }
  0xee   : > { %v458_v25 = vpack.c.bf16 %v406_v16, %v403_v15  ;;  %v462_v30 = vpack.c.bf16 %v438_v26, %v435_v18 }
  0xef   : > { %v457_v28 = vpack.c.bf16 %v398_v22, %v395_v21  ;;  %v461_v32 = vpack.c.bf16 %v430_v29, %v427_v23  ;;  %v884_v22 = vld [vmem:[%s7494_s3 + $0x8] sm:$0xff] }
  0xf0   : > { %467 = vst.msk [vmem:[#allocation2 + $0x8] sm:$0xff] %vm465_vm1, %v458_v25  ;;  %471 = vst.msk [vmem:[#allocation2 + $0x28] sm:$0xff] %vm465_vm1, %v462_v30 }
  0xf1   : > { %466 = vst.msk [vmem:[#allocation2] sm:$0xff] %vm465_vm1, %v457_v28  ;;  %v5123_v31 = vpop.f32.mrb[4].mxu0  ;;  %470 = vst.msk [vmem:[#allocation2 + $0x20] sm:$0xff] %vm465_vm1, %v461_v32  ;;  %v5131_v37 = vpop.f32.mrb[4].mxu1  ;;  %v885_v28 = vld [vmem:[%s7494_s3 + $0x10] sm:$0xff] }
  0xf2   : > { %v419_v33 = vadd.f32 %v5123_v31, %v4857_v11  ;;  %v410_v34 = vpop.f32.mrb[5].mxu0  ;;  %v451_v40 = vadd.f32 %v5131_v37, %v4857_v11  ;;  %v442_v41 = vpop.f32.mrb[5].mxu1 }
  0xf3   : > { %v411_v35 = vadd.f32 %v4857_v11, %v410_v34  ;;  %v5124_v36 = vpop.f32.mrb[6].mxu0  ;;  %v443_v43 = vadd.f32 %v4857_v11, %v442_v41  ;;  %v5132_v44 = vpop.f32.mrb[6].mxu1 }
  0xf4   : > { %v422_v38 = vadd.f32 %v5124_v36, %v4857_v11  ;;  %v413_v39 = vpop.f32.mrb[7].mxu0  ;;  %v454_v46 = vadd.f32 %v5132_v44, %v4857_v11  ;;  %v445_v47 = vpop.f32.mrb[7].mxu1 }
  0xf5   : > { %v414_v42 = vadd.f32 %v4857_v11, %v413_v39  ;;  %v446_v49 = vadd.f32 %v4857_v11, %v445_v47 }
  0xf6   : > { %v460_v45 = vpack.c.bf16 %v422_v38, %v419_v33  ;;  %v464_v50 = vpack.c.bf16 %v454_v46, %v451_v40  ;;  %v886_v38 = vld [vmem:[%s7494_s3 + $0x18] sm:$0xff] }
  0xf7   : > { %v459_v48 = vpack.c.bf16 %v414_v42, %v411_v35  ;;  %v463_v52 = vpack.c.bf16 %v446_v49, %v443_v43  ;;  %v5951_v53 = vld [vmem:[#allocation2 + $0x8] sm:$0xff] }
  0xf8   : > { %469 = vst.msk [vmem:[#allocation2 + $0x18] sm:$0xff] %vm465_vm1, %v460_v45  ;;  %v5945_v51 = vld [vmem:[#allocation2] sm:$0xff]  ;;  %473 = vst.msk [vmem:[#allocation2 + $0x38] sm:$0xff] %vm465_vm1, %v464_v50  ;;  %v5966_v58 = vld [vmem:[#allocation2 + $0x28] sm:$0xff] }
  0xf9   : > { %468 = vst.msk [vmem:[#allocation2 + $0x10] sm:$0xff] %vm465_vm1, %v459_v48  ;;  %483 = vrot.lane.b32.xlu0 %v5945_v51, %s5854_s10  ;;  %472 = vst.msk [vmem:[#allocation2 + $0x30] sm:$0xff] %vm465_vm1, %v463_v52  ;;  %v5956_v55 = vld [vmem:[#allocation2 + $0x20] sm:$0xff] }
  0xfd   : > { %534 = vrot.lane.b32.xlu0 %v5951_v53, %s5854_s10 }
  0xff   : > { %v5960_v56 = vld [vmem:[#allocation2 + $0x18] sm:$0xff] }
 0x100   : > { %v5954_v54 = vld [vmem:[#allocation2 + $0x10] sm:$0xff]  ;;  %v5971_v59 = vld [vmem:[#allocation2 + $0x38] sm:$0xff] }
 0x101   : > { %584 = vrot.lane.b32.xlu1 %v5954_v54, %s5854_s10  ;;  %684 = vrot.lane.b32.xlu0 %v5956_v55, %s5854_s10  ;;  %v5962_v57 = vld [vmem:[#allocation2 + $0x30] sm:$0xff] }
 0x105   : > { %634 = vrot.lane.b32.xlu1 %v5960_v56, %s5854_s10  ;;  %784 = vrot.lane.b32.xlu0 %v5962_v57, %s5854_s10 }
 0x109   : > { %734 = vrot.lane.b32.xlu1 %v5966_v58, %s5854_s10  ;;  %1135 = vrot.lane.b32.xlu0 %v5951_v53, %s5855_s11 }
 0x10d   : > { %834 = vrot.lane.b32.xlu1 %v5971_v59, %s5854_s10  ;;  %s5860_s10 = smov 112  }
 0x111   : > { %1088 = vrot.lane.b32.xlu1 %v5945_v51, %s5855_s11 }
 0x115   : > { %1229 = vrot.lane.b32.xlu1 %v5960_v56, %s5855_s11 }
 0x119   : > { %1182 = vrot.lane.b32.xlu1 %v5954_v54, %s5855_s11 }
 0x16b   : > { %v484_v60 = vpop.permute.xlu0 %483 }
 0x16c   : > { %v490_v61 = vsel %vm485_vm3, %v484_v60, 0 }
 0x16d   : > { %5134 = vmatpush3.bf16.xpose.msra.mxu1 %v490_v61 }
 0x16e   : > { %5139 = vmatprep.subr.bf16.mxu1 %v7498_v20 }
 0x16f   : > { %v535_v62 = vpop.permute.xlu0 %534 }
 0x170   : > { %v540_v1 = vsel %vm485_vm3, %v535_v62, 0 }
 0x173   : > { %v585_v63 = vpop.permute.xlu1 %584  ;;  %v685_v0 = vpop.permute.xlu0 %684 }
 0x174   : > { %v690_v2 = vsel %vm485_vm3, %v685_v0, 0  ;;  %5136 = vmatmul.mubr.msk.bf16.vlgmr.msra.gmra.mrb[8].mxu1 %vm485_vm3, %v5945_v51  ;;  %v590_v5 = vsel %vm485_vm3, %v585_v63, 0 }
 0x175   : > { %5140 = vmatpush3.bf16.xpose.msra.mxu1 %v540_v1  ;;  %5158 = vmatpush3.bf16.xpose.msra.mxu0 %v690_v2 }
 0x176   : > { %5141 = vmatprep.mubr.msk.bf16.mxu1 %vm5853_vm2, %v7498_v20  ;;  %5145 = vmatprep.subr.bf16.mxu1 %v7498_v20 }
 0x177   : > { %v635_v3 = vpop.permute.xlu1 %634  ;;  %5169 = vmatprep.subr.bf16.mxu0 %v7498_v20  ;;  %v785_v4 = vpop.permute.xlu0 %784 }
 0x178   : > { %v790_v6 = vsel %vm485_vm3, %v785_v4, 0  ;;  %v640_v10 = vsel %vm485_vm3, %v635_v3, 0 }
 0x17b   : > { %v735_v7 = vpop.permute.xlu1 %734  ;;  %v1136_v13 = vpop.permute.xlu0 %1135 }
 0x17c   : > { %5142 = vmatmul.mubr.msk.bf16.vlgmr.msra.gmra.mrb[12].mxu1 %vm485_vm3, %v5951_v53  ;;  %5160 = vmatmul.mubr.msk.bf16.vlgmr.msra.gmra.mrb[8].mxu0 %vm485_vm3, %v5956_v55  ;;  %v740_v11 = vsel %vm485_vm3, %v735_v7, 0 }
 0x17d   : > { %5146 = vmatpush3.bf16.xpose.msra.mxu1 %v590_v5  ;;  %5170 = vmatpush3.bf16.xpose.msra.mxu0 %v790_v6 }
 0x17e   : > { %5147 = vmatprep.mubr.msk.bf16.mxu1 %vm5853_vm2, %v7498_v20  ;;  %5171 = vmatprep.mubr.msk.bf16.mxu0 %vm5853_vm2, %v7498_v20 }
 0x17f   : > { %v835_v8 = vpop.permute.xlu1 %834  ;;  %5151 = vmatprep.subr.bf16.mxu1 %v7498_v20  ;;  %5181 = vmatprep.subr.bf16.mxu0 %v7498_v20 }
 0x180   : > { %v840_v12 = vsel %vm485_vm3, %v835_v8, 0 }
 0x183   : > { %v1089_v9 = vpop.permute.xlu1 %1088 }
 0x184   : > { %5148 = vmatmul.mubr.msk.bf16.vlgmr.msra.gmra.mrb[16].mxu1 %vm485_vm3, %v5954_v54  ;;  %5172 = vmatmul.mubr.msk.bf16.vlgmr.msra.gmra.mrb[12].mxu0 %vm485_vm3, %v5962_v57 }
 0x185   : > { %5152 = vmatpush3.bf16.xpose.msra.mxu1 %v640_v10  ;;  %5182 = vmatpush3.bf16.msra.mxu0 %v1089_v9 }
 0x186   : > { %5153 = vmatprep.mubr.msk.bf16.mxu1 %vm5853_vm2, %v7498_v20  ;;  %5163 = vmatprep.subr.bf16.mxu1 %v7498_v20 }
 0x187   : > { %5183 = vmatprep.mubr.msk.bf16.mxu0 %vm5853_vm2, %v7498_v20  ;;  %5193 = vmatprep.subr.bf16.mxu0 %v7498_v20 }
 0x18c   : > { %5154 = vmatmul.mubr.msk.bf16.vlgmr.msra.gmra.mrb[20].mxu1 %vm485_vm3, %v5960_v56 }
 0x18d   : > { %5164 = vmatpush3.bf16.xpose.msra.mxu1 %v740_v11  ;;  %5165 = vmatprep.mubr.msk.bf16.mxu1 %vm5853_vm2, %v7498_v20 }
 0x18e   : > { %5175 = vmatprep.subr.bf16.mxu1 %v7498_v20 }
 0x194   : > { %5166 = vmatmul.mubr.msk.bf16.vlgmr.msra.gmra.mrb[24].mxu1 %vm485_vm3, %v5966_v58 }
 0x195   : > { %5176 = vmatpush3.bf16.xpose.msra.mxu1 %v840_v12  ;;  %5177 = vmatprep.mubr.msk.bf16.mxu1 %vm5853_vm2, %v7498_v20 }
 0x196   : > { %5187 = vmatprep.subr.bf16.mxu1 %v7498_v20 }
 0x19c   : > { %5178 = vmatmul.mubr.msk.bf16.vlgmr.msra.gmra.mrb[28].mxu1 %vm485_vm3, %v5971_v59 }
 0x19d   : > { %5188 = vmatpush3.bf16.msra.mxu1 %v1136_v13  ;;  %5189 = vmatprep.mubr.msk.bf16.mxu1 %vm5853_vm2, %v7498_v20 }
 0x19e   : > { %5199 = vmatprep.subr.bf16.mxu1 %v7498_v20 }
 0x247   : > { %v526_v15 = vpop.f32.mrb[8].mxu1 }
 0x248   : > { %v6033_v16 = vadd.f32 %v883_v14, %v526_v15  ;;  %v5137_v17 = vpop.f32.mrb[9].mxu1 }
 0x249   : > { %v529_v18 = vpop.f32.mrb[10].mxu1 }
 0x24a   : > { %v5138_v19 = vpop.f32.mrb[11].mxu1  ;;  %v904_v21 = vsel %vm903_vm4, %v6033_v16, -inf  ;;  %v6045_v31 = vadd.f32 %v884_v22, %v529_v18 }
 0x24b   : > { %905 = vmax.xlane.f32.xlu0 %v904_v21 }
 0x24c   : > { %v907_v39 = vsel %vm903_vm4, %v6045_v31, -inf }
 0x24f   : > { %v576_v23 = vpop.f32.mrb[12].mxu1  ;;  %v726_v24 = vpop.f32.mrb[8].mxu0 }
 0x250   : > { %v6040_v25 = vadd.f32 %v883_v14, %v726_v24  ;;  %v5143_v26 = vpop.f32.mrb[13].mxu1  ;;  %v5161_v27 = vpop.f32.mrb[9].mxu0  ;;  %v6051_v36 = vadd.f32 %v885_v28, %v576_v23 }
 0x251   : > { %v579_v29 = vpop.f32.mrb[14].mxu1  ;;  %v729_v30 = vpop.f32.mrb[10].mxu0 }
 0x252   : > { %v6047_v32 = vadd.f32 %v884_v22, %v729_v30  ;;  %v5144_v33 = vpop.f32.mrb[15].mxu1  ;;  %v5162_v34 = vpop.f32.mrb[11].mxu0  ;;  %v928_v35 = vsel %vm903_vm4, %v6040_v25, -inf  ;;  %v6060_v42 = vadd.f32 %v886_v38, %v579_v29  ;;  %v910_v46 = vsel %vm903_vm4, %v6051_v36, -inf }
 0x253   : > { %929 = vmax.xlane.f32.xlu1 %v928_v35 }
 0x254   : > { %v931_v37 = vsel %vm903_vm4, %v6047_v32, -inf  ;;  %v913_v62 = vsel %vm903_vm4, %v6060_v42, -inf }
 0x255   : > { %932 = vmax.xlane.f32.xlu0 %v931_v37 }
 0x257   : > { %v626_v40 = vpop.f32.mrb[16].mxu1  ;;  %908 = vmax.xlane.f32.xlu1 %v907_v39  ;;  %v826_v41 = vpop.f32.mrb[12].mxu0 }
 0x258   : > { %v6062_v43 = vadd.f32 %v883_v14, %v826_v41  ;;  %v5149_v44 = vpop.f32.mrb[17].mxu1  ;;  %v5173_v45 = vpop.f32.mrb[13].mxu0  ;;  %v6066_v49 = vadd.f32 %v883_v14, %v626_v40 }
 0x259   : > { %v629_v47 = vpop.f32.mrb[18].mxu1  ;;  %911 = vmax.xlane.f32.xlu0 %v910_v46  ;;  %v829_v48 = vpop.f32.mrb[14].mxu0 }
 0x25a   : > { %v5150_v50 = vpop.f32.mrb[19].mxu1  ;;  %v5174_v52 = vpop.f32.mrb[15].mxu0  ;;  %v940_v60 = vsel %vm903_vm4, %v6062_v43, -inf  ;;  %v6070_v61 = vadd.f32 %v884_v22, %v829_v48  ;;  %v916_v63 = vsel %vm903_vm4, %v6066_v49, -inf  ;;  %v6076_v1 = vadd.f32 %v884_v22, %v629_v47 }
 0x25b   : > { %941 = vmax.xlane.f32.xlu1 %v940_v60 }
 0x25c   : > { %v943_v4 = vsel %vm903_vm4, %v6070_v61, -inf  ;;  %v919_v9 = vsel %vm903_vm4, %v6076_v1, -inf }
 0x25d   : > { %914 = vmax.xlane.f32.xlu0 %v913_v62 }
 0x25f   : > { %v676_v0 = vpop.f32.mrb[20].mxu1  ;;  %917 = vmax.xlane.f32.xlu1 %v916_v63 }
 0x260   : > { %v6078_v2 = vadd.f32 %v885_v28, %v676_v0  ;;  %v5155_v3 = vpop.f32.mrb[21].mxu1 }
 0x261   : > { %v679_v5 = vpop.f32.mrb[22].mxu1  ;;  %944 = vmax.xlane.f32.xlu0 %v943_v4 }
 0x262   : > { %v5156_v6 = vpop.f32.mrb[23].mxu1  ;;  %v922_v7 = vsel %vm903_vm4, %v6078_v2, -inf  ;;  %v6084_v8 = vadd.f32 %v886_v38, %v679_v5 }
 0x263   : > { %923 = vmax.xlane.f32.xlu1 %v922_v7 }
 0x264   : > { %v925_v13 = vsel %vm903_vm4, %v6084_v8, -inf }
 0x265   : > { %920 = vmax.xlane.f32.xlu0 %v919_v9 }
 0x267   : > { %v776_v10 = vpop.f32.mrb[24].mxu1 }
 0x268   : > { %v6088_v11 = vadd.f32 %v885_v28, %v776_v10  ;;  %v5167_v12 = vpop.f32.mrb[25].mxu1 }
 0x269   : > { %v779_v14 = vpop.f32.mrb[26].mxu1  ;;  %926 = vmax.xlane.f32.xlu0 %v925_v13 }
 0x26a   : > { %v6092_v15 = vadd.f32 %v886_v38, %v779_v14  ;;  %v5168_v17 = vpop.f32.mrb[27].mxu1  ;;  %v934_v18 = vsel %vm903_vm4, %v6088_v11, -inf }
 0x26b   : > { %935 = vmax.xlane.f32.xlu1 %v934_v18 }
 0x26c   : > { %v937_v19 = vsel %vm903_vm4, %v6092_v15, -inf }
 0x26d   : > { %938 = vmax.xlane.f32.xlu0 %v937_v19 }
 0x26f   : > { %v876_v21 = vpop.f32.mrb[28].mxu1 }
 0x270   : > { %v6098_v22 = vadd.f32 %v885_v28, %v876_v21  ;;  %v5179_v23 = vpop.f32.mrb[29].mxu1  ;;  %v6110_v28 = vpop.permute.xlu1 %1229 }
 0x271   : > { %v879_v24 = vpop.f32.mrb[30].mxu1 }
 0x272   : > { %v6100_v26 = vadd.f32 %v886_v38, %v879_v24  ;;  %v5180_v27 = vpop.f32.mrb[31].mxu1  ;;  %v946_v29 = vsel %vm903_vm4, %v6098_v22, -inf }
 0x273   : > { %947 = vmax.xlane.f32.xlu1 %v946_v29 }
 0x274   : > { %v949_v30 = vsel %vm903_vm4, %v6100_v26, -inf  ;;  %v6113_v37 = vpop.permute.xlu1 %1182 }
 0x275   : > { %950 = vmax.xlane.f32.xlu0 %v949_v30 }
 0x284   : > { %1323 = vrot.lane.b32.xlu1 %v5966_v58, %s5855_s11 }
 0x28b   : > { %1276 = vrot.lane.b32.xlu0 %v5956_v55, %s5855_s11 }
 0x2d8   : > { %v906_v33 = vpop.xlane.xlu0 %905 }
 0x2d9   : > { %v952_v34 = vsub.f32 %v6033_v16, %v906_v33 }
 0x2db   : > { %v968_v35 = vmul.f32 1.442695, %v952_v34 }
 0x2dd   : > { %5577 = vpow2.f32 %v968_v35 }
 0x2e0   : > { %v930_v38 = vpop.xlane.xlu1 %929 }
 0x2e1   : > { %v960_v39 = vsub.f32 %v6040_v25, %v930_v38 }
 0x2e2   : > { %v933_v40 = vpop.xlane.xlu0 %932 }
 0x2e3   : > { %v984_v41 = vmul.f32 1.442695, %v960_v39  ;;  %v961_v44 = vsub.f32 %v6047_v32, %v933_v40 }
 0x2e4   : > { %v909_v45 = vpop.xlane.xlu1 %908 }
 0x2e5   : > { %5579 = vpow2.f32 %v984_v41  ;;  %v953_v46 = vsub.f32 %v6045_v31, %v909_v45  ;;  %v986_v47 = vmul.f32 1.442695, %v961_v44 }
 0x2e6   : > { %v912_v48 = vpop.xlane.xlu0 %911 }
 0x2e7   : > { %v6118_v50 = vpop.eup %5577  ;;  %v970_v16 = vmul.f32 1.442695, %v953_v46  ;;  %v954_v52 = vsub.f32 %v6051_v36, %v912_v48 }
 0x2e8   : > { %v942_v60 = vpop.xlane.xlu1 %941  ;;  %v1000_v62 = vsel %vm903_vm4, %v6118_v50, 0.0 }
 0x2e9   : > { %5581 = vpow2.f32 %v970_v16  ;;  %v972_v25 = vmul.f32 1.442695, %v954_v52  ;;  %v964_v63 = vsub.f32 %v6062_v43, %v942_v60  ;;  %1001 = vadd.xlane.f32.xlu1 %v1000_v62 }
 0x2ea   : > { %5583 = vpow2.f32 %v986_v47  ;;  %v915_v32 = vpop.xlane.xlu0 %914 }
 0x2eb   : > { %5585 = vpow2.f32 %v972_v25  ;;  %v992_v31 = vmul.f32 1.442695, %v964_v63  ;;  %v955_v0 = vsub.f32 %v6060_v42, %v915_v32 }
 0x2ec   : > { %v918_v3 = vpop.xlane.xlu1 %917 }
 0x2ed   : > { %5587 = vpow2.f32 %v992_v31  ;;  %v974_v4 = vmul.f32 1.442695, %v955_v0  ;;  %v956_v36 = vsub.f32 %v6066_v49, %v918_v3 }
 0x2ee   : > { %v945_v5 = vpop.xlane.xlu0 %944 }
 0x2ef   : > { %v6126_v6 = vpop.eup %5579  ;;  %5589 = vpow2.f32 %v974_v4  ;;  %v976_v7 = vmul.f32 1.442695, %v956_v36  ;;  %v965_v9 = vsub.f32 %v6070_v61, %v945_v5 }
 0x2f0   : > { %v924_v43 = vpop.xlane.xlu1 %923  ;;  %v1024_v10 = vsel %vm903_vm4, %v6126_v6, 0.0 }
 0x2f1   : > { %5591 = vpow2.f32 %v976_v7  ;;  %v994_v12 = vmul.f32 1.442695, %v965_v9  ;;  %v958_v42 = vsub.f32 %v6078_v2, %v924_v43  ;;  %1025 = vadd.xlane.f32.xlu1 %v1024_v10 }
 0x2f2   : > { %v921_v13 = vpop.xlane.xlu0 %920 }
 0x2f3   : > { %v6132_v14 = vpop.eup %5581  ;;  %5593 = vpow2.f32 %v994_v12  ;;  %v980_v49 = vmul.f32 1.442695, %v958_v42  ;;  %v957_v17 = vsub.f32 %v6076_v1, %v921_v13 }
 0x2f4   : > { %v6135_v18 = vpop.eup %5583  ;;  %v1003_v61 = vsel %vm903_vm4, %v6132_v14, 0.0 }
 0x2f5   : > { %v6139_v19 = vpop.eup %5585  ;;  %5595 = vpow2.f32 %v980_v49  ;;  %v978_v21 = vmul.f32 1.442695, %v957_v17  ;;  %1004 = vadd.xlane.f32.xlu0 %v1003_v61  ;;  %v1027_v29 = vsel %vm903_vm4, %v6135_v18, 0.0 }
 0x2f6   : > { %v927_v23 = vpop.xlane.xlu0 %926  ;;  %v1006_v2 = vsel %vm903_vm4, %v6139_v19, 0.0 }
 0x2f7   : > { %v6143_v24 = vpop.eup %5587  ;;  %5597 = vpow2.f32 %v978_v21  ;;  %v959_v27 = vsub.f32 %v6084_v8, %v927_v23  ;;  %1007 = vadd.xlane.f32.xlu1 %v1006_v2 }
 0x2f8   : > { %v936_v1 = vpop.xlane.xlu1 %935  ;;  %v1036_v38 = vsel %vm903_vm4, %v6143_v24, 0.0 }
 0x2f9   : > { %v6148_v30 = vpop.eup %5589  ;;  %v982_v33 = vmul.f32 1.442695, %v959_v27  ;;  %v962_v34 = vsub.f32 %v6088_v11, %v936_v1  ;;  %1028 = vadd.xlane.f32.xlu0 %v1027_v29 }
 0x2fa   : > { %v939_v35 = vpop.xlane.xlu0 %938  ;;  %v1009_v41 = vsel %vm903_vm4, %v6148_v30, 0.0 }
 0x2fb   : > { %v6153_v39 = vpop.eup %5591  ;;  %5599 = vpow2.f32 %v982_v33  ;;  %v988_v40 = vmul.f32 1.442695, %v962_v34  ;;  %v963_v8 = vsub.f32 %v6092_v15, %v939_v35  ;;  %1037 = vadd.xlane.f32.xlu1 %v1036_v38 }
 0x2fc   : > { %v1012_v11 = vsel %vm903_vm4, %v6153_v39, 0.0 }
 0x2fd   : > { %v6158_v44 = vpop.eup %5593  ;;  %5601 = vpow2.f32 %v988_v40  ;;  %v990_v45 = vmul.f32 1.442695, %v963_v8  ;;  %1010 = vadd.xlane.f32.xlu0 %v1009_v41 }
 0x2fe   : > { %v1039_v47 = vsel %vm903_vm4, %v6158_v44, 0.0 }
 0x2ff   : > { %v6162_v46 = vpop.eup %5595  ;;  %5603 = vpow2.f32 %v990_v45  ;;  %1013 = vadd.xlane.f32.xlu1 %v1012_v11 }
 0x300   : > { %v1018_v48 = vsel %vm903_vm4, %v6162_v46, 0.0  ;;  %v948_v31 = vpop.xlane.xlu1 %947 }
 0x301   : > { %v6166_v15 = vpop.eup %5597  ;;  %1040 = vadd.xlane.f32.xlu0 %v1039_v47  ;;  %v966_v0 = vsub.f32 %v6098_v22, %v948_v31 }
 0x302   : > { %v1015_v16 = vsel %vm903_vm4, %v6166_v15, 0.0  ;;  %v951_v3 = vpop.xlane.xlu0 %950 }
 0x303   : > { %1019 = vadd.xlane.f32.xlu1 %v1018_v48  ;;  %v996_v4 = vmul.f32 1.442695, %v966_v0  ;;  %v967_v36 = vsub.f32 %v6100_v26, %v951_v3 }
 0x304   : > { %v6220_v22 = vpop.permute.xlu1 %1323 }
 0x305   : > { %v6172_v52 = vpop.eup %5599  ;;  %1016 = vadd.xlane.f32.xlu0 %v1015_v16  ;;  %5605 = vpow2.f32 %v996_v4  ;;  %v998_v5 = vmul.f32 1.442695, %v967_v36 }
 0x306   : > { %v1021_v25 = vsel %vm903_vm4, %v6172_v52, 0.0 }
 0x307   : > { %v6174_v60 = vpop.eup %5601  ;;  %5607 = vpow2.f32 %v998_v5 }
 0x308   : > { %v1030_v62 = vsel %vm903_vm4, %v6174_v60, 0.0 }
 0x309   : > { %v6180_v63 = vpop.eup %5603  ;;  %1031 = vadd.xlane.f32.xlu1 %v1030_v62  ;;  %1022 = vadd.xlane.f32.xlu0 %v1021_v25 }
 0x30a   : > { %v1033_v32 = vsel %vm903_vm4, %v6180_v63, 0.0 }
 0x30d   : > { %1034 = vadd.xlane.f32.xlu0 %v1033_v32 }
 0x30f   : > { %v6190_v7 = vpop.eup %5605 }
 0x310   : > { %v1042_v9 = vsel %vm903_vm4, %v6190_v7, 0.0 }
 0x311   : > { %v6194_v43 = vpop.eup %5607 }
 0x312   : > { %v1045_v10 = vsel %vm903_vm4, %v6194_v43, 0.0 }
 0x31a   : > { %1417 = vrot.lane.b32.xlu1 %v5971_v59, %s5855_s11 }
 0x323   : > { %1370 = vrot.lane.b32.xlu0 %v5962_v57, %s5855_s11  ;;  %s5861_s11 = smov 48  }
 0x33e   : > { %1043 = vadd.xlane.f32.xlu1 %v1042_v9 }
 0x342   : > { %1046 = vadd.xlane.f32.xlu0 %v1045_v10 }
 0x34f   : > { %1535 = vrot.lane.b32.xlu1 %v5951_v53, %s5856_s20 }
 0x353   : > { %1587 = vrot.lane.b32.xlu1 %v5954_v54, %s5856_s20 }
 0x357   : > { %1639 = vrot.lane.b32.xlu1 %v5960_v56, %s5856_s20 }
 0x358   : > { %1483 = vrot.lane.b32.xlu0 %v5945_v51, %s5856_s20 }
 0x35b   : > { %1691 = vrot.lane.b32.xlu1 %v5956_v55, %s5856_s20 }
 0x35c   : > { %1481 = vrot.lane.b32.xlu0 %v5945_v51, %s5857_s22 }
 0x35f   : > { %1743 = vrot.lane.b32.xlu1 %v5966_v58, %s5856_s20 }
 0x360   : > { %1533 = vrot.lane.b32.xlu0 %v5951_v53, %s5857_s22 }
 0x363   : > { %1795 = vrot.lane.b32.xlu1 %v5962_v57, %s5856_s20 }
 0x364   : > { %1585 = vrot.lane.b32.xlu0 %v5954_v54, %s5857_s22 }
 0x367   : > { %1847 = vrot.lane.b32.xlu1 %v5971_v59, %s5856_s20  ;;  %s5862_s20 = smov 72  }
 0x368   : > { %1637 = vrot.lane.b32.xlu0 %v5960_v56, %s5857_s22 }
 0x36b   : > { %1845 = vrot.lane.b32.xlu1 %v5971_v59, %s5857_s22  ;;  %v1277_v59 = vpop.permute.xlu0 %1276 }
 0x36c   : > { %1689 = vrot.lane.b32.xlu0 %v5956_v55, %s5857_s22 }
 0x36f   : > { %2101 = vrot.lane.b32.xlu1 %v5945_v51, %s5858_s23 }
 0x370   : > { %1741 = vrot.lane.b32.xlu0 %v5966_v58, %s5857_s22 }
 0x373   : > { %2195 = vrot.lane.b32.xlu1 %v5954_v54, %s5858_s23 }
 0x374   : > { %1793 = vrot.lane.b32.xlu0 %v5962_v57, %s5857_s22  ;;  %s5863_s22 = smov 104  }
 0x376   : > { %v1002_v55 = vpop.xlane.xlu1 %1001 }
 0x377   : > { %2242 = vrot.lane.b32.xlu1 %v5960_v56, %s5858_s23  ;;  %5609 = vrcp.f32 %v1002_v55 }
 0x378   : > { %2148 = vrot.lane.b32.xlu0 %v5951_v53, %s5858_s23 }
 0x37e   : > { %v1026_v26 = vpop.xlane.xlu1 %1025 }
 0x381   : > { %v5610_v57 = vpop.eup %5609 }
 0x382   : > { %v1005_v51 = vpop.xlane.xlu0 %1004  ;;  %v1064_v49 = vmul.f32 %v5610_v57, %v6118_v50 }
 0x383   : > { %5611 = vrcp.f32 %v1005_v51 }
 0x384   : > { %v1008_v58 = vpop.xlane.xlu1 %1007 }
 0x385   : > { %5613 = vrcp.f32 %v1008_v58 }
 0x386   : > { %v1029_v12 = vpop.xlane.xlu0 %1028 }
 0x388   : > { %v1038_v42 = vpop.xlane.xlu1 %1037 }
 0x38a   : > { %v1011_v54 = vpop.xlane.xlu0 %1010 }
 0x38b   : > { %5615 = vrcp.f32 %v1011_v54 }
 0x38c   : > { %v1014_v56 = vpop.xlane.xlu1 %1013 }
 0x38d   : > { %v5612_v13 = vpop.eup %5611  ;;  %5617 = vrcp.f32 %v1014_v56 }
 0x38e   : > { %v1065_v17 = vmul.f32 %v5612_v13, %v6132_v14  ;;  %v1041_v53 = vpop.xlane.xlu0 %1040 }
 0x38f   : > { %v5614_v23 = vpop.eup %5613 }
 0x390   : > { %v1080_v61 = vpack.c.bf16 %v1065_v17, %v1064_v49  ;;  %v1020_v2 = vpop.xlane.xlu1 %1019  ;;  %v1066_v50 = vmul.f32 %v5614_v23, %v6139_v19 }
 0x392   : > { %5184 = vmatmul.mubr.msk.bf16.vlgmr.msra.gmra.mrb[16].mxu0 %vm903_vm4, %v1080_v61  ;;  %v1017_v21 = vpop.xlane.xlu0 %1016 }
 0x393   : > { %5194 = vmatpush3.bf16.msra.mxu0 %v6113_v37  ;;  %5619 = vrcp.f32 %v1017_v21  ;;  %5195 = vmatprep.mubr.msk.bf16.mxu0 %vm5853_vm2, %v7498_v20 }
 0x394   : > { %5205 = vmatprep.subr.bf16.mxu0 %v7498_v20  ;;  %5621 = vrcp.f32 %v1020_v2 }
 0x395   : > { %v5616_v27 = vpop.eup %5615  ;;  %5623 = vrcp.f32 %v1029_v12 }
 0x396   : > { %v1067_v14 = vmul.f32 %v5616_v27, %v6148_v30  ;;  %v1023_v1 = vpop.xlane.xlu0 %1022  ;;  %v1032_v34 = vpop.xlane.xlu1 %1031 }
 0x397   : > { %5625 = vrcp.f32 %v1023_v1  ;;  %v5618_v33 = vpop.eup %5617 }
 0x398   : > { %v1081_v29 = vpack.c.bf16 %v1067_v14, %v1066_v50  ;;  %5627 = vrcp.f32 %v1026_v26  ;;  %v1068_v30 = vmul.f32 %v5618_v33, %v6153_v39 }
 0x39a   : > { %5190 = vmatmul.mubr.msk.bf16.vlgmr.msra.gmra.mrb[32].mxu1 %vm903_vm4, %v1081_v29  ;;  %v1035_v37 = vpop.xlane.xlu0 %1034 }
 0x39b   : > { %5200 = vmatpush3.bf16.msra.mxu1 %v6110_v28  ;;  %5201 = vmatprep.mubr.msk.bf16.mxu1 %vm5853_vm2, %v7498_v20  ;;  %5629 = vrcp.f32 %v1035_v37 }
 0x39c   : > { %5211 = vmatprep.subr.bf16.mxu1 %v7498_v20  ;;  %5631 = vrcp.f32 %v1032_v34 }
 0x39d   : > { %v5620_v19 = vpop.eup %5619  ;;  %5633 = vrcp.f32 %v1041_v53 }
 0x39e   : > { %v1069_v35 = vmul.f32 %v5620_v19, %v6166_v15  ;;  %v5622_v38 = vpop.eup %5621  ;;  %5635 = vrcp.f32 %v1038_v42 }
 0x39f   : > { %v5624_v8 = vpop.eup %5623  ;;  %v1070_v45 = vmul.f32 %v5622_v38, %v6162_v46 }
 0x3a0   : > { %v1082_v40 = vpack.c.bf16 %v1069_v35, %v1068_v30  ;;  %v1073_v39 = vmul.f32 %v5624_v8, %v6135_v18  ;;  %v1371_v18 = vpop.permute.xlu0 %1370 }
 0x3a1   : > { %v5626_v41 = vpop.eup %5625 }
 0x3a2   : > { %5196 = vmatmul.mubr.msk.bf16.vlgmr.msra.gmra.mrb[20].mxu0 %vm903_vm4, %v1082_v40  ;;  %v5628_v28 = vpop.eup %5627  ;;  %v1071_v11 = vmul.f32 %v5626_v41, %v6172_v52 }
 0x3a3   : > { %5206 = vmatpush3.bf16.msra.mxu0 %v1277_v59  ;;  %5207 = vmatprep.mubr.msk.bf16.mxu0 %vm5853_vm2, %v7498_v20  ;;  %v1072_v48 = vmul.f32 %v5628_v28, %v6126_v6 }
 0x3a4   : > { %5217 = vmatprep.subr.bf16.mxu0 %v7498_v20  ;;  %v1083_v47 = vpack.c.bf16 %v1071_v11, %v1070_v45 }
 0x3a5   : > { %v5630_v15 = vpop.eup %5629  ;;  %v1084_v46 = vpack.c.bf16 %v1073_v39, %v1072_v48 }
 0x3a6   : > { %5202 = vmatmul.mubr.msk.bf16.vlgmr.msra.gmra.mrb[36].mxu1 %vm903_vm4, %v1083_v47  ;;  %v5632_v16 = vpop.eup %5631  ;;  %v1075_v62 = vmul.f32 %v5630_v15, %v6180_v63  ;;  %v1418_v63 = vpop.permute.xlu1 %1417 }
 0x3a7   : > { %5212 = vmatpush3.bf16.msra.mxu1 %v6220_v22  ;;  %5213 = vmatprep.mubr.msk.bf16.mxu1 %vm5853_vm2, %v7498_v20  ;;  %v5634_v52 = vpop.eup %5633  ;;  %v1074_v6 = vmul.f32 %v5632_v16, %v6174_v60 }
 0x3a8   : > { %5223 = vmatprep.subr.bf16.mxu1 %v7498_v20  ;;  %v5636_v25 = vpop.eup %5635  ;;  %v1077_v32 = vmul.f32 %v5634_v52, %v6158_v44 }
 0x3a9   : > { %v1085_v31 = vpack.c.bf16 %v1075_v62, %v1074_v6  ;;  %v1076_v0 = vmul.f32 %v5636_v25, %v6143_v24 }
 0x3aa   : > { %5208 = vmatmul.mubr.msk.bf16.vlgmr.msra.gmra.mrb[24].mxu0 %vm903_vm4, %v1084_v46 }
 0x3ab   : > { %5218 = vmatpush3.bf16.msra.mxu0 %v1371_v18  ;;  %5219 = vmatprep.mubr.msk.bf16.mxu0 %vm5853_vm2, %v7498_v20  ;;  %v1086_v3 = vpack.c.bf16 %v1077_v32, %v1076_v0 }
 0x3ac   : > { %5229 = vmatprep.subr.bf16.mxu0 %v7498_v20 }
 0x3ae   : > { %5214 = vmatmul.mubr.msk.bf16.vlgmr.msra.gmra.mrb[40].mxu1 %vm903_vm4, %v1085_v31 }
 0x3af   : > { %5224 = vmatpush3.bf16.msra.mxu1 %v1418_v63  ;;  %5225 = vmatprep.mubr.msk.bf16.mxu1 %vm5853_vm2, %v7498_v20 }
 0x3b0   : > { %5235 = vmatprep.subr.bf16.mxu1 %v7498_v20 }
 0x3b2   : > { %5220 = vmatmul.mubr.msk.bf16.vlgmr.msra.gmra.mrb[28].mxu0 %vm903_vm4, %v1086_v3 }
 0x3b3   : > { %5231 = vmatprep.mubr.msk.bf16.mxu0 %vm5853_vm2, %v7498_v20 }
 0x3cb   : > { %v1044_v44 = vpop.xlane.xlu1 %1043 }
 0x3cc   : > { %5637 = vrcp.f32 %v1044_v44 }
 0x3cf   : > { %v1536_v60 = vpop.permute.xlu1 %1535  ;;  %v1047_v4 = vpop.xlane.xlu0 %1046 }
 0x3d0   : > { %5639 = vrcp.f32 %v1047_v4  ;;  %v1541_v54 = vsel %vm485_vm3, %v1536_v60, 0 }
 0x3d3   : > { %v1588_v24 = vpop.permute.xlu1 %1587  ;;  %v1484_v36 = vpop.permute.xlu0 %1483 }
 0x3d4   : > { %v1489_v5 = vsel %vm485_vm3, %v1484_v36, 0  ;;  %v1593_v12 = vsel %vm485_vm3, %v1588_v24, 0 }
 0x3d5   : > { %5230 = vmatpush3.bf16.xpose.msra.mxu0 %v1489_v5  ;;  %v6360_v5 = vld [vmem:[%s7494_s3 + $0x20] sm:$0xff] }
 0x3d6   : > { %5241 = vmatprep.subr.bf16.mxu0 %v7498_v20  ;;  %v5638_v22 = vpop.eup %5637 }
 0x3d7   : > { %v1640_v9 = vpop.permute.xlu1 %1639  ;;  %v1482_v10 = vpop.permute.xlu0 %1481  ;;  %v1078_v59 = vmul.f32 %v5638_v22, %v6190_v7 }
 0x3d8   : > { %v1645_v49 = vsel %vm485_vm3, %v1640_v9, 0 }
 0x3da   : > { %v5640_v55 = vpop.eup %5639 }
 0x3db   : > { %v1079_v26 = vmul.f32 %v5640_v55, %v6194_v43  ;;  %v1692_v51 = vpop.permute.xlu1 %1691  ;;  %v1534_v58 = vpop.permute.xlu0 %1533 }
 0x3dc   : > { %5232 = vmatmul.mubr.msk.bf16.vlgmr.msra.gmra.mrb[32].mxu0 %vm485_vm3, %v1482_v10  ;;  %v1697_v56 = vsel %vm485_vm3, %v1692_v51, 0  ;;  %v6365_v10 = vld [vmem:[%s7494_s3 + $0x28] sm:$0xff] }
 0x3dd   : > { %5242 = vmatpush3.bf16.xpose.msra.mxu0 %v1593_v12  ;;  %v1087_v42 = vpack.c.bf16 %v1079_v26, %v1078_v59  ;;  %5243 = vmatprep.mubr.msk.bf16.mxu0 %vm5853_vm2, %v7498_v20 }
 0x3de   : > { %5253 = vmatprep.subr.bf16.mxu0 %v7498_v20 }
 0x3df   : > { %v1744_v57 = vpop.permute.xlu1 %1743  ;;  %5226 = vmatmul.mubr.msk.bf16.vlgmr.msra.gmra.mrb[44].mxu1 %vm903_vm4, %v1087_v42  ;;  %v1586_v7 = vpop.permute.xlu0 %1585 }
 0x3e0   : > { %5236 = vmatpush3.bf16.xpose.msra.mxu1 %v1541_v54  ;;  %5237 = vmatprep.mubr.msk.bf16.mxu1 %vm5853_vm2, %v7498_v20  ;;  %v1749_v2 = vsel %vm485_vm3, %v1744_v57, 0 }
 0x3e1   : > { %5247 = vmatprep.subr.bf16.mxu1 %v7498_v20 }
 0x3e3   : > { %v1796_v43 = vpop.permute.xlu1 %1795  ;;  %v1638_v13 = vpop.permute.xlu0 %1637 }
 0x3e4   : > { %5244 = vmatmul.mubr.msk.bf16.vlgmr.msra.gmra.mrb[36].mxu0 %vm485_vm3, %v1586_v7  ;;  %v1801_v61 = vsel %vm485_vm3, %v1796_v43, 0 }
 0x3e5   : > { %5254 = vmatpush3.bf16.xpose.msra.mxu0 %v1697_v56  ;;  %5255 = vmatprep.mubr.msk.bf16.mxu0 %vm5853_vm2, %v7498_v20 }
 0x3e6   : > { %5265 = vmatprep.subr.bf16.mxu0 %v7498_v20 }
 0x3e7   : > { %5238 = vmatmul.mubr.msk.bf16.vlgmr.msra.gmra.mrb[48].mxu1 %vm485_vm3, %v1534_v58  ;;  %v1690_v17 = vpop.permute.xlu0 %1689  ;;  %v1848_v53 = vpop.permute.xlu1 %1847 }
 0x3e8   : > { %5248 = vmatpush3.bf16.xpose.msra.mxu1 %v1645_v49  ;;  %5249 = vmatprep.mubr.msk.bf16.mxu1 %vm5853_vm2, %v7498_v20  ;;  %v1853_v14 = vsel %vm485_vm3, %v1848_v53, 0 }
 0x3e9   : > { %5259 = vmatprep.subr.bf16.mxu1 %v7498_v20 }
 0x3eb   : > { %v1742_v21 = vpop.permute.xlu0 %1741  ;;  %v1846_v23 = vpop.permute.xlu1 %1845 }
 0x3ec   : > { %5256 = vmatmul.mubr.msk.bf16.vlgmr.msra.gmra.mrb[40].mxu0 %vm485_vm3, %v1690_v17  ;;  %v4902_v17 = vld [vmem:[%s7494_s3 + $0x30] sm:$0xff] }
 0x3ed   : > { %5266 = vmatpush3.bf16.xpose.msra.mxu0 %v1801_v61  ;;  %5267 = vmatprep.mubr.msk.bf16.mxu0 %vm5853_vm2, %v7498_v20 }
 0x3ee   : > { %5277 = vmatprep.subr.bf16.mxu0 %v7498_v20 }
 0x3ef   : > { %5250 = vmatmul.mubr.msk.bf16.vlgmr.msra.gmra.mrb[52].mxu1 %vm485_vm3, %v1638_v13  ;;  %v1794_v27 = vpop.permute.xlu0 %1793  ;;  %v2102_v50 = vpop.permute.xlu1 %2101 }
 0x3f0   : > { %5260 = vmatpush3.bf16.xpose.msra.mxu1 %v1749_v2  ;;  %5261 = vmatprep.mubr.msk.bf16.mxu1 %vm5853_vm2, %v7498_v20  ;;  %v4903_v2 = vld [vmem:[%s7494_s3 + $0x38] sm:$0xff] }
 0x3f1   : > { %5271 = vmatprep.subr.bf16.mxu1 %v7498_v20 }
 0x3f3   : > { %v2149_v1 = vpop.permute.xlu0 %2148 }
 0x3f4   : > { %5268 = vmatmul.mubr.msk.bf16.vlgmr.msra.gmra.mrb[44].mxu0 %vm485_vm3, %v1794_v27 }
 0x3f5   : > { %5278 = vmatpush3.bf16.msra.mxu0 %v2102_v50  ;;  %5279 = vmatprep.mubr.msk.bf16.mxu0 %vm5853_vm2, %v7498_v20 }
 0x3f6   : > { %5289 = vmatprep.subr.bf16.mxu0 %v7498_v20 }
 0x3f7   : > { %5262 = vmatmul.mubr.msk.bf16.vlgmr.msra.gmra.mrb[56].mxu1 %vm485_vm3, %v1742_v21 }
 0x3f8   : > { %5272 = vmatpush3.bf16.xpose.msra.mxu1 %v1853_v14  ;;  %5273 = vmatprep.mubr.msk.bf16.mxu1 %vm5853_vm2, %v7498_v20 }
 0x3f9   : > { %5283 = vmatprep.subr.bf16.mxu1 %v7498_v20 }
 0x3ff   : > { %5274 = vmatmul.mubr.msk.bf16.vlgmr.msra.gmra.mrb[60].mxu1 %vm485_vm3, %v1846_v23 }
 0x400   : > { %5284 = vmatpush3.bf16.msra.mxu1 %v2149_v1  ;;  %5285 = vmatprep.mubr.msk.bf16.mxu1 %vm5853_vm2, %v7498_v20 }
 0x401   : > { %5295 = vmatprep.subr.bf16.mxu1 %v7498_v20 }
 0x465   : > { %v6315_v29 = vpop.f32.mrb[16].mxu0 }
 0x466   : > { %7515 = vst [vmem:[#allocation3_spill] sm:$0xff] %v6315_v29  ;;  %v5185_v37 = vpop.f32.mrb[17].mxu0 }
 0x467   : > { %v6317_v33 = vpop.f32.mrb[18].mxu0 }
 0x468   : > { %v5186_v19 = vpop.f32.mrb[19].mxu0 }
 0x46d   : > { %v6321_v30 = vpop.f32.mrb[32].mxu1 }
 0x46e   : > { %7516 = vst [vmem:[#allocation4_spill] sm:$0xff] %v6321_v30  ;;  %v5191_v35 = vpop.f32.mrb[33].mxu1 }
 0x46f   : > { %v6323_v38 = vpop.f32.mrb[34].mxu1 }
 0x470   : > { %7517 = vst [vmem:[#allocation5_spill] sm:$0xff] %v6323_v38  ;;  %v5192_v8 = vpop.f32.mrb[35].mxu1 }
 0x475   : > { %v6327_v41 = vpop.f32.mrb[20].mxu0 }
 0x476   : > { %7518 = vst [vmem:[#allocation6_spill] sm:$0xff] %v6327_v41  ;;  %v5197_v28 = vpop.f32.mrb[21].mxu0 }
 0x477   : > { %v6329_v45 = vpop.f32.mrb[22].mxu0 }
 0x478   : > { %7519 = vst [vmem:[#allocation7_spill] sm:$0xff] %v6329_v45  ;;  %v5198_v39 = vpop.f32.mrb[23].mxu0 }
 0x479   : > { %v6333_v47 = vpop.f32.mrb[36].mxu1 }
 0x47a   : > { %7520 = vst [vmem:[#allocation8_spill] sm:$0xff] %v6333_v47  ;;  %v5203_v15 = vpop.f32.mrb[37].mxu1 }
 0x47b   : > { %v6335_v48 = vpop.f32.mrb[38].mxu1 }
 0x47c   : > { %7521 = vst [vmem:[#allocation9_spill] sm:$0xff] %v6335_v48  ;;  %v5204_v46 = vpop.f32.mrb[39].mxu1 }
 0x47d   : > { %v6339_v52 = vpop.f32.mrb[24].mxu0 }
 0x47e   : > { %7522 = vst [vmem:[#allocation10_spill] sm:$0xff] %v6339_v52  ;;  %v5209_v62 = vpop.f32.mrb[25].mxu0 }
 0x47f   : > { %v6341_v18 = vpop.f32.mrb[26].mxu0 }
 0x480   : > { %7523 = vst [vmem:[#allocation11_spill] sm:$0xff] %v6341_v18  ;;  %v5210_v6 = vpop.f32.mrb[27].mxu0 }
 0x481   : > { %v6345_v32 = vpop.f32.mrb[40].mxu1 }
 0x482   : > { %7524 = vst [vmem:[#allocation12_spill] sm:$0xff] %v6345_v32  ;;  %v5215_v31 = vpop.f32.mrb[41].mxu1 }
 0x483   : > { %v6347_v0 = vpop.f32.mrb[42].mxu1 }
 0x484   : > { %7525 = vst [vmem:[#allocation13_spill] sm:$0xff] %v6347_v0  ;;  %v5216_v3 = vpop.f32.mrb[43].mxu1 }
 0x485   : > { %v6351_v44 = vpop.f32.mrb[28].mxu0 }
 0x486   : > { %7526 = vst [vmem:[#allocation14_spill] sm:$0xff] %v6351_v44  ;;  %v5221_v60 = vpop.f32.mrb[29].mxu0 }
 0x487   : > { %v6353_v4 = vpop.f32.mrb[30].mxu0 }
 0x488   : > { %7527 = vst [vmem:[#allocation15_spill] sm:$0xff] %v6353_v4  ;;  %v5222_v36 = vpop.f32.mrb[31].mxu0 }
 0x4af   : > { %v1525_v9 = vpop.f32.mrb[32].mxu0 }
 0x4b0   : > { %v6368_v22 = vadd.f32 %v6360_v5, %v1525_v9  ;;  %v5233_v55 = vpop.f32.mrb[33].mxu0 }
 0x4b1   : > { %v1528_v59 = vpop.f32.mrb[34].mxu0 }
 0x4b2   : > { %v6371_v26 = vadd.f32 %v6365_v10, %v1528_v59  ;;  %v6373_v51 = vpop.f32.mrb[44].mxu1  ;;  %v5234_v58 = vpop.f32.mrb[35].mxu0  ;;  %v1917_v12 = vsel %vm903_vm4, %v6368_v22, -inf }
 0x4b3   : > { %7528 = vst [vmem:[#allocation16_spill] sm:$0xff] %v6373_v51  ;;  %v5227_v42 = vpop.f32.mrb[45].mxu1  ;;  %1918 = vmax.xlane.f32.xlu0 %v1917_v12 }
 0x4b4   : > { %v6377_v54 = vpop.f32.mrb[46].mxu1  ;;  %v1920_v57 = vsel %vm903_vm4, %v6371_v26, -inf }
 0x4b5   : > { %7529 = vst [vmem:[#allocation17_spill] sm:$0xff] %v6377_v54  ;;  %v5228_v43 = vpop.f32.mrb[47].mxu1  ;;  %1921 = vmax.xlane.f32.xlu1 %v1920_v57 }
 0x4b7   : > { %v1629_v13 = vpop.f32.mrb[36].mxu0 }
 0x4b8   : > { %v6384_v56 = vadd.f32 %v6360_v5, %v1629_v13  ;;  %v5245_v49 = vpop.f32.mrb[37].mxu0 }
 0x4b9   : > { %v1632_v53 = vpop.f32.mrb[38].mxu0 }
 0x4ba   : > { %v1577_v61 = vpop.f32.mrb[48].mxu1  ;;  %v5246_v21 = vpop.f32.mrb[39].mxu0  ;;  %v1929_v23 = vsel %vm903_vm4, %v6384_v56, -inf  ;;  %v6401_v28 = vadd.f32 %v6365_v10, %v1632_v53 }
 0x4bb   : > { %v6394_v27 = vadd.f32 %v4902_v17, %v1577_v61  ;;  %v5239_v50 = vpop.f32.mrb[49].mxu1  ;;  %1930 = vmax.xlane.f32.xlu1 %v1929_v23 }
 0x4bc   : > { %v1580_v14 = vpop.f32.mrb[50].mxu1  ;;  %v1932_v55 = vsel %vm903_vm4, %v6401_v28, -inf }
 0x4bd   : > { %v6396_v1 = vadd.f32 %v4903_v2, %v1580_v14  ;;  %v5240_v37 = vpop.f32.mrb[51].mxu1  ;;  %v1923_v19 = vsel %vm903_vm4, %v6394_v27, -inf }
 0x4be   : > { %1924 = vmax.xlane.f32.xlu0 %v1923_v19 }
 0x4bf   : > { %v1733_v35 = vpop.f32.mrb[40].mxu0  ;;  %v1926_v15 = vsel %vm903_vm4, %v6396_v1, -inf }
 0x4c0   : > { %v5257_v8 = vpop.f32.mrb[41].mxu0  ;;  %v6408_v60 = vadd.f32 %v6360_v5, %v1733_v35 }
 0x4c1   : > { %v1736_v39 = vpop.f32.mrb[42].mxu0 }
 0x4c2   : > { %1927 = vmax.xlane.f32.xlu0 %v1926_v15  ;;  %v1681_v46 = vpop.f32.mrb[52].mxu1  ;;  %v5258_v62 = vpop.f32.mrb[43].mxu0  ;;  %v6417_v42 = vadd.f32 %v6365_v10, %v1736_v39  ;;  %v1941_v13 = vsel %vm903_vm4, %v6408_v60, -inf }
 0x4c3   : > { %v6405_v6 = vadd.f32 %v4902_v17, %v1681_v46  ;;  %v5251_v31 = vpop.f32.mrb[53].mxu1 }
 0x4c4   : > { %v1684_v3 = vpop.f32.mrb[54].mxu1  ;;  %v1944_v19 = vsel %vm903_vm4, %v6417_v42, -inf }
 0x4c5   : > { %v6410_v36 = vadd.f32 %v4903_v2, %v1684_v3  ;;  %v5252_v9 = vpop.f32.mrb[55].mxu1  ;;  %v1935_v59 = vsel %vm903_vm4, %v6405_v6, -inf }
 0x4c6   : > { %1933 = vmax.xlane.f32.xlu0 %v1932_v55  ;;  %1936 = vmax.xlane.f32.xlu1 %v1935_v59 }
 0x4c7   : > { %v1837_v58 = vpop.f32.mrb[44].mxu0  ;;  %v1938_v43 = vsel %vm903_vm4, %v6410_v36, -inf }
 0x4c8   : > { %v5269_v12 = vpop.f32.mrb[45].mxu0  ;;  %v6426_v50 = vadd.f32 %v6360_v5, %v1837_v58  ;;  %v5833_v58 = vld [vmem:[#allocation2 + $0x28] sm:$0xff] }
 0x4c9   : > { %v1840_v57 = vpop.f32.mrb[46].mxu0  ;;  %v5836_v12 = vld [vmem:[#allocation2 + $0x30] sm:$0xff] }
 0x4ca   : > { %1939 = vmax.xlane.f32.xlu0 %v1938_v43  ;;  %1942 = vmax.xlane.f32.xlu1 %v1941_v13  ;;  %v1785_v49 = vpop.f32.mrb[56].mxu1  ;;  %v5270_v53 = vpop.f32.mrb[47].mxu0  ;;  %v6435_v8 = vadd.f32 %v6365_v10, %v1840_v57  ;;  %v1953_v5 = vsel %vm903_vm4, %v6426_v50, -inf }
 0x4cb   : > { %v6423_v61 = vadd.f32 %v4902_v17, %v1785_v49  ;;  %v5263_v21 = vpop.f32.mrb[57].mxu1  ;;  %v6455_v57 = vpop.permute.xlu1 %2195 }
 0x4cc   : > { %v1788_v23 = vpop.f32.mrb[58].mxu1  ;;  %v1956_v55 = vsel %vm903_vm4, %v6435_v8, -inf }
 0x4cd   : > { %v6428_v14 = vadd.f32 %v4903_v2, %v1788_v23  ;;  %v5264_v37 = vpop.f32.mrb[59].mxu1  ;;  %v1947_v35 = vsel %vm903_vm4, %v6423_v61, -inf }
 0x4ce   : > { %1945 = vmax.xlane.f32.xlu0 %v1944_v19  ;;  %1948 = vmax.xlane.f32.xlu1 %v1947_v35 }
 0x4cf   : > { %v1950_v39 = vsel %vm903_vm4, %v6428_v14, -inf  ;;  %v6457_v43 = vpop.permute.xlu1 %2242 }
 0x4d2   : > { %1951 = vmax.xlane.f32.xlu0 %v1950_v39  ;;  %v1889_v15 = vpop.f32.mrb[60].mxu1  ;;  %1954 = vmax.xlane.f32.xlu1 %v1953_v5 }
 0x4d3   : > { %v6441_v46 = vadd.f32 %v4902_v17, %v1889_v15  ;;  %v5275_v62 = vpop.f32.mrb[61].mxu1  ;;  %v5834_v17 = vld [vmem:[#allocation2 + $0x38] sm:$0xff] }
 0x4d4   : > { %v1892_v31 = vpop.f32.mrb[62].mxu1 }
 0x4d5   : > { %v6443_v3 = vadd.f32 %v4903_v2, %v1892_v31  ;;  %v5276_v9 = vpop.f32.mrb[63].mxu1  ;;  %v1959_v10 = vsel %vm903_vm4, %v6441_v46, -inf  ;;  %v5835_v2 = vld [vmem:[#allocation2 + $0x20] sm:$0xff] }
 0x4d6   : > { %1960 = vmax.xlane.f32.xlu1 %v1959_v10  ;;  %1957 = vmax.xlane.f32.xlu0 %v1956_v55 }
 0x4d7   : > { %v1962_v59 = vsel %vm903_vm4, %v6443_v3, -inf }
 0x4da   : > { %1963 = vmax.xlane.f32.xlu0 %v1962_v59 }
 0x4e7   : > { %2336 = vrot.lane.b32.xlu1 %v5833_v58, %s5858_s23 }
 0x4eb   : > { %2430 = vrot.lane.b32.xlu1 %v5834_v17, %s5858_s23 }
 0x4f0   : > { %2289 = vrot.lane.b32.xlu0 %v5835_v2, %s5858_s23 }
 0x4f4   : > { %2383 = vrot.lane.b32.xlu0 %v5836_v12, %s5858_s23  ;;  %s5864_s23 = smov 40  }
 0x540   : > { %v1919_v13 = vpop.xlane.xlu0 %1918 }
 0x541   : > { %v1965_v49 = vsub.f32 %v6368_v22, %v1919_v13 }
 0x542   : > { %v1922_v53 = vpop.xlane.xlu1 %1921 }
 0x543   : > { %v1981_v21 = vmul.f32 1.442695, %v1965_v49  ;;  %v1966_v23 = vsub.f32 %v6371_v26, %v1922_v53 }
 0x545   : > { %5641 = vpow2.f32 %v1981_v21  ;;  %v1983_v37 = vmul.f32 1.442695, %v1966_v23 }
 0x547   : > { %5643 = vpow2.f32 %v1983_v37 }
 0x548   : > { %v1931_v19 = vpop.xlane.xlu1 %1930 }
 0x549   : > { %v1969_v35 = vsub.f32 %v6384_v56, %v1931_v19 }
 0x54b   : > { %v1925_v39 = vpop.xlane.xlu0 %1924  ;;  %v1989_v15 = vmul.f32 1.442695, %v1969_v35 }
 0x54c   : > { %v1967_v5 = vsub.f32 %v6394_v27, %v1925_v39 }
 0x54e   : > { %v1985_v62 = vmul.f32 1.442695, %v1967_v5 }
 0x54f   : > { %v6463_v31 = vpop.eup %5641  ;;  %v1928_v9 = vpop.xlane.xlu0 %1927 }
 0x550   : > { %5645 = vpow2.f32 %v1985_v62  ;;  %v1968_v22 = vsub.f32 %v6396_v1, %v1928_v9  ;;  %v2013_v26 = vsel %vm903_vm4, %v6463_v31, 0.0 }
 0x551   : > { %v6468_v10 = vpop.eup %5643  ;;  %2014 = vadd.xlane.f32.xlu1 %v2013_v26  ;;  %5647 = vpow2.f32 %v1989_v15 }
 0x552   : > { %v1987_v55 = vmul.f32 1.442695, %v1968_v22  ;;  %v2016_v56 = vsel %vm903_vm4, %v6468_v10, 0.0 }
 0x553   : > { %v1937_v27 = vpop.xlane.xlu1 %1936  ;;  %2017 = vadd.xlane.f32.xlu0 %v2016_v56  ;;  %v1934_v59 = vpop.xlane.xlu0 %1933 }
 0x554   : > { %5649 = vpow2.f32 %v1987_v55  ;;  %v1971_v58 = vsub.f32 %v6405_v6, %v1937_v27  ;;  %v1970_v17 = vsub.f32 %v6401_v28, %v1934_v59 }
 0x556   : > { %v1993_v1 = vmul.f32 1.442695, %v1971_v58  ;;  %v1991_v2 = vmul.f32 1.442695, %v1970_v17 }
 0x557   : > { %v1943_v12 = vpop.xlane.xlu1 %1942  ;;  %v1940_v13 = vpop.xlane.xlu0 %1939 }
 0x558   : > { %5651 = vpow2.f32 %v1993_v1  ;;  %v1973_v49 = vsub.f32 %v6408_v60, %v1943_v12  ;;  %v1972_v53 = vsub.f32 %v6410_v36, %v1940_v13 }
 0x559   : > { %5653 = vpow2.f32 %v1991_v2 }
 0x55a   : > { %v6476_v21 = vpop.eup %5645  ;;  %v1997_v23 = vmul.f32 1.442695, %v1973_v49  ;;  %v1995_v37 = vmul.f32 1.442695, %v1972_v53 }
 0x55b   : > { %v1949_v19 = vpop.xlane.xlu1 %1948  ;;  %v1946_v35 = vpop.xlane.xlu0 %1945  ;;  %v2019_v6 = vsel %vm903_vm4, %v6476_v21, 0.0 }
 0x55c   : > { %v6480_v28 = vpop.eup %5647  ;;  %5655 = vpow2.f32 %v1997_v23  ;;  %v1975_v39 = vsub.f32 %v6423_v61, %v1949_v19  ;;  %v1974_v5 = vsub.f32 %v6417_v42, %v1946_v35  ;;  %2020 = vadd.xlane.f32.xlu1 %v2019_v6 }
 0x55d   : > { %5657 = vpow2.f32 %v1995_v37  ;;  %v2025_v22 = vsel %vm903_vm4, %v6480_v28, 0.0 }
 0x55e   : > { %v6484_v60 = vpop.eup %5649  ;;  %v2001_v36 = vmul.f32 1.442695, %v1975_v39  ;;  %v1999_v15 = vmul.f32 1.442695, %v1974_v5 }
 0x55f   : > { %v1955_v62 = vpop.xlane.xlu1 %1954  ;;  %v1952_v9 = vpop.xlane.xlu0 %1951  ;;  %v2022_v26 = vsel %vm903_vm4, %v6484_v60, 0.0 }
 0x560   : > { %5659 = vpow2.f32 %v2001_v36  ;;  %v1977_v55 = vsub.f32 %v6426_v50, %v1955_v62  ;;  %v1976_v61 = vsub.f32 %v6428_v14, %v1952_v9  ;;  %2026 = vadd.xlane.f32.xlu1 %v2025_v22  ;;  %2023 = vadd.xlane.f32.xlu0 %v2022_v26 }
 0x561   : > { %5661 = vpow2.f32 %v1999_v15 }
 0x562   : > { %v6492_v42 = vpop.eup %5651  ;;  %v2005_v56 = vmul.f32 1.442695, %v1977_v55  ;;  %v2003_v27 = vmul.f32 1.442695, %v1976_v61 }
 0x563   : > { %v6494_v59 = vpop.eup %5653  ;;  %v1961_v58 = vpop.xlane.xlu1 %1960  ;;  %v2031_v1 = vsel %vm903_vm4, %v6492_v42, 0.0 }
 0x564   : > { %v1958_v17 = vpop.xlane.xlu0 %1957  ;;  %5663 = vpow2.f32 %v2005_v56  ;;  %v1979_v2 = vsub.f32 %v6441_v46, %v1961_v58  ;;  %2032 = vadd.xlane.f32.xlu1 %v2031_v1  ;;  %v2028_v14 = vsel %vm903_vm4, %v6494_v59, 0.0  ;;  %v6542_v58 = vld [vmem:[#allocation2 + $0x10] sm:$0xff]  ;;  %v6548_v1 = vld [vmem:[#allocation2] sm:$0xff] }
 0x565   : > { %v1978_v50 = vsub.f32 %v6435_v8, %v1958_v17  ;;  %5665 = vpow2.f32 %v2003_v27  ;;  %2029 = vadd.xlane.f32.xlu0 %v2028_v14  ;;  %v6539_v27 = vld [vmem:[#allocation2 + $0x8] sm:$0xff]  ;;  %v6545_v17 = vld [vmem:[#allocation2 + $0x18] sm:$0xff]  ;;  %v6559_v14 = vld [vmem:[#allocation2 + $0x30] sm:$0xff] }
 0x566   : > { %v6502_v12 = vpop.eup %5655  ;;  %v2009_v13 = vmul.f32 1.442695, %v1979_v2  ;;  %v6551_v2 = vld [vmem:[#allocation2 + $0x20] sm:$0xff] }
 0x567   : > { %v2007_v49 = vmul.f32 1.442695, %v1978_v50  ;;  %v6504_v53 = vpop.eup %5657  ;;  %v2037_v37 = vsel %vm903_vm4, %v6502_v12, 0.0  ;;  %v6555_v50 = vld [vmem:[#allocation2 + $0x28] sm:$0xff] }
 0x568   : > { %v1964_v23 = vpop.xlane.xlu0 %1963  ;;  %5667 = vpow2.f32 %v2009_v13  ;;  %2038 = vadd.xlane.f32.xlu1 %v2037_v37  ;;  %v2034_v8 = vsel %vm903_vm4, %v6504_v53, 0.0  ;;  %v6563_v13 = vld [vmem:[#allocation2 + $0x38] sm:$0xff] }
 0x569   : > { %v1980_v46 = vsub.f32 %v6443_v3, %v1964_v23  ;;  %5669 = vpow2.f32 %v2007_v49  ;;  %2035 = vadd.xlane.f32.xlu0 %v2034_v8  ;;  %v6579_v49 = vpop.permute.xlu1 %2336 }
 0x56a   : > { %v6511_v19 = vpop.eup %5659 }
 0x56b   : > { %v2011_v35 = vmul.f32 1.442695, %v1980_v46  ;;  %v6513_v6 = vpop.eup %5661  ;;  %v2043_v39 = vsel %vm903_vm4, %v6511_v19, 0.0 }
 0x56c   : > { %2044 = vadd.xlane.f32.xlu1 %v2043_v39  ;;  %v2040_v5 = vsel %vm903_vm4, %v6513_v6, 0.0  ;;  %v2290_v23 = vpop.permute.xlu0 %2289 }
 0x56d   : > { %5671 = vpow2.f32 %v2011_v35  ;;  %2041 = vadd.xlane.f32.xlu0 %v2040_v5  ;;  %v6581_v37 = vpop.permute.xlu1 %2430 }
 0x56e   : > { %v6519_v3 = vpop.eup %5663 }
 0x56f   : > { %v6521_v36 = vpop.eup %5665  ;;  %v2049_v15 = vsel %vm903_vm4, %v6519_v3, 0.0 }
 0x570   : > { %2050 = vadd.xlane.f32.xlu1 %v2049_v15  ;;  %v2046_v62 = vsel %vm903_vm4, %v6521_v36, 0.0  ;;  %v6583_v46 = vpop.permute.xlu0 %2383 }
 0x571   : > { %2047 = vadd.xlane.f32.xlu0 %v2046_v62 }
 0x572   : > { %v6527_v9 = vpop.eup %5667 }
 0x573   : > { %v6529_v22 = vpop.eup %5669  ;;  %v2055_v26 = vsel %vm903_vm4, %v6527_v9, 0.0 }
 0x574   : > { %2056 = vadd.xlane.f32.xlu1 %v2055_v26  ;;  %v2052_v55 = vsel %vm903_vm4, %v6529_v22, 0.0 }
 0x575   : > { %2053 = vadd.xlane.f32.xlu0 %v2052_v55 }
 0x577   : > { %v6535_v61 = vpop.eup %5671 }
 0x578   : > { %v2058_v56 = vsel %vm903_vm4, %v6535_v61, 0.0 }
 0x579   : > { %2059 = vadd.xlane.f32.xlu0 %v2058_v56 }
 0x585   : > { %2548 = vrot.lane.b32.xlu1 %v6539_v27, %s5859_s9 }
 0x589   : > { %2600 = vrot.lane.b32.xlu1 %v6542_v58, %s5859_s9 }
 0x58d   : > { %2652 = vrot.lane.b32.xlu1 %v6545_v17, %s5859_s9 }
 0x58f   : > { %2496 = vrot.lane.b32.xlu0 %v6548_v1, %s5859_s9 }
 0x591   : > { %2704 = vrot.lane.b32.xlu1 %v6551_v2, %s5859_s9 }
 0x593   : > { %2494 = vrot.lane.b32.xlu0 %v6548_v1, %s5860_s10 }
 0x595   : > { %2756 = vrot.lane.b32.xlu1 %v6555_v50, %s5859_s9 }
 0x597   : > { %2546 = vrot.lane.b32.xlu0 %v6539_v27, %s5860_s10 }
 0x599   : > { %2808 = vrot.lane.b32.xlu1 %v6559_v14, %s5859_s9 }
 0x59b   : > { %2598 = vrot.lane.b32.xlu0 %v6542_v58, %s5860_s10 }
 0x59d   : > { %2860 = vrot.lane.b32.xlu1 %v6563_v13, %s5859_s9  ;;  %s5865_s9 = smov 8  }
 0x59f   : > { %2650 = vrot.lane.b32.xlu0 %v6545_v17, %s5860_s10 }
 0x5a1   : > { %2858 = vrot.lane.b32.xlu1 %v6563_v13, %s5860_s10 }
 0x5a3   : > { %2702 = vrot.lane.b32.xlu0 %v6551_v2, %s5860_s10 }
 0x5a5   : > { %3114 = vrot.lane.b32.xlu1 %v6548_v1, %s5861_s11 }
 0x5a7   : > { %2754 = vrot.lane.b32.xlu0 %v6555_v50, %s5860_s10 }
 0x5a9   : > { %3208 = vrot.lane.b32.xlu1 %v6542_v58, %s5861_s11 }
 0x5ab   : > { %2806 = vrot.lane.b32.xlu0 %v6559_v14, %s5860_s10  ;;  %s5866_s10 = smov 16  }
 0x5ad   : > { %3255 = vrot.lane.b32.xlu1 %v6545_v17, %s5861_s11 }
 0x5af   : > { %3161 = vrot.lane.b32.xlu0 %v6539_v27, %s5861_s11 }
 0x5de   : > { %v2015_v8 = vpop.xlane.xlu1 %2014 }
 0x5df   : > { %5673 = vrcp.f32 %v2015_v8 }
 0x5e0   : > { %v2018_v35 = vpop.xlane.xlu0 %2017 }
 0x5e1   : > { %5675 = vrcp.f32 %v2018_v35 }
 0x5e9   : > { %v5674_v39 = vpop.eup %5673  ;;  %v2021_v5 = vpop.xlane.xlu1 %2020 }
 0x5ea   : > { %v2077_v62 = vmul.f32 %v5674_v39, %v6463_v31  ;;  %5677 = vrcp.f32 %v2021_v5 }
 0x5eb   : > { %v5676_v15 = vpop.eup %5675 }
 0x5ec   : > { %v2078_v26 = vmul.f32 %v5676_v15, %v6468_v10 }
 0x5ed   : > { %v2027_v55 = vpop.xlane.xlu1 %2026  ;;  %v2024_v56 = vpop.xlane.xlu0 %2023 }
 0x5ee   : > { %v2093_v7 = vpack.c.bf16 %v2078_v26, %v2077_v62  ;;  %5679 = vrcp.f32 %v2024_v56 }
 0x5ef   : > { %5681 = vrcp.f32 %v2027_v55 }
 0x5f0   : > { %5280 = vmatmul.mubr.msk.bf16.vlgmr.msra.gmra.mrb[48].mxu0 %vm903_vm4, %v2093_v7 }
 0x5f1   : > { %5290 = vmatpush3.bf16.msra.mxu0 %v6455_v57  ;;  %v2033_v8 = vpop.xlane.xlu1 %2032  ;;  %5291 = vmatprep.mubr.msk.bf16.mxu0 %vm5853_vm2, %v7498_v20 }
 0x5f2   : > { %v2030_v35 = vpop.xlane.xlu0 %2029  ;;  %5301 = vmatprep.subr.bf16.mxu0 %v7498_v20 }
 0x5f3   : > { %5683 = vrcp.f32 %v2030_v35 }
 0x5f4   : > { %5685 = vrcp.f32 %v2033_v8  ;;  %v5678_v39 = vpop.eup %5677 }
 0x5f5   : > { %v2039_v31 = vpop.xlane.xlu1 %2038  ;;  %v2079_v7 = vmul.f32 %v5678_v39, %v6476_v21 }
 0x5f6   : > { %v2036_v10 = vpop.xlane.xlu0 %2035 }
 0x5f7   : > { %5687 = vrcp.f32 %v2036_v10 }
 0x5f8   : > { %v5680_v5 = vpop.eup %5679  ;;  %5689 = vrcp.f32 %v2039_v31 }
 0x5f9   : > { %v2045_v15 = vpop.xlane.xlu1 %2044  ;;  %v2080_v57 = vmul.f32 %v5680_v5, %v6484_v60  ;;  %v5682_v26 = vpop.eup %5681 }
 0x5fa   : > { %v2042_v62 = vpop.xlane.xlu0 %2041  ;;  %v2081_v8 = vmul.f32 %v5682_v26, %v6480_v28 }
 0x5fb   : > { %5691 = vrcp.f32 %v2042_v62  ;;  %v2094_v55 = vpack.c.bf16 %v2080_v57, %v2079_v7 }
 0x5fc   : > { %5693 = vrcp.f32 %v2045_v15 }
 0x5fd   : > { %v5684_v56 = vpop.eup %5683  ;;  %v2051_v24 = vpop.xlane.xlu1 %2050  ;;  %5286 = vmatmul.mubr.msk.bf16.vlgmr.msra.gmra.mrb[64].mxu1 %vm903_vm4, %v2094_v55 }
 0x5fe   : > { %v2082_v35 = vmul.f32 %v5684_v56, %v6494_v59  ;;  %v2048_v10 = vpop.xlane.xlu0 %2047  ;;  %v5686_v31 = vpop.eup %5685  ;;  %5296 = vmatpush3.bf16.msra.mxu1 %v6457_v43  ;;  %5297 = vmatprep.mubr.msk.bf16.mxu1 %vm5853_vm2, %v7498_v20 }
 0x5ff   : > { %5695 = vrcp.f32 %v2048_v10  ;;  %5307 = vmatprep.subr.bf16.mxu1 %v7498_v20  ;;  %v2083_v28 = vmul.f32 %v5686_v31, %v6492_v42 }
 0x600   : > { %v2095_v21 = vpack.c.bf16 %v2082_v35, %v2081_v8  ;;  %5697 = vrcp.f32 %v2051_v24 }
 0x601   : > { %v5688_v60 = vpop.eup %5687  ;;  %v2057_v39 = vpop.xlane.xlu1 %2056 }
 0x602   : > { %v2084_v59 = vmul.f32 %v5688_v60, %v6504_v53  ;;  %5292 = vmatmul.mubr.msk.bf16.vlgmr.msra.gmra.mrb[52].mxu0 %vm903_vm4, %v2095_v21  ;;  %v2054_v5 = vpop.xlane.xlu0 %2053  ;;  %v5690_v15 = vpop.eup %5689 }
 0x603   : > { %5302 = vmatpush3.bf16.msra.mxu0 %v2290_v23  ;;  %5699 = vrcp.f32 %v2054_v5  ;;  %5303 = vmatprep.mubr.msk.bf16.mxu0 %vm5853_vm2, %v7498_v20  ;;  %v2085_v57 = vmul.f32 %v5690_v15, %v6502_v12 }
 0x604   : > { %v2096_v43 = vpack.c.bf16 %v2084_v59, %v2083_v28  ;;  %5313 = vmatprep.subr.bf16.mxu0 %v7498_v20  ;;  %5701 = vrcp.f32 %v2057_v39 }
 0x605   : > { %v5692_v7 = vpop.eup %5691  ;;  %v2549_v24 = vpop.permute.xlu1 %2548 }
 0x606   : > { %v2086_v42 = vmul.f32 %v5692_v7, %v6513_v6  ;;  %5298 = vmatmul.mubr.msk.bf16.vlgmr.msra.gmra.mrb[68].mxu1 %vm903_vm4, %v2096_v43  ;;  %v2060_v53 = vpop.xlane.xlu0 %2059  ;;  %v5694_v62 = vpop.eup %5693  ;;  %v2554_v5 = vsel %vm485_vm3, %v2549_v24, 0 }
 0x607   : > { %5308 = vmatpush3.bf16.msra.mxu1 %v6579_v49  ;;  %5703 = vrcp.f32 %v2060_v53  ;;  %5309 = vmatprep.mubr.msk.bf16.mxu1 %vm5853_vm2, %v7498_v20  ;;  %v2087_v56 = vmul.f32 %v5694_v62, %v6511_v19 }
 0x608   : > { %v2097_v23 = vpack.c.bf16 %v2086_v42, %v2085_v57  ;;  %5319 = vmatprep.subr.bf16.mxu1 %v7498_v20 }
 0x609   : > { %v5696_v26 = vpop.eup %5695  ;;  %v2601_v55 = vpop.permute.xlu1 %2600 }
 0x60a   : > { %v2088_v12 = vmul.f32 %v5696_v26, %v6521_v36  ;;  %5304 = vmatmul.mubr.msk.bf16.vlgmr.msra.gmra.mrb[56].mxu0 %vm903_vm4, %v2097_v23  ;;  %v2497_v6 = vpop.permute.xlu0 %2496  ;;  %v5698_v8 = vpop.eup %5697 }
 0x60b   : > { %5314 = vmatpush3.bf16.msra.mxu0 %v6583_v46  ;;  %5315 = vmatprep.mubr.msk.bf16.mxu0 %vm5853_vm2, %v7498_v20  ;;  %v2089_v10 = vmul.f32 %v5698_v8, %v6519_v3 }
 0x60c   : > { %v2098_v49 = vpack.c.bf16 %v2088_v12, %v2087_v56  ;;  %5325 = vmatprep.subr.bf16.mxu0 %v7498_v20 }
 0x60d   : > { %v5700_v35 = vpop.eup %5699  ;;  %v2653_v21 = vpop.permute.xlu1 %2652 }
 0x60e   : > { %v2090_v31 = vmul.f32 %v5700_v35, %v6529_v22  ;;  %5310 = vmatmul.mubr.msk.bf16.vlgmr.msra.gmra.mrb[72].mxu1 %vm903_vm4, %v2098_v49  ;;  %v2495_v19 = vpop.permute.xlu0 %2494  ;;  %v5702_v36 = vpop.eup %5701  ;;  %v2502_v22 = vsel %vm485_vm3, %v2497_v6, 0  ;;  %v2658_v43 = vsel %vm485_vm3, %v2653_v21, 0 }
 0x60f   : > { %5320 = vmatpush3.bf16.msra.mxu1 %v6581_v37  ;;  %5321 = vmatprep.mubr.msk.bf16.mxu1 %vm5853_vm2, %v7498_v20  ;;  %v2091_v39 = vmul.f32 %v5702_v36, %v6527_v9 }
 0x610   : > { %v2099_v46 = vpack.c.bf16 %v2090_v31, %v2089_v10  ;;  %5331 = vmatprep.subr.bf16.mxu1 %v7498_v20 }
 0x611   : > { %v5704_v60 = vpop.eup %5703  ;;  %v2705_v59 = vpop.permute.xlu1 %2704 }
 0x612   : > { %v2092_v3 = vmul.f32 %v5704_v60, %v6535_v61  ;;  %5316 = vmatmul.mubr.msk.bf16.vlgmr.msra.gmra.mrb[60].mxu0 %vm903_vm4, %v2099_v46  ;;  %v2547_v28 = vpop.permute.xlu0 %2546  ;;  %v2606_v61 = vsel %vm485_vm3, %v2601_v55, 0  ;;  %v2710_v57 = vsel %vm485_vm3, %v2705_v59, 0 }
 0x613   : > { %5327 = vmatprep.mubr.msk.bf16.mxu0 %vm5853_vm2, %v7498_v20 }
 0x614   : > { %5326 = vmatpush3.bf16.xpose.msra.mxu0 %v2502_v22  ;;  %v2100_v37 = vpack.c.bf16 %v2092_v3, %v2091_v39 }
 0x615   : > { %5337 = vmatprep.subr.bf16.mxu0 %v7498_v20  ;;  %v2757_v15 = vpop.permute.xlu1 %2756 }
 0x616   : > { %5322 = vmatmul.mubr.msk.bf16.vlgmr.msra.gmra.mrb[76].mxu1 %vm903_vm4, %v2100_v37  ;;  %v2599_v9 = vpop.permute.xlu0 %2598  ;;  %v2762_v53 = vsel %vm485_vm3, %v2757_v15, 0 }
 0x617   : > { %5333 = vmatprep.mubr.msk.bf16.mxu1 %vm5853_vm2, %v7498_v20 }
 0x618   : > { %5332 = vmatpush3.bf16.xpose.msra.mxu1 %v2554_v5 }
 0x619   : > { %5343 = vmatprep.subr.bf16.mxu1 %v7498_v20  ;;  %v2809_v24 = vpop.permute.xlu1 %2808 }
 0x61a   : > { %v2651_v7 = vpop.permute.xlu0 %2650  ;;  %v2814_v23 = vsel %vm485_vm3, %v2809_v24, 0 }
 0x61b   : > { %5328 = vmatmul.mubr.msk.bf16.vlgmr.msra.gmra.mrb[64].mxu0 %vm485_vm3, %v2495_v19 }
 0x61c   : > { %5338 = vmatpush3.bf16.xpose.msra.mxu0 %v2606_v61  ;;  %5339 = vmatprep.mubr.msk.bf16.mxu0 %vm5853_vm2, %v7498_v20 }
 0x61d   : > { %5349 = vmatprep.subr.bf16.mxu0 %v7498_v20  ;;  %v2861_v62 = vpop.permute.xlu1 %2860 }
 0x61e   : > { %v2703_v42 = vpop.permute.xlu0 %2702  ;;  %v2866_v56 = vsel %vm485_vm3, %v2861_v62, 0 }
 0x61f   : > { %5334 = vmatmul.mubr.msk.bf16.vlgmr.msra.gmra.mrb[80].mxu1 %vm485_vm3, %v2547_v28 }
 0x620   : > { %5344 = vmatpush3.bf16.xpose.msra.mxu1 %v2658_v43  ;;  %5345 = vmatprep.mubr.msk.bf16.mxu1 %vm5853_vm2, %v7498_v20 }
 0x621   : > { %5355 = vmatprep.subr.bf16.mxu1 %v7498_v20  ;;  %v2859_v55 = vpop.permute.xlu1 %2858 }
 0x622   : > { %v2755_v26 = vpop.permute.xlu0 %2754 }
 0x623   : > { %5340 = vmatmul.mubr.msk.bf16.vlgmr.msra.gmra.mrb[68].mxu0 %vm485_vm3, %v2599_v9 }
 0x624   : > { %5350 = vmatpush3.bf16.xpose.msra.mxu0 %v2710_v57  ;;  %5351 = vmatprep.mubr.msk.bf16.mxu0 %vm5853_vm2, %v7498_v20 }
 0x625   : > { %5361 = vmatprep.subr.bf16.mxu0 %v7498_v20  ;;  %v3115_v6 = vpop.permute.xlu1 %3114 }
 0x626   : > { %v2807_v12 = vpop.permute.xlu0 %2806 }
 0x627   : > { %5346 = vmatmul.mubr.msk.bf16.vlgmr.msra.gmra.mrb[84].mxu1 %vm485_vm3, %v2651_v7 }
 0x628   : > { %5356 = vmatpush3.bf16.xpose.msra.mxu1 %v2762_v53  ;;  %5357 = vmatprep.mubr.msk.bf16.mxu1 %vm5853_vm2, %v7498_v20 }
 0x629   : > { %5367 = vmatprep.subr.bf16.mxu1 %v7498_v20 }
 0x62a   : > { %v3162_v8 = vpop.permute.xlu0 %3161 }
 0x62b   : > { %5352 = vmatmul.mubr.msk.bf16.vlgmr.msra.gmra.mrb[72].mxu0 %vm485_vm3, %v2703_v42 }
 0x62c   : > { %5362 = vmatpush3.bf16.xpose.msra.mxu0 %v2814_v23  ;;  %5363 = vmatprep.mubr.msk.bf16.mxu0 %vm5853_vm2, %v7498_v20 }
 0x62d   : > { %5373 = vmatprep.subr.bf16.mxu0 %v7498_v20 }
 0x62f   : > { %5358 = vmatmul.mubr.msk.bf16.vlgmr.msra.gmra.mrb[88].mxu1 %vm485_vm3, %v2755_v26 }
 0x630   : > { %5368 = vmatpush3.bf16.xpose.msra.mxu1 %v2866_v56  ;;  %5369 = vmatprep.mubr.msk.bf16.mxu1 %vm5853_vm2, %v7498_v20 }
 0x631   : > { %5379 = vmatprep.subr.bf16.mxu1 %v7498_v20 }
 0x633   : > { %5364 = vmatmul.mubr.msk.bf16.vlgmr.msra.gmra.mrb[76].mxu0 %vm485_vm3, %v2807_v12 }
 0x634   : > { %5374 = vmatpush3.bf16.msra.mxu0 %v3115_v6  ;;  %5375 = vmatprep.mubr.msk.bf16.mxu0 %vm5853_vm2, %v7498_v20 }
 0x635   : > { %5385 = vmatprep.subr.bf16.mxu0 %v7498_v20 }
 0x637   : > { %5370 = vmatmul.mubr.msk.bf16.vlgmr.msra.gmra.mrb[92].mxu1 %vm485_vm3, %v2859_v55 }
 0x638   : > { %5380 = vmatpush3.bf16.msra.mxu1 %v3162_v8  ;;  %5381 = vmatprep.mubr.msk.bf16.mxu1 %vm5853_vm2, %v7498_v20 }
 0x639   : > { %5391 = vmatprep.subr.bf16.mxu1 %v7498_v20 }
 0x6c3   : > { %v6678_v49 = vpop.f32.mrb[48].mxu0 }
 0x6c4   : > { %v5281_v35 = vpop.f32.mrb[49].mxu0 }
 0x6c5   : > { %v6680_v10 = vpop.f32.mrb[50].mxu0 }
 0x6c6   : > { %v5282_v19 = vpop.f32.mrb[51].mxu0 }
 0x6d0   : > { %v6684_v36 = vpop.f32.mrb[64].mxu1 }
 0x6d1   : > { %v5287_v21 = vpop.f32.mrb[65].mxu1 }
 0x6d2   : > { %v6686_v46 = vpop.f32.mrb[66].mxu1 }
 0x6d3   : > { %v5288_v39 = vpop.f32.mrb[67].mxu1 }
 0x6d5   : > { %v6690_v3 = vpop.f32.mrb[52].mxu0 }
 0x6d6   : > { %v5293_v22 = vpop.f32.mrb[53].mxu0 }
 0x6d7   : > { %v6692_v28 = vpop.f32.mrb[54].mxu0 }
 0x6d8   : > { %v5294_v59 = vpop.f32.mrb[55].mxu0 }
 0x6d9   : > { %v6696_v5 = vpop.f32.mrb[68].mxu1 }
 0x6da   : > { %v5299_v9 = vpop.f32.mrb[69].mxu1 }
 0x6db   : > { %v6698_v61 = vpop.f32.mrb[70].mxu1 }
 0x6dc   : > { %v5300_v43 = vpop.f32.mrb[71].mxu1 }
 0x6dd   : > { %v6702_v7 = vpop.f32.mrb[56].mxu0  ;;  %v6729_v43 = vld [vmem:[%s7494_s3 + $0x40] sm:$0xff] }
 0x6de   : > { %v5305_v24 = vpop.f32.mrb[57].mxu0 }
 0x6df   : > { %v6704_v57 = vpop.f32.mrb[58].mxu0 }
 0x6e0   : > { %v5306_v53 = vpop.f32.mrb[59].mxu0 }
 0x6e1   : > { %v6708_v62 = vpop.f32.mrb[72].mxu1  ;;  %v6734_v53 = vld [vmem:[%s7494_s3 + $0x48] sm:$0xff] }
 0x6e2   : > { %v5311_v23 = vpop.f32.mrb[73].mxu1 }
 0x6e3   : > { %v6710_v26 = vpop.f32.mrb[74].mxu1 }
 0x6e4   : > { %v5312_v56 = vpop.f32.mrb[75].mxu1 }
 0x6e5   : > { %v6714_v12 = vpop.f32.mrb[60].mxu0 }
 0x6e6   : > { %v5317_v6 = vpop.f32.mrb[61].mxu0 }
 0x6e7   : > { %v6716_v8 = vpop.f32.mrb[62].mxu0 }
 0x6e8   : > { %v5318_v19 = vpop.f32.mrb[63].mxu0 }
 0x6e9   : > { %v6720_v21 = vpop.f32.mrb[76].mxu1  ;;  %v6742_v19 = vld [vmem:[%s7494_s3 + $0x50] sm:$0xff] }
 0x6ea   : > { %v5323_v39 = vpop.f32.mrb[77].mxu1 }
 0x6eb   : > { %v6722_v22 = vpop.f32.mrb[78].mxu1 }
 0x6ec   : > { %v5324_v9 = vpop.f32.mrb[79].mxu1 }
 0x6ee   : > { %v2538_v24 = vpop.f32.mrb[64].mxu0 }
 0x6ef   : > { %v6737_v23 = vadd.f32 %v6729_v43, %v2538_v24  ;;  %v5329_v56 = vpop.f32.mrb[65].mxu0  ;;  %v6752_v24 = vld [vmem:[%s7494_s3 + $0x58] sm:$0xff] }
 0x6f0   : > { %v2541_v6 = vpop.f32.mrb[66].mxu0 }
 0x6f1   : > { %v6745_v39 = vadd.f32 %v6734_v53, %v2541_v6  ;;  %v5330_v9 = vpop.f32.mrb[67].mxu0  ;;  %v2930_v63 = vsel %vm903_vm4, %v6737_v23, -inf }
 0x6f2   : > { %2931 = vmax.xlane.f32.xlu0 %v2930_v63  ;;  %v2590_v25 = vpop.f32.mrb[80].mxu1 }
 0x6f3   : > { %v6755_v56 = vadd.f32 %v6742_v19, %v2590_v25  ;;  %v5335_v16 = vpop.f32.mrb[81].mxu1  ;;  %v2933_v11 = vsel %vm903_vm4, %v6745_v39, -inf }
 0x6f4   : > { %2934 = vmax.xlane.f32.xlu1 %v2933_v11  ;;  %v2593_v6 = vpop.f32.mrb[82].mxu1 }
 0x6f5   : > { %v6760_v9 = vadd.f32 %v6752_v24, %v2593_v6  ;;  %v5336_v40 = vpop.f32.mrb[83].mxu1  ;;  %v2936_v63 = vsel %vm903_vm4, %v6755_v56, -inf }
 0x6f6   : > { %2937 = vmax.xlane.f32.xlu0 %v2936_v63  ;;  %v2642_v34 = vpop.f32.mrb[68].mxu0 }
 0x6f7   : > { %v6765_v59 = vadd.f32 %v6729_v43, %v2642_v34  ;;  %v5341_v25 = vpop.f32.mrb[69].mxu0  ;;  %v2939_v11 = vsel %vm903_vm4, %v6760_v9, -inf }
 0x6f8   : > { %v2645_v35 = vpop.f32.mrb[70].mxu0 }
 0x6f9   : > { %v6768_v16 = vadd.f32 %v6734_v53, %v2645_v35  ;;  %v5342_v42 = vpop.f32.mrb[71].mxu0  ;;  %v2942_v40 = vsel %vm903_vm4, %v6765_v59, -inf }
 0x6fa   : > { %2940 = vmax.xlane.f32.xlu0 %v2939_v11  ;;  %2943 = vmax.xlane.f32.xlu1 %v2942_v40  ;;  %v2694_v6 = vpop.f32.mrb[84].mxu1 }
 0x6fb   : > { %v6775_v63 = vadd.f32 %v6742_v19, %v2694_v6  ;;  %v5347_v34 = vpop.f32.mrb[85].mxu1  ;;  %v2945_v42 = vsel %vm903_vm4, %v6768_v16, -inf }
 0x6fc   : > { %v2697_v37 = vpop.f32.mrb[86].mxu1 }
 0x6fd   : > { %v6778_v25 = vadd.f32 %v6752_v24, %v2697_v37  ;;  %v5348_v35 = vpop.f32.mrb[87].mxu1  ;;  %v2948_v55 = vsel %vm903_vm4, %v6775_v63, -inf }
 0x6fe   : > { %2946 = vmax.xlane.f32.xlu0 %v2945_v42  ;;  %2949 = vmax.xlane.f32.xlu1 %v2948_v55  ;;  %v2746_v11 = vpop.f32.mrb[72].mxu0 }
 0x6ff   : > { %v6785_v40 = vadd.f32 %v6729_v43, %v2746_v11  ;;  %v5353_v6 = vpop.f32.mrb[73].mxu0  ;;  %v2951_v35 = vsel %vm903_vm4, %v6778_v25, -inf }
 0x700   : > { %v2749_v31 = vpop.f32.mrb[74].mxu0 }
 0x701   : > { %v6788_v34 = vadd.f32 %v6734_v53, %v2749_v31  ;;  %v5354_v37 = vpop.f32.mrb[75].mxu0  ;;  %v2954_v15 = vsel %vm903_vm4, %v6785_v40, -inf }
 0x702   : > { %2952 = vmax.xlane.f32.xlu0 %v2951_v35  ;;  %2955 = vmax.xlane.f32.xlu1 %v2954_v15  ;;  %v2798_v42 = vpop.f32.mrb[88].mxu1 }
 0x703   : > { %v6795_v55 = vadd.f32 %v6742_v19, %v2798_v42  ;;  %v5359_v11 = vpop.f32.mrb[89].mxu1  ;;  %v2957_v37 = vsel %vm903_vm4, %v6788_v34, -inf }
 0x704   : > { %v2801_v60 = vpop.f32.mrb[90].mxu1 }
 0x705   : > { %v6798_v6 = vadd.f32 %v6752_v24, %v2801_v60  ;;  %v5360_v31 = vpop.f32.mrb[91].mxu1  ;;  %v2960_v20 = vsel %vm903_vm4, %v6795_v55, -inf }
 0x706   : > { %2958 = vmax.xlane.f32.xlu0 %v2957_v37  ;;  %2961 = vmax.xlane.f32.xlu1 %v2960_v20  ;;  %v2850_v35 = vpop.f32.mrb[76].mxu0 }
 0x707   : > { %v6805_v15 = vadd.f32 %v6729_v43, %v2850_v35  ;;  %v5365_v42 = vpop.f32.mrb[77].mxu0  ;;  %v2963_v31 = vsel %vm903_vm4, %v6798_v6, -inf }
 0x708   : > { %v2853_v51 = vpop.f32.mrb[78].mxu0 }
 0x709   : > { %v6808_v11 = vadd.f32 %v6734_v53, %v2853_v51  ;;  %v5366_v60 = vpop.f32.mrb[79].mxu0  ;;  %v2966_v54 = vsel %vm903_vm4, %v6805_v15, -inf }
 0x70a   : > { %2964 = vmax.xlane.f32.xlu0 %v2963_v31  ;;  %v2902_v44 = vpop.f32.mrb[92].mxu1  ;;  %2967 = vmax.xlane.f32.xlu1 %v2966_v54 }
 0x70b   : > { %v6815_v20 = vadd.f32 %v6742_v19, %v2902_v44  ;;  %v5371_v43 = vpop.f32.mrb[93].mxu1  ;;  %v2969_v42 = vsel %vm903_vm4, %v6808_v11, -inf  ;;  %v6834_v44 = vpop.permute.xlu1 %3208 }
 0x70c   : > { %v2905_v37 = vpop.f32.mrb[94].mxu1 }
 0x70d   : > { %v6818_v35 = vadd.f32 %v6752_v24, %v2905_v37  ;;  %v5372_v51 = vpop.f32.mrb[95].mxu1  ;;  %v2972_v53 = vsel %vm903_vm4, %v6815_v20, -inf }
 0x70e   : > { %2973 = vmax.xlane.f32.xlu1 %v2972_v53  ;;  %2970 = vmax.xlane.f32.xlu0 %v2969_v42 }
 0x70f   : > { %v2975_v54 = vsel %vm903_vm4, %v6818_v35, -inf  ;;  %v6836_v19 = vpop.permute.xlu1 %3255 }
 0x712   : > { %2976 = vmax.xlane.f32.xlu0 %v2975_v54 }
 0x71f   : > { %3349 = vrot.lane.b32.xlu1 %v6555_v50, %s5861_s11 }
 0x723   : > { %3443 = vrot.lane.b32.xlu1 %v6563_v13, %s5861_s11 }
 0x728   : > { %3302 = vrot.lane.b32.xlu0 %v6551_v2, %s5861_s11 }
 0x72c   : > { %3396 = vrot.lane.b32.xlu0 %v6559_v14, %s5861_s11 }
 0x77f   : > { %v2932_v24 = vpop.xlane.xlu0 %2931 }
 0x780   : > { %v2978_v60 = vsub.f32 %v6737_v23, %v2932_v24 }
 0x781   : > { %v2935_v31 = vpop.xlane.xlu1 %2934 }
 0x782   : > { %v2994_v43 = vmul.f32 1.442695, %v2978_v60  ;;  %v2979_v37 = vsub.f32 %v6745_v39, %v2935_v31 }
 0x783   : > { %v2938_v51 = vpop.xlane.xlu0 %2937 }
 0x784   : > { %5705 = vpow2.f32 %v2994_v43  ;;  %v2996_v53 = vmul.f32 1.442695, %v2979_v37  ;;  %v2980_v42 = vsub.f32 %v6755_v56, %v2938_v51 }
 0x786   : > { %5707 = vpow2.f32 %v2996_v53  ;;  %v2998_v54 = vmul.f32 1.442695, %v2980_v42 }
 0x787   : > { %v2944_v4 = vpop.xlane.xlu1 %2943  ;;  %v2941_v32 = vpop.xlane.xlu0 %2940 }
 0x788   : > { %5709 = vpow2.f32 %v2998_v54  ;;  %v2982_v0 = vsub.f32 %v6765_v59, %v2944_v4  ;;  %v2981_v52 = vsub.f32 %v6760_v9, %v2941_v32 }
 0x78a   : > { %v3002_v18 = vmul.f32 1.442695, %v2982_v0  ;;  %v3000_v23 = vmul.f32 1.442695, %v2981_v52 }
 0x78b   : > { %v2950_v24 = vpop.xlane.xlu1 %2949  ;;  %v2947_v60 = vpop.xlane.xlu0 %2946 }
 0x78c   : > { %5711 = vpow2.f32 %v3002_v18  ;;  %v2984_v39 = vsub.f32 %v6775_v63, %v2950_v24  ;;  %v2983_v31 = vsub.f32 %v6768_v16, %v2947_v60 }
 0x78d   : > { %5713 = vpow2.f32 %v3000_v23 }
 0x78e   : > { %v6845_v56 = vpop.eup %5705  ;;  %v3006_v43 = vmul.f32 1.442695, %v2984_v39  ;;  %v3004_v37 = vmul.f32 1.442695, %v2983_v31 }
 0x78f   : > { %v2956_v51 = vpop.xlane.xlu1 %2955  ;;  %v2953_v53 = vpop.xlane.xlu0 %2952  ;;  %v3026_v4 = vsel %vm903_vm4, %v6845_v56, 0.0 }
 0x790   : > { %v6849_v32 = vpop.eup %5707  ;;  %5715 = vpow2.f32 %v3006_v43  ;;  %v2986_v52 = vsub.f32 %v6785_v40, %v2956_v51  ;;  %v2985_v18 = vsub.f32 %v6778_v25, %v2953_v53  ;;  %3027 = vadd.xlane.f32.xlu1 %v3026_v4 }
 0x791   : > { %5717 = vpow2.f32 %v3004_v37  ;;  %v3029_v0 = vsel %vm903_vm4, %v6849_v32, 0.0 }
 0x792   : > { %v6855_v59 = vpop.eup %5709  ;;  %v3010_v9 = vmul.f32 1.442695, %v2986_v52  ;;  %v3008_v16 = vmul.f32 1.442695, %v2985_v18  ;;  %3030 = vadd.xlane.f32.xlu0 %v3029_v0 }
 0x793   : > { %v2962_v63 = vpop.xlane.xlu1 %2961  ;;  %v2959_v42 = vpop.xlane.xlu0 %2958  ;;  %v3032_v54 = vsel %vm903_vm4, %v6855_v59, 0.0 }
 0x794   : > { %5719 = vpow2.f32 %v3010_v9  ;;  %v2988_v40 = vsub.f32 %v6795_v55, %v2962_v63  ;;  %v2987_v25 = vsub.f32 %v6788_v34, %v2959_v42  ;;  %3033 = vadd.xlane.f32.xlu1 %v3032_v54 }
 0x795   : > { %5721 = vpow2.f32 %v3008_v16 }
 0x796   : > { %v6861_v23 = vpop.eup %5711  ;;  %v3014_v24 = vmul.f32 1.442695, %v2988_v40  ;;  %v3012_v60 = vmul.f32 1.442695, %v2987_v25 }
 0x797   : > { %v6863_v39 = vpop.eup %5713  ;;  %v2968_v31 = vpop.xlane.xlu1 %2967  ;;  %v3038_v37 = vsel %vm903_vm4, %v6861_v23, 0.0 }
 0x798   : > { %v2965_v43 = vpop.xlane.xlu0 %2964  ;;  %5723 = vpow2.f32 %v3014_v24  ;;  %v2990_v51 = vsub.f32 %v6805_v15, %v2968_v31  ;;  %3039 = vadd.xlane.f32.xlu1 %v3038_v37  ;;  %v3035_v34 = vsel %vm903_vm4, %v6863_v39, 0.0 }
 0x799   : > { %v2989_v55 = vsub.f32 %v6798_v6, %v2965_v43  ;;  %5725 = vpow2.f32 %v3012_v60  ;;  %3036 = vadd.xlane.f32.xlu0 %v3035_v34 }
 0x79a   : > { %v6871_v53 = vpop.eup %5715  ;;  %v3018_v4 = vmul.f32 1.442695, %v2990_v51 }
 0x79b   : > { %v3016_v52 = vmul.f32 1.442695, %v2989_v55  ;;  %v6873_v18 = vpop.eup %5717  ;;  %v2974_v0 = vpop.xlane.xlu1 %2973  ;;  %v3044_v16 = vsel %vm903_vm4, %v6871_v53, 0.0 }
 0x79c   : > { %v2971_v9 = vpop.xlane.xlu0 %2970  ;;  %5727 = vpow2.f32 %v3018_v4  ;;  %v2992_v6 = vsub.f32 %v6815_v20, %v2974_v0  ;;  %3045 = vadd.xlane.f32.xlu1 %v3044_v16  ;;  %v3041_v63 = vsel %vm903_vm4, %v6873_v18, 0.0 }
 0x79d   : > { %v2991_v15 = vsub.f32 %v6808_v11, %v2971_v9  ;;  %5729 = vpow2.f32 %v3016_v52  ;;  %3042 = vadd.xlane.f32.xlu0 %v3041_v63 }
 0x79e   : > { %v6881_v42 = vpop.eup %5719  ;;  %v3022_v54 = vmul.f32 1.442695, %v2992_v6 }
 0x79f   : > { %v3020_v40 = vmul.f32 1.442695, %v2991_v15  ;;  %v6883_v25 = vpop.eup %5721  ;;  %v3050_v60 = vsel %vm903_vm4, %v6881_v42, 0.0 }
 0x7a0   : > { %v2977_v24 = vpop.xlane.xlu0 %2976  ;;  %5731 = vpow2.f32 %v3022_v54  ;;  %3051 = vadd.xlane.f32.xlu1 %v3050_v60  ;;  %v3047_v11 = vsel %vm903_vm4, %v6883_v25, 0.0 }
 0x7a1   : > { %v2993_v20 = vsub.f32 %v6818_v35, %v2977_v24  ;;  %5733 = vpow2.f32 %v3020_v40  ;;  %3048 = vadd.xlane.f32.xlu0 %v3047_v11 }
 0x7a2   : > { %v6890_v31 = vpop.eup %5723 }
 0x7a3   : > { %v3024_v43 = vmul.f32 1.442695, %v2993_v20  ;;  %v6892_v37 = vpop.eup %5725  ;;  %v3056_v51 = vsel %vm903_vm4, %v6890_v31, 0.0 }
 0x7a4   : > { %3057 = vadd.xlane.f32.xlu1 %v3056_v51  ;;  %v3053_v55 = vsel %vm903_vm4, %v6892_v37, 0.0  ;;  %v3303_v54 = vpop.permute.xlu0 %3302 }
 0x7a5   : > { %5735 = vpow2.f32 %v3024_v43  ;;  %3054 = vadd.xlane.f32.xlu0 %v3053_v55 }
 0x7a6   : > { %v6898_v35 = vpop.eup %5727 }
 0x7a7   : > { %v6900_v34 = vpop.eup %5729  ;;  %v3062_v4 = vsel %vm903_vm4, %v6898_v35, 0.0 }
 0x7a8   : > { %3063 = vadd.xlane.f32.xlu1 %v3062_v4  ;;  %v3059_v52 = vsel %vm903_vm4, %v6900_v34, 0.0  ;;  %v6940_v40 = vpop.permute.xlu0 %3396 }
 0x7a9   : > { %3060 = vadd.xlane.f32.xlu0 %v3059_v52 }
 0x7aa   : > { %v6906_v0 = vpop.eup %5731 }
 0x7ab   : > { %v6908_v9 = vpop.eup %5733  ;;  %v3068_v16 = vsel %vm903_vm4, %v6906_v0, 0.0 }
 0x7ac   : > { %3069 = vadd.xlane.f32.xlu1 %v3068_v16  ;;  %v3065_v6 = vsel %vm903_vm4, %v6908_v9, 0.0  ;;  %v7530_v16 = vmov 0.0  }
 0x7ad   : > { %3066 = vadd.xlane.f32.xlu0 %v3065_v6 }
 0x7af   : > { %v6914_v15 = vpop.eup %5735 }
 0x7b0   : > { %v3071_v63 = vsel %vm903_vm4, %v6914_v15, 0.0 }
 0x7b1   : > { %3072 = vadd.xlane.f32.xlu0 %v3071_v63 }
 0x7bd   : > { %3561 = vrot.lane.b32.xlu1 %v6539_v27, %s5862_s20 }
 0x7c1   : > { %3613 = vrot.lane.b32.xlu1 %v6542_v58, %s5862_s20 }
 0x7c5   : > { %3665 = vrot.lane.b32.xlu1 %v6545_v17, %s5862_s20 }
 0x7c7   : > { %3509 = vrot.lane.b32.xlu0 %v6548_v1, %s5862_s20 }
 0x7c9   : > { %3717 = vrot.lane.b32.xlu1 %v6551_v2, %s5862_s20 }
 0x7cb   : > { %3507 = vrot.lane.b32.xlu0 %v6548_v1, %s5863_s22 }
 0x7cd   : > { %3769 = vrot.lane.b32.xlu1 %v6555_v50, %s5862_s20 }
 0x7cf   : > { %3559 = vrot.lane.b32.xlu0 %v6539_v27, %s5863_s22  ;;  %v6936_v27 = vpop.permute.xlu1 %3349 }
 0x7d1   : > { %3821 = vrot.lane.b32.xlu1 %v6559_v14, %s5862_s20 }
 0x7d3   : > { %3611 = vrot.lane.b32.xlu0 %v6542_v58, %s5863_s22  ;;  %v6938_v58 = vpop.permute.xlu1 %3443 }
 0x7d5   : > { %3873 = vrot.lane.b32.xlu1 %v6563_v13, %s5862_s20 }
 0x7d7   : > { %3663 = vrot.lane.b32.xlu0 %v6545_v17, %s5863_s22 }
 0x7d9   : > { %3871 = vrot.lane.b32.xlu1 %v6563_v13, %s5863_s22 }
 0x7db   : > { %3715 = vrot.lane.b32.xlu0 %v6551_v2, %s5863_s22 }
 0x7dd   : > { %4127 = vrot.lane.b32.xlu1 %v6548_v1, %s5864_s23 }
 0x7df   : > { %3767 = vrot.lane.b32.xlu0 %v6555_v50, %s5863_s22 }
 0x7e3   : > { %3819 = vrot.lane.b32.xlu0 %v6559_v14, %s5863_s22  ;;  %s7454_s22 = scalar_lea.vmem %s7497_s6, %s4856_s16 }
 0x81d   : > { %v3028_v17 = vpop.xlane.xlu1 %3027 }
 0x81e   : > { %5737 = vrcp.f32 %v3028_v17 }
 0x81f   : > { %v3031_v13 = vpop.xlane.xlu0 %3030 }
 0x820   : > { %5739 = vrcp.f32 %v3031_v13 }
 0x821   : > { %v3034_v2 = vpop.xlane.xlu1 %3033 }
 0x822   : > { %5741 = vrcp.f32 %v3034_v2 }
 0x825   : > { %v3040_v24 = vpop.xlane.xlu1 %3039 }
 0x826   : > { %v3037_v60 = vpop.xlane.xlu0 %3036 }
 0x827   : > { %5743 = vrcp.f32 %v3037_v60 }
 0x828   : > { %v5738_v1 = vpop.eup %5737  ;;  %5745 = vrcp.f32 %v3040_v24 }
 0x829   : > { %v3046_v50 = vpop.xlane.xlu1 %3045  ;;  %v3090_v11 = vmul.f32 %v5738_v1, %v6845_v56 }
 0x82a   : > { %v5740_v14 = vpop.eup %5739  ;;  %v3043_v20 = vpop.xlane.xlu0 %3042 }
 0x82b   : > { %v3091_v43 = vmul.f32 %v5740_v14, %v6849_v32  ;;  %5747 = vrcp.f32 %v3043_v20 }
 0x82c   : > { %5749 = vrcp.f32 %v3046_v50  ;;  %v5742_v52 = vpop.eup %5741 }
 0x82d   : > { %v3052_v51 = vpop.xlane.xlu1 %3051  ;;  %v3106_v55 = vpack.c.bf16 %v3091_v43, %v3090_v11  ;;  %v3092_v56 = vmul.f32 %v5742_v52, %v6855_v59 }
 0x82e   : > { %v3049_v4 = vpop.xlane.xlu0 %3048 }
 0x82f   : > { %5751 = vrcp.f32 %v3049_v4  ;;  %5376 = vmatmul.mubr.msk.bf16.vlgmr.msra.gmra.mrb[80].mxu0 %vm903_vm4, %v3106_v55 }
 0x830   : > { %5386 = vmatpush3.bf16.msra.mxu0 %v6834_v44  ;;  %5387 = vmatprep.mubr.msk.bf16.mxu0 %vm5853_vm2, %v7530_v16  ;;  %5753 = vrcp.f32 %v3052_v51 }
 0x831   : > { %v5744_v6 = vpop.eup %5743  ;;  %v3058_v63 = vpop.xlane.xlu1 %3057  ;;  %5397 = vmatprep.subr.bf16.mxu0 %v7530_v16 }
 0x832   : > { %v3093_v32 = vmul.f32 %v5744_v6, %v6863_v39  ;;  %v3055_v17 = vpop.xlane.xlu0 %3054  ;;  %v5746_v13 = vpop.eup %5745 }
 0x833   : > { %5755 = vrcp.f32 %v3055_v17  ;;  %v3094_v44 = vmul.f32 %v5746_v13, %v6861_v23 }
 0x834   : > { %v3107_v2 = vpack.c.bf16 %v3093_v32, %v3092_v56  ;;  %5757 = vrcp.f32 %v3058_v63 }
 0x835   : > { %v5748_v24 = vpop.eup %5747  ;;  %v3064_v60 = vpop.xlane.xlu1 %3063 }
 0x836   : > { %v3095_v1 = vmul.f32 %v5748_v24, %v6873_v18  ;;  %5382 = vmatmul.mubr.msk.bf16.vlgmr.msra.gmra.mrb[96].mxu1 %vm903_vm4, %v3107_v2  ;;  %v3061_v50 = vpop.xlane.xlu0 %3060  ;;  %v5750_v14 = vpop.eup %5749 }
 0x837   : > { %5392 = vmatpush3.bf16.msra.mxu1 %v6836_v19  ;;  %5759 = vrcp.f32 %v3061_v50  ;;  %5393 = vmatprep.mubr.msk.bf16.mxu1 %vm5853_vm2, %v7530_v16  ;;  %v3096_v23 = vmul.f32 %v5750_v14, %v6871_v53 }
 0x838   : > { %v3108_v59 = vpack.c.bf16 %v3095_v1, %v3094_v44  ;;  %5403 = vmatprep.subr.bf16.mxu1 %v7530_v16  ;;  %5761 = vrcp.f32 %v3064_v60 }
 0x839   : > { %v5752_v39 = vpop.eup %5751  ;;  %v3070_v20 = vpop.xlane.xlu1 %3069 }
 0x83a   : > { %v3097_v18 = vmul.f32 %v5752_v39, %v6883_v25  ;;  %5388 = vmatmul.mubr.msk.bf16.vlgmr.msra.gmra.mrb[84].mxu0 %vm903_vm4, %v3108_v59  ;;  %v3067_v11 = vpop.xlane.xlu0 %3066  ;;  %v5754_v43 = vpop.eup %5753 }
 0x83b   : > { %5398 = vmatpush3.bf16.msra.mxu0 %v3303_v54  ;;  %5763 = vrcp.f32 %v3067_v11  ;;  %5399 = vmatprep.mubr.msk.bf16.mxu0 %vm5853_vm2, %v7530_v16  ;;  %v3098_v4 = vmul.f32 %v5754_v43, %v6881_v42 }
 0x83c   : > { %v3109_v19 = vpack.c.bf16 %v3097_v18, %v3096_v23  ;;  %5409 = vmatprep.subr.bf16.mxu0 %v7530_v16  ;;  %5765 = vrcp.f32 %v3070_v20 }
 0x83d   : > { %v5756_v51 = vpop.eup %5755  ;;  %v3562_v55 = vpop.permute.xlu1 %3561 }
 0x83e   : > { %v3099_v53 = vmul.f32 %v5756_v51, %v6892_v37  ;;  %5394 = vmatmul.mubr.msk.bf16.vlgmr.msra.gmra.mrb[100].mxu1 %vm903_vm4, %v3109_v19  ;;  %v3073_v25 = vpop.xlane.xlu0 %3072  ;;  %v5758_v52 = vpop.eup %5757  ;;  %v3567_v14 = vsel %vm485_vm3, %v3562_v55, 0 }
 0x83f   : > { %5404 = vmatpush3.bf16.msra.mxu1 %v6936_v27  ;;  %5767 = vrcp.f32 %v3073_v25  ;;  %5405 = vmatprep.mubr.msk.bf16.mxu1 %vm5853_vm2, %v7530_v16  ;;  %v3100_v56 = vmul.f32 %v5758_v52, %v6890_v31 }
 0x840   : > { %v3110_v54 = vpack.c.bf16 %v3099_v53, %v3098_v4  ;;  %5415 = vmatprep.subr.bf16.mxu1 %v7530_v16 }
 0x841   : > { %v5760_v6 = vpop.eup %5759  ;;  %v3614_v63 = vpop.permute.xlu1 %3613 }
 0x842   : > { %v3101_v42 = vmul.f32 %v5760_v6, %v6900_v34  ;;  %5400 = vmatmul.mubr.msk.bf16.vlgmr.msra.gmra.mrb[88].mxu0 %vm903_vm4, %v3110_v54  ;;  %v3510_v37 = vpop.permute.xlu0 %3509  ;;  %v5762_v32 = vpop.eup %5761 }
 0x843   : > { %5410 = vmatpush3.bf16.msra.mxu0 %v6940_v40  ;;  %5411 = vmatprep.mubr.msk.bf16.mxu0 %vm5853_vm2, %v7530_v16  ;;  %v3102_v13 = vmul.f32 %v5762_v32, %v6898_v35 }
 0x844   : > { %v3111_v27 = vpack.c.bf16 %v3101_v42, %v3100_v56  ;;  %5421 = vmatprep.subr.bf16.mxu0 %v7530_v16 }
 0x845   : > { %v5764_v17 = vpop.eup %5763  ;;  %v3666_v24 = vpop.permute.xlu1 %3665 }
 0x846   : > { %v3103_v2 = vmul.f32 %v5764_v17, %v6908_v9  ;;  %5406 = vmatmul.mubr.msk.bf16.vlgmr.msra.gmra.mrb[104].mxu1 %vm903_vm4, %v3111_v27  ;;  %v3508_v31 = vpop.permute.xlu0 %3507  ;;  %v5766_v34 = vpop.eup %5765  ;;  %v3515_v9 = vsel %vm485_vm3, %v3510_v37, 0  ;;  %v3671_v39 = vsel %vm485_vm3, %v3666_v24, 0 }
 0x847   : > { %5416 = vmatpush3.bf16.msra.mxu1 %v6938_v58  ;;  %5417 = vmatprep.mubr.msk.bf16.mxu1 %vm5853_vm2, %v7530_v16  ;;  %v3104_v44 = vmul.f32 %v5766_v34, %v6906_v0 }
 0x848   : > { %v3112_v40 = vpack.c.bf16 %v3103_v2, %v3102_v13  ;;  %5427 = vmatprep.subr.bf16.mxu1 %v7530_v16 }
 0x849   : > { %v5768_v60 = vpop.eup %5767  ;;  %v3718_v50 = vpop.permute.xlu1 %3717 }
 0x84a   : > { %v3105_v35 = vmul.f32 %v5768_v60, %v6914_v15  ;;  %5412 = vmatmul.mubr.msk.bf16.vlgmr.msra.gmra.mrb[92].mxu0 %vm903_vm4, %v3112_v40  ;;  %v3560_v1 = vpop.permute.xlu0 %3559  ;;  %v3619_v15 = vsel %vm485_vm3, %v3614_v63, 0  ;;  %v3723_v18 = vsel %vm485_vm3, %v3718_v50, 0 }
 0x84b   : > { %5423 = vmatprep.mubr.msk.bf16.mxu0 %vm5853_vm2, %v7530_v16 }
 0x84c   : > { %5422 = vmatpush3.bf16.xpose.msra.mxu0 %v3515_v9  ;;  %v3113_v58 = vpack.c.bf16 %v3105_v35, %v3104_v44 }
 0x84d   : > { %5433 = vmatprep.subr.bf16.mxu0 %v7530_v16  ;;  %v3770_v59 = vpop.permute.xlu1 %3769 }
 0x84e   : > { %5418 = vmatmul.mubr.msk.bf16.vlgmr.msra.gmra.mrb[108].mxu1 %vm903_vm4, %v3113_v58  ;;  %v3612_v0 = vpop.permute.xlu0 %3611  ;;  %v3775_v43 = vsel %vm485_vm3, %v3770_v59, 0 }
 0x84f   : > { %5429 = vmatprep.mubr.msk.bf16.mxu1 %vm5853_vm2, %v7530_v16 }
 0x850   : > { %5428 = vmatpush3.bf16.xpose.msra.mxu1 %v3567_v14 }
 0x851   : > { %5439 = vmatprep.subr.bf16.mxu1 %v7530_v16  ;;  %v3822_v23 = vpop.permute.xlu1 %3821 }
 0x852   : > { %v3664_v20 = vpop.permute.xlu0 %3663  ;;  %v3827_v51 = vsel %vm485_vm3, %v3822_v23, 0 }
 0x853   : > { %5424 = vmatmul.mubr.msk.bf16.vlgmr.msra.gmra.mrb[96].mxu0 %vm485_vm3, %v3508_v31 }
 0x854   : > { %5434 = vmatpush3.bf16.xpose.msra.mxu0 %v3619_v15  ;;  %5435 = vmatprep.mubr.msk.bf16.mxu0 %vm5853_vm2, %v7530_v16 }
 0x855   : > { %5445 = vmatprep.subr.bf16.mxu0 %v7530_v16  ;;  %v3874_v19 = vpop.permute.xlu1 %3873 }
 0x856   : > { %v3716_v11 = vpop.permute.xlu0 %3715  ;;  %v3879_v53 = vsel %vm485_vm3, %v3874_v19, 0 }
 0x857   : > { %5430 = vmatmul.mubr.msk.bf16.vlgmr.msra.gmra.mrb[112].mxu1 %vm485_vm3, %v3560_v1 }
 0x858   : > { %5440 = vmatpush3.bf16.xpose.msra.mxu1 %v3671_v39  ;;  %5441 = vmatprep.mubr.msk.bf16.mxu1 %vm5853_vm2, %v7530_v16 }
 0x859   : > { %5451 = vmatprep.subr.bf16.mxu1 %v7530_v16  ;;  %v3872_v4 = vpop.permute.xlu1 %3871 }
 0x85a   : > { %v3768_v55 = vpop.permute.xlu0 %3767 }
 0x85b   : > { %5436 = vmatmul.mubr.msk.bf16.vlgmr.msra.gmra.mrb[100].mxu0 %vm485_vm3, %v3612_v0 }
 0x85c   : > { %5446 = vmatpush3.bf16.xpose.msra.mxu0 %v3723_v18  ;;  %5447 = vmatprep.mubr.msk.bf16.mxu0 %vm5853_vm2, %v7530_v16 }
 0x85d   : > { %5457 = vmatprep.subr.bf16.mxu0 %v7530_v16  ;;  %v4128_v52 = vpop.permute.xlu1 %4127 }
 0x85e   : > { %v3820_v25 = vpop.permute.xlu0 %3819 }
 0x85f   : > { %5442 = vmatmul.mubr.msk.bf16.vlgmr.msra.gmra.mrb[116].mxu1 %vm485_vm3, %v3664_v20 }
 0x860   : > { %5452 = vmatpush3.bf16.xpose.msra.mxu1 %v3775_v43  ;;  %5453 = vmatprep.mubr.msk.bf16.mxu1 %vm5853_vm2, %v7530_v16 }
 0x861   : > { %5463 = vmatprep.subr.bf16.mxu1 %v7530_v16 }
 0x863   : > { %5448 = vmatmul.mubr.msk.bf16.vlgmr.msra.gmra.mrb[104].mxu0 %vm485_vm3, %v3716_v11 }
 0x864   : > { %5458 = vmatpush3.bf16.xpose.msra.mxu0 %v3827_v51  ;;  %5459 = vmatprep.mubr.msk.bf16.mxu0 %vm5853_vm2, %v7530_v16 }
 0x865   : > { %5469 = vmatprep.subr.bf16.mxu0 %v7530_v16 }
 0x867   : > { %5454 = vmatmul.mubr.msk.bf16.vlgmr.msra.gmra.mrb[120].mxu1 %vm485_vm3, %v3768_v55 }
 0x868   : > { %5464 = vmatpush3.bf16.xpose.msra.mxu1 %v3879_v53  ;;  %5465 = vmatprep.mubr.msk.bf16.mxu1 %vm5853_vm2, %v7530_v16 }
 0x869   : > { %5475 = vmatprep.subr.bf16.mxu1 %v7530_v16 }
 0x86b   : > { %5460 = vmatmul.mubr.msk.bf16.vlgmr.msra.gmra.mrb[108].mxu0 %vm485_vm3, %v3820_v25 }
 0x86c   : > { %5470 = vmatpush3.bf16.msra.mxu0 %v4128_v52  ;;  %5471 = vmatprep.mubr.msk.bf16.mxu0 %vm5853_vm2, %v7530_v16 }
 0x86d   : > { %5481 = vmatprep.subr.bf16.mxu0 %v7530_v16 }
 0x86f   : > { %5466 = vmatmul.mubr.msk.bf16.vlgmr.msra.gmra.mrb[124].mxu1 %vm485_vm3, %v3872_v4 }
 0x870   : > { %5477 = vmatprep.mubr.msk.bf16.mxu1 %vm5853_vm2, %v7530_v16 }
 0x902   : > { %v7034_v54 = vpop.f32.mrb[80].mxu0 }
 0x903   : > { %v5377_v6 = vpop.f32.mrb[81].mxu0 }
 0x904   : > { %v7036_v63 = vpop.f32.mrb[82].mxu0 }
 0x905   : > { %v5378_v42 = vpop.f32.mrb[83].mxu0 }
 0x906   : > { %v7085_v42 = vld [vmem:[%s7494_s3 + $0x60] sm:$0xff] }
 0x909   : > { %v7040_v37 = vpop.f32.mrb[96].mxu1 }
 0x90a   : > { %v5383_v32 = vpop.f32.mrb[97].mxu1 }
 0x90b   : > { %v7042_v27 = vpop.f32.mrb[98].mxu1 }
 0x90c   : > { %v5384_v13 = vpop.f32.mrb[99].mxu1 }
 0x90d   : > { %v7046_v2 = vpop.f32.mrb[84].mxu0  ;;  %v7090_v13 = vld [vmem:[%s7494_s3 + $0x68] sm:$0xff] }
 0x90e   : > { %v5389_v31 = vpop.f32.mrb[85].mxu0 }
 0x90f   : > { %v7048_v34 = vpop.f32.mrb[86].mxu0 }
 0x910   : > { %v5390_v40 = vpop.f32.mrb[87].mxu0 }
 0x911   : > { %v7052_v60 = vpop.f32.mrb[100].mxu1 }
 0x912   : > { %v5395_v44 = vpop.f32.mrb[101].mxu1 }
 0x913   : > { %v7054_v35 = vpop.f32.mrb[102].mxu1 }
 0x914   : > { %v5396_v1 = vpop.f32.mrb[103].mxu1 }
 0x915   : > { %v7058_v58 = vpop.f32.mrb[88].mxu0  ;;  %v7098_v1 = vld [vmem:[%s7494_s3 + $0x70] sm:$0xff] }
 0x916   : > { %v5401_v50 = vpop.f32.mrb[89].mxu0 }
 0x917   : > { %v7060_v14 = vpop.f32.mrb[90].mxu0 }
 0x918   : > { %v5402_v15 = vpop.f32.mrb[91].mxu0 }
 0x919   : > { %v7064_v59 = vpop.f32.mrb[104].mxu1 }
 0x91a   : > { %v5407_v39 = vpop.f32.mrb[105].mxu1 }
 0x91b   : > { %v7066_v20 = vpop.f32.mrb[106].mxu1 }
 0x91c   : > { %v5408_v18 = vpop.f32.mrb[107].mxu1 }
 0x91d   : > { %v7070_v11 = vpop.f32.mrb[92].mxu0 }
 0x91e   : > { %v5413_v43 = vpop.f32.mrb[93].mxu0 }
 0x91f   : > { %v7072_v19 = vpop.f32.mrb[94].mxu0  ;;  %v7108_v43 = vld [vmem:[%s7494_s3 + $0x78] sm:$0xff] }
 0x920   : > { %v5414_v55 = vpop.f32.mrb[95].mxu0 }
 0x921   : > { %v7076_v4 = vpop.f32.mrb[108].mxu1 }
 0x922   : > { %v5419_v53 = vpop.f32.mrb[109].mxu1 }
 0x923   : > { %v7078_v25 = vpop.f32.mrb[110].mxu1 }
 0x924   : > { %v5420_v6 = vpop.f32.mrb[111].mxu1 }
 0x926   : > { %v3551_v32 = vpop.f32.mrb[96].mxu0 }
 0x927   : > { %v7093_v31 = vadd.f32 %v7085_v42, %v3551_v32  ;;  %v5425_v40 = vpop.f32.mrb[97].mxu0 }
 0x928   : > { %v3554_v44 = vpop.f32.mrb[98].mxu0 }
 0x929   : > { %v7101_v50 = vadd.f32 %v7090_v13, %v3554_v44  ;;  %v5426_v15 = vpop.f32.mrb[99].mxu0  ;;  %v3943_v39 = vsel %vm903_vm4, %v7093_v31, -inf }
 0x92a   : > { %3944 = vmax.xlane.f32.xlu0 %v3943_v39  ;;  %v3603_v18 = vpop.f32.mrb[112].mxu1 }
 0x92b   : > { %v7111_v55 = vadd.f32 %v7098_v1, %v3603_v18  ;;  %v5431_v53 = vpop.f32.mrb[113].mxu1  ;;  %v3946_v6 = vsel %vm903_vm4, %v7101_v50, -inf }
 0x92c   : > { %3947 = vmax.xlane.f32.xlu1 %v3946_v6  ;;  %v3606_v32 = vpop.f32.mrb[114].mxu1 }
 0x92d   : > { %v7116_v40 = vadd.f32 %v7108_v43, %v3606_v32  ;;  %v5432_v44 = vpop.f32.mrb[115].mxu1  ;;  %v3949_v15 = vsel %vm903_vm4, %v7111_v55, -inf }
 0x92e   : > { %3950 = vmax.xlane.f32.xlu0 %v3949_v15  ;;  %v3655_v39 = vpop.f32.mrb[100].mxu0 }
 0x92f   : > { %v7121_v52 = vadd.f32 %v7085_v42, %v3655_v39  ;;  %v5437_v18 = vpop.f32.mrb[101].mxu0  ;;  %v3952_v6 = vsel %vm903_vm4, %v7116_v40, -inf }
 0x930   : > { %v3658_v51 = vpop.f32.mrb[102].mxu0 }
 0x931   : > { %v7124_v53 = vadd.f32 %v7090_v13, %v3658_v51  ;;  %v5438_v23 = vpop.f32.mrb[103].mxu0  ;;  %v3955_v32 = vsel %vm903_vm4, %v7121_v52, -inf }
 0x932   : > { %3953 = vmax.xlane.f32.xlu0 %v3952_v6  ;;  %3956 = vmax.xlane.f32.xlu1 %v3955_v32  ;;  %v3707_v44 = vpop.f32.mrb[116].mxu1 }
 0x933   : > { %v7131_v15 = vadd.f32 %v7098_v1, %v3707_v44  ;;  %v5443_v39 = vpop.f32.mrb[117].mxu1  ;;  %v3958_v23 = vsel %vm903_vm4, %v7124_v53, -inf }
 0x934   : > { %v3710_v0 = vpop.f32.mrb[118].mxu1 }
 0x935   : > { %v7134_v18 = vadd.f32 %v7108_v43, %v3710_v0  ;;  %v5444_v51 = vpop.f32.mrb[119].mxu1  ;;  %v3961_v24 = vsel %vm903_vm4, %v7131_v15, -inf }
 0x936   : > { %3959 = vmax.xlane.f32.xlu0 %v3958_v23  ;;  %3962 = vmax.xlane.f32.xlu1 %v3961_v24  ;;  %v3759_v6 = vpop.f32.mrb[104].mxu0 }
 0x937   : > { %v7141_v32 = vadd.f32 %v7085_v42, %v3759_v6  ;;  %v5449_v44 = vpop.f32.mrb[105].mxu0  ;;  %v3964_v51 = vsel %vm903_vm4, %v7134_v18, -inf }
 0x938   : > { %v3762_v56 = vpop.f32.mrb[106].mxu0 }
 0x939   : > { %v7144_v39 = vadd.f32 %v7090_v13, %v3762_v56  ;;  %v5450_v0 = vpop.f32.mrb[107].mxu0  ;;  %v3967_v9 = vsel %vm903_vm4, %v7141_v32, -inf }
 0x93a   : > { %3965 = vmax.xlane.f32.xlu0 %v3964_v51  ;;  %3968 = vmax.xlane.f32.xlu1 %v3967_v9  ;;  %v3811_v23 = vpop.f32.mrb[120].mxu1 }
 0x93b   : > { %v7151_v24 = vadd.f32 %v7098_v1, %v3811_v23  ;;  %v5455_v6 = vpop.f32.mrb[121].mxu1  ;;  %v3970_v0 = vsel %vm903_vm4, %v7144_v39, -inf }
 0x93c   : > { %v3814_v17 = vpop.f32.mrb[122].mxu1 }
 0x93d   : > { %v7154_v44 = vadd.f32 %v7108_v43, %v3814_v17  ;;  %v5456_v56 = vpop.f32.mrb[123].mxu1  ;;  %v3973_v47 = vsel %vm903_vm4, %v7151_v24, -inf }
 0x93e   : > { %3971 = vmax.xlane.f32.xlu0 %v3970_v0  ;;  %3974 = vmax.xlane.f32.xlu1 %v3973_v47  ;;  %v3863_v51 = vpop.f32.mrb[108].mxu0 }
 0x93f   : > { %v7161_v9 = vadd.f32 %v7085_v42, %v3863_v51  ;;  %v5461_v23 = vpop.f32.mrb[109].mxu0  ;;  %v3976_v56 = vsel %vm903_vm4, %v7154_v44, -inf }
 0x940   : > { %v3866_v48 = vpop.f32.mrb[110].mxu0 }
 0x941   : > { %v7164_v6 = vadd.f32 %v7090_v13, %v3866_v48  ;;  %v5462_v17 = vpop.f32.mrb[111].mxu0  ;;  %v3979_v41 = vsel %vm903_vm4, %v7161_v9, -inf }
 0x942   : > { %3977 = vmax.xlane.f32.xlu0 %v3976_v56  ;;  %v3915_v45 = vpop.f32.mrb[124].mxu1  ;;  %3980 = vmax.xlane.f32.xlu1 %v3979_v41  ;;  %v5840_v17 = vld [vmem:[#allocation2 + $0x8] sm:$0xff]  ;;  %v5841_v56 = vld [vmem:[#allocation2 + $0x20] sm:$0xff] }
 0x943   : > { %v7171_v47 = vadd.f32 %v7098_v1, %v3915_v45  ;;  %v5467_v42 = vpop.f32.mrb[125].mxu1  ;;  %v3982_v23 = vsel %vm903_vm4, %v7164_v6, -inf  ;;  %v5837_v45 = vld [vmem:[#allocation2 + $0x10] sm:$0xff]  ;;  %v5838_v1 = vld [vmem:[#allocation2 + $0x18] sm:$0xff] }
 0x944   : > { %v3918_v0 = vpop.f32.mrb[126].mxu1 }
 0x945   : > { %v7174_v51 = vadd.f32 %v7108_v43, %v3918_v0  ;;  %v5468_v48 = vpop.f32.mrb[127].mxu1  ;;  %v3985_v13 = vsel %vm903_vm4, %v7171_v47, -inf  ;;  %v5839_v43 = vld [vmem:[#allocation2 + $0x28] sm:$0xff] }
 0x946   : > { %3986 = vmax.xlane.f32.xlu1 %v3985_v13  ;;  %3983 = vmax.xlane.f32.xlu0 %v3982_v23 }
 0x947   : > { %v3988_v41 = vsel %vm903_vm4, %v7174_v51, -inf }
 0x94a   : > { %3989 = vmax.xlane.f32.xlu0 %v3988_v41 }
 0x957   : > { %4221 = vrot.lane.b32.xlu1 %v5837_v45, %s5864_s23 }
 0x95b   : > { %4268 = vrot.lane.b32.xlu1 %v5838_v1, %s5864_s23 }
 0x95f   : > { %4362 = vrot.lane.b32.xlu1 %v5839_v43, %s5864_s23 }
 0x960   : > { %4174 = vrot.lane.b32.xlu0 %v5840_v17, %s5864_s23 }
 0x964   : > { %4315 = vrot.lane.b32.xlu0 %v5841_v56, %s5864_s23 }
 0x9b7   : > { %v3945_v42 = vpop.xlane.xlu0 %3944 }
 0x9b8   : > { %v3991_v0 = vsub.f32 %v7093_v31, %v3945_v42 }
 0x9b9   : > { %v3948_v48 = vpop.xlane.xlu1 %3947 }
 0x9ba   : > { %v4007_v13 = vmul.f32 1.442695, %v3991_v0  ;;  %v3992_v23 = vsub.f32 %v7101_v50, %v3948_v48 }
 0x9bb   : > { %v3951_v41 = vpop.xlane.xlu0 %3950 }
 0x9bc   : > { %5769 = vpow2.f32 %v4007_v13  ;;  %v4009_v45 = vmul.f32 1.442695, %v3992_v23  ;;  %v3993_v1 = vsub.f32 %v7111_v55, %v3951_v41 }
 0x9be   : > { %5771 = vpow2.f32 %v4009_v45  ;;  %v4011_v43 = vmul.f32 1.442695, %v3993_v1 }
 0x9bf   : > { %v3957_v30 = vpop.xlane.xlu1 %3956  ;;  %v3954_v38 = vpop.xlane.xlu0 %3953 }
 0x9c0   : > { %5773 = vpow2.f32 %v4011_v43  ;;  %v3995_v17 = vsub.f32 %v7121_v52, %v3957_v30  ;;  %v3994_v56 = vsub.f32 %v7116_v40, %v3954_v38 }
 0x9c2   : > { %v4015_v29 = vmul.f32 1.442695, %v3995_v17  ;;  %v4013_v31 = vmul.f32 1.442695, %v3994_v56 }
 0x9c3   : > { %v3963_v42 = vpop.xlane.xlu1 %3962  ;;  %v3960_v0 = vpop.xlane.xlu0 %3959 }
 0x9c4   : > { %5775 = vpow2.f32 %v4015_v29  ;;  %v3997_v50 = vsub.f32 %v7131_v15, %v3963_v42  ;;  %v3996_v48 = vsub.f32 %v7124_v53, %v3960_v0 }
 0x9c5   : > { %5777 = vpow2.f32 %v4013_v31 }
 0x9c6   : > { %v7194_v55 = vpop.eup %5769  ;;  %v4019_v13 = vmul.f32 1.442695, %v3997_v50  ;;  %v4017_v23 = vmul.f32 1.442695, %v3996_v48 }
 0x9c7   : > { %v3969_v41 = vpop.xlane.xlu1 %3968  ;;  %v3966_v45 = vpop.xlane.xlu0 %3965  ;;  %v4039_v30 = vsel %vm903_vm4, %v7194_v55, 0.0 }
 0x9c8   : > { %v7198_v38 = vpop.eup %5771  ;;  %5779 = vpow2.f32 %v4019_v13  ;;  %v3999_v52 = vsub.f32 %v7141_v32, %v3969_v41  ;;  %v3998_v29 = vsub.f32 %v7134_v18, %v3966_v45  ;;  %4040 = vadd.xlane.f32.xlu1 %v4039_v30 }
 0x9c9   : > { %5781 = vpow2.f32 %v4017_v23  ;;  %v4042_v40 = vsel %vm903_vm4, %v7198_v38, 0.0 }
 0x9ca   : > { %v7204_v53 = vpop.eup %5773  ;;  %v4023_v15 = vmul.f32 1.442695, %v3999_v52  ;;  %v4021_v1 = vmul.f32 1.442695, %v3998_v29  ;;  %4043 = vadd.xlane.f32.xlu0 %v4042_v40 }
 0x9cb   : > { %v3975_v43 = vpop.xlane.xlu1 %3974  ;;  %v3972_v17 = vpop.xlane.xlu0 %3971  ;;  %v4045_v56 = vsel %vm903_vm4, %v7204_v53, 0.0 }
 0x9cc   : > { %5783 = vpow2.f32 %v4023_v15  ;;  %v4001_v32 = vsub.f32 %v7151_v24, %v3975_v43  ;;  %v4000_v18 = vsub.f32 %v7144_v39, %v3972_v17  ;;  %4046 = vadd.xlane.f32.xlu1 %v4045_v56 }
 0x9cd   : > { %5785 = vpow2.f32 %v4021_v1 }
 0x9ce   : > { %v7210_v31 = vpop.eup %5775  ;;  %v4027_v42 = vmul.f32 1.442695, %v4001_v32  ;;  %v4025_v0 = vmul.f32 1.442695, %v4000_v18 }
 0x9cf   : > { %v7212_v50 = vpop.eup %5777  ;;  %v3981_v48 = vpop.xlane.xlu1 %3980  ;;  %v4051_v23 = vsel %vm903_vm4, %v7210_v31, 0.0 }
 0x9d0   : > { %v3978_v13 = vpop.xlane.xlu0 %3977  ;;  %5787 = vpow2.f32 %v4027_v42  ;;  %v4003_v41 = vsub.f32 %v7161_v9, %v3981_v48  ;;  %4052 = vadd.xlane.f32.xlu1 %v4051_v23  ;;  %v4048_v39 = vsel %vm903_vm4, %v7212_v50, 0.0 }
 0x9d1   : > { %v4002_v24 = vsub.f32 %v7154_v44, %v3978_v13  ;;  %5789 = vpow2.f32 %v4025_v0  ;;  %4049 = vadd.xlane.f32.xlu0 %v4048_v39 }
 0x9d2   : > { %v7220_v45 = vpop.eup %5779  ;;  %v4031_v30 = vmul.f32 1.442695, %v4003_v41 }
 0x9d3   : > { %v4029_v52 = vmul.f32 1.442695, %v4002_v24  ;;  %v7222_v29 = vpop.eup %5781  ;;  %v3987_v40 = vpop.xlane.xlu1 %3986  ;;  %v4057_v1 = vsel %vm903_vm4, %v7220_v45, 0.0 }
 0x9d4   : > { %v3984_v15 = vpop.xlane.xlu0 %3983  ;;  %5791 = vpow2.f32 %v4031_v30  ;;  %v4005_v44 = vsub.f32 %v7171_v47, %v3987_v40  ;;  %4058 = vadd.xlane.f32.xlu1 %v4057_v1  ;;  %v4054_v43 = vsel %vm903_vm4, %v7222_v29, 0.0 }
 0x9d5   : > { %v4004_v9 = vsub.f32 %v7164_v6, %v3984_v15  ;;  %5793 = vpow2.f32 %v4029_v52  ;;  %4055 = vadd.xlane.f32.xlu0 %v4054_v43 }
 0x9d6   : > { %v7230_v17 = vpop.eup %5783  ;;  %v4035_v56 = vmul.f32 1.442695, %v4005_v44 }
 0x9d7   : > { %v4033_v32 = vmul.f32 1.442695, %v4004_v9  ;;  %v7232_v18 = vpop.eup %5785  ;;  %v4063_v0 = vsel %vm903_vm4, %v7230_v17, 0.0 }
 0x9d8   : > { %v3990_v42 = vpop.xlane.xlu0 %3989  ;;  %5795 = vpow2.f32 %v4035_v56  ;;  %4064 = vadd.xlane.f32.xlu1 %v4063_v0  ;;  %v4060_v6 = vsel %vm903_vm4, %v7232_v18, 0.0  ;;  %v7532_v0 = vpack.c.bf16 %v7042_v27, %v7040_v37 }
 0x9d9   : > { %v4006_v47 = vsub.f32 %v7174_v51, %v3990_v42  ;;  %5797 = vpow2.f32 %v4033_v32  ;;  %4061 = vadd.xlane.f32.xlu0 %v4060_v6  ;;  %v5842_v32 = vld [vmem:[#allocation2 + $0x38] sm:$0xff]  ;;  %v7531_v42 = vpack.c.bf16 %v6686_v46, %v6684_v36  ;;  %v7533_v6 = vpack.c.bf16 %v6698_v61, %v6696_v5 }
 0x9da   : > { %v7239_v48 = vpop.eup %5787  ;;  %v7535_v36 = vpack.c.bf16 %v7054_v35, %v7052_v60  ;;  %v7536_v46 = vpack.c.bf16 %v7036_v63, %v7034_v54  ;;  %v7537_v5 = vpack.c.bf16 %v6710_v26, %v6708_v62  ;;  %v7540_v61 = vpack.c.bf16 %v6704_v57, %v6702_v7  ;;  %v4222_v54 = vpop.permute.xlu1 %4221 }
 0x9db   : > { %v4037_v13 = vmul.f32 1.442695, %v4006_v47  ;;  %v7241_v23 = vpop.eup %5789  ;;  %v4069_v24 = vsel %vm903_vm4, %v7239_v48, 0.0  ;;  %v5843_v47 = vld [vmem:[#allocation2 + $0x30] sm:$0xff] }
 0x9dc   : > { %v4175_v41 = vpop.permute.xlu0 %4174  ;;  %4070 = vadd.xlane.f32.xlu1 %v4069_v24  ;;  %v4066_v51 = vsel %vm903_vm4, %v7241_v23, 0.0 }
 0x9dd   : > { %5799 = vpow2.f32 %v4037_v13  ;;  %5476 = vmatpush3.bf16.msra.mxu1 %v4175_v41  ;;  %4067 = vadd.xlane.f32.xlu0 %v4066_v51  ;;  %v7534_v13 = vpack.c.bf16 %v6680_v10, %v6678_v49  ;;  %v7538_v49 = vpack.c.bf16 %v6692_v28, %v6690_v3  ;;  %v7539_v10 = vpack.c.bf16 %v7048_v34, %v7046_v2 }
 0x9de   : > { %5487 = vmatprep.subr.bf16.mxu1 %v7530_v16  ;;  %v7248_v39 = vpop.eup %5791  ;;  %v4269_v63 = vpop.permute.xlu1 %4268 }
 0x9df   : > { %v7250_v30 = vpop.eup %5793  ;;  %v4075_v52 = vsel %vm903_vm4, %v7248_v39, 0.0 }
 0x9e0   : > { %4076 = vadd.xlane.f32.xlu1 %v4075_v52  ;;  %v4072_v40 = vsel %vm903_vm4, %v7250_v30, 0.0  ;;  %v4316_v62 = vpop.permute.xlu0 %4315 }
 0x9e1   : > { %4073 = vadd.xlane.f32.xlu0 %v4072_v40 }
 0x9e2   : > { %v7256_v15 = vpop.eup %5795  ;;  %v7310_v37 = vpop.permute.xlu1 %4362 }
 0x9e3   : > { %v7258_v1 = vpop.eup %5797  ;;  %v4081_v44 = vsel %vm903_vm4, %v7256_v15, 0.0 }
 0x9e4   : > { %4082 = vadd.xlane.f32.xlu1 %v4081_v44  ;;  %v4078_v9 = vsel %vm903_vm4, %v7258_v1, 0.0 }
 0x9e5   : > { %4079 = vadd.xlane.f32.xlu0 %v4078_v9 }
 0x9e7   : > { %v7264_v43 = vpop.eup %5799 }
 0x9e8   : > { %v4084_v56 = vsel %vm903_vm4, %v7264_v43, 0.0 }
 0x9e9   : > { %4085 = vadd.xlane.f32.xlu0 %v4084_v56 }
 0x9f5   : > { %4456 = vrot.lane.b32.xlu1 %v5842_v32, %s5864_s23 }
 0x9f9   : > { %4521 = vrot.lane.b32.xlu1 %v7531_v42, %s5865_s9 }
 0x9fd   : > { %4545 = vrot.lane.b32.xlu1 %v7532_v0, %s5866_s10 }
 0x9ff   : > { %4409 = vrot.lane.b32.xlu0 %v5843_v47, %s5864_s23 }
 0xa01   : > { %4525 = vrot.lane.b32.xlu1 %v7533_v6, %s5865_s9 }
 0xa03   : > { %4519 = vrot.lane.b32.xlu0 %v7534_v13, %s5865_s9 }
 0xa05   : > { %4549 = vrot.lane.b32.xlu1 %v7535_v36, %s5866_s10 }
 0xa07   : > { %4543 = vrot.lane.b32.xlu0 %v7536_v46, %s5866_s10 }
 0xa09   : > { %4529 = vrot.lane.b32.xlu1 %v7537_v5, %s5865_s9 }
 0xa0b   : > { %4523 = vrot.lane.b32.xlu0 %v7538_v49, %s5865_s9 }
 0xa0f   : > { %4547 = vrot.lane.b32.xlu0 %v7539_v10, %s5866_s10 }
 0xa13   : > { %4527 = vrot.lane.b32.xlu0 %v7540_v61, %s5865_s9 }
 0xa55   : > { %v4041_v26 = vpop.xlane.xlu1 %4040 }
 0xa56   : > { %5801 = vrcp.f32 %v4041_v26 }
 0xa57   : > { %v4044_v27 = vpop.xlane.xlu0 %4043 }
 0xa58   : > { %5803 = vrcp.f32 %v4044_v27 }
 0xa59   : > { %v4047_v3 = vpop.xlane.xlu1 %4046 }
 0xa5a   : > { %5805 = vrcp.f32 %v4047_v3 }
 0xa5d   : > { %v4053_v28 = vpop.xlane.xlu1 %4052 }
 0xa5e   : > { %v4050_v60 = vpop.xlane.xlu0 %4049 }
 0xa5f   : > { %5807 = vrcp.f32 %v4050_v60 }
 0xa60   : > { %v5802_v2 = vpop.eup %5801  ;;  %5809 = vrcp.f32 %v4053_v28 }
 0xa61   : > { %v4059_v34 = vpop.xlane.xlu1 %4058  ;;  %v4103_v57 = vmul.f32 %v5802_v2, %v7194_v55 }
 0xa62   : > { %v5804_v35 = vpop.eup %5803  ;;  %v4056_v7 = vpop.xlane.xlu0 %4055 }
 0xa63   : > { %v4104_v41 = vmul.f32 %v5804_v35, %v7198_v38  ;;  %5811 = vrcp.f32 %v4056_v7 }
 0xa64   : > { %5813 = vrcp.f32 %v4059_v34  ;;  %v5806_v40 = vpop.eup %5805 }
 0xa65   : > { %v4065_v24 = vpop.xlane.xlu1 %4064  ;;  %v4119_v51 = vpack.c.bf16 %v4104_v41, %v4103_v57  ;;  %v4105_v55 = vmul.f32 %v5806_v40, %v7204_v53 }
 0xa66   : > { %v4062_v52 = vpop.xlane.xlu0 %4061 }
 0xa67   : > { %5815 = vrcp.f32 %v4062_v52  ;;  %5472 = vmatmul.mubr.msk.bf16.vlgmr.msra.gmra.mrb[112].mxu0 %vm903_vm4, %v4119_v51 }
 0xa68   : > { %5482 = vmatpush3.bf16.msra.mxu0 %v4222_v54  ;;  %5483 = vmatprep.mubr.msk.bf16.mxu0 %vm5853_vm2, %v7530_v16  ;;  %5817 = vrcp.f32 %v4065_v24 }
 0xa69   : > { %v5808_v44 = vpop.eup %5807  ;;  %v4071_v9 = vpop.xlane.xlu1 %4070  ;;  %5493 = vmatprep.subr.bf16.mxu0 %v7530_v16 }
 0xa6a   : > { %v4106_v38 = vmul.f32 %v5808_v44, %v7212_v50  ;;  %v4068_v56 = vpop.xlane.xlu0 %4067  ;;  %v5810_v32 = vpop.eup %5809 }
 0xa6b   : > { %5819 = vrcp.f32 %v4068_v56  ;;  %v4107_v6 = vmul.f32 %v5810_v32, %v7210_v31 }
 0xa6c   : > { %v4120_v42 = vpack.c.bf16 %v4106_v38, %v4105_v55  ;;  %5821 = vrcp.f32 %v4071_v9  ;;  %v7541_v55 = vpack.c.bf16 %v7060_v14, %v7058_v58 }
 0xa6d   : > { %v5812_v0 = vpop.eup %5811  ;;  %v4077_v47 = vpop.xlane.xlu1 %4076 }
 0xa6e   : > { %v4108_v13 = vmul.f32 %v5812_v0, %v7222_v29  ;;  %5478 = vmatmul.mubr.msk.bf16.vlgmr.msra.gmra.mrb[128].mxu1 %vm903_vm4, %v4120_v42  ;;  %v4074_v36 = vpop.xlane.xlu0 %4073  ;;  %v5814_v46 = vpop.eup %5813 }
 0xa6f   : > { %5488 = vmatpush3.bf16.msra.mxu1 %v4269_v63  ;;  %5823 = vrcp.f32 %v4074_v36  ;;  %5489 = vmatprep.mubr.msk.bf16.mxu1 %vm5853_vm2, %v7530_v16  ;;  %v4109_v5 = vmul.f32 %v5814_v46, %v7220_v45  ;;  %v7542_v36 = vpack.c.bf16 %v7066_v20, %v7064_v59  ;;  %v7544_v20 = vpack.c.bf16 %v6722_v22, %v6720_v21 }
 0xa70   : > { %v4121_v53 = vpack.c.bf16 %v4108_v13, %v4107_v6  ;;  %5499 = vmatprep.subr.bf16.mxu1 %v7530_v16  ;;  %5825 = vrcp.f32 %v4077_v47  ;;  %v7546_v22 = vpack.c.bf16 %v7078_v25, %v7076_v4  ;;  %v7547_v4 = vld [vmem:[#allocation3_spill] sm:$0xff] }
 0xa71   : > { %v5816_v50 = vpop.eup %5815  ;;  %v4083_v49 = vpop.xlane.xlu1 %4082  ;;  %v7548_v25 = vpack.c.bf16 %v6317_v33, %v7547_v4 }
 0xa72   : > { %v4110_v31 = vmul.f32 %v5816_v50, %v7232_v18  ;;  %5484 = vmatmul.mubr.msk.bf16.vlgmr.msra.gmra.mrb[116].mxu0 %vm903_vm4, %v4121_v53  ;;  %v4080_v29 = vpop.xlane.xlu0 %4079  ;;  %v5818_v10 = vpop.eup %5817 }
 0xa73   : > { %5494 = vmatpush3.bf16.msra.mxu0 %v4316_v62  ;;  %5827 = vrcp.f32 %v4080_v29  ;;  %5495 = vmatprep.mubr.msk.bf16.mxu0 %vm5853_vm2, %v7530_v16  ;;  %v4111_v63 = vmul.f32 %v5818_v10, %v7230_v17 }
 0xa74   : > { %v4122_v61 = vpack.c.bf16 %v4110_v31, %v4109_v5  ;;  %5505 = vmatprep.subr.bf16.mxu0 %v7530_v16  ;;  %5829 = vrcp.f32 %v4083_v49  ;;  %v7543_v5 = vpack.c.bf16 %v6716_v8, %v6714_v12  ;;  %v7545_v8 = vpack.c.bf16 %v7072_v19, %v7070_v11 }
 0xa75   : > { %v5820_v54 = vpop.eup %5819  ;;  %v4457_v35 = vpop.permute.xlu1 %4456 }
 0xa76   : > { %v4112_v45 = vmul.f32 %v5820_v54, %v7241_v23  ;;  %5490 = vmatmul.mubr.msk.bf16.vlgmr.msra.gmra.mrb[132].mxu1 %vm903_vm4, %v4122_v61  ;;  %v4086_v18 = vpop.xlane.xlu0 %4085  ;;  %v5822_v26 = vpop.eup %5821 }
 0xa77   : > { %5500 = vmatpush3.bf16.msra.mxu1 %v7310_v37  ;;  %5831 = vrcp.f32 %v4086_v18  ;;  %5501 = vmatprep.mubr.msk.bf16.mxu1 %vm5853_vm2, %v7530_v16  ;;  %v4113_v3 = vmul.f32 %v5822_v26, %v7239_v48 }
 0xa78   : > { %v4123_v62 = vpack.c.bf16 %v4112_v45, %v4111_v63  ;;  %5511 = vmatprep.subr.bf16.mxu1 %v7530_v16 }
 0xa79   : > { %v5824_v27 = vpop.eup %5823 }
 0xa7a   : > { %v4114_v17 = vmul.f32 %v5824_v27, %v7250_v30  ;;  %5496 = vmatmul.mubr.msk.bf16.vlgmr.msra.gmra.mrb[120].mxu0 %vm903_vm4, %v4123_v62  ;;  %v4410_v23 = vpop.permute.xlu0 %4409  ;;  %v5826_v28 = vpop.eup %5825 }
 0xa7b   : > { %5506 = vmatpush3.bf16.msra.mxu0 %v4410_v23  ;;  %5507 = vmatprep.mubr.msk.bf16.mxu0 %vm5853_vm2, %v7530_v16  ;;  %v4115_v2 = vmul.f32 %v5826_v28, %v7248_v39  ;;  %v5575_v39 = vld [vmem:[%s7495_s4] sm:$0xff]  }
 0xa7c   : > { %v4124_v37 = vpack.c.bf16 %v4114_v17, %v4113_v3  ;;  %5517 = vmatprep.subr.bf16.mxu0 %v5575_v39 }
 0xa7d   : > { %v5828_v60 = vpop.eup %5827 }
 0xa7e   : > { %v4116_v34 = vmul.f32 %v5828_v60, %v7258_v1  ;;  %5502 = vmatmul.mubr.msk.bf16.vlgmr.msra.gmra.mrb[136].mxu1 %vm903_vm4, %v4124_v37  ;;  %v5830_v48 = vpop.eup %5829  ;;  %v4520_v11 = vpop.permute.xlu0 %4519 }
 0xa7f   : > { %5512 = vmatpush3.bf16.msra.mxu1 %v4457_v35  ;;  %5513 = vmatprep.mubr.msk.bf16.mxu1 %vm5853_vm2, %v7530_v16  ;;  %v4117_v57 = vmul.f32 %v5830_v48, %v7256_v15  ;;  %v5576_v16 = vld [vmem:[%s7495_s4 + $0x8] sm:$0xff]   ;;  %v4522_v37 = vpop.permute.xlu1 %4521 }
 0xa80   : > { %v4125_v30 = vpack.c.bf16 %v4116_v34, %v4115_v2 }
 0xa81   : > { %v5832_v7 = vpop.eup %5831 }
 0xa82   : > { %v4118_v41 = vmul.f32 %v5832_v7, %v7264_v43  ;;  %5508 = vmatmul.mubr.msk.bf16.vlgmr.msra.gmra.mrb[124].mxu0 %vm903_vm4, %v4125_v30  ;;  %v4544_v19 = vpop.permute.xlu0 %4543  ;;  %v4585_v7 = vsel %vm485_vm3, %v7548_v25, %v4520_v11  ;;  %v7567_v11 = vld [vmem:[#allocation17_spill] sm:$0xff] }
 0xa83   : > { %5518 = vmatpush3.bf16.msra.mxu0 %v5575_v39  ;;  %v4546_v2 = vpop.permute.xlu1 %4545 }
 0xa84   : > { %v4126_v24 = vpack.c.bf16 %v4118_v41, %v4117_v57  ;;  %5519 = vmatprep.subr.bf16.mxu0 %v5576_v16  ;;  %v4608_v57 = vsel %vm903_vm4, %v4585_v7, %v4544_v19  ;;  %v7568_v19 = vld [vmem:[#allocation16_spill] sm:$0xff] }
 0xa86   : > { %5514 = vmatmul.mubr.msk.bf16.vlgmr.msra.gmra.mrb[140].mxu1 %vm903_vm4, %v4126_v24  ;;  %v4524_v60 = vpop.permute.xlu0 %4523 }
 0xa87   : > { %5520 = vmatpush3.bf16.msra.mxu0 %v5576_v16  ;;  %v4526_v35 = vpop.permute.xlu1 %4525  ;;  %v7549_v16 = vld [vmem:[#allocation5_spill] sm:$0xff] }
 0xa8a   : > { %v4548_v34 = vpop.permute.xlu0 %4547 }
 0xa8b   : > { %v4550_v30 = vpop.permute.xlu1 %4549 }
 0xa8e   : > { %v4528_v48 = vpop.permute.xlu0 %4527 }
 0xa8f   : > { %v4530_v39 = vpop.permute.xlu1 %4529 }
 0xb3a   : > { %v4167_v15 = vpop.f32.mrb[112].mxu0 }
 0xb3b   : > { %v5473_v1 = vpop.f32.mrb[113].mxu0 }
 0xb3c   : > { %v4170_v43 = vpop.f32.mrb[114].mxu0 }
 0xb3d   : > { %v4503_v51 = vpack.c.bf16 %v4170_v43, %v4167_v15  ;;  %v5474_v52 = vpop.f32.mrb[115].mxu0  ;;  %v7550_v15 = vld [vmem:[#allocation4_spill] sm:$0xff] }
 0xb3e   : > { %v7551_v1 = vpack.c.bf16 %v7549_v16, %v7550_v15 }
 0xb3f   : > { %4567 = vrot.lane.b32.xlu0 %v4503_v51, %s5867_s15 }
 0xb40   : > { %v4588_v43 = vsel %vm485_vm3, %v7551_v1, %v4522_v37  ;;  %v7569_v37 = vpack.c.bf16 %v7567_v11, %v7568_v19 }
 0xb41   : > { %v4214_v40 = vpop.f32.mrb[128].mxu1  ;;  %v4610_v51 = vsel %vm903_vm4, %v4588_v43, %v4546_v2 }
 0xb42   : > { %v5479_v44 = vpop.f32.mrb[129].mxu1 }
 0xb43   : > { %v4217_v9 = vpop.f32.mrb[130].mxu1  ;;  %4551 = vrot.lane.b32.xlu0 %v7541_v55, %s5866_s10  ;;  %v7552_v44 = vld [vmem:[#allocation7_spill] sm:$0xff] }
 0xb44   : > { %v4504_v38 = vpack.c.bf16 %v4217_v9, %v4214_v40  ;;  %v5480_v56 = vpop.f32.mrb[131].mxu1  ;;  %v7553_v9 = vld [vmem:[#allocation6_spill] sm:$0xff] }
 0xb45   : > { %v4261_v32 = vpop.f32.mrb[116].mxu0  ;;  %v7554_v55 = vpack.c.bf16 %v7552_v44, %v7553_v9 }
 0xb46   : > { %4569 = vrot.lane.b32.xlu1 %v4504_v38, %s5867_s15  ;;  %v5485_v42 = vpop.f32.mrb[117].mxu0 }
 0xb47   : > { %v4264_v0 = vpop.f32.mrb[118].mxu0  ;;  %v4591_v38 = vsel %vm485_vm3, %v7554_v55, %v4524_v60 }
 0xb48   : > { %v4505_v47 = vpack.c.bf16 %v4264_v0, %v4261_v32  ;;  %v5486_v6 = vpop.f32.mrb[119].mxu0  ;;  %v4612_v56 = vsel %vm903_vm4, %v4591_v38, %v4548_v34 }
 0xb49   : > { %v4308_v13 = vpop.f32.mrb[132].mxu1  ;;  %v7556_v6 = vld [vmem:[#allocation8_spill] sm:$0xff] }
 0xb4a   : > { %4553 = vrot.lane.b32.xlu1 %v7542_v36, %s5866_s10  ;;  %4571 = vrot.lane.b32.xlu0 %v4505_v47, %s5867_s15  ;;  %v5491_v46 = vpop.f32.mrb[133].mxu1  ;;  %v7555_v47 = vld [vmem:[#allocation9_spill] sm:$0xff] }
 0xb4b   : > { %v4311_v58 = vpop.f32.mrb[134].mxu1 }
 0xb4c   : > { %v4506_v14 = vpack.c.bf16 %v4311_v58, %v4308_v13  ;;  %v5492_v53 = vpop.f32.mrb[135].mxu1  ;;  %v7557_v13 = vpack.c.bf16 %v7555_v47, %v7556_v6 }
 0xb4d   : > { %v4355_v50 = vpop.f32.mrb[120].mxu0 }
 0xb4e   : > { %4531 = vrot.lane.b32.xlu0 %v7543_v5, %s5865_s9  ;;  %4573 = vrot.lane.b32.xlu1 %v4506_v14, %s5867_s15  ;;  %v5497_v31 = vpop.f32.mrb[121].mxu0  ;;  %v4594_v36 = vsel %vm485_vm3, %v7557_v13, %v4526_v35  ;;  %v7559_v5 = vld [vmem:[#allocation10_spill] sm:$0xff] }
 0xb4f   : > { %v4358_v49 = vpop.f32.mrb[122].mxu0  ;;  %v4614_v46 = vsel %vm903_vm4, %v4594_v36, %v4550_v30 }
 0xb50   : > { %v4507_v29 = vpack.c.bf16 %v4358_v49, %v4355_v50  ;;  %v5498_v10 = vpop.f32.mrb[123].mxu0  ;;  %v7558_v50 = vld [vmem:[#allocation11_spill] sm:$0xff] }
 0xb51   : > { %v4402_v59 = vpop.f32.mrb[136].mxu1  ;;  %v7560_v31 = vpack.c.bf16 %v7558_v50, %v7559_v5 }
 0xb52   : > { %4533 = vrot.lane.b32.xlu1 %v7544_v20, %s5865_s9  ;;  %4575 = vrot.lane.b32.xlu0 %v4507_v29, %s5867_s15  ;;  %v5503_v61 = vpop.f32.mrb[137].mxu1 }
 0xb53   : > { %v4405_v54 = vpop.f32.mrb[138].mxu1  ;;  %v4597_v49 = vsel %vm485_vm3, %v7560_v31, %v4528_v48  ;;  %v7561_v61 = vld [vmem:[#allocation13_spill] sm:$0xff]  ;;  %v4952_v48 = vld [vmem:[%s7496_s5] ss:$0 sm:$0xff] }
 0xb54   : > { %v4508_v63 = vpack.c.bf16 %v4405_v54, %v4402_v59  ;;  %v5504_v45 = vpop.f32.mrb[139].mxu1  ;;  %v7562_v54 = vld [vmem:[#allocation12_spill] sm:$0xff] }
 0xb55   : > { %v4449_v12 = vpop.f32.mrb[124].mxu0 }
 0xb56   : > { %4555 = vrot.lane.b32.xlu0 %v7545_v8, %s5866_s10  ;;  %4577 = vrot.lane.b32.xlu1 %v4508_v63, %s5867_s15  ;;  %v5509_v18 = vpop.f32.mrb[125].mxu0  ;;  %v7563_v63 = vpack.c.bf16 %v7561_v61, %v7562_v54 }
 0xb57   : > { %v4452_v26 = vpop.f32.mrb[126].mxu0 }
 0xb58   : > { %v4509_v62 = vpack.c.bf16 %v4452_v26, %v4449_v12  ;;  %v5510_v27 = vpop.f32.mrb[127].mxu0  ;;  %v4600_v45 = vsel %vm485_vm3, %v7563_v63, %v4530_v39 }
 0xb59   : > { %v4496_v21 = vpop.f32.mrb[140].mxu1  ;;  %v7565_v27 = vld [vmem:[#allocation14_spill] sm:$0xff] }
 0xb5a   : > { %4557 = vrot.lane.b32.xlu1 %v7546_v22, %s5866_s10  ;;  %v5515_v3 = vpop.f32.mrb[141].mxu1  ;;  %4579 = vrot.lane.b32.xlu0 %v4509_v62, %s5867_s15  ;;  %v7564_v62 = vld [vmem:[#allocation15_spill] sm:$0xff] }
 0xb5b   : > { %v4499_v17 = vpop.f32.mrb[142].mxu1 }
 0xb5c   : > { %v4510_v23 = vpack.c.bf16 %v4499_v17, %v4496_v21  ;;  %v5516_v28 = vpop.f32.mrb[143].mxu1  ;;  %v7566_v21 = vpack.c.bf16 %v7564_v62, %v7565_v27 }
 0xb5e   : > { %4581 = vrot.lane.b32.xlu1 %v4510_v23, %s5867_s15 }
 0xbb1   : > { %v4568_v41 = vpop.permute.xlu0 %4567 }
 0xbb2   : > { %v4625_v24 = vsel %vm4623_vm5, %v4608_v57, %v4568_v41 }
 0xbb3   : > { %5521 = vmatprep.mubr.msk.bf16.mxu0 %vm335_vm0, %v4625_v24 }
 0xbb5   : > { %v4552_v52 = vpop.permute.xlu0 %4551 }
 0xbb6   : > { %v4616_v29 = vsel %vm903_vm4, %v4597_v49, %v4552_v52 }
 0xbb8   : > { %v4570_v40 = vpop.permute.xlu1 %4569 }
 0xbb9   : > { %v4627_v33 = vsel %vm4623_vm5, %v4610_v51, %v4570_v40 }
 0xbba   : > { %5522 = vmatmul.mubr.msk.bf16.vlgmr.msra.gmra.mrb[128].mxu0 %vm335_vm0, %v4627_v33 }
 0xbbc   : > { %v4554_v32 = vpop.permute.xlu1 %4553  ;;  %v4572_v42 = vpop.permute.xlu0 %4571 }
 0xbbd   : > { %v4629_v0 = vsel %vm4623_vm5, %v4612_v56, %v4572_v42  ;;  %v4618_v12 = vsel %vm903_vm4, %v4600_v45, %v4554_v32 }
 0xbbe   : > { %5525 = vmatprep.mubr.msk.bf16.mxu0 %vm335_vm0, %v4629_v0 }
 0xbc0   : > { %v4574_v58 = vpop.permute.xlu1 %4573  ;;  %v4532_v14 = vpop.permute.xlu0 %4531 }
 0xbc1   : > { %v4631_v53 = vsel %vm4623_vm5, %v4614_v46, %v4574_v58  ;;  %v4603_v22 = vsel %vm485_vm3, %v7566_v21, %v4532_v14 }
 0xbc2   : > { %5526 = vmatmul.mubr.msk.bf16.gmra.mrb[132].mxu0 %vm335_vm0, %v4631_v53 }
 0xbc4   : > { %v4534_v10 = vpop.permute.xlu1 %4533  ;;  %v4576_v59 = vpop.permute.xlu0 %4575 }
 0xbc5   : > { %v4633_v20 = vsel %vm4623_vm5, %v4616_v29, %v4576_v59  ;;  %v4606_v60 = vsel %vm485_vm3, %v7569_v37, %v4534_v10 }
 0xbc6   : > { %5529 = vmatprep.mubr.msk.bf16.mxu0 %vm335_vm0, %v4633_v20 }
 0xbc8   : > { %v4578_v8 = vpop.permute.xlu1 %4577  ;;  %v4556_v18 = vpop.permute.xlu0 %4555 }
 0xbc9   : > { %v4635_v26 = vsel %vm4623_vm5, %v4618_v12, %v4578_v8  ;;  %v4620_v3 = vsel %vm903_vm4, %v4603_v22, %v4556_v18 }
 0xbca   : > { %5530 = vmatmul.mubr.msk.bf16.gmra.mrb[136].mxu0 %vm335_vm0, %v4635_v26 }
 0xbcc   : > { %v4558_v17 = vpop.permute.xlu1 %4557  ;;  %v4580_v23 = vpop.permute.xlu0 %4579 }
 0xbcd   : > { %v4637_v28 = vsel %vm4623_vm5, %v4620_v3, %v4580_v23  ;;  %v4622_v2 = vsel %vm903_vm4, %v4606_v60, %v4558_v17 }
 0xbce   : > { %5533 = vmatprep.mubr.msk.bf16.mxu0 %vm335_vm0, %v4637_v28 }
 0xbd0   : > { %v4582_v34 = vpop.permute.xlu1 %4581 }
 0xbd1   : > { %v4639_v35 = vsel %vm4623_vm5, %v4622_v2, %v4582_v34 }
 0xbd2   : > { %5534 = vmatmul.mubr.msk.bf16.gmra.mrb[140].mxu0 %vm335_vm0, %v4639_v35 }
 0xc8d   : > { %v5523_v30 = vpop.f32.mrb[128].mxu0 }
 0xc8e   : > { %v4722_v4 = vadd.f32 %v5523_v30, %v4952_v48  ;;  %v4713_v25 = vpop.f32.mrb[129].mxu0 }
 0xc8f   : > { %v4714_v7 = vadd.f32 %v4952_v48, %v4713_v25  ;;  %v5524_v57 = vpop.f32.mrb[130].mxu0 }
 0xc90   : > { %4778 = vst.msk [vmem:[%s7454_s22 + $0x10] sm:$0xff] %vm335_vm0, %v4722_v4  ;;  %v4725_v41 = vadd.f32 %v5524_v57, %v4952_v48  ;;  %v4716_v24 = vpop.f32.mrb[131].mxu0 }
 0xc91   : > { %4776 = vst.msk [vmem:[%s7454_s22] sm:$0xff] %vm335_vm0, %v4714_v7  ;;  %v4717_v39 = vadd.f32 %v4952_v48, %v4716_v24 }
 0xc92   : > { %4779 = vst.msk [vmem:[%s7454_s22 + $0x18] sm:$0xff] %vm335_vm0, %v4725_v41 }
 0xc93   : > { %4777 = vst.msk [vmem:[%s7454_s22 + $0x8] sm:$0xff] %vm335_vm0, %v4717_v39 }
 0xc95   : > { %v5527_v16 = vpop.f32.mrb[132].mxu0 }
 0xc96   : > { %v4738_v15 = vadd.f32 %v5527_v16, %v4952_v48  ;;  %v4729_v1 = vpop.f32.mrb[133].mxu0 }
 0xc97   : > { %v4730_v43 = vadd.f32 %v4952_v48, %v4729_v1  ;;  %v5528_v51 = vpop.f32.mrb[134].mxu0 }
 0xc98   : > { %4782 = vst.msk [vmem:[%s7454_s22 + $0x30] sm:$0xff] %vm335_vm0, %v4738_v15  ;;  %v4741_v52 = vadd.f32 %v5528_v51, %v4952_v48  ;;  %v4732_v40 = vpop.f32.mrb[135].mxu0 }
 0xc99   : > { %4780 = vst.msk [vmem:[%s7454_s22 + $0x20] sm:$0xff] %vm335_vm0, %v4730_v43  ;;  %v4733_v33 = vadd.f32 %v4952_v48, %v4732_v40 }
 0xc9a   : > { %4783 = vst.msk [vmem:[%s7454_s22 + $0x38] sm:$0xff] %vm335_vm0, %v4741_v52 }
 0xc9b   : > { %4781 = vst.msk [vmem:[%s7454_s22 + $0x28] sm:$0xff] %vm335_vm0, %v4733_v33 }
 0xc9d   : > { %v5531_v44 = vpop.f32.mrb[136].mxu0 }
 0xc9e   : > { %v4754_v9 = vadd.f32 %v5531_v44, %v4952_v48  ;;  %v4745_v55 = vpop.f32.mrb[137].mxu0 }
 0xc9f   : > { %v4746_v38 = vadd.f32 %v4952_v48, %v4745_v55  ;;  %v5532_v56 = vpop.f32.mrb[138].mxu0 }
 0xca0   : > { %4786 = vst.msk [vmem:[%s7454_s22 + $0x50] sm:$0xff] %vm335_vm0, %v4754_v9  ;;  %v4757_v32 = vadd.f32 %v5532_v56, %v4952_v48  ;;  %v4748_v42 = vpop.f32.mrb[139].mxu0 }
 0xca1   : > { %4784 = vst.msk [vmem:[%s7454_s22 + $0x40] sm:$0xff] %vm335_vm0, %v4746_v38  ;;  %v4749_v0 = vadd.f32 %v4952_v48, %v4748_v42 }
 0xca2   : > { %4787 = vst.msk [vmem:[%s7454_s22 + $0x58] sm:$0xff] %vm335_vm0, %v4757_v32 }
 0xca3   : > { %4785 = vst.msk [vmem:[%s7454_s22 + $0x48] sm:$0xff] %vm335_vm0, %v4749_v0 }
 0xca5   : > { %v5535_v47 = vpop.f32.mrb[140].mxu0 }
 0xca6   : > { %v4770_v6 = vadd.f32 %v5535_v47, %v4952_v48  ;;  %v4761_v13 = vpop.f32.mrb[141].mxu0 }
 0xca7   : > { %v4762_v36 = vadd.f32 %v4952_v48, %v4761_v13  ;;  %v5536_v46 = vpop.f32.mrb[142].mxu0 }
 0xca8   : > { %4790 = vst.msk [vmem:[%s7454_s22 + $0x70] sm:$0xff] %vm335_vm0, %v4770_v6  ;;  %v4773_v58 = vadd.f32 %v5536_v46, %v4952_v48  ;;  %v4764_v14 = vpop.f32.mrb[143].mxu0 }
 0xca9   : > { %4788 = vst.msk [vmem:[%s7454_s22 + $0x60] sm:$0xff] %vm335_vm0, %v4762_v36  ;;  %v4765_v53 = vadd.f32 %v4952_v48, %v4764_v14 }
 0xcaa   : > { %4791 = vst.msk [vmem:[%s7454_s22 + $0x78] sm:$0xff] %vm335_vm0, %v4773_v58 }
 0xcab   : > { %4789 = vst.msk [vmem:[%s7454_s22 + $0x68] sm:$0xff] %vm335_vm0, %v4765_v53 }
 0xcac PF: > { %s16_s21 = sadd.s32 1, %s5850_s21  }
 0xcad   : > { %p13_p4 = scmp.ge.s32.totalorder %s16_s21, 4  }
 0xcaf   :  { %15 = sbr.rel (!%p13_p4) target bundleno = 1 (0x1), region = 77 }

</bundles_post_ra>
